<compile_context>
chip_gen: v6e
topology: v6e:2x2x1
jax: 0.10.0
libtpu: 0.0.40
codegen_flags: <defaults>
</compile_context>

<pallas_src>
from functools import partial

import jax
import jax.numpy as jnp
from jax.experimental import pallas as pl
from jax.experimental.pallas import tpu as pltpu

_LANES = 128


def _round_up(x, m):
    return ((x + m - 1) // m) * m


def _pad_axis(a, axis, target):
    if a.shape[axis] == target:
        return a
    widths = [(0, 0)] * a.ndim
    widths[axis] = (0, target - a.shape[axis])
    return jnp.pad(a, widths)


def _fold_bn(gamma, beta, mean, var, eps=1e-5):
    scale = gamma / jnp.sqrt(var + eps)
    shift = beta - mean * scale
    return scale, shift


def _basic_block_kernel(H, W, Cp_in, Cp_mid, Cp_out, compute_dtype,
                        x_ref, w1_ref, w2_ref, s1_ref, b1_ref, s2_ref, b2_ref,
                        o_ref, xh1_ref, xh2_ref):
    """Whole BasicBlock for one batch element, entirely in VMEM.

    x_ref:    (1, H, W, Cp_in)     f32 input (also the residual), read once
    w1_ref:   (9, Cp_in,  Cp_mid)  bf16 conv1 taps (ky*3+kx major)
    w2_ref:   (9, Cp_mid, Cp_out)  bf16 conv2 taps
    s*/b*_ref:(1, C)               folded BN scale/shift (f32)
    o_ref:    (1, H, W, Cp_out)    output (lane-dense: last dim = 128 multiple)
    xh*_ref:  (H+2, W+9, C)        zero-halo scratch; interior at (1, 8) so all
                                   stores are sublane-aligned.
    """
    x_f32 = x_ref[0]                                    # (H, W, Cp_in), one read

    def conv3x3(xh_ref, w_ref, interior, cout):
        # Zero-halo scratch fill (aligned stores only), then 9 tap matmuls
        # accumulated in f32.  After channel padding K = N = 128 per tap.
        xh_ref[...] = jnp.zeros_like(xh_ref)
        xh_ref[1:1 + H, 8:8 + W, :] = interior
        acc = jnp.zeros((H * W, cout), jnp.float32)
        for ky in range(3):
            rows = xh_ref[ky:ky + H, :, :]              # leading-dim slice: cheap
            for kx in range(3):
                patch = rows[:, 7 + kx:7 + kx + W, :].reshape(H * W, -1)
                acc = acc + jnp.dot(patch, w_ref[3 * ky + kx],
                                    preferred_element_type=jnp.float32)
        return acc

    # conv1 + BN1 + ReLU (epilogue in f32)
    y1 = conv3x3(xh1_ref, w1_ref, x_f32.astype(compute_dtype), Cp_mid)
    y1 = jnp.maximum(y1 * s1_ref[0] + b1_ref[0], 0.0)

    # conv2 + BN2 + identity residual + ReLU (intermediate never leaves VMEM)
    y2 = conv3x3(xh2_ref, w2_ref,
                 y1.reshape(H, W, Cp_mid).astype(compute_dtype), Cp_out)
    y2 = y2 * s2_ref[0] + b2_ref[0] + x_f32.reshape(H * W, Cp_out)
    y2 = jnp.maximum(y2, 0.0)
    o_ref[0] = y2.reshape(H, W, Cp_out).astype(o_ref.dtype)


def basic_block_forward(x_nchw, params, compute_dtype=jnp.bfloat16):
    """BasicBlock.forward (stride=1, downsample=None) with NCHW interface."""
    N, Cin, H, W = x_nchw.shape
    Cmid = params["w1"].shape[-1]
    Cout = params["w2"].shape[-1]
    if Cin != Cout:
        raise ValueError("identity residual requires inplanes == planes "
                         f"(got {Cin} vs {Cout}); downsample is not supported")

    s1, b1 = _fold_bn(params["bn1_gamma"], params["bn1_beta"],
                      params["bn1_mean"], params["bn1_var"])
    s2, b2 = _fold_bn(params["bn2_gamma"], params["bn2_beta"],
                      params["bn2_mean"], params["bn2_var"])

    Cp_in = _round_up(Cin, _LANES)
    Cp_mid = _round_up(Cmid, _LANES)
    Cp_out = _round_up(Cout, _LANES)

    # NCHW -> NHWC + one-time channel pad to 128 lanes (hardware-friendly layout).
    # TODO(synk): if the surrounding model runs NHWC end-to-end these transposes
    # disappear from the hot path.
    x = jnp.transpose(x_nchw, (0, 2, 3, 1)).astype(jnp.float32)
    x = _pad_axis(x, 3, Cp_in)

    def prep_w(w, cpi, cpo):
        w = _pad_axis(_pad_axis(w, 2, cpi), 3, cpo)          # (3,3,cpi,cpo)
        return w.reshape(9, cpi, cpo).astype(compute_dtype)  # pre-cast once

    w1 = prep_w(params["w1"], Cp_in, Cp_mid)
    w2 = prep_w(params["w2"], Cp_mid, Cp_out)

    def prep_affine(v, cp):
        return _pad_axis(v.reshape(1, -1).astype(jnp.float32), 1, cp)

    s1p, b1p = prep_affine(s1, Cp_mid), prep_affine(b1, Cp_mid)
    s2p, b2p = prep_affine(s2, Cp_out), prep_affine(b2, Cp_out)

    kernel = partial(_basic_block_kernel, H, W, Cp_in, Cp_mid, Cp_out,
                     compute_dtype)

    out = pl.pallas_call(
        kernel,
        out_shape=jax.ShapeDtypeStruct((N, H, W, Cp_out), jnp.float32),
        grid=(N,),
        in_specs=[
            pl.BlockSpec((1, H, W, Cp_in), lambda n: (n, 0, 0, 0)),
            pl.BlockSpec((9, Cp_in, Cp_mid), lambda n: (0, 0, 0)),
            pl.BlockSpec((9, Cp_mid, Cp_out), lambda n: (0, 0, 0)),
            pl.BlockSpec((1, Cp_mid), lambda n: (0, 0)),
            pl.BlockSpec((1, Cp_mid), lambda n: (0, 0)),
            pl.BlockSpec((1, Cp_out), lambda n: (0, 0)),
            pl.BlockSpec((1, Cp_out), lambda n: (0, 0)),
        ],
        out_specs=pl.BlockSpec((1, H, W, Cp_out), lambda n: (n, 0, 0, 0)),
        scratch_shapes=[
            pltpu.VMEM((H + 2, W + 9, Cp_in), compute_dtype),
            pltpu.VMEM((H + 2, W + 9, Cp_mid), compute_dtype),
        ],
        compiler_params=pltpu.CompilerParams(
            dimension_semantics=("parallel",)),
    )(x, w1, w2, s1p, b1p, s2p, b2p)

    out = out[..., :Cout]                       # drop channel padding
    return jnp.transpose(out, (0, 3, 1, 2))     # NHWC -> NCHW


def _reference_forward(x_nchw, params, compute_dtype=jnp.float32):
    """Pure-JAX reference (lax conv).  `compute_dtype` mimics the kernel's matmul
    operand dtype; accumulation, BN/ReLU epilogues and the residual stay f32."""
    x = jnp.transpose(x_nchw, (0, 2, 3, 1)).astype(jnp.float32)
    dn = ("NHWC", "HWIO", "NHWC")

    def conv(a, w):
        return jax.lax.conv_general_dilated(
            a.astype(compute_dtype), w.astype(compute_dtype), (1, 1), "SAME",
            dimension_numbers=dn, preferred_element_type=jnp.float32)

    s1, b1 = _fold_bn(params["bn1_gamma"], params["bn1_beta"],
                      params["bn1_mean"], params["bn1_var"])
    s2, b2 = _fold_bn(params["bn2_gamma"], params["bn2_beta"],
                      params["bn2_mean"], params["bn2_var"])

    out = jnp.maximum(conv(x, params["w1"]) * s1 + b1, 0.0)
    out = jnp.maximum(conv(out, params["w2"]) * s2 + b2 + x, 0.0)
    return jnp.transpose(out, (0, 3, 1, 2))


if __name__ == "__main__":
    # Module hyper-params: inplanes=4, cfg=[8], planes=4, stride=1, downsample=None
    N, Cin, Hs, Ws = 2, 4, 16, 16
    Cmid, Cout = 8, 4

    key = jax.random.PRNGKey(0)
    keys = jax.random.split(key, 8)

    x = jax.random.normal(keys[0], (N, Cin, Hs, Ws), jnp.float32)

    params = {
        # conv weights, HWIO layout
        "w1": jax.random.normal(keys[1], (3, 3, Cin, Cmid), jnp.float32) * 0.1,
        "w2": jax.random.normal(keys[2], (3, 3, Cmid, Cout), jnp.float32) * 0.1,
        # BN1 (over Cmid channels)
        "bn1_gamma": 1.0 + 0.1 * jax.random.normal(keys[3], (Cmid,), jnp.float32),
        "bn1_beta": 0.1 * jax.random.normal(keys[4], (Cmid,), jnp.float32),
        "bn1_mean": 0.05 * jax.random.normal(keys[5], (Cmid,), jnp.float32),
        "bn1_var": jnp.abs(1.0 + 0.1 * jax.random.normal(keys[6], (Cmid,),
                                                         jnp.float32)),
        # BN2 (over Cout channels)
        "bn2_gamma": jnp.ones((Cout,), jnp.float32),
        "bn2_beta": jnp.zeros((Cout,), jnp.float32),
        "bn2_mean": jnp.zeros((Cout,), jnp.float32),
        "bn2_var": jnp.ones((Cout,), jnp.float32),
    }

    out = jax.jit(basic_block_forward)(x, params)
    out = jax.block_until_ready(out)
    assert out.shape == (N, Cout, Hs, Ws)

    # Tight check against a reference that uses the same bf16 matmul operands,
    # plus a loose sanity bound against the pure-f32 reference.
    ref_bf16 = _reference_forward(x, params, compute_dtype=jnp.bfloat16)
    ref_f32 = _reference_forward(x, params, compute_dtype=jnp.float32)
    err_bf16 = float(jnp.max(jnp.abs(out - ref_bf16)))
    err_f32 = float(jnp.max(jnp.abs(out - ref_f32)))
    assert err_bf16 < 2e-3, f"mismatch vs bf16-operand reference: {err_bf16}"
    assert err_f32 < 1e-1, f"mismatch vs f32 reference: {err_f32}"

    print("KERNEL_OK")
</pallas_src>

<mosaic_0001>
module attributes {stable_mosaic.version = 11 : i64} {
  func.func @_basic_block_kernel(%arg0: i32, %arg1: memref<1x16x16x128xf32, #tpu.memory_space<vmem>>, %arg2: memref<9x128x128xbf16, #tpu.memory_space<vmem>>, %arg3: memref<9x128x128xbf16, #tpu.memory_space<vmem>>, %arg4: memref<1x128xf32, #tpu.memory_space<vmem>>, %arg5: memref<1x128xf32, #tpu.memory_space<vmem>>, %arg6: memref<1x128xf32, #tpu.memory_space<vmem>>, %arg7: memref<1x128xf32, #tpu.memory_space<vmem>>, %arg8: memref<1x16x16x128xf32, #tpu.memory_space<vmem>>, %arg9: memref<18x25x128xbf16, #tpu.memory_space<vmem>>, %arg10: memref<18x25x128xbf16, #tpu.memory_space<vmem>>) attributes {dimension_semantics = [#tpu.dimension_semantics<parallel>], iteration_bounds = array<i64: 2>, scalar_prefetch = 0 : i64, scratch_operands = 2 : i64, tpu.core_type = #tpu.core_type<tc>, window_params = [{transform_indices = @transform_0, window_bounds = array<i64: 1, 16, 16, 128>}, {pipeline_mode = #tpu.pipeline_mode<synchronous>, transform_indices = @transform_1, window_bounds = array<i64: 9, 128, 128>}, {pipeline_mode = #tpu.pipeline_mode<synchronous>, transform_indices = @transform_2, window_bounds = array<i64: 9, 128, 128>}, {pipeline_mode = #tpu.pipeline_mode<synchronous>, transform_indices = @transform_3, window_bounds = array<i64: 1, 128>}, {pipeline_mode = #tpu.pipeline_mode<synchronous>, transform_indices = @transform_4, window_bounds = array<i64: 1, 128>}, {pipeline_mode = #tpu.pipeline_mode<synchronous>, transform_indices = @transform_5, window_bounds = array<i64: 1, 128>}, {pipeline_mode = #tpu.pipeline_mode<synchronous>, transform_indices = @transform_6, window_bounds = array<i64: 1, 128>}, {transform_indices = @transform_7, window_bounds = array<i64: 1, 16, 16, 128>}]} {
    %c0 = arith.constant 0 : index
    %c0_0 = arith.constant 0 : index
    %c0_1 = arith.constant 0 : index
    %c0_2 = arith.constant 0 : index
    %0 = vector.load %arg1[%c0, %c0_0, %c0_1, %c0_2] : memref<1x16x16x128xf32, #tpu.memory_space<vmem>>, vector<1x16x16x128xf32>
    %1 = vector.shape_cast %0 : vector<1x16x16x128xf32> to vector<16x16x128xf32>
    %2 = arith.truncf %1 : vector<16x16x128xf32> to vector<16x16x128xbf16>
    %cst = arith.constant 0.000000e+00 : bf16
    %3 = vector.broadcast %cst : bf16 to vector<18x25x128xbf16>
    %c0_3 = arith.constant 0 : index
    %c0_4 = arith.constant 0 : index
    %c0_5 = arith.constant 0 : index
    %4 = vector.load %arg9[%c0_3, %c0_4, %c0_5] : memref<18x25x128xbf16, #tpu.memory_space<vmem>>, vector<18x25x128xbf16>
    tpu.vector_store %arg9[%c0_3, %c0_4, %c0_5], %3 {strides = array<i32>} : memref<18x25x128xbf16, #tpu.memory_space<vmem>>, vector<18x25x128xbf16>,
    %c1 = arith.constant 1 : index
    %c8 = arith.constant 8 : index
    %c0_6 = arith.constant 0 : index
    %5 = vector.load %arg9[%c1, %c8, %c0_6] : memref<18x25x128xbf16, #tpu.memory_space<vmem>>, vector<16x16x128xbf16>
    tpu.vector_store %arg9[%c1, %c8, %c0_6], %2 {strides = array<i32>} : memref<18x25x128xbf16, #tpu.memory_space<vmem>>, vector<16x16x128xbf16>,
    %cst_7 = arith.constant 0.000000e+00 : f32
    %6 = vector.broadcast %cst_7 : f32 to vector<256x128xf32>
    %c0_8 = arith.constant 0 : index
    %c0_9 = arith.constant 0 : index
    %c0_10 = arith.constant 0 : index
    %7 = vector.load %arg9[%c0_8, %c0_9, %c0_10] : memref<18x25x128xbf16, #tpu.memory_space<vmem>>, vector<16x25x128xbf16>
    %8 = vector.extract_strided_slice %7 {offsets = [0, 7, 0], sizes = [16, 16, 128], strides = [1, 1, 1]} : vector<16x25x128xbf16> to vector<16x16x128xbf16>
    %9 = vector.shape_cast %8 : vector<16x16x128xbf16> to vector<256x128xbf16>
    %c0_11 = arith.constant 0 : index
    %c0_12 = arith.constant 0 : index
    %c0_13 = arith.constant 0 : index
    %10 = vector.load %arg2[%c0_11, %c0_12, %c0_13] : memref<9x128x128xbf16, #tpu.memory_space<vmem>>, vector<1x128x128xbf16>
    %11 = vector.shape_cast %10 : vector<1x128x128xbf16> to vector<128x128xbf16>
    %cst_14 = arith.constant dense<0.000000e+00> : vector<256x128xf32>
    %12 = tpu.matmul %9, %11, %cst_14 {dimension_numbers = #tpu.dot_dimension_numbers<[1], [0], [0], [1], [0, 0, 1, 1], [], []>} : vector<256x128xbf16>, vector<128x128xbf16>, vector<256x128xf32> -> vector<256x128xf32>
    %13 = arith.addf %6, %12 : vector<256x128xf32>
    %14 = vector.extract_strided_slice %7 {offsets = [0, 8, 0], sizes = [16, 16, 128], strides = [1, 1, 1]} : vector<16x25x128xbf16> to vector<16x16x128xbf16>
    %15 = vector.shape_cast %14 : vector<16x16x128xbf16> to vector<256x128xbf16>
    %c1_15 = arith.constant 1 : index
    %c0_16 = arith.constant 0 : index
    %c0_17 = arith.constant 0 : index
    %16 = vector.load %arg2[%c1_15, %c0_16, %c0_17] : memref<9x128x128xbf16, #tpu.memory_space<vmem>>, vector<1x128x128xbf16>
    %17 = vector.shape_cast %16 : vector<1x128x128xbf16> to vector<128x128xbf16>
    %cst_18 = arith.constant dense<0.000000e+00> : vector<256x128xf32>
    %18 = tpu.matmul %15, %17, %cst_18 {dimension_numbers = #tpu.dot_dimension_numbers<[1], [0], [0], [1], [0, 0, 1, 1], [], []>} : vector<256x128xbf16>, vector<128x128xbf16>, vector<256x128xf32> -> vector<256x128xf32>
    %19 = arith.addf %13, %18 : vector<256x128xf32>
    %20 = vector.extract_strided_slice %7 {offsets = [0, 9, 0], sizes = [16, 16, 128], strides = [1, 1, 1]} : vector<16x25x128xbf16> to vector<16x16x128xbf16>
    %21 = vector.shape_cast %20 : vector<16x16x128xbf16> to vector<256x128xbf16>
    %c2 = arith.constant 2 : index
    %c0_19 = arith.constant 0 : index
    %c0_20 = arith.constant 0 : index
    %22 = vector.load %arg2[%c2, %c0_19, %c0_20] : memref<9x128x128xbf16, #tpu.memory_space<vmem>>, vector<1x128x128xbf16>
    %23 = vector.shape_cast %22 : vector<1x128x128xbf16> to vector<128x128xbf16>
    %cst_21 = arith.constant dense<0.000000e+00> : vector<256x128xf32>
    %24 = tpu.matmul %21, %23, %cst_21 {dimension_numbers = #tpu.dot_dimension_numbers<[1], [0], [0], [1], [0, 0, 1, 1], [], []>} : vector<256x128xbf16>, vector<128x128xbf16>, vector<256x128xf32> -> vector<256x128xf32>
    %25 = arith.addf %19, %24 : vector<256x128xf32>
    %c1_22 = arith.constant 1 : index
    %c0_23 = arith.constant 0 : index
    %c0_24 = arith.constant 0 : index
    %26 = vector.load %arg9[%c1_22, %c0_23, %c0_24] : memref<18x25x128xbf16, #tpu.memory_space<vmem>>, vector<16x25x128xbf16>
    %27 = vector.extract_strided_slice %26 {offsets = [0, 7, 0], sizes = [16, 16, 128], strides = [1, 1, 1]} : vector<16x25x128xbf16> to vector<16x16x128xbf16>
    %28 = vector.shape_cast %27 : vector<16x16x128xbf16> to vector<256x128xbf16>
    %c3 = arith.constant 3 : index
    %c0_25 = arith.constant 0 : index
    %c0_26 = arith.constant 0 : index
    %29 = vector.load %arg2[%c3, %c0_25, %c0_26] : memref<9x128x128xbf16, #tpu.memory_space<vmem>>, vector<1x128x128xbf16>
    %30 = vector.shape_cast %29 : vector<1x128x128xbf16> to vector<128x128xbf16>
    %cst_27 = arith.constant dense<0.000000e+00> : vector<256x128xf32>
    %31 = tpu.matmul %28, %30, %cst_27 {dimension_numbers = #tpu.dot_dimension_numbers<[1], [0], [0], [1], [0, 0, 1, 1], [], []>} : vector<256x128xbf16>, vector<128x128xbf16>, vector<256x128xf32> -> vector<256x128xf32>
    %32 = arith.addf %25, %31 : vector<256x128xf32>
    %33 = vector.extract_strided_slice %26 {offsets = [0, 8, 0], sizes = [16, 16, 128], strides = [1, 1, 1]} : vector<16x25x128xbf16> to vector<16x16x128xbf16>
    %34 = vector.shape_cast %33 : vector<16x16x128xbf16> to vector<256x128xbf16>
    %c4 = arith.constant 4 : index
    %c0_28 = arith.constant 0 : index
    %c0_29 = arith.constant 0 : index
    %35 = vector.load %arg2[%c4, %c0_28, %c0_29] : memref<9x128x128xbf16, #tpu.memory_space<vmem>>, vector<1x128x128xbf16>
    %36 = vector.shape_cast %35 : vector<1x128x128xbf16> to vector<128x128xbf16>
    %cst_30 = arith.constant dense<0.000000e+00> : vector<256x128xf32>
    %37 = tpu.matmul %34, %36, %cst_30 {dimension_numbers = #tpu.dot_dimension_numbers<[1], [0], [0], [1], [0, 0, 1, 1], [], []>} : vector<256x128xbf16>, vector<128x128xbf16>, vector<256x128xf32> -> vector<256x128xf32>
    %38 = arith.addf %32, %37 : vector<256x128xf32>
    %39 = vector.extract_strided_slice %26 {offsets = [0, 9, 0], sizes = [16, 16, 128], strides = [1, 1, 1]} : vector<16x25x128xbf16> to vector<16x16x128xbf16>
    %40 = vector.shape_cast %39 : vector<16x16x128xbf16> to vector<256x128xbf16>
    %c5 = arith.constant 5 : index
    %c0_31 = arith.constant 0 : index
    %c0_32 = arith.constant 0 : index
    %41 = vector.load %arg2[%c5, %c0_31, %c0_32] : memref<9x128x128xbf16, #tpu.memory_space<vmem>>, vector<1x128x128xbf16>
    %42 = vector.shape_cast %41 : vector<1x128x128xbf16> to vector<128x128xbf16>
    %cst_33 = arith.constant dense<0.000000e+00> : vector<256x128xf32>
    %43 = tpu.matmul %40, %42, %cst_33 {dimension_numbers = #tpu.dot_dimension_numbers<[1], [0], [0], [1], [0, 0, 1, 1], [], []>} : vector<256x128xbf16>, vector<128x128xbf16>, vector<256x128xf32> -> vector<256x128xf32>
    %44 = arith.addf %38, %43 : vector<256x128xf32>
    %c2_34 = arith.constant 2 : index
    %c0_35 = arith.constant 0 : index
    %c0_36 = arith.constant 0 : index
    %45 = vector.load %arg9[%c2_34, %c0_35, %c0_36] : memref<18x25x128xbf16, #tpu.memory_space<vmem>>, vector<16x25x128xbf16>
    %46 = vector.extract_strided_slice %45 {offsets = [0, 7, 0], sizes = [16, 16, 128], strides = [1, 1, 1]} : vector<16x25x128xbf16> to vector<16x16x128xbf16>
    %47 = vector.shape_cast %46 : vector<16x16x128xbf16> to vector<256x128xbf16>
    %c6 = arith.constant 6 : index
    %c0_37 = arith.constant 0 : index
    %c0_38 = arith.constant 0 : index
    %48 = vector.load %arg2[%c6, %c0_37, %c0_38] : memref<9x128x128xbf16, #tpu.memory_space<vmem>>, vector<1x128x128xbf16>
    %49 = vector.shape_cast %48 : vector<1x128x128xbf16> to vector<128x128xbf16>
    %cst_39 = arith.constant dense<0.000000e+00> : vector<256x128xf32>
    %50 = tpu.matmul %47, %49, %cst_39 {dimension_numbers = #tpu.dot_dimension_numbers<[1], [0], [0], [1], [0, 0, 1, 1], [], []>} : vector<256x128xbf16>, vector<128x128xbf16>, vector<256x128xf32> -> vector<256x128xf32>
    %51 = arith.addf %44, %50 : vector<256x128xf32>
    %52 = vector.extract_strided_slice %45 {offsets = [0, 8, 0], sizes = [16, 16, 128], strides = [1, 1, 1]} : vector<16x25x128xbf16> to vector<16x16x128xbf16>
    %53 = vector.shape_cast %52 : vector<16x16x128xbf16> to vector<256x128xbf16>
    %c7 = arith.constant 7 : index
    %c0_40 = arith.constant 0 : index
    %c0_41 = arith.constant 0 : index
    %54 = vector.load %arg2[%c7, %c0_40, %c0_41] : memref<9x128x128xbf16, #tpu.memory_space<vmem>>, vector<1x128x128xbf16>
    %55 = vector.shape_cast %54 : vector<1x128x128xbf16> to vector<128x128xbf16>
    %cst_42 = arith.constant dense<0.000000e+00> : vector<256x128xf32>
    %56 = tpu.matmul %53, %55, %cst_42 {dimension_numbers = #tpu.dot_dimension_numbers<[1], [0], [0], [1], [0, 0, 1, 1], [], []>} : vector<256x128xbf16>, vector<128x128xbf16>, vector<256x128xf32> -> vector<256x128xf32>
    %57 = arith.addf %51, %56 : vector<256x128xf32>
    %58 = vector.extract_strided_slice %45 {offsets = [0, 9, 0], sizes = [16, 16, 128], strides = [1, 1, 1]} : vector<16x25x128xbf16> to vector<16x16x128xbf16>
    %59 = vector.shape_cast %58 : vector<16x16x128xbf16> to vector<256x128xbf16>
    %c8_43 = arith.constant 8 : index
    %c0_44 = arith.constant 0 : index
    %c0_45 = arith.constant 0 : index
    %60 = vector.load %arg2[%c8_43, %c0_44, %c0_45] : memref<9x128x128xbf16, #tpu.memory_space<vmem>>, vector<1x128x128xbf16>
    %61 = vector.shape_cast %60 : vector<1x128x128xbf16> to vector<128x128xbf16>
    %cst_46 = arith.constant dense<0.000000e+00> : vector<256x128xf32>
    %62 = tpu.matmul %59, %61, %cst_46 {dimension_numbers = #tpu.dot_dimension_numbers<[1], [0], [0], [1], [0, 0, 1, 1], [], []>} : vector<256x128xbf16>, vector<128x128xbf16>, vector<256x128xf32> -> vector<256x128xf32>
    %63 = arith.addf %57, %62 : vector<256x128xf32>
    %c0_47 = arith.constant 0 : index
    %c0_48 = arith.constant 0 : index
    %64 = vector.load %arg4[%c0_47, %c0_48] : memref<1x128xf32, #tpu.memory_space<vmem>>, vector<1x128xf32>
    %65 = vector.shape_cast %64 : vector<1x128xf32> to vector<128xf32>
    %66 = vector.shape_cast %65 : vector<128xf32> to vector<1x128xf32>
    %67 = vector.broadcast %66 : vector<1x128xf32> to vector<256x128xf32>
    %68 = arith.mulf %63, %67 : vector<256x128xf32>
    %c0_49 = arith.constant 0 : index
    %c0_50 = arith.constant 0 : index
    %69 = vector.load %arg5[%c0_49, %c0_50] : memref<1x128xf32, #tpu.memory_space<vmem>>, vector<1x128xf32>
    %70 = vector.shape_cast %69 : vector<1x128xf32> to vector<128xf32>
    %71 = vector.shape_cast %70 : vector<128xf32> to vector<1x128xf32>
    %72 = vector.broadcast %71 : vector<1x128xf32> to vector<256x128xf32>
    %73 = arith.addf %68, %72 : vector<256x128xf32>
    %cst_51 = arith.constant 0.000000e+00 : f32
    %74 = vector.broadcast %cst_51 : f32 to vector<256x128xf32>
    %75 = arith.maximumf %73, %74 : vector<256x128xf32>
    %76 = vector.shape_cast %75 : vector<256x128xf32> to vector<16x16x128xf32>
    %77 = arith.truncf %76 : vector<16x16x128xf32> to vector<16x16x128xbf16>
    %cst_52 = arith.constant 0.000000e+00 : bf16
    %78 = vector.broadcast %cst_52 : bf16 to vector<18x25x128xbf16>
    %c0_53 = arith.constant 0 : index
    %c0_54 = arith.constant 0 : index
    %c0_55 = arith.constant 0 : index
    %79 = vector.load %arg10[%c0_53, %c0_54, %c0_55] : memref<18x25x128xbf16, #tpu.memory_space<vmem>>, vector<18x25x128xbf16>
    tpu.vector_store %arg10[%c0_53, %c0_54, %c0_55], %78 {strides = array<i32>} : memref<18x25x128xbf16, #tpu.memory_space<vmem>>, vector<18x25x128xbf16>,
    %c1_56 = arith.constant 1 : index
    %c8_57 = arith.constant 8 : index
    %c0_58 = arith.constant 0 : index
    %80 = vector.load %arg10[%c1_56, %c8_57, %c0_58] : memref<18x25x128xbf16, #tpu.memory_space<vmem>>, vector<16x16x128xbf16>
    tpu.vector_store %arg10[%c1_56, %c8_57, %c0_58], %77 {strides = array<i32>} : memref<18x25x128xbf16, #tpu.memory_space<vmem>>, vector<16x16x128xbf16>,
    %cst_59 = arith.constant 0.000000e+00 : f32
    %81 = vector.broadcast %cst_59 : f32 to vector<256x128xf32>
    %c0_60 = arith.constant 0 : index
    %c0_61 = arith.constant 0 : index
    %c0_62 = arith.constant 0 : index
    %82 = vector.load %arg10[%c0_60, %c0_61, %c0_62] : memref<18x25x128xbf16, #tpu.memory_space<vmem>>, vector<16x25x128xbf16>
    %83 = vector.extract_strided_slice %82 {offsets = [0, 7, 0], sizes = [16, 16, 128], strides = [1, 1, 1]} : vector<16x25x128xbf16> to vector<16x16x128xbf16>
    %84 = vector.shape_cast %83 : vector<16x16x128xbf16> to vector<256x128xbf16>
    %c0_63 = arith.constant 0 : index
    %c0_64 = arith.constant 0 : index
    %c0_65 = arith.constant 0 : index
    %85 = vector.load %arg3[%c0_63, %c0_64, %c0_65] : memref<9x128x128xbf16, #tpu.memory_space<vmem>>, vector<1x128x128xbf16>
    %86 = vector.shape_cast %85 : vector<1x128x128xbf16> to vector<128x128xbf16>
    %cst_66 = arith.constant dense<0.000000e+00> : vector<256x128xf32>
    %87 = tpu.matmul %84, %86, %cst_66 {dimension_numbers = #tpu.dot_dimension_numbers<[1], [0], [0], [1], [0, 0, 1, 1], [], []>} : vector<256x128xbf16>, vector<128x128xbf16>, vector<256x128xf32> -> vector<256x128xf32>
    %88 = arith.addf %81, %87 : vector<256x128xf32>
    %89 = vector.extract_strided_slice %82 {offsets = [0, 8, 0], sizes = [16, 16, 128], strides = [1, 1, 1]} : vector<16x25x128xbf16> to vector<16x16x128xbf16>
    %90 = vector.shape_cast %89 : vector<16x16x128xbf16> to vector<256x128xbf16>
    %c1_67 = arith.constant 1 : index
    %c0_68 = arith.constant 0 : index
    %c0_69 = arith.constant 0 : index
    %91 = vector.load %arg3[%c1_67, %c0_68, %c0_69] : memref<9x128x128xbf16, #tpu.memory_space<vmem>>, vector<1x128x128xbf16>
    %92 = vector.shape_cast %91 : vector<1x128x128xbf16> to vector<128x128xbf16>
    %cst_70 = arith.constant dense<0.000000e+00> : vector<256x128xf32>
    %93 = tpu.matmul %90, %92, %cst_70 {dimension_numbers = #tpu.dot_dimension_numbers<[1], [0], [0], [1], [0, 0, 1, 1], [], []>} : vector<256x128xbf16>, vector<128x128xbf16>, vector<256x128xf32> -> vector<256x128xf32>
    %94 = arith.addf %88, %93 : vector<256x128xf32>
    %95 = vector.extract_strided_slice %82 {offsets = [0, 9, 0], sizes = [16, 16, 128], strides = [1, 1, 1]} : vector<16x25x128xbf16> to vector<16x16x128xbf16>
    %96 = vector.shape_cast %95 : vector<16x16x128xbf16> to vector<256x128xbf16>
    %c2_71 = arith.constant 2 : index
    %c0_72 = arith.constant 0 : index
    %c0_73 = arith.constant 0 : index
    %97 = vector.load %arg3[%c2_71, %c0_72, %c0_73] : memref<9x128x128xbf16, #tpu.memory_space<vmem>>, vector<1x128x128xbf16>
    %98 = vector.shape_cast %97 : vector<1x128x128xbf16> to vector<128x128xbf16>
    %cst_74 = arith.constant dense<0.000000e+00> : vector<256x128xf32>
    %99 = tpu.matmul %96, %98, %cst_74 {dimension_numbers = #tpu.dot_dimension_numbers<[1], [0], [0], [1], [0, 0, 1, 1], [], []>} : vector<256x128xbf16>, vector<128x128xbf16>, vector<256x128xf32> -> vector<256x128xf32>
    %100 = arith.addf %94, %99 : vector<256x128xf32>
    %c1_75 = arith.constant 1 : index
    %c0_76 = arith.constant 0 : index
    %c0_77 = arith.constant 0 : index
    %101 = vector.load %arg10[%c1_75, %c0_76, %c0_77] : memref<18x25x128xbf16, #tpu.memory_space<vmem>>, vector<16x25x128xbf16>
    %102 = vector.extract_strided_slice %101 {offsets = [0, 7, 0], sizes = [16, 16, 128], strides = [1, 1, 1]} : vector<16x25x128xbf16> to vector<16x16x128xbf16>
    %103 = vector.shape_cast %102 : vector<16x16x128xbf16> to vector<256x128xbf16>
    %c3_78 = arith.constant 3 : index
    %c0_79 = arith.constant 0 : index
    %c0_80 = arith.constant 0 : index
    %104 = vector.load %arg3[%c3_78, %c0_79, %c0_80] : memref<9x128x128xbf16, #tpu.memory_space<vmem>>, vector<1x128x128xbf16>
    %105 = vector.shape_cast %104 : vector<1x128x128xbf16> to vector<128x128xbf16>
    %cst_81 = arith.constant dense<0.000000e+00> : vector<256x128xf32>
    %106 = tpu.matmul %103, %105, %cst_81 {dimension_numbers = #tpu.dot_dimension_numbers<[1], [0], [0], [1], [0, 0, 1, 1], [], []>} : vector<256x128xbf16>, vector<128x128xbf16>, vector<256x128xf32> -> vector<256x128xf32>
    %107 = arith.addf %100, %106 : vector<256x128xf32>
    %108 = vector.extract_strided_slice %101 {offsets = [0, 8, 0], sizes = [16, 16, 128], strides = [1, 1, 1]} : vector<16x25x128xbf16> to vector<16x16x128xbf16>
    %109 = vector.shape_cast %108 : vector<16x16x128xbf16> to vector<256x128xbf16>
    %c4_82 = arith.constant 4 : index
    %c0_83 = arith.constant 0 : index
    %c0_84 = arith.constant 0 : index
    %110 = vector.load %arg3[%c4_82, %c0_83, %c0_84] : memref<9x128x128xbf16, #tpu.memory_space<vmem>>, vector<1x128x128xbf16>
    %111 = vector.shape_cast %110 : vector<1x128x128xbf16> to vector<128x128xbf16>
    %cst_85 = arith.constant dense<0.000000e+00> : vector<256x128xf32>
    %112 = tpu.matmul %109, %111, %cst_85 {dimension_numbers = #tpu.dot_dimension_numbers<[1], [0], [0], [1], [0, 0, 1, 1], [], []>} : vector<256x128xbf16>, vector<128x128xbf16>, vector<256x128xf32> -> vector<256x128xf32>
    %113 = arith.addf %107, %112 : vector<256x128xf32>
    %114 = vector.extract_strided_slice %101 {offsets = [0, 9, 0], sizes = [16, 16, 128], strides = [1, 1, 1]} : vector<16x25x128xbf16> to vector<16x16x128xbf16>
    %115 = vector.shape_cast %114 : vector<16x16x128xbf16> to vector<256x128xbf16>
    %c5_86 = arith.constant 5 : index
    %c0_87 = arith.constant 0 : index
    %c0_88 = arith.constant 0 : index
    %116 = vector.load %arg3[%c5_86, %c0_87, %c0_88] : memref<9x128x128xbf16, #tpu.memory_space<vmem>>, vector<1x128x128xbf16>
    %117 = vector.shape_cast %116 : vector<1x128x128xbf16> to vector<128x128xbf16>
    %cst_89 = arith.constant dense<0.000000e+00> : vector<256x128xf32>
    %118 = tpu.matmul %115, %117, %cst_89 {dimension_numbers = #tpu.dot_dimension_numbers<[1], [0], [0], [1], [0, 0, 1, 1], [], []>} : vector<256x128xbf16>, vector<128x128xbf16>, vector<256x128xf32> -> vector<256x128xf32>
    %119 = arith.addf %113, %118 : vector<256x128xf32>
    %c2_90 = arith.constant 2 : index
    %c0_91 = arith.constant 0 : index
    %c0_92 = arith.constant 0 : index
    %120 = vector.load %arg10[%c2_90, %c0_91, %c0_92] : memref<18x25x128xbf16, #tpu.memory_space<vmem>>, vector<16x25x128xbf16>
    %121 = vector.extract_strided_slice %120 {offsets = [0, 7, 0], sizes = [16, 16, 128], strides = [1, 1, 1]} : vector<16x25x128xbf16> to vector<16x16x128xbf16>
    %122 = vector.shape_cast %121 : vector<16x16x128xbf16> to vector<256x128xbf16>
    %c6_93 = arith.constant 6 : index
    %c0_94 = arith.constant 0 : index
    %c0_95 = arith.constant 0 : index
    %123 = vector.load %arg3[%c6_93, %c0_94, %c0_95] : memref<9x128x128xbf16, #tpu.memory_space<vmem>>, vector<1x128x128xbf16>
    %124 = vector.shape_cast %123 : vector<1x128x128xbf16> to vector<128x128xbf16>
    %cst_96 = arith.constant dense<0.000000e+00> : vector<256x128xf32>
    %125 = tpu.matmul %122, %124, %cst_96 {dimension_numbers = #tpu.dot_dimension_numbers<[1], [0], [0], [1], [0, 0, 1, 1], [], []>} : vector<256x128xbf16>, vector<128x128xbf16>, vector<256x128xf32> -> vector<256x128xf32>
    %126 = arith.addf %119, %125 : vector<256x128xf32>
    %127 = vector.extract_strided_slice %120 {offsets = [0, 8, 0], sizes = [16, 16, 128], strides = [1, 1, 1]} : vector<16x25x128xbf16> to vector<16x16x128xbf16>
    %128 = vector.shape_cast %127 : vector<16x16x128xbf16> to vector<256x128xbf16>
    %c7_97 = arith.constant 7 : index
    %c0_98 = arith.constant 0 : index
    %c0_99 = arith.constant 0 : index
    %129 = vector.load %arg3[%c7_97, %c0_98, %c0_99] : memref<9x128x128xbf16, #tpu.memory_space<vmem>>, vector<1x128x128xbf16>
    %130 = vector.shape_cast %129 : vector<1x128x128xbf16> to vector<128x128xbf16>
    %cst_100 = arith.constant dense<0.000000e+00> : vector<256x128xf32>
    %131 = tpu.matmul %128, %130, %cst_100 {dimension_numbers = #tpu.dot_dimension_numbers<[1], [0], [0], [1], [0, 0, 1, 1], [], []>} : vector<256x128xbf16>, vector<128x128xbf16>, vector<256x128xf32> -> vector<256x128xf32>
    %132 = arith.addf %126, %131 : vector<256x128xf32>
    %133 = vector.extract_strided_slice %120 {offsets = [0, 9, 0], sizes = [16, 16, 128], strides = [1, 1, 1]} : vector<16x25x128xbf16> to vector<16x16x128xbf16>
    %134 = vector.shape_cast %133 : vector<16x16x128xbf16> to vector<256x128xbf16>
    %c8_101 = arith.constant 8 : index
    %c0_102 = arith.constant 0 : index
    %c0_103 = arith.constant 0 : index
    %135 = vector.load %arg3[%c8_101, %c0_102, %c0_103] : memref<9x128x128xbf16, #tpu.memory_space<vmem>>, vector<1x128x128xbf16>
    %136 = vector.shape_cast %135 : vector<1x128x128xbf16> to vector<128x128xbf16>
    %cst_104 = arith.constant dense<0.000000e+00> : vector<256x128xf32>
    %137 = tpu.matmul %134, %136, %cst_104 {dimension_numbers = #tpu.dot_dimension_numbers<[1], [0], [0], [1], [0, 0, 1, 1], [], []>} : vector<256x128xbf16>, vector<128x128xbf16>, vector<256x128xf32> -> vector<256x128xf32>
    %138 = arith.addf %132, %137 : vector<256x128xf32>
    %c0_105 = arith.constant 0 : index
    %c0_106 = arith.constant 0 : index
    %139 = vector.load %arg6[%c0_105, %c0_106] : memref<1x128xf32, #tpu.memory_space<vmem>>, vector<1x128xf32>
    %140 = vector.shape_cast %139 : vector<1x128xf32> to vector<128xf32>
    %141 = vector.shape_cast %140 : vector<128xf32> to vector<1x128xf32>
    %142 = vector.broadcast %141 : vector<1x128xf32> to vector<256x128xf32>
    %143 = arith.mulf %138, %142 : vector<256x128xf32>
    %c0_107 = arith.constant 0 : index
    %c0_108 = arith.constant 0 : index
    %144 = vector.load %arg7[%c0_107, %c0_108] : memref<1x128xf32, #tpu.memory_space<vmem>>, vector<1x128xf32>
    %145 = vector.shape_cast %144 : vector<1x128xf32> to vector<128xf32>
    %146 = vector.shape_cast %145 : vector<128xf32> to vector<1x128xf32>
    %147 = vector.broadcast %146 : vector<1x128xf32> to vector<256x128xf32>
    %148 = arith.addf %143, %147 : vector<256x128xf32>
    %149 = vector.shape_cast %1 : vector<16x16x128xf32> to vector<256x128xf32>
    %150 = arith.addf %148, %149 : vector<256x128xf32>
    %cst_109 = arith.constant 0.000000e+00 : f32
    %151 = vector.broadcast %cst_109 : f32 to vector<256x128xf32>
    %152 = arith.maximumf %150, %151 : vector<256x128xf32>
    %153 = vector.shape_cast %152 : vector<256x128xf32> to vector<16x16x128xf32>
    %c0_110 = arith.constant 0 : index
    %c0_111 = arith.constant 0 : index
    %c0_112 = arith.constant 0 : index
    %c0_113 = arith.constant 0 : index
    %154 = vector.load %arg8[%c0_110, %c0_111, %c0_112, %c0_113] : memref<1x16x16x128xf32, #tpu.memory_space<vmem>>, vector<1x16x16x128xf32>
    %155 = vector.shape_cast %154 : vector<1x16x16x128xf32> to vector<16x16x128xf32>
    %156 = vector.shape_cast %153 : vector<16x16x128xf32> to vector<1x16x16x128xf32>
    tpu.vector_store %arg8[%c0_110, %c0_111, %c0_112, %c0_113], %156 {strides = array<i32>} : memref<1x16x16x128xf32, #tpu.memory_space<vmem>>, vector<1x16x16x128xf32>,
    return
  }
  func.func @transform_0(%arg0: i32) -> (i32, i32, i32, i32) {
    %c0_i32 = arith.constant 0 : i32
    %c0_i32_0 = arith.constant 0 : i32
    %c0_i32_1 = arith.constant 0 : i32
    %c0_i32_2 = arith.constant 0 : i32
    return %arg0, %c0_i32, %c0_i32_0, %c0_i32_1 : i32, i32, i32, i32
  }
  func.func @transform_1(%arg0: i32) -> (i32, i32, i32) {
    %c0_i32 = arith.constant 0 : i32
    %c0_i32_0 = arith.constant 0 : i32
    %c0_i32_1 = arith.constant 0 : i32
    %c0_i32_2 = arith.constant 0 : i32
    return %c0_i32, %c0_i32_0, %c0_i32_1 : i32, i32, i32
  }
  func.func @transform_2(%arg0: i32) -> (i32, i32, i32) {
    %c0_i32 = arith.constant 0 : i32
    %c0_i32_0 = arith.constant 0 : i32
    %c0_i32_1 = arith.constant 0 : i32
    %c0_i32_2 = arith.constant 0 : i32
    return %c0_i32, %c0_i32_0, %c0_i32_1 : i32, i32, i32
  }
  func.func @transform_3(%arg0: i32) -> (i32, i32) {
    %c0_i32 = arith.constant 0 : i32
    %c0_i32_0 = arith.constant 0 : i32
    %c0_i32_1 = arith.constant 0 : i32
    return %c0_i32, %c0_i32_0 : i32, i32
  }
  func.func @transform_4(%arg0: i32) -> (i32, i32) {
    %c0_i32 = arith.constant 0 : i32
    %c0_i32_0 = arith.constant 0 : i32
    %c0_i32_1 = arith.constant 0 : i32
    return %c0_i32, %c0_i32_0 : i32, i32
  }
  func.func @transform_5(%arg0: i32) -> (i32, i32) {
    %c0_i32 = arith.constant 0 : i32
    %c0_i32_0 = arith.constant 0 : i32
    %c0_i32_1 = arith.constant 0 : i32
    return %c0_i32, %c0_i32_0 : i32, i32
  }
  func.func @transform_6(%arg0: i32) -> (i32, i32) {
    %c0_i32 = arith.constant 0 : i32
    %c0_i32_0 = arith.constant 0 : i32
    %c0_i32_1 = arith.constant 0 : i32
    return %c0_i32, %c0_i32_0 : i32, i32
  }
  func.func @transform_7(%arg0: i32) -> (i32, i32, i32, i32) {
    %c0_i32 = arith.constant 0 : i32
    %c0_i32_0 = arith.constant 0 : i32
    %c0_i32_1 = arith.constant 0 : i32
    %c0_i32_2 = arith.constant 0 : i32
    return %arg0, %c0_i32, %c0_i32_0, %c0_i32_1 : i32, i32, i32, i32
  }
}

</mosaic_0001>

<bundles_post_ra>
// kernel: basic_block_forward.1
= control target key start
LH: loop header
LB: loop body
LE: loop exit
PB: predicated region body
PF: predicated region fallthrough
CT: control target
= control target key end

     0   :  { %s13460_s24 = smov 0   ;;  %s19674_s0 = inlined_call_operand.vmem [shape: f32[2,16,16,128], index: 0, kind: input, shape index: {}]   ;;  %s19675_s1 = inlined_call_operand.vmem [shape: bf16[9,128,128], index: 1, kind: input, shape index: {}]   ;;  %s19676_s2 = inlined_call_operand.vmem [shape: bf16[9,128,128], index: 2, kind: input, shape index: {}]   ;;  %s19677_s3 = inlined_call_operand.vmem [shape: f32[1,128], index: 3, kind: input, shape index: {}]   ;;  %s19678_s4 = inlined_call_operand.vmem [shape: f32[1,128], index: 4, kind: input, shape index: {}]   ;;  %s19679_s5 = inlined_call_operand.vmem [shape: f32[1,128], index: 5, kind: input, shape index: {}]   ;;  %s19680_s6 = inlined_call_operand.vmem [shape: f32[1,128], index: 6, kind: input, shape index: {}]   ;;  %s19681_s7 = inlined_call_operand.vmem [shape: f32[2,16,16,128], index: 7, kind: output, shape index: {}]  }
   0x1 LB: > { %s10897_s25 = sadd.s32 4294967295, %s13417_s24   ;;  %p10901_p0 = scmp.ge.s32.totalorder %s13417_s24, 1  ;;  %s13417_s24 = sphi %s13460_s24, %s17_s24  }
   0x2   : > { %p237_p1 = scmp.lt.s32.totalorder %s13417_s24, 3 }
   0x4   : > { %p238_p2 = pnand %p10901_p0, %p237_p1 }
   0x6   : > { %241 = sbr.rel (%p238_p2) target bundleno = 1252 (0x4e4), region = 48 }
   0xb   : > { %v13471_v0 = vld [vmem:[%s19675_s1 + $0x78] sm:$0xff]   ;;  %v13419_v2 = vmov 0   ;;  %v13133_v3 = vld [vmem:[%s19675_s1 + $0x70] sm:$0xff]   ;;  %v13135_v5 = vld [vmem:[%s19675_s1 + $0x68] sm:$0xff]   ;;  %p269_p3 = scmp.lt.s32.totalorder %s10897_s25, 1  ;;  %v19967_v33 = vmov 0 }
   0xc   : > { %v13476_v1 = vld [vmem:[%s19675_s1 + $0x38] sm:$0xff]   ;;  %329 = vst [vmem:[#allocation2 + $0x4] sm:$0xf] %v13419_v2  ;;  %330 = vst [vmem:[#allocation2 + $0x8] sm:$0xf] %v13419_v2  ;;  %12258 = vmatprep.subr.bf16.mxu0 %v13471_v0  ;;  %v13134_v4 = vld [vmem:[%s19675_s1 + $0x30] sm:$0xff]  }
   0xd   : > { %328 = vst [vmem:[#allocation2] sm:$0xf] %v13419_v2  ;;  %337 = vst [vmem:[#allocation2 + $0x10] sm:$0xf] %v13419_v2  ;;  %12306 = vmatprep.subr.bf16.mxu1 %v13476_v1  ;;  %12259 = vmatpush3.bf16.msra.mxu0 %v13471_v0  ;;  %v13136_v6 = vld [vmem:[%s19675_s1 + $0x28] sm:$0xff]   ;;  %v13137_v7 = vld [vmem:[%s19675_s1 + $0x60] sm:$0xff]  }
   0xe   : > { %338 = vst [vmem:[#allocation2 + $0x14] sm:$0xf] %v13419_v2  ;;  %339 = vst [vmem:[#allocation2 + $0x18] sm:$0xf] %v13419_v2  ;;  %12307 = vmatpush3.bf16.msra.mxu1 %v13476_v1  ;;  %12260 = vmatprep.subr.bf16.mxu0 %v13133_v3  ;;  %s20881_s25 = smov (!%p269_p3, %s10897_s25), 1  ;;  %v13138_v8 = vld [vmem:[%s19675_s1 + $0x20] sm:$0xff]  }
   0xf   : > { %343 = vst [vmem:[#allocation2 + $0x20] sm:$0xf] %v13419_v2  ;;  %344 = vst [vmem:[#allocation2 + $0x24] sm:$0xf] %v13419_v2  ;;  %12308 = vmatprep.subr.bf16.mxu1 %v13134_v4  ;;  %v13139_v9 = vld [vmem:[%s19675_s1 + $0x58] sm:$0xff]   ;;  %s11760_s21 = sshll.u32 %s20881_s25, 8 }
  0x10   : > { %345 = vst [vmem:[#allocation2 + $0x28] sm:$0xf] %v13419_v2  ;;  %349 = vst [vmem:[#allocation2 + $0x30] sm:$0xf] %v13419_v2  ;;  %v13140_v10 = vld [vmem:[%s19675_s1 + $0x18] sm:$0xff]   ;;  %v13141_v11 = vld [vmem:[%s19675_s1 + $0x50] sm:$0xff]   ;;  %s13632_s9 = scalar_lea.vmem %s19674_s0, %s11760_s21  ;;  %s19449_s23 = scalar_lea.vmem %s19681_s7, %s11760_s21 }
  0x11   : > { %350 = vst [vmem:[#allocation2 + $0x34] sm:$0xf] %v13419_v2  ;;  %351 = vst [vmem:[#allocation2 + $0x38] sm:$0xf] %v13419_v2  ;;  %12261 = vmatpush3.bf16.msra.mxu0 %v13133_v3  ;;  %v13142_v12 = vld [vmem:[%s19675_s1 + $0x10] sm:$0xff]   ;;  %v13637_v20 = vld [vmem:[%s19675_s1 + $0x48] sm:$0xff]  }
  0x12   : > { %355 = vst [vmem:[#allocation2 + $0x40] sm:$0xf] %v13419_v2  ;;  %356 = vst [vmem:[#allocation2 + $0x44] sm:$0xf] %v13419_v2  ;;  %12309 = vmatpush3.bf16.msra.mxu1 %v13134_v4  ;;  %12262 = vmatprep.subr.bf16.mxu0 %v13135_v5  ;;  %vm332_vm0 = vsmask.f32 256 }
  0x13   : > { %357 = vst [vmem:[#allocation2 + $0x48] sm:$0xf] %v13419_v2  ;;  %361 = vst [vmem:[#allocation2 + $0x50] sm:$0xf] %v13419_v2  ;;  %12310 = vmatprep.subr.bf16.mxu1 %v13136_v6  ;;  %v585_v13 = vld [vmem:[#allocation2 + $0x4] sm:$0xf] }
  0x14   : > { %362 = vst [vmem:[#allocation2 + $0x54] sm:$0xf] %v13419_v2  ;;  %363 = vst [vmem:[#allocation2 + $0x58] sm:$0xf] %v13419_v2  ;;  %v586_v14 = vld [vmem:[#allocation2 + $0x8] sm:$0xf] }
  0x15   : > { %367 = vst [vmem:[#allocation2 + $0x60] sm:$0xf] %v13419_v2  ;;  %368 = vst [vmem:[#allocation2 + $0x64] sm:$0xf] %v13419_v2  ;;  %12263 = vmatpush3.bf16.msra.mxu0 %v13135_v5  ;;  %v656_v15 = vshrl.u32 %v585_v13, 16  ;;  %v659_v16 = vshll.u32 %v585_v13, 16  ;;  %v10970_v21 = vcombine.low %v585_v13, %v586_v14 }
  0x16   : > { %369 = vst [vmem:[#allocation2 + $0x68] sm:$0xf] %v13419_v2  ;;  %373 = vst [vmem:[#allocation2 + $0x70] sm:$0xf] %v13419_v2  ;;  %12311 = vmatpush3.bf16.msra.mxu1 %v13136_v6  ;;  %12264 = vmatprep.subr.bf16.mxu0 %v13137_v7  ;;  %v665_v17 = vshrl.u32 %v586_v14, 16  ;;  %v668_v18 = vshll.u32 %v586_v14, 16 }
  0x17   : > { %374 = vst [vmem:[#allocation2 + $0x74] sm:$0xf] %v13419_v2  ;;  %375 = vst [vmem:[#allocation2 + $0x78] sm:$0xf] %v13419_v2  ;;  %12312 = vmatprep.subr.bf16.mxu1 %v13138_v8  ;;  %v584_v19 = vld [vmem:[#allocation2] sm:$0xf]  ;;  %12274 = vmatprep.mubr.bf16.mxu0 %v10970_v21 }
  0x18   : > { %379 = vst [vmem:[#allocation2 + $0x80] sm:$0xf] %v13419_v2  ;;  %380 = vst [vmem:[#allocation2 + $0x84] sm:$0xf] %v13419_v2  ;;  %vm648_vm1 = vsmask.f32 4368 }
  0x19   : > { %381 = vst [vmem:[#allocation2 + $0x88] sm:$0xf] %v13419_v2  ;;  %385 = vst [vmem:[#allocation2 + $0x90] sm:$0xf] %v13419_v2  ;;  %12265 = vmatpush3.bf16.msra.mxu0 %v13137_v7  ;;  %v651_v22 = vshrl.u32 %v584_v19, 16  ;;  %v280_v23 = vld [vmem:[%s13632_s9] sm:$0xff] }
  0x1a   : > { %386 = vst [vmem:[#allocation2 + $0x94] sm:$0xf] %v13419_v2  ;;  %387 = vst [vmem:[#allocation2 + $0x98] sm:$0xf] %v13419_v2  ;;  %12313 = vmatpush3.bf16.msra.mxu1 %v13138_v8  ;;  %12266 = vmatprep.subr.bf16.mxu0 %v13139_v9  ;;  %v281_v24 = vld [vmem:[%s13632_s9 + $0x8] sm:$0xff]  ;;  %v658_v26 = vrot.slane %v656_v15, 7  ;;  %v11762_v35 = vpack.c.bf16 %v280_v23, %v280_v23 }
  0x1b   : > { %391 = vst [vmem:[#allocation2 + $0xa0] sm:$0xf] %v13419_v2  ;;  %392 = vst [vmem:[#allocation2 + $0xa4] sm:$0xf] %v13419_v2  ;;  %12314 = vmatprep.subr.bf16.mxu1 %v13140_v10  ;;  %v13644_v25 = vld [vmem:[%s19675_s1 + $0x8] sm:$0xff]   ;;  %v667_v27 = vrot.slane %v665_v17, 7  ;;  %v11763_v45 = vpack.c.bf16 %v281_v24, %v281_v24 }
  0x1c   : > { %393 = vst [vmem:[#allocation2 + $0xa8] sm:$0xf] %v13419_v2  ;;  %397 = vst [vmem:[#allocation2 + $0xb0] sm:$0xf] %v13419_v2  ;;  %v1616_v28 = vrot.slane %v656_v15, 4  ;;  %v1617_v29 = vrot.slane %v659_v16, 5  ;;  %v661_v38 = vor.u32 %v659_v16, %v658_v26 }
  0x1d   : > { %398 = vst [vmem:[#allocation2 + $0xb4] sm:$0xf] %v13419_v2  ;;  %399 = vst [vmem:[#allocation2 + $0xb8] sm:$0xf] %v13419_v2  ;;  %12267 = vmatpush3.bf16.msra.mxu0 %v13139_v9  ;;  %v13646_v30 = vld [vmem:[#allocation2 + $0x10] sm:$0xf]  ;;  %v670_v40 = vor.u32 %v668_v18, %v667_v27 }
  0x1e   : > { %403 = vst [vmem:[#allocation2 + $0xc0] sm:$0xf] %v13419_v2  ;;  %404 = vst [vmem:[#allocation2 + $0xc4] sm:$0xf] %v13419_v2  ;;  %12315 = vmatpush3.bf16.msra.mxu1 %v13140_v10  ;;  %12268 = vmatprep.subr.bf16.mxu0 %v13141_v11  ;;  %v13648_v31 = vrot.slane %v668_v18, 5  ;;  %v1622_v32 = vrot.slane %v665_v17, 4  ;;  %v1618_v37 = vor.u32 %v1617_v29, %v1616_v28 }
  0x1f   : > { %405 = vst [vmem:[#allocation2 + $0xc8] sm:$0xf] %v13419_v2  ;;  %409 = vst [vmem:[#allocation2 + $0xd0] sm:$0xf] %v13419_v2  ;;  %v10938_v34 = vrot.slane %v651_v22, 11  ;;  %v282_v36 = vld [vmem:[%s13632_s9 + $0x10] sm:$0xff]  ;;  %12316 = vmatprep.subr.bf16.mxu1 %v13142_v12 }
  0x20   : > { %410 = vst [vmem:[#allocation2 + $0xd4] sm:$0xf] %v13419_v2  ;;  %411 = vst [vmem:[#allocation2 + $0xd8] sm:$0xf] %v13419_v2  ;;  %v663_v39 = vrot.slane %v658_v26, 4  ;;  %v283_v41 = vld [vmem:[%s13632_s9 + $0x18] sm:$0xff]  ;;  %v1623_v44 = vor.u32 %v1622_v32, %v13648_v31  ;;  %v11764_v46 = vpack.c.bf16 %v282_v36, %v282_v36 }
  0x21   : > { %415 = vst [vmem:[#allocation2 + $0xe0] sm:$0xf] %v13419_v2  ;;  %416 = vst [vmem:[#allocation2 + $0xe4] sm:$0xf] %v13419_v2  ;;  %v592_v42 = vld [vmem:[#allocation2 + $0x20] sm:$0xf]  ;;  %12269 = vmatpush3.bf16.msra.mxu0 %v13141_v11  ;;  %v11765_v53 = vpack.c.bf16 %v283_v41, %v283_v41 }
  0x22   : > { %417 = vst [vmem:[#allocation2 + $0xe8] sm:$0xf] %v13419_v2  ;;  %421 = vst [vmem:[#allocation2 + $0xf0] sm:$0xf] %v13419_v2  ;;  %v13661_v43 = vld [vmem:[%s19675_s1 + $0x40] sm:$0xff]   ;;  %v285_v48 = vld [vmem:[%s13632_s9 + $0x28] sm:$0xff]  ;;  %12317 = vmatpush3.bf16.msra.mxu1 %v13142_v12  ;;  %12270 = vmatprep.subr.bf16.mxu0 %v13637_v20 }
  0x23   : > { %422 = vst [vmem:[#allocation2 + $0xf4] sm:$0xf] %v13419_v2  ;;  %423 = vst [vmem:[#allocation2 + $0xf8] sm:$0xf] %v13419_v2  ;;  %v284_v47 = vld [vmem:[%s13632_s9 + $0x20] sm:$0xff]  ;;  %v673_v55 = vshrl.u32 %v13646_v30, 16  ;;  %12318 = vmatprep.subr.bf16.mxu1 %v13644_v25  ;;  %v11767_v61 = vpack.c.bf16 %v285_v48, %v285_v48 }
  0x24   : > { %427 = vst [vmem:[#allocation2 + $0x100] sm:$0xf] %v13419_v2  ;;  %428 = vst [vmem:[#allocation2 + $0x104] sm:$0xf] %v13419_v2  ;;  %v596_v49 = vld [vmem:[#allocation2 + $0x30] sm:$0xf]  ;;  %v11766_v60 = vpack.c.bf16 %v284_v47, %v284_v47 }
  0x25   : > { %429 = vst [vmem:[#allocation2 + $0x108] sm:$0xf] %v13419_v2  ;;  %433 = vst [vmem:[#allocation2 + $0x110] sm:$0xf] %v13419_v2  ;;  %v13669_v50 = vld [vmem:[%s19675_s1] sm:$0xff]   ;;  %v695_v56 = vshrl.u32 %v592_v42, 16  ;;  %12271 = vmatpush3.bf16.msra.mxu0 %v13637_v20 }
  0x26   : > { %434 = vst [vmem:[#allocation2 + $0x114] sm:$0xf] %v13419_v2  ;;  %435 = vst [vmem:[#allocation2 + $0x118] sm:$0xf] %v13419_v2  ;;  %v286_v57 = vld [vmem:[%s13632_s9 + $0x30] sm:$0xff]  ;;  %v287_v58 = vld [vmem:[%s13632_s9 + $0x38] sm:$0xff]  ;;  %12319 = vmatpush3.bf16.msra.mxu1 %v13644_v25  ;;  %12272 = vmatprep.subr.bf16.mxu0 %v13661_v43 }
  0x27   : > { %5565 = vst [vmem:[#allocation3] sm:$0xf] %v13419_v2  ;;  %5566 = vst [vmem:[#allocation3 + $0x4] sm:$0xf] %v13419_v2  ;;  %v288_v59 = vld [vmem:[%s13632_s9 + $0x40] sm:$0xff]  ;;  %v717_v62 = vshrl.u32 %v596_v49, 16  ;;  %v11768_v63 = vpack.c.bf16 %v286_v57, %v286_v57  ;;  %v11769_v3 = vpack.c.bf16 %v287_v58, %v287_v58  ;;  %12320 = vmatprep.subr.bf16.mxu1 %v13669_v50 }
  0x28   : > { %5567 = vst [vmem:[#allocation3 + $0x8] sm:$0xf] %v13419_v2  ;;  %5571 = vst [vmem:[#allocation3 + $0x10] sm:$0xf] %v13419_v2  ;;  %v600_v0 = vld [vmem:[#allocation2 + $0x40] sm:$0xf]  ;;  %v11770_v5 = vpack.c.bf16 %v288_v59, %v288_v59 }
  0x29   : > { %5572 = vst [vmem:[#allocation3 + $0x14] sm:$0xf] %v13419_v2  ;;  %5573 = vst [vmem:[#allocation3 + $0x18] sm:$0xf] %v13419_v2  ;;  %v289_v1 = vld [vmem:[%s13632_s9 + $0x48] sm:$0xff]  ;;  %v739_v4 = vshrl.u32 %v600_v0, 16  ;;  %12273 = vmatpush3.bf16.msra.mxu0 %v13661_v43 }
  0x2a   : > { %5577 = vst [vmem:[#allocation3 + $0x20] sm:$0xf] %v13419_v2  ;;  %5578 = vst [vmem:[#allocation3 + $0x24] sm:$0xf] %v13419_v2  ;;  %v13683_v6 = vrot.slane %v1618_v37, 4  ;;  %v13685_v7 = vrot.slane %v1623_v44, 4  ;;  %v11771_v9 = vpack.c.bf16 %v289_v1, %v289_v1  ;;  %12321 = vmatpush3.bf16.msra.mxu1 %v13669_v50 }
  0x2b   : > { %5579 = vst [vmem:[#allocation3 + $0x28] sm:$0xf] %v13419_v2  ;;  %5583 = vst [vmem:[#allocation3 + $0x30] sm:$0xf] %v13419_v2  ;;  %v13149_v8 = vld [vmem:[%s19675_s1 + $0xb8] sm:$0xff]   ;;  %v290_v11 = vld [vmem:[%s13632_s9 + $0x50] sm:$0xff] }
  0x2c   : > { %5584 = vst [vmem:[#allocation3 + $0x34] sm:$0xf] %v13419_v2  ;;  %5585 = vst [vmem:[#allocation3 + $0x38] sm:$0xf] %v13419_v2  ;;  %v291_v12 = vld [vmem:[%s13632_s9 + $0x58] sm:$0xff]  ;;  %v13694_v13 = vrot.slane %v673_v55, 11  ;;  %v11772_v15 = vpack.c.bf16 %v290_v11, %v290_v11  ;;  %12354 = vmatprep.subr.bf16.mxu0 %v13149_v8 }
  0x2d   : > { %5589 = vst [vmem:[#allocation3 + $0x40] sm:$0xf] %v13419_v2  ;;  %5590 = vst [vmem:[#allocation3 + $0x44] sm:$0xf] %v13419_v2  ;;  %v13696_v14 = vrot.slane %v695_v56, 11  ;;  %v11773_v16 = vpack.c.bf16 %v291_v12, %v291_v12  ;;  %v292_v18 = vld [vmem:[%s13632_s9 + $0x60] sm:$0xff] }
  0x2e   : > { %5591 = vst [vmem:[#allocation3 + $0x48] sm:$0xf] %v13419_v2  ;;  %5595 = vst [vmem:[#allocation3 + $0x50] sm:$0xf] %v13419_v2  ;;  %v608_v17 = vld [vmem:[#allocation2 + $0x60] sm:$0xf]  ;;  %v11774_v23 = vpack.c.bf16 %v292_v18, %v292_v18 }
  0x2f   : > { %5596 = vst [vmem:[#allocation3 + $0x54] sm:$0xf] %v13419_v2  ;;  %5597 = vst [vmem:[#allocation3 + $0x58] sm:$0xf] %v13419_v2  ;;  %v293_v19 = vld [vmem:[%s13632_s9 + $0x68] sm:$0xff]  ;;  %v13701_v21 = vrot.slane %v717_v62, 11 }
  0x30   : > { %5601 = vst [vmem:[#allocation3 + $0x60] sm:$0xf] %v13419_v2  ;;  %5602 = vst [vmem:[#allocation3 + $0x64] sm:$0xf] %v13419_v2  ;;  %v783_v22 = vshrl.u32 %v608_v17, 16  ;;  %v11775_v24 = vpack.c.bf16 %v293_v19, %v293_v19  ;;  %v13705_v28 = vrot.slane %v739_v4, 11 }
  0x31   : > { %5603 = vst [vmem:[#allocation3 + $0x68] sm:$0xf] %v13419_v2  ;;  %5607 = vst [vmem:[#allocation3 + $0x70] sm:$0xf] %v13419_v2  ;;  %v13703_v25 = vld [vmem:[#allocation2 + $0x70] sm:$0xf] }
  0x32   : > { %5608 = vst [vmem:[#allocation3 + $0x74] sm:$0xf] %v13419_v2  ;;  %5609 = vst [vmem:[#allocation3 + $0x78] sm:$0xf] %v13419_v2  ;;  %v13152_v41 = vld [vmem:[%s19675_s1 + $0xb0] sm:$0xff]   ;;  %v13155_v59 = vld [vmem:[%s19675_s1 + $0xa8] sm:$0xff]  }
  0x33   : > { %5613 = vst [vmem:[#allocation3 + $0x80] sm:$0xf] %v13419_v2  ;;  %5614 = vst [vmem:[#allocation3 + $0x84] sm:$0xf] %v13419_v2  ;;  %v13162_v1 = vld [vmem:[%s19675_s1 + $0xf8] sm:$0xff]   ;;  %vm331_vm3 = vcmask 1040384  }
  0x34   : > { %5615 = vst [vmem:[#allocation3 + $0x88] sm:$0xf] %v13419_v2  ;;  %5619 = vst [vmem:[#allocation3 + $0x90] sm:$0xf] %v13419_v2  ;;  %12402 = vmatprep.subr.bf16.mxu1 %v13162_v1  ;;  %vm1613_vm5 = vsmask.f32 3328 }
  0x35   : > { %5620 = vst [vmem:[#allocation3 + $0x94] sm:$0xf] %v13419_v2  ;;  %5621 = vst [vmem:[#allocation3 + $0x98] sm:$0xf] %v13419_v2  ;;  %vm1614_vm6 = vsmask.f32 7440 }
  0x36   : > { %5625 = vst [vmem:[#allocation3 + $0xa0] sm:$0xf] %v13419_v2  ;;  %5626 = vst [vmem:[#allocation3 + $0xa4] sm:$0xf] %v13419_v2 }
  0x37   : > { %5627 = vst [vmem:[#allocation3 + $0xa8] sm:$0xf] %v13419_v2  ;;  %5631 = vst [vmem:[#allocation3 + $0xb0] sm:$0xf] %v13419_v2 }
  0x38   : > { %5632 = vst [vmem:[#allocation3 + $0xb4] sm:$0xf] %v13419_v2  ;;  %5633 = vst [vmem:[#allocation3 + $0xb8] sm:$0xf] %v13419_v2 }
  0x39   : > { %5637 = vst [vmem:[#allocation3 + $0xc0] sm:$0xf] %v13419_v2  ;;  %5638 = vst [vmem:[#allocation3 + $0xc4] sm:$0xf] %v13419_v2 }
  0x3a   : > { %5639 = vst [vmem:[#allocation3 + $0xc8] sm:$0xf] %v13419_v2  ;;  %5643 = vst [vmem:[#allocation3 + $0xd0] sm:$0xf] %v13419_v2 }
  0x3b   : > { %5644 = vst [vmem:[#allocation3 + $0xd4] sm:$0xf] %v13419_v2  ;;  %5645 = vst [vmem:[#allocation3 + $0xd8] sm:$0xf] %v13419_v2 }
  0x3c   : > { %5649 = vst [vmem:[#allocation3 + $0xe0] sm:$0xf] %v13419_v2  ;;  %5650 = vst [vmem:[#allocation3 + $0xe4] sm:$0xf] %v13419_v2 }
  0x3d   : > { %5651 = vst [vmem:[#allocation3 + $0xe8] sm:$0xf] %v13419_v2  ;;  %5655 = vst [vmem:[#allocation3 + $0xf0] sm:$0xf] %v13419_v2 }
  0x3e   : > { %5656 = vst [vmem:[#allocation3 + $0xf4] sm:$0xf] %v13419_v2  ;;  %5657 = vst [vmem:[#allocation3 + $0xf8] sm:$0xf] %v13419_v2 }
  0x3f   : > { %5661 = vst [vmem:[#allocation3 + $0x100] sm:$0xf] %v13419_v2  ;;  %5662 = vst [vmem:[#allocation3 + $0x104] sm:$0xf] %v13419_v2 }
  0x40   : > { %5663 = vst [vmem:[#allocation3 + $0x108] sm:$0xf] %v13419_v2  ;;  %5667 = vst [vmem:[#allocation3 + $0x110] sm:$0xf] %v13419_v2 }
  0x41   : > { %5668 = vst [vmem:[#allocation3 + $0x114] sm:$0xf] %v13419_v2  ;;  %5669 = vst [vmem:[#allocation3 + $0x118] sm:$0xf] %v13419_v2  ;;  %v604_v2 = vld [vmem:[#allocation2 + $0x50] sm:$0xf] }
  0x42   : > { %vm13652_vm2 = vmor %vm332_vm0, %vm648_vm1  ;;  %552 = vst [vmem:[#allocation2 + $0x14] sm:$0xf] %v11762_v35  ;;  %v761_v10 = vshrl.u32 %v604_v2, 16  ;;  %v805_v35 = vshrl.u32 %v13703_v25, 16 }
  0x43   : > { %v19968_v33 = vsel %vm13652_vm2, 4294967295, %v19967_v33  ;;  %v662_v51 = vsel %vm13652_vm2, %v10938_v34, %v661_v38  ;;  %v671_v52 = vsel %vm13652_vm2, %v663_v39, %v670_v40  ;;  %553 = vst [vmem:[#allocation2 + $0x18] sm:$0xf] %v11763_v45  ;;  %554 = vst [vmem:[#allocation2 + $0x24] sm:$0xf] %v11764_v46  ;;  %v13710_v34 = vrot.slane %v783_v22, 11 }
  0x44   : > { %19969 = vst [vmem:[#allocation4_spill] sm:$0xff] %v19968_v33  ;;  %v10994_v54 = vcombine.low %v662_v51, %v671_v52  ;;  %555 = vst [vmem:[#allocation2 + $0x28] sm:$0xf] %v11765_v53  ;;  %v13707_v29 = vrot.slane %v761_v10, 11 }
  0x45   : > { %556 = vst [vmem:[#allocation2 + $0x34] sm:$0xf] %v11766_v60  ;;  %557 = vst [vmem:[#allocation2 + $0x38] sm:$0xf] %v11767_v61 }
  0x46   : > { %12322 = vmatprep.mubr.bf16.mxu1 %v10994_v54  ;;  %558 = vst [vmem:[#allocation2 + $0x44] sm:$0xf] %v11768_v63  ;;  %559 = vst [vmem:[#allocation2 + $0x48] sm:$0xf] %v11769_v3 }
  0x47   : > { %560 = vst [vmem:[#allocation2 + $0x54] sm:$0xf] %v11770_v5  ;;  %561 = vst [vmem:[#allocation2 + $0x58] sm:$0xf] %v11771_v9 }
  0x48   : > { %562 = vst [vmem:[#allocation2 + $0x64] sm:$0xf] %v11772_v15  ;;  %563 = vst [vmem:[#allocation2 + $0x68] sm:$0xf] %v11773_v16 }
  0x49   : > { %v589_v20 = vld [vmem:[#allocation2 + $0x14] sm:$0xf]  ;;  %564 = vst [vmem:[#allocation2 + $0x74] sm:$0xf] %v11774_v23  ;;  %565 = vst [vmem:[#allocation2 + $0x78] sm:$0xf] %v11775_v24 }
  0x4a   : > { %v678_v26 = vshrl.u32 %v589_v20, 16  ;;  %v681_v27 = vshll.u32 %v589_v20, 16  ;;  %v590_v30 = vld [vmem:[#allocation2 + $0x18] sm:$0xf]  ;;  %v593_v32 = vld [vmem:[#allocation2 + $0x24] sm:$0xf]  ;;  %vm13913_vm4 = vmand %vm331_vm3, %vm332_vm0 }
  0x4b   : > { %v687_v37 = vshrl.u32 %v590_v30, 16  ;;  %v690_v38 = vshll.u32 %v590_v30, 16  ;;  %v10971_v39 = vcombine.low %v589_v20, %v590_v30  ;;  %v13714_v40 = vld [vmem:[#allocation2 + $0x28] sm:$0xf]  ;;  %v700_v44 = vshrl.u32 %v593_v32, 16  ;;  %vm14099_vm7 = vmor %vm1613_vm5, %vm1614_vm6 }
  0x4c   : > { %v680_v36 = vrot.slane %v678_v26, 7  ;;  %v1630_v42 = vrot.slane %v678_v26, 4  ;;  %v1631_v43 = vrot.slane %v681_v27, 5  ;;  %v703_v45 = vshll.u32 %v593_v32, 16  ;;  %v597_v58 = vld [vmem:[#allocation2 + $0x34] sm:$0xf] }
  0x4d   : > { %v689_v46 = vrot.slane %v687_v37, 7  ;;  %12275 = vmatmul.mubr.bf16.vlgmr.msra.gmra.mxu0 %v10971_v39  ;;  %v13719_v47 = vrot.slane %v690_v38, 5  ;;  %v1636_v48 = vrot.slane %v687_v37, 4  ;;  %v702_v52 = vrot.slane %v700_v44, 7  ;;  %v13735_v0 = vld [vmem:[#allocation2 + $0x38] sm:$0xf] }
  0x4e   : > { %v683_v49 = vor.u32 %v681_v27, %v680_v36  ;;  %v1632_v50 = vor.u32 %v1631_v43, %v1630_v42  ;;  %v685_v51 = vrot.slane %v680_v36, 4  ;;  %12355 = vmatpush3.bf16.msra.mxu0 %v13149_v8  ;;  %v709_v53 = vshrl.u32 %v13714_v40, 16  ;;  %v601_v8 = vld [vmem:[#allocation2 + $0x44] sm:$0xf]  ;;  %v13761_v23 = vld [vmem:[#allocation2 + $0x48] sm:$0xf] }
  0x4f   : > { %v1637_v54 = vor.u32 %v1636_v48, %v13719_v47  ;;  %v692_v56 = vor.u32 %v690_v38, %v689_v46  ;;  %v19686_v57 = vshll.u32 %v13714_v40, 16  ;;  %12356 = vmatprep.subr.bf16.mxu0 %v13152_v41  ;;  %v10972_v62 = vcombine.low %v593_v32, %v13714_v40  ;;  %v13158_v26 = vld [vmem:[%s19675_s1 + $0xa0] sm:$0xff]   ;;  %v605_v37 = vld [vmem:[#allocation2 + $0x54] sm:$0xf]  ;;  %v13772_v42 = vld [vmem:[#allocation2 + $0x58] sm:$0xf] }
  0x50   : > { %v684_v55 = vsel %vm13652_vm2, %v13694_v13, %v683_v49  ;;  %v13730_v60 = vrot.slane %v1632_v50, 4  ;;  %v711_v61 = vrot.slane %v709_v53, 7  ;;  %v13733_v63 = vrot.slane %v700_v44, 4  ;;  %v13163_v13 = vld [vmem:[%s19675_s1 + $0xf0] sm:$0xff]  }
  0x51   : > { %v13740_v2 = vrot.slane %v1637_v54, 4  ;;  %v693_v3 = vsel %vm13652_vm2, %v685_v51, %v692_v56  ;;  %v13744_v4 = vrot.slane %v703_v45, 5  ;;  %v13746_v5 = vrot.slane %v709_v53, 4  ;;  %12278 = vmatprep.mubr.bf16.mxu0 %v10972_v62 }
  0x52   : > { %v10995_v9 = vcombine.low %v684_v55, %v693_v3  ;;  %v705_v10 = vor.u32 %v703_v45, %v702_v52  ;;  %v707_v11 = vrot.slane %v702_v52, 4  ;;  %v714_v12 = vor.u32 %v19686_v57, %v711_v61  ;;  %12357 = vmatpush3.bf16.msra.mxu0 %v13152_v41  ;;  %v13161_v52 = vld [vmem:[%s19675_s1 + $0x98] sm:$0xff]   ;;  %v13793_v3 = vld [vmem:[#allocation2 + $0x68] sm:$0xf] }
  0x53   : > { %v722_v15 = vshrl.u32 %v597_v58, 16  ;;  %v725_v16 = vshll.u32 %v597_v58, 16  ;;  %v731_v17 = vshrl.u32 %v13735_v0, 16  ;;  %v19685_v18 = vshll.u32 %v13735_v0, 16  ;;  %12358 = vmatprep.subr.bf16.mxu0 %v13155_v59 }
  0x54   : > { %12323 = vmatmul.mubr.bf16.vlgmr.msra.gmra.mxu1 %v10995_v9  ;;  %v706_v19 = vsel %vm13652_vm2, %v13696_v14, %v705_v10  ;;  %v715_v20 = vsel %vm13652_vm2, %v707_v11, %v714_v12  ;;  %v10973_v22 = vcombine.low %v597_v58, %v13735_v0  ;;  %v744_v24 = vshrl.u32 %v601_v8, 16  ;;  %v13166_v11 = vld [vmem:[%s19675_s1 + $0x90] sm:$0xff]  }
  0x55   : > { %v10996_v27 = vcombine.low %v706_v19, %v715_v20  ;;  %v724_v30 = vrot.slane %v722_v15, 7  ;;  %v733_v32 = vrot.slane %v731_v17, 7  ;;  %v13766_v36 = vrot.slane %v722_v15, 4  ;;  %12403 = vmatpush3.bf16.msra.mxu1 %v13162_v1  ;;  %v609_v1 = vld [vmem:[#allocation2 + $0x64] sm:$0xf] }
  0x56   : > { %12279 = vmatmul.mubr.bf16.gmra.mxu0 %v10973_v22  ;;  %v13768_v14 = vrot.slane %v725_v16, 5  ;;  %v13770_v38 = vrot.slane %v731_v17, 4  ;;  %v746_v39 = vrot.slane %v744_v24, 7  ;;  %v747_v41 = vshll.u32 %v601_v8, 16  ;;  %12404 = vmatprep.subr.bf16.mxu1 %v13163_v13 }
  0x57   : > { %12326 = vmatprep.mubr.bf16.mxu1 %v10996_v27  ;;  %v727_v43 = vor.u32 %v725_v16, %v724_v30  ;;  %v729_v44 = vrot.slane %v724_v30, 4  ;;  %v736_v45 = vor.u32 %v19685_v18, %v733_v32  ;;  %v753_v46 = vshrl.u32 %v13761_v23, 16  ;;  %12359 = vmatpush3.bf16.msra.mxu0 %v13155_v59 }
  0x58   : > { %v19684_v48 = vshll.u32 %v13761_v23, 16  ;;  %v10974_v49 = vcombine.low %v601_v8, %v13761_v23  ;;  %v13779_v50 = vrot.slane %v744_v24, 4  ;;  %v13781_v51 = vrot.slane %v747_v41, 5  ;;  %12360 = vmatprep.subr.bf16.mxu0 %v13158_v26  ;;  %v13167_v24 = vld [vmem:[%s19675_s1 + $0xe8] sm:$0xff]  }
  0x59   : > { %v728_v53 = vsel %vm13652_vm2, %v13701_v21, %v727_v43  ;;  %v737_v54 = vsel %vm13652_vm2, %v729_v44, %v736_v45  ;;  %v755_v55 = vrot.slane %v753_v46, 7  ;;  %v13791_v56 = vrot.slane %v753_v46, 4  ;;  %12405 = vmatpush3.bf16.msra.mxu1 %v13163_v13  ;;  %v613_v43 = vld [vmem:[#allocation2 + $0x74] sm:$0xf]  ;;  %v13168_v44 = vld [vmem:[%s19675_s1 + $0xe0] sm:$0xff]  }
  0x5a   : > { %v10997_v58 = vcombine.low %v728_v53, %v737_v54  ;;  %12282 = vmatprep.mubr.bf16.mxu0 %v10974_v49  ;;  %v749_v59 = vor.u32 %v747_v41, %v746_v39  ;;  %v751_v61 = vrot.slane %v746_v39, 4  ;;  %v766_v62 = vshrl.u32 %v605_v37, 16  ;;  %12406 = vmatprep.subr.bf16.mxu1 %v13167_v24  ;;  %v13830_v54 = vld [vmem:[#allocation2 + $0x78] sm:$0xf] }
  0x5b   : > { %v758_v8 = vor.u32 %v19684_v48, %v755_v55  ;;  %v769_v9 = vshll.u32 %v605_v37, 16  ;;  %v775_v21 = vshrl.u32 %v13772_v42, 16  ;;  %v19683_v10 = vshll.u32 %v13772_v42, 16  ;;  %12361 = vmatpush3.bf16.msra.mxu0 %v13158_v26  ;;  %19970 = vst [vmem:[#allocation5_spill] sm:$0xff] %v13830_v54  ;;  %v303_v48 = vld [vmem:[%s13632_s9 + $0xb8] sm:$0xff] }
  0x5c   : > { %12327 = vmatmul.mubr.bf16.gmra.mxu1 %v10997_v58  ;;  %v750_v12 = vsel %vm13652_vm2, %v13705_v28, %v749_v59  ;;  %v768_v13 = vrot.slane %v766_v62, 7  ;;  %v10975_v15 = vcombine.low %v605_v37, %v13772_v42  ;;  %v13806_v16 = vrot.slane %v766_v62, 4  ;;  %12362 = vmatprep.subr.bf16.mxu0 %v13161_v52 }
  0x5d   : > { %v759_v17 = vsel %vm13652_vm2, %v751_v61, %v758_v8  ;;  %v777_v19 = vrot.slane %v775_v21, 7  ;;  %v13810_v20 = vrot.slane %v769_v9, 5  ;;  %v13812_v22 = vrot.slane %v775_v21, 4  ;;  %12407 = vmatpush3.bf16.msra.mxu1 %v13167_v24  ;;  %v295_v21 = vld [vmem:[%s13632_s9 + $0x78] sm:$0xff]  ;;  %v296_v24 = vld [vmem:[%s13632_s9 + $0x80] sm:$0xff] }
  0x5e   : > { %v10998_v26 = vcombine.low %v750_v12, %v759_v17  ;;  %12283 = vmatmul.mubr.bf16.gmra.mxu0 %v10975_v15  ;;  %v771_v28 = vor.u32 %v769_v9, %v768_v13  ;;  %v773_v27 = vrot.slane %v768_v13, 4  ;;  %v788_v30 = vshrl.u32 %v609_v1, 16  ;;  %v294_v9 = vld [vmem:[%s13632_s9 + $0x70] sm:$0xff]  ;;  %v616_v12 = vld [vmem:[#allocation2 + $0x80] sm:$0xf]  ;;  %12408 = vmatprep.subr.bf16.mxu1 %v13168_v44 }
  0x5f   : > { %v780_v32 = vor.u32 %v19683_v10, %v777_v19  ;;  %v791_v37 = vshll.u32 %v609_v1, 16  ;;  %v797_v39 = vshrl.u32 %v13793_v3, 16  ;;  %v19682_v41 = vshll.u32 %v13793_v3, 16  ;;  %12363 = vmatpush3.bf16.msra.mxu0 %v13161_v52  ;;  %v301_v10 = vld [vmem:[%s13632_s9 + $0xa8] sm:$0xff] }
  0x60   : > { %12330 = vmatprep.mubr.bf16.mxu1 %v10998_v26  ;;  %v772_v45 = vsel %vm13652_vm2, %v13707_v29, %v771_v28  ;;  %v790_v46 = vrot.slane %v788_v30, 7  ;;  %v10976_v49 = vcombine.low %v609_v1, %v13793_v3  ;;  %v13828_v53 = vrot.slane %v788_v30, 4  ;;  %12364 = vmatprep.subr.bf16.mxu0 %v13166_v11  ;;  %v13171_v29 = vld [vmem:[%s19675_s1 + $0x88] sm:$0xff]   ;;  %v13849_v28 = vld [vmem:[#allocation2 + $0x90] sm:$0xf] }
  0x61   : > { %v781_v52 = vsel %vm13652_vm2, %v773_v27, %v780_v32  ;;  %v799_v55 = vrot.slane %v797_v39, 7  ;;  %v13834_v58 = vrot.slane %v791_v37, 5  ;;  %v13836_v59 = vrot.slane %v797_v39, 4  ;;  %v297_v26 = vld [vmem:[%s13632_s9 + $0x88] sm:$0xff]  ;;  %v13172_v27 = vld [vmem:[%s19675_s1 + $0xd8] sm:$0xff]   ;;  %12409 = vmatpush3.bf16.msra.mxu1 %v13168_v44  ;;  %v13173_v44 = vld [vmem:[%s19675_s1 + $0xd0] sm:$0xff]  }
  0x62   : > { %v10999_v61 = vcombine.low %v772_v45, %v781_v52  ;;  %12286 = vmatprep.mubr.bf16.mxu0 %v10976_v49  ;;  %v793_v62 = vor.u32 %v791_v37, %v790_v46  ;;  %v795_v1 = vrot.slane %v790_v46, 4  ;;  %v810_v8 = vshrl.u32 %v613_v43, 16  ;;  %v298_v45 = vld [vmem:[%s13632_s9 + $0x90] sm:$0xff]  ;;  %v299_v46 = vld [vmem:[%s13632_s9 + $0x98] sm:$0xff]  ;;  %12410 = vmatprep.subr.bf16.mxu1 %v13172_v27 }
  0x63   : > { %19971 = vst [vmem:[#allocation6_spill] sm:$0xff] %v13836_v59  ;;  %v802_v13 = vor.u32 %v19682_v41, %v799_v55  ;;  %v813_v15 = vshll.u32 %v613_v43, 16  ;;  %v819_v17 = vshrl.u32 %v13830_v54, 16  ;;  %v19688_v19 = vshll.u32 %v13830_v54, 16  ;;  %12365 = vmatpush3.bf16.msra.mxu0 %v13166_v11  ;;  %v306_v59 = vld [vmem:[%s13632_s9 + $0xd0] sm:$0xff] }
  0x64   : > { %12331 = vmatmul.mubr.bf16.gmra.mxu1 %v10999_v61  ;;  %v794_v30 = vsel %vm13652_vm2, %v13710_v34, %v793_v62  ;;  %v812_v32 = vrot.slane %v810_v8, 7  ;;  %v10977_v37 = vcombine.low %v613_v43, %v13830_v54  ;;  %v13858_v39 = vrot.slane %v810_v8, 4  ;;  %12366 = vmatprep.subr.bf16.mxu0 %v13171_v29  ;;  %v13868_v34 = vld [vmem:[#allocation2 + $0xa0] sm:$0xf]  ;;  %v636_v54 = vld [vmem:[#allocation2 + $0xd0] sm:$0xf] }
  0x65   : > { %v803_v11 = vsel %vm13652_vm2, %v795_v1, %v802_v13  ;;  %v821_v49 = vrot.slane %v819_v17, 7  ;;  %v13864_v52 = vrot.slane %v813_v15, 5  ;;  %v13866_v55 = vrot.slane %v819_v17, 4  ;;  %v300_v61 = vld [vmem:[%s13632_s9 + $0xa0] sm:$0xff]  ;;  %v13874_v1 = vld [vmem:[#allocation2 + $0xb0] sm:$0xf]  ;;  %12411 = vmatpush3.bf16.msra.mxu1 %v13172_v27 }
  0x66   : > { %v11000_v43 = vcombine.low %v794_v30, %v803_v11  ;;  %12287 = vmatmul.mubr.bf16.gmra.mxu0 %v10977_v37  ;;  %v10945_v62 = vrot.slane %v805_v35, 11  ;;  %v815_v8 = vor.u32 %v813_v15, %v812_v32  ;;  %v817_v41 = vrot.slane %v812_v32, 4  ;;  %v302_v13 = vld [vmem:[%s13632_s9 + $0xb0] sm:$0xff]  ;;  %v13883_v15 = vld [vmem:[#allocation2 + $0xc0] sm:$0xf]  ;;  %v305_v37 = vld [vmem:[%s13632_s9 + $0xc8] sm:$0xff]  ;;  %12412 = vmatprep.subr.bf16.mxu1 %v13173_v44 }
  0x67   : > { %19972 = vst [vmem:[#allocation7_spill] sm:$0xff] %v13866_v55  ;;  %v824_v17 = vor.u32 %v19688_v19, %v821_v49  ;;  %v11776_v25 = vpack.c.bf16 %v294_v9, %v294_v9  ;;  %v11777_v30 = vpack.c.bf16 %v295_v21, %v295_v21  ;;  %v827_v35 = vshrl.u32 %v616_v12, 16  ;;  %v304_v32 = vld [vmem:[%s13632_s9 + $0xc0] sm:$0xff]  ;;  %12367 = vmatpush3.bf16.msra.mxu0 %v13171_v29  ;;  %v307_v49 = vld [vmem:[%s13632_s9 + $0xd8] sm:$0xff] }
  0x68   : > { %12334 = vmatprep.mubr.bf16.mxu1 %v11000_v43  ;;  %v816_v11 = vsel %vm13652_vm2, %v10945_v62, %v815_v8  ;;  %v11778_v18 = vpack.c.bf16 %v296_v24, %v296_v24  ;;  %v11779_v57 = vpack.c.bf16 %v297_v26, %v297_v26  ;;  %v849_v55 = vshrl.u32 %v13849_v28, 16  ;;  %v13176_v9 = vld [vmem:[%s19675_s1 + $0x80] sm:$0xff]  }
  0x69   : > { %v825_v21 = vsel %vm13652_vm2, %v817_v41, %v824_v17  ;;  %566 = vst [vmem:[#allocation2 + $0x84] sm:$0xf] %v11776_v25  ;;  %567 = vst [vmem:[#allocation2 + $0x88] sm:$0xf] %v11777_v30  ;;  %v13897_v29 = vrot.slane %v827_v35, 11  ;;  %v11780_v12 = vpack.c.bf16 %v298_v45, %v298_v45  ;;  %v11781_v43 = vpack.c.bf16 %v299_v46, %v299_v46  ;;  %v308_v26 = vld [vmem:[%s13632_s9 + $0xe0] sm:$0xff] }
  0x6a   : > { %v640_v24 = vld [vmem:[#allocation2 + $0xe0] sm:$0xf]  ;;  %v11001_v28 = vcombine.low %v816_v11, %v825_v21  ;;  %568 = vst [vmem:[#allocation2 + $0x94] sm:$0xf] %v11778_v18  ;;  %569 = vst [vmem:[#allocation2 + $0x98] sm:$0xf] %v11779_v57  ;;  %v11782_v8 = vpack.c.bf16 %v300_v61, %v300_v61  ;;  %12368 = vmatprep.subr.bf16.mxu0 %v13176_v9  ;;  %v11783_v45 = vpack.c.bf16 %v301_v10, %v301_v10 }
  0x6b   : > { %v871_v62 = vshrl.u32 %v13868_v34, 16  ;;  %v13177_v41 = vld [vmem:[%s19675_s1 + $0xc8] sm:$0xff]   ;;  %570 = vst [vmem:[#allocation2 + $0xa4] sm:$0xf] %v11780_v12  ;;  %571 = vst [vmem:[#allocation2 + $0xa8] sm:$0xf] %v11781_v43  ;;  %v11784_v46 = vpack.c.bf16 %v302_v13, %v302_v13  ;;  %v11785_v17 = vpack.c.bf16 %v303_v48, %v303_v48  ;;  %12369 = vmatpush3.bf16.msra.mxu0 %v13176_v9  ;;  %12413 = vmatpush3.bf16.msra.mxu1 %v13173_v44 }
  0x6c   : > { %v893_v27 = vshrl.u32 %v13874_v1, 16  ;;  %v309_v25 = vld [vmem:[%s13632_s9 + $0xe8] sm:$0xff]  ;;  %v13906_v30 = vld [vmem:[#allocation2 + $0xf0] sm:$0xf]  ;;  %12335 = vmatmul.mubr.bf16.gmra.mxu1 %v11001_v28  ;;  %v13908_v18 = vrot.slane %v849_v55, 11  ;;  %v915_v34 = vshrl.u32 %v13883_v15, 16  ;;  %v11786_v61 = vpack.c.bf16 %v304_v32, %v304_v32  ;;  %12414 = vmatprep.subr.bf16.mxu1 %v13177_v41 }
  0x6d   : > { %v334_v57 = vld [vmem:[#allocation2 + $0xc] sm:$0x1]  ;;  %572 = vst [vmem:[#allocation2 + $0xb4] sm:$0xf] %v11782_v8  ;;  %v11787_v35 = vpack.c.bf16 %v305_v37, %v305_v37  ;;  %v19973_v10 = vmov 0  ;;  %v13917_v48 = vrot.slane %v871_v62, 11  ;;  %v11788_v13 = vpack.c.bf16 %v306_v59, %v306_v59 }
  0x6e   : > { %v19974_v10 = vsel %vm13913_vm4, 4294967295, %v19973_v10  ;;  %573 = vst [vmem:[#allocation2 + $0xb8] sm:$0xf] %v11783_v45  ;;  %574 = vst [vmem:[#allocation2 + $0xc4] sm:$0xf] %v11784_v46  ;;  %v937_v1 = vshrl.u32 %v636_v54, 16  ;;  %v11789_v55 = vpack.c.bf16 %v307_v49, %v307_v49  ;;  %v11790_v9 = vpack.c.bf16 %v308_v26, %v308_v26 }
  0x6f   : > { %19975 = vst [vmem:[#allocation8_spill] sm:$0xff] %v19974_v10  ;;  %575 = vst [vmem:[#allocation2 + $0xc8] sm:$0xf] %v11785_v17  ;;  %v340_v11 = vld [vmem:[#allocation2 + $0x1c] sm:$0x1]  ;;  %v13924_v32 = vrot.slane %v893_v27, 11  ;;  %v11791_v21 = vpack.c.bf16 %v309_v25, %v309_v25  ;;  %12415 = vmatpush3.bf16.msra.mxu1 %v13177_v41 }
  0x70   : > { %v13922_v15 = vld [vmem:[%s19675_s1 + $0x138] sm:$0xff]   ;;  %576 = vst [vmem:[#allocation2 + $0xd4] sm:$0xf] %v11786_v61  ;;  %577 = vst [vmem:[#allocation2 + $0xd8] sm:$0xf] %v11787_v35  ;;  %v959_v37 = vshrl.u32 %v640_v24, 16 }
  0x71   : > { %v13178_v54 = vld [vmem:[%s19675_s1 + $0xc0] sm:$0xff]   ;;  %v13929_v59 = vrot.slane %v915_v34, 11  ;;  %v13931_v44 = vrot.slane %v937_v1, 11  ;;  %578 = vst [vmem:[#allocation2 + $0xe4] sm:$0xf] %v11788_v13  ;;  %v335_v12 = vsel %vm13913_vm4, 0, %v334_v57  ;;  %12450 = vmatprep.subr.bf16.mxu0 %v13922_v15 }
  0x72   : > { %579 = vst [vmem:[#allocation2 + $0xe8] sm:$0xf] %v11789_v55  ;;  %v617_v43 = vld [vmem:[#allocation2 + $0x84] sm:$0xf]  ;;  %v13937_v24 = vld [vmem:[#allocation2 + $0x88] sm:$0xf]  ;;  %12416 = vmatprep.subr.bf16.mxu1 %v13178_v54 }
  0x73   : > { %v13939_v26 = vrot.slane %v959_v37, 11  ;;  %580 = vst [vmem:[#allocation2 + $0xf4] sm:$0xf] %v11790_v9  ;;  %581 = vst [vmem:[#allocation2 + $0xf8] sm:$0xf] %v11791_v21  ;;  %v341_v28 = vsel %vm13913_vm4, 0, %v340_v11  ;;  %v10978_v57 = vcombine.low %v617_v43, %v13937_v24  ;;  %12417 = vmatpush3.bf16.msra.mxu1 %v13178_v54 }
  0x74   : > { %336 = vst [vmem:[#allocation2 + $0xc] sm:$0x1] %v335_v12  ;;  %v832_v45 = vshrl.u32 %v617_v43, 16  ;;  %v835_v27 = vshll.u32 %v617_v43, 16  ;;  %v841_v46 = vshrl.u32 %v13937_v24, 16  ;;  %v19689_v17 = vshll.u32 %v13937_v24, 16 }
  0x75   : > { %v621_v25 = vld [vmem:[#allocation2 + $0x94] sm:$0xf]  ;;  %342 = vst [vmem:[#allocation2 + $0x1c] sm:$0x1] %v341_v28  ;;  %v13950_v34 = vld [vmem:[#allocation2 + $0x98] sm:$0xf]  ;;  %12290 = vmatprep.mubr.bf16.mxu0 %v10978_v57 }
  0x76   : > { %v854_v61 = vshrl.u32 %v621_v25, 16  ;;  %v857_v35 = vshll.u32 %v621_v25, 16  ;;  %v834_v13 = vrot.slane %v832_v45, 7  ;;  %v843_v55 = vrot.slane %v841_v46, 7  ;;  %v625_v8 = vld [vmem:[#allocation2 + $0xa4] sm:$0xf] }
  0x77   : > { %v13954_v11 = vrot.slane %v832_v45, 4  ;;  %v13956_v37 = vrot.slane %v835_v27, 5  ;;  %v13958_v9 = vrot.slane %v841_v46, 4  ;;  %v863_v21 = vshrl.u32 %v13950_v34, 16  ;;  %v13971_v49 = vld [vmem:[#allocation2 + $0xa8] sm:$0xf] }
  0x78   : > { %v856_v41 = vrot.slane %v854_v61, 7  ;;  %v19690_v12 = vshll.u32 %v13950_v34, 16  ;;  %v837_v43 = vor.u32 %v835_v27, %v834_v13  ;;  %v839_v28 = vrot.slane %v834_v13, 4  ;;  %19979 = vst [vmem:[#allocation12_spill] sm:$0xff] %v13971_v49 }
  0x79   : > { %19976 = vst [vmem:[#allocation9_spill] sm:$0xff] %v13958_v9  ;;  %v846_v19 = vor.u32 %v19689_v17, %v843_v55  ;;  %v10979_v1 = vcombine.low %v621_v25, %v13950_v34  ;;  %v865_v45 = vrot.slane %v863_v21, 7  ;;  %v13965_v62 = vrot.slane %v854_v61, 4 }
  0x7a   : > { %v13967_v57 = vrot.slane %v857_v35, 5  ;;  %v13969_v46 = vrot.slane %v863_v21, 4  ;;  %v838_v27 = vsel %vm13652_vm2, %v13897_v29, %v837_v43  ;;  %v859_v25 = vor.u32 %v857_v35, %v856_v41  ;;  %v629_v21 = vld [vmem:[#allocation2 + $0xb4] sm:$0xf] }
  0x7b   : > { %v847_v13 = vsel %vm13652_vm2, %v839_v28, %v846_v19  ;;  %12291 = vmatmul.mubr.bf16.gmra.mxu0 %v10979_v1  ;;  %v861_v55 = vrot.slane %v856_v41, 4  ;;  %v868_v61 = vor.u32 %v19690_v12, %v865_v45  ;;  %v876_v17 = vshrl.u32 %v625_v8, 16  ;;  %v13986_v1 = vld [vmem:[#allocation2 + $0xb8] sm:$0xf] }
  0x7c   : > { %19977 = vst [vmem:[#allocation10_spill] sm:$0xff] %v13967_v57  ;;  %19978 = vst [vmem:[#allocation11_spill] sm:$0xff] %v13969_v46  ;;  %v11002_v54 = vcombine.low %v838_v27, %v847_v13  ;;  %v879_v9 = vshll.u32 %v625_v8, 16  ;;  %v860_v46 = vsel %vm13652_vm2, %v13908_v18, %v859_v25  ;;  %v885_v57 = vshrl.u32 %v13971_v49, 16  ;;  %v13997_v18 = vld [vmem:[%s19675_s1 + $0x178] sm:$0xff]  }
  0x7d   : > { %v19691_v29 = vshll.u32 %v13971_v49, 16  ;;  %v10980_v19 = vcombine.low %v625_v8, %v13971_v49  ;;  %v869_v35 = vsel %vm13652_vm2, %v861_v55, %v868_v61  ;;  %v878_v41 = vrot.slane %v876_v17, 7  ;;  %12498 = vmatprep.subr.bf16.mxu1 %v13997_v18 }
  0x7e   : > { %12338 = vmatprep.mubr.bf16.mxu1 %v11002_v54  ;;  %v13990_v43 = vrot.slane %v876_v17, 4  ;;  %v13992_v28 = vrot.slane %v879_v9, 5  ;;  %v11003_v45 = vcombine.low %v860_v46, %v869_v35  ;;  %v887_v27 = vrot.slane %v885_v57, 7 }
  0x7f   : > { %12294 = vmatprep.mubr.bf16.mxu0 %v10980_v19  ;;  %v13999_v8 = vrot.slane %v885_v57, 4  ;;  %v898_v13 = vshrl.u32 %v629_v21, 16  ;;  %v881_v25 = vor.u32 %v879_v9, %v878_v41  ;;  %v883_v54 = vrot.slane %v878_v41, 4  ;;  %v633_v19 = vld [vmem:[#allocation2 + $0xc4] sm:$0xf] }
  0x80   : > { %19980 = vst [vmem:[#allocation13_spill] sm:$0xff] %v13990_v43  ;;  %19981 = vst [vmem:[#allocation14_spill] sm:$0xff] %v13992_v28  ;;  %v901_v12 = vshll.u32 %v629_v21, 16  ;;  %v907_v55 = vshrl.u32 %v13986_v1, 16  ;;  %12339 = vmatmul.mubr.bf16.gmra.mxu1 %v11003_v45  ;;  %v890_v17 = vor.u32 %v19691_v29, %v887_v27  ;;  %v10981_v46 = vcombine.low %v629_v21, %v13986_v1 }
  0x81   : > { %19982 = vst [vmem:[#allocation15_spill] sm:$0xff] %v13999_v8  ;;  %v900_v61 = vrot.slane %v898_v13, 7  ;;  %v882_v9 = vsel %vm13652_vm2, %v13917_v48, %v881_v25  ;;  %v14010_v35 = vrot.slane %v898_v13, 4  ;;  %v14014_v8 = vld [vmem:[#allocation2 + $0xc8] sm:$0xf]  ;;  %v19987_v49 = vshll.u32 %v13986_v1, 16 }
  0x82   : > { %v909_v57 = vrot.slane %v907_v55, 7  ;;  %v14012_v41 = vrot.slane %v901_v12, 5  ;;  %19985 = vst [vmem:[#allocation18_spill] sm:$0xff] %v14014_v8  ;;  %v891_v45 = vsel %vm13652_vm2, %v883_v54, %v890_v17  ;;  %v14018_v27 = vrot.slane %v907_v55, 4  ;;  %v637_v13 = vld [vmem:[#allocation2 + $0xd4] sm:$0xf] }
  0x83   : > { %19983 = vst [vmem:[#allocation16_spill] sm:$0xff] %v14010_v35  ;;  %12295 = vmatmul.mubr.bf16.gmra.mxu0 %v10981_v46  ;;  %v903_v29 = vor.u32 %v901_v12, %v900_v61  ;;  %v905_v21 = vrot.slane %v900_v61, 4  ;;  %v11004_v28 = vcombine.low %v882_v9, %v891_v45  ;;  %v920_v48 = vshrl.u32 %v633_v19, 16  ;;  %v14028_v17 = vld [vmem:[#allocation2 + $0xd8] sm:$0xf] }
  0x84   : > { %19984 = vst [vmem:[#allocation17_spill] sm:$0xff] %v14012_v41  ;;  %19986 = vst [vmem:[#allocation19_spill] sm:$0xff] %v14018_v27  ;;  %v912_v43 = vor.u32 %v19987_v49, %v909_v57  ;;  %v923_v25 = vshll.u32 %v633_v19, 16  ;;  %v929_v35 = vshrl.u32 %v14014_v8, 16  ;;  %v10982_v55 = vcombine.low %v633_v19, %v14014_v8 }
  0x85   : > { %v904_v41 = vsel %vm13652_vm2, %v13924_v32, %v903_v29  ;;  %19988 = vst [vmem:[#allocation20_spill] sm:$0xff] %v14028_v17  ;;  %12342 = vmatprep.mubr.bf16.mxu1 %v11004_v28  ;;  %v922_v49 = vrot.slane %v920_v48, 7  ;;  %v14032_v61 = vrot.slane %v920_v48, 4  ;;  %v942_v29 = vshrl.u32 %v637_v13, 16 }
  0x86   : > { %v913_v12 = vsel %vm13652_vm2, %v905_v21, %v912_v43  ;;  %v14034_v46 = vrot.slane %v923_v25, 5  ;;  %v931_v57 = vrot.slane %v929_v35, 7  ;;  %12298 = vmatprep.mubr.bf16.mxu0 %v10982_v55  ;;  %v14036_v32 = vrot.slane %v929_v35, 4 }
  0x87   : > { %19989 = vst [vmem:[#allocation21_spill] sm:$0xff] %v14032_v61  ;;  %v11005_v9 = vcombine.low %v904_v41, %v913_v12  ;;  %v925_v45 = vor.u32 %v923_v25, %v922_v49  ;;  %v927_v54 = vrot.slane %v922_v49, 4  ;;  %v945_v19 = vshll.u32 %v637_v13, 16  ;;  %v641_v41 = vld [vmem:[#allocation2 + $0xe4] sm:$0xf] }
  0x88   : > { %19990 = vst [vmem:[#allocation22_spill] sm:$0xff] %v14034_v46  ;;  %19991 = vst [vmem:[#allocation23_spill] sm:$0xff] %v14036_v32  ;;  %v951_v27 = vshrl.u32 %v14028_v17, 16  ;;  %v19992_v28 = vshll.u32 %v14014_v8, 16  ;;  %v944_v21 = vrot.slane %v942_v29, 7  ;;  %v10983_v46 = vcombine.low %v637_v13, %v14028_v17 }
  0x89   : > { %12343 = vmatmul.mubr.bf16.gmra.mxu1 %v11005_v9  ;;  %v14043_v12 = vld [vmem:[#allocation2 + $0xe8] sm:$0xf]  ;;  %v926_v35 = vsel %vm13652_vm2, %v13929_v59, %v925_v45  ;;  %v14048_v55 = vrot.slane %v942_v29, 4  ;;  %v14050_v49 = vrot.slane %v945_v19, 5  ;;  %v19996_v32 = vshll.u32 %v14028_v17, 16 }
  0x8a   : > { %v934_v43 = vor.u32 %v19992_v28, %v931_v57  ;;  %19993 = vst [vmem:[#allocation24_spill] sm:$0xff] %v14043_v12  ;;  %v953_v25 = vrot.slane %v951_v27, 7  ;;  %v14054_v57 = vrot.slane %v951_v27, 4  ;;  %v947_v13 = vor.u32 %v945_v19, %v944_v21  ;;  %v645_v45 = vld [vmem:[#allocation2 + $0xf4] sm:$0xf] }
  0x8b   : > { %19994 = vst [vmem:[#allocation25_spill] sm:$0xff] %v14050_v49  ;;  %12299 = vmatmul.mubr.bf16.gmra.mxu0 %v10983_v46  ;;  %v949_v28 = vrot.slane %v944_v21, 4  ;;  %v964_v61 = vshrl.u32 %v641_v41, 16  ;;  %v967_v59 = vshll.u32 %v641_v41, 16  ;;  %v973_v49 = vshrl.u32 %v14043_v12, 16 }
  0x8c   : > { %v935_v9 = vsel %vm13652_vm2, %v927_v54, %v934_v43  ;;  %19995 = vst [vmem:[#allocation26_spill] sm:$0xff] %v14054_v57  ;;  %v956_v8 = vor.u32 %v19996_v32, %v953_v25  ;;  %v948_v29 = vsel %vm13652_vm2, %v13931_v44, %v947_v13  ;;  %v10984_v27 = vcombine.low %v641_v41, %v14043_v12  ;;  %v14064_v46 = vld [vmem:[#allocation2 + $0xf8] sm:$0xf]  ;;  %v2162_v17 = vld [vmem:[#allocation2 + $0x10] sm:$0xf] }
  0x8d   : > { %v11006_v48 = vcombine.low %v926_v35, %v935_v9  ;;  %v966_v32 = vrot.slane %v964_v61, 7  ;;  %v14068_v43 = vrot.slane %v964_v61, 4  ;;  %v14070_v21 = vrot.slane %v967_v59, 5 }
  0x8e   : > { %v957_v19 = vsel %vm13652_vm2, %v949_v28, %v956_v8  ;;  %v975_v25 = vrot.slane %v973_v49, 7  ;;  %12302 = vmatprep.mubr.bf16.mxu0 %v10984_v27  ;;  %v14072_v44 = vrot.slane %v973_v49, 4  ;;  %v986_v9 = vshrl.u32 %v645_v45, 16 }
  0x8f   : > { %12346 = vmatprep.mubr.bf16.mxu1 %v11006_v48  ;;  %19997 = vst [vmem:[#allocation27_spill] sm:$0xff] %v14070_v21  ;;  %v11007_v35 = vcombine.low %v948_v29, %v957_v19  ;;  %v969_v13 = vor.u32 %v967_v59, %v966_v32  ;;  %v971_v54 = vrot.slane %v966_v32, 4  ;;  %v989_v41 = vshll.u32 %v645_v45, 16  ;;  %v587_v48 = vld [vmem:[#allocation2 + $0xc] sm:$0x1] }
  0x90   : > { %19998 = vst [vmem:[#allocation28_spill] sm:$0xff] %v14072_v44  ;;  %v995_v57 = vshrl.u32 %v14064_v46, 16  ;;  %v19999_v8 = vshll.u32 %v14043_v12, 16  ;;  %v988_v28 = vrot.slane %v986_v9, 7  ;;  %v10985_v29 = vcombine.low %v645_v45, %v14064_v46  ;;  %v591_v32 = vld [vmem:[#allocation2 + $0x1c] sm:$0x1] }
  0x91   : > { %12347 = vmatmul.mubr.bf16.gmra.mxu1 %v11007_v35  ;;  %v970_v49 = vsel %vm13652_vm2, %v13939_v26, %v969_v13  ;;  %v14082_v27 = vrot.slane %v986_v9, 4  ;;  %v14084_v19 = vrot.slane %v989_v41, 5  ;;  %v14092_v44 = vld [vmem:[#allocation2 + $0x14] sm:$0xf]  ;;  %v20002_v9 = vshll.u32 %v14064_v46, 16 }
  0x92   : > { %v978_v61 = vor.u32 %v19999_v8, %v975_v25  ;;  %v997_v59 = vrot.slane %v995_v57, 7  ;;  %v14088_v25 = vrot.slane %v995_v57, 4  ;;  %v20001_v8 = vshrl.u32 %v13906_v30, 16 }
  0x93   : > { %20000 = vst [vmem:[#allocation29_spill] sm:$0xff] %v14084_v19  ;;  %12303 = vmatmul.mubr.bf16.gmra.mxu0 %v10985_v29  ;;  %v991_v45 = vor.u32 %v989_v41, %v988_v28  ;;  %v993_v26 = vrot.slane %v988_v28, 4  ;;  %v1626_v57 = vshll.u32 %v587_v48, 16  ;;  %v1640_v30 = vshll.u32 %v591_v32, 16 }
  0x94   : > { %v979_v35 = vsel %vm13652_vm2, %v971_v54, %v978_v61  ;;  %v10953_v21 = vrot.slane %v20001_v8, 11  ;;  %v1000_v13 = vor.u32 %v20002_v9, %v997_v59  ;;  %v20003_v54 = vmov 0  ;;  %v14103_v61 = vld [vmem:[#allocation2 + $0x18] sm:$0xf]  ;;  %v14116_v59 = vld [vmem:[#allocation2 + $0x24] sm:$0xf] }
  0x95   : > { %v11008_v12 = vcombine.low %v970_v49, %v979_v35  ;;  %v20004_v54 = vsel %vm14099_vm7, 4294967295, %v20003_v54  ;;  %v2227_v41 = vshrl.u32 %v2162_v17, 16  ;;  %v1621_v29 = vsel %vm14099_vm7, %v13683_v6, %v13648_v31  ;;  %v2166_v49 = vld [vmem:[#allocation2 + $0x20] sm:$0xf]  ;;  %v14118_v8 = vld [vmem:[#allocation2 + $0x28] sm:$0xf] }
  0x96   : > { %v992_v19 = vsel %vm13652_vm2, %v10953_v21, %v991_v45  ;;  %20005 = vst [vmem:[#allocation30_spill] sm:$0xff] %v20004_v54  ;;  %v1001_v28 = vsel %vm13652_vm2, %v993_v26, %v1000_v13  ;;  %v1635_v21 = vsel %vm14099_vm7, %v13730_v60, %v13719_v47  ;;  %v19696_v48 = vshrl.u32 %v14092_v44, 16  ;;  %v346_v13 = vld [vmem:[#allocation2 + $0x2c] sm:$0x1] }
  0x97   : > { %12350 = vmatprep.mubr.bf16.mxu1 %v11008_v12  ;;  %v11009_v17 = vcombine.low %v992_v19, %v1001_v28  ;;  %v1628_v12 = vrot.slane %v1626_v57, 5  ;;  %v1642_v32 = vrot.slane %v1640_v30, 5  ;;  %v11058_v35 = vrot.slane %v2227_v41, 11  ;;  %v13259_v54 = vld [vmem:[%s19676_s2 + $0x8] sm:$0xff]  }
  0x98   : > { %v2234_v45 = vrot.slane %v19696_v48, 7  ;;  %v19704_v31 = vshll.u32 %v14092_v44, 16  ;;  %v19698_v6 = vshrl.u32 %v14103_v61, 16  ;;  %v19703_v47 = vshll.u32 %v14103_v61, 16  ;;  %v352_v48 = vld [vmem:[#allocation2 + $0x3c] sm:$0x1] }
  0x99   : > { %12351 = vmatmul.mubr.bf16.gmra.mxu1 %v11009_v17  ;;  %v1629_v60 = vsel %vm14099_vm7, %v13685_v7, %v1628_v12  ;;  %v1643_v19 = vsel %vm14099_vm7, %v13740_v2, %v1642_v32  ;;  %v2249_v26 = vshrl.u32 %v2166_v49, 16  ;;  %v19697_v9 = vshrl.u32 %v14116_v59, 16  ;;  %v13180_v17 = vld [vmem:[%s19675_s1 + $0x130] sm:$0xff]  }
  0x9a   : > { %v11034_v57 = vcombine.low %v1621_v29, %v1629_v60  ;;  %v11035_v30 = vcombine.low %v1635_v21, %v1643_v19  ;;  %v2237_v41 = vor.u32 %v19704_v31, %v2234_v45  ;;  %v2239_v28 = vrot.slane %v2234_v45, 4  ;;  %v2170_v29 = vld [vmem:[#allocation2 + $0x30] sm:$0xf]  ;;  %v14148_v19 = vld [vmem:[#allocation2 + $0x34] sm:$0xf] }
  0x9b   : > { %v2243_v7 = vrot.slane %v19698_v6, 7  ;;  %v11059_v12 = vrot.slane %v2249_v26, 11  ;;  %v2256_v2 = vrot.slane %v19697_v9, 7  ;;  %v19700_v49 = vshll.u32 %v14116_v59, 16  ;;  %v14159_v6 = vld [vmem:[#allocation2 + $0x38] sm:$0xf] }
  0x9c   : > { %12370 = vmatprep.mubr.bf16.mxu0 %v11034_v57  ;;  %v2238_v21 = vsel %vm13652_vm2, %v11058_v35, %v2237_v41  ;;  %v19699_v32 = vshrl.u32 %v14118_v8, 16  ;;  %v19702_v45 = vshll.u32 %v14118_v8, 16  ;;  %v347_v60 = vsel %vm13913_vm4, 0, %v346_v13  ;;  %v13181_v13 = vld [vmem:[%s19675_s1 + $0x128] sm:$0xff]  }
  0x9d   : > { %12371 = vmatmul.mubr.bf16.vlgmr.msra.gmra.mxu0 %v11035_v30  ;;  %v2246_v26 = vor.u32 %v19703_v47, %v2243_v7  ;;  %v2259_v9 = vor.u32 %v19700_v49, %v2256_v2  ;;  %v2261_v57 = vrot.slane %v2256_v2, 4  ;;  %348 = vst [vmem:[#allocation2 + $0x2c] sm:$0x1] %v347_v60  ;;  %v20006_v35 = vor.u32 %v13744_v4, %v13733_v63 }
  0x9e   : > { %12451 = vmatpush3.bf16.msra.mxu0 %v13922_v15  ;;  %v2265_v30 = vrot.slane %v19699_v32, 7  ;;  %v20007_v7 = vshll.u32 %v13714_v40, 16  ;;  %v353_v63 = vsel %vm13913_vm4, 0, %v352_v48  ;;  %v20008_v4 = vor.u32 %v13768_v14, %v13766_v36 }
  0x9f   : > { %v14157_v41 = vrot.slane %v20006_v35, 4  ;;  %v2247_v35 = vsel %vm13652_vm2, %v2239_v28, %v2246_v26  ;;  %v2260_v15 = vsel %vm13652_vm2, %v11059_v12, %v2259_v9  ;;  %354 = vst [vmem:[#allocation2 + $0x3c] sm:$0x1] %v353_v63  ;;  %v20009_v32 = vshll.u32 %v13735_v0, 16  ;;  %12452 = vmatprep.subr.bf16.mxu0 %v13180_v17  ;;  %v2174_v9 = vld [vmem:[#allocation2 + $0x40] sm:$0xf] }
  0xa0   : > { %v14169_v2 = vrot.slane %v20007_v7, 5  ;;  %v14176_v60 = vrot.slane %v20008_v4, 4  ;;  %v2271_v7 = vshrl.u32 %v2170_v29, 16  ;;  %v11090_v49 = vcombine.low %v2238_v21, %v2247_v35  ;;  %v14201_v21 = vld [vmem:[#allocation2 + $0x44] sm:$0xf] }
  0xa1   : > { %v14184_v40 = vrot.slane %v20009_v32, 5  ;;  %v2268_v48 = vor.u32 %v19702_v45, %v2265_v30  ;;  %v19701_v29 = vshrl.u32 %v14148_v19, 16  ;;  %v14207_v30 = vld [vmem:[#allocation2 + $0x48] sm:$0xf]  ;;  %v19709_v4 = vshll.u32 %v14159_v6, 16 }
  0xa2   : > { %v1649_v36 = vsel %vm14099_vm7, %v14157_v41, %v14169_v2  ;;  %v1651_v14 = vor.u32 %v13746_v5, %v14169_v2  ;;  %v11060_v12 = vrot.slane %v2271_v7, 11  ;;  %12418 = vmatprep.mubr.bf16.mxu1 %v11090_v49  ;;  %v19706_v5 = vshll.u32 %v14148_v19, 16  ;;  %12453 = vmatpush3.bf16.msra.mxu0 %v13180_v17  ;;  %v13182_v49 = vld [vmem:[%s19675_s1 + $0x120] sm:$0xff]   ;;  %v358_v45 = vld [vmem:[#allocation2 + $0x4c] sm:$0x1] }
  0xa3   : > { %v1665_v28 = vor.u32 %v13770_v38, %v14184_v40  ;;  %v2269_v32 = vsel %vm13652_vm2, %v2261_v57, %v2268_v48  ;;  %v19705_v41 = vshrl.u32 %v14159_v6, 16  ;;  %v2278_v38 = vrot.slane %v19701_v29, 7  ;;  %12454 = vmatprep.subr.bf16.mxu0 %v13181_v13  ;;  %v13185_v57 = vld [vmem:[%s19675_s1 + $0x170] sm:$0xff]   ;;  %v364_v48 = vld [vmem:[#allocation2 + $0x5c] sm:$0x1] }
  0xa4   : > { %v1652_v26 = vrot.slane %v1651_v14, 4  ;;  %v11091_v2 = vcombine.low %v2260_v15, %v2269_v32  ;;  %v595_v35 = vld [vmem:[#allocation2 + $0x2c] sm:$0x1]  ;;  %v2293_v15 = vshrl.u32 %v2174_v9, 16  ;;  %v19708_v7 = vshrl.u32 %v14201_v21, 16 }
  0xa5   : > { %v1666_v63 = vrot.slane %v1665_v28, 4  ;;  %v2287_v17 = vrot.slane %v19705_v41, 7  ;;  %v1654_v14 = vshll.u32 %v595_v35, 16  ;;  %v2281_v28 = vor.u32 %v19706_v5, %v2278_v38 }
  0xa6   : > { %12419 = vmatmul.mubr.bf16.vlgmr.msra.gmra.mxu1 %v11091_v2  ;;  %v2283_v32 = vrot.slane %v2278_v38, 4  ;;  %v19707_v29 = vshrl.u32 %v14207_v30, 16  ;;  %v599_v47 = vld [vmem:[#allocation2 + $0x3c] sm:$0x1]  ;;  %v11061_v0 = vrot.slane %v2293_v15, 11  ;;  %v2300_v9 = vrot.slane %v19708_v7, 7  ;;  %12455 = vmatpush3.bf16.msra.mxu0 %v13181_v13 }
  0xa7   : > { %v2290_v31 = vor.u32 %v19709_v4, %v2287_v17  ;;  %v19712_v41 = vshll.u32 %v14207_v30, 16  ;;  %12499 = vmatpush3.bf16.msra.mxu1 %v13997_v18  ;;  %v1656_v2 = vrot.slane %v1654_v14, 5  ;;  %v1668_v35 = vshll.u32 %v599_v47, 16  ;;  %12456 = vmatprep.subr.bf16.mxu0 %v13182_v49  ;;  %v13183_v17 = vld [vmem:[%s19675_s1 + $0x118] sm:$0xff]   ;;  %v2178_v14 = vld [vmem:[#allocation2 + $0x50] sm:$0xf] }
  0xa8   : > { %v2282_v38 = vsel %vm13652_vm2, %v11060_v12, %v2281_v28  ;;  %v2309_v5 = vrot.slane %v19707_v29, 7  ;;  %12500 = vmatprep.subr.bf16.mxu1 %v13185_v57  ;;  %v20010_v18 = vshll.u32 %v14201_v21, 16  ;;  %v2305_v47 = vrot.slane %v2300_v9, 4 }
  0xa9   : > { %v2291_v13 = vsel %vm13652_vm2, %v2283_v32, %v2290_v31  ;;  %v359_v12 = vsel %vm13913_vm4, 0, %v358_v45  ;;  %v1657_v28 = vsel %vm14099_vm7, %v1652_v26, %v1656_v2  ;;  %v1670_v29 = vrot.slane %v1668_v35, 5  ;;  %v13187_v31 = vld [vmem:[%s19675_s1 + $0x168] sm:$0xff]   ;;  %v14262_v35 = vld [vmem:[#allocation2 + $0x54] sm:$0xf] }
  0xaa   : > { %v2303_v15 = vor.u32 %v20010_v18, %v2300_v9  ;;  %v11092_v7 = vcombine.low %v2282_v38, %v2291_v13  ;;  %v2312_v4 = vor.u32 %v19712_v41, %v2309_v5  ;;  %360 = vst [vmem:[#allocation2 + $0x4c] sm:$0x1] %v359_v12  ;;  %v11036_v32 = vcombine.low %v1649_v36, %v1657_v28  ;;  %v14298_v13 = vld [vmem:[#allocation2 + $0x64] sm:$0xf] }
  0xab   : > { %v20011_v45 = vor.u32 %v13781_v51, %v13779_v50  ;;  %v20012_v26 = vshll.u32 %v13761_v23, 16  ;;  %12457 = vmatpush3.bf16.msra.mxu0 %v13182_v49  ;;  %12501 = vmatpush3.bf16.msra.mxu1 %v13185_v57  ;;  %v1671_v5 = vsel %vm14099_vm7, %v1666_v63, %v1670_v29  ;;  %v365_v50 = vsel %vm13913_vm4, 0, %v364_v48  ;;  %v14272_v23 = vld [vmem:[#allocation2 + $0x58] sm:$0xf]  ;;  %v2182_v49 = vld [vmem:[#allocation2 + $0x60] sm:$0xf] }
  0xac   : > { %v2304_v9 = vsel %vm13652_vm2, %v11061_v0, %v2303_v15  ;;  %12422 = vmatprep.mubr.bf16.mxu1 %v11092_v7  ;;  %v2313_v36 = vsel %vm13652_vm2, %v2305_v47, %v2312_v4  ;;  %v1688_v51 = vor.u32 %v13810_v20, %v13806_v16  ;;  %12458 = vmatprep.subr.bf16.mxu0 %v13183_v17  ;;  %v13186_v0 = vld [vmem:[%s19675_s1 + $0x110] sm:$0xff]   ;;  %v13188_v57 = vld [vmem:[%s19675_s1 + $0x160] sm:$0xff]   ;;  %v2315_v48 = vshrl.u32 %v2178_v14, 16  ;;  %v14309_v14 = vld [vmem:[%s19675_s1 + $0x158] sm:$0xff]  }
  0xad   : > { %v14256_v18 = vrot.slane %v20011_v45, 4  ;;  %v14260_v2 = vrot.slane %v20012_v26, 5  ;;  %12374 = vmatprep.mubr.bf16.mxu0 %v11036_v32  ;;  %v20013_v29 = vsel %vm14099_vm7, %v14176_v60, %v14184_v40  ;;  %v11093_v4 = vcombine.low %v2304_v9, %v2313_v36  ;;  %366 = vst [vmem:[#allocation2 + $0x5c] sm:$0x1] %v365_v50  ;;  %12502 = vmatprep.subr.bf16.mxu1 %v13187_v31  ;;  %v14319_v26 = vld [vmem:[#allocation2 + $0x68] sm:$0xf] }
  0xae   : > { %v11037_v63 = vcombine.low %v20013_v29, %v1671_v5  ;;  %v14291_v7 = vrot.slane %v1688_v51, 4  ;;  %v20014_v60 = vshll.u32 %v13772_v42, 16  ;;  %v19711_v38 = vshrl.u32 %v14262_v35, 16  ;;  %v13189_v42 = vld [vmem:[%s19675_s1 + $0x108] sm:$0xff]  }
  0xaf   : > { %v1677_v16 = vsel %vm14099_vm7, %v14256_v18, %v14260_v2  ;;  %v1679_v20 = vor.u32 %v13791_v56, %v14260_v2  ;;  %12423 = vmatmul.mubr.bf16.gmra.mxu1 %v11093_v4  ;;  %v19744_v15 = vshll.u32 %v14262_v35, 16  ;;  %v19710_v47 = vshrl.u32 %v14272_v23, 16  ;;  %v370_v5 = vld [vmem:[#allocation2 + $0x6c] sm:$0x1]  ;;  %12459 = vmatpush3.bf16.msra.mxu0 %v13183_v17  ;;  %v14373_v2 = vld [vmem:[#allocation2 + $0x74] sm:$0xf] }
  0xb0   : > { %v14295_v40 = vrot.slane %v20014_v60, 5  ;;  %12375 = vmatmul.mubr.bf16.gmra.mxu0 %v11037_v63  ;;  %v19714_v12 = vshll.u32 %v14272_v23, 16  ;;  %v11062_v9 = vrot.slane %v2315_v48, 11  ;;  %v2322_v45 = vrot.slane %v19711_v38, 7  ;;  %12503 = vmatpush3.bf16.msra.mxu1 %v13187_v31 }
  0xb1   : > { %v1680_v56 = vrot.slane %v1679_v20, 4  ;;  %v603_v36 = vld [vmem:[#allocation2 + $0x4c] sm:$0x1]  ;;  %v2331_v50 = vrot.slane %v19710_v47, 7  ;;  %v2337_v51 = vshrl.u32 %v2182_v49, 16  ;;  %v19713_v29 = vshrl.u32 %v14298_v13, 16  ;;  %12460 = vmatprep.subr.bf16.mxu0 %v13186_v0  ;;  %12504 = vmatprep.subr.bf16.mxu1 %v13188_v57 }
  0xb2   : > { %v1691_v28 = vsel %vm14099_vm7, %v14291_v7, %v14295_v40  ;;  %v1693_v32 = vor.u32 %v13812_v22, %v14295_v40  ;;  %v19743_v63 = vshll.u32 %v14298_v13, 16  ;;  %v1682_v22 = vshll.u32 %v603_v36, 16  ;;  %v376_v47 = vld [vmem:[#allocation2 + $0x7c] sm:$0x1] }
  0xb3   : > { %v2325_v20 = vor.u32 %v19744_v15, %v2322_v45  ;;  %v2327_v60 = vrot.slane %v2322_v45, 4  ;;  %v2334_v17 = vor.u32 %v19714_v12, %v2331_v50  ;;  %v11063_v31 = vrot.slane %v2337_v51, 11  ;;  %12461 = vmatpush3.bf16.msra.mxu0 %v13186_v0 }
  0xb4   : > { %v1694_v4 = vrot.slane %v1693_v32, 4  ;;  %v2344_v48 = vrot.slane %v19713_v29, 7  ;;  %v19737_v49 = vshrl.u32 %v14319_v26, 16  ;;  %v1684_v38 = vrot.slane %v1682_v22, 5  ;;  %v607_v41 = vld [vmem:[#allocation2 + $0x5c] sm:$0x1]  ;;  %12505 = vmatpush3.bf16.msra.mxu1 %v13188_v57  ;;  %12462 = vmatprep.subr.bf16.mxu0 %v13189_v42 }
  0xb5   : > { %v2326_v36 = vsel %vm13652_vm2, %v11062_v9, %v2325_v20  ;;  %v19741_v32 = vshll.u32 %v14319_v26, 16  ;;  %v371_v45 = vsel %vm13913_vm4, 0, %v370_v5  ;;  %v1696_v50 = vshll.u32 %v607_v41, 16  ;;  %12506 = vmatprep.subr.bf16.mxu1 %v14309_v14  ;;  %v2186_v57 = vld [vmem:[#allocation2 + $0x70] sm:$0xf]  ;;  %v13192_v20 = vld [vmem:[%s19675_s1 + $0x100] sm:$0xff]  }
  0xb6   : > { %v2335_v51 = vsel %vm13652_vm2, %v2327_v60, %v2334_v17  ;;  %v2347_v29 = vor.u32 %v19743_v63, %v2344_v48  ;;  %v2349_v12 = vrot.slane %v2344_v48, 4  ;;  %372 = vst [vmem:[#allocation2 + $0x6c] sm:$0x1] %v371_v45  ;;  %v1685_v9 = vsel %vm14099_vm7, %v1680_v56, %v1684_v38  ;;  %v13191_v5 = vld [vmem:[%s19675_s1 + $0x150] sm:$0xff]   ;;  %v20017_v45 = vld [vmem:[#allocation5_spill] sm:$0xff] }
  0xb7   : > { %v11094_v22 = vcombine.low %v2326_v36, %v2335_v51  ;;  %v2353_v0 = vrot.slane %v19737_v49, 7  ;;  %v1702_v41 = vor.u32 %v13834_v58, %v13828_v53  ;;  %v11038_v38 = vcombine.low %v1677_v16, %v1685_v9  ;;  %v14375_v16 = vld [vmem:[#allocation2 + $0x78] sm:$0xf]  ;;  %12463 = vmatpush3.bf16.msra.mxu0 %v13189_v42  ;;  %v2190_v9 = vld [vmem:[#allocation2 + $0x80] sm:$0xf] }
  0xb8   : > { %v1698_v56 = vrot.slane %v1696_v50, 5  ;;  %v2348_v60 = vsel %vm13652_vm2, %v11063_v31, %v2347_v29  ;;  %v20015_v53 = vshll.u32 %v13793_v3, 16  ;;  %v377_v36 = vsel %vm13913_vm4, 0, %v376_v47  ;;  %v20016_v29 = vld [vmem:[#allocation6_spill] sm:$0xff]  ;;  %12507 = vmatpush3.bf16.msra.mxu1 %v14309_v14  ;;  %v14404_v14 = vld [vmem:[#allocation2 + $0x88] sm:$0xf]  ;;  %12464 = vmatprep.subr.bf16.mxu0 %v13192_v20 }
  0xb9   : > { %12426 = vmatprep.mubr.bf16.mxu1 %v11094_v22  ;;  %v2356_v17 = vor.u32 %v19741_v32, %v2353_v0  ;;  %v14367_v48 = vrot.slane %v1702_v41, 4  ;;  %v1716_v18 = vor.u32 %v13864_v52, %v13858_v39  ;;  %12378 = vmatprep.mubr.bf16.mxu0 %v11038_v38  ;;  %378 = vst [vmem:[#allocation2 + $0x7c] sm:$0x1] %v377_v36  ;;  %v20018_v50 = vshll.u32 %v20017_v45, 16  ;;  %v14385_v39 = vld [vmem:[#allocation2 + $0x84] sm:$0xf] }
  0xba   : > { %v14363_v58 = vrot.slane %v20015_v53, 5  ;;  %v1699_v3 = vsel %vm14099_vm7, %v1694_v4, %v1698_v56  ;;  %v2359_v47 = vshrl.u32 %v2186_v57, 16  ;;  %v13193_v52 = vld [vmem:[%s19675_s1 + $0x148] sm:$0xff]   ;;  %12508 = vmatprep.subr.bf16.mxu1 %v13191_v5  ;;  %v14409_v41 = vld [vmem:[%s19675_s1 + $0x1b8] sm:$0xff]   ;;  %v19716_v53 = vshrl.u32 %v14373_v2, 16 }
  0xbb   : > { %v14383_v51 = vrot.slane %v20018_v50, 5  ;;  %v11039_v42 = vcombine.low %v1691_v28, %v1699_v3  ;;  %v2357_v4 = vsel %vm13652_vm2, %v2349_v12, %v2356_v17  ;;  %v14402_v0 = vrot.slane %v1716_v18, 4  ;;  %v20019_v12 = vld [vmem:[#allocation7_spill] sm:$0xff]  ;;  %12465 = vmatpush3.bf16.msra.mxu0 %v13192_v20  ;;  %v13194_v20 = vld [vmem:[%s19675_s1 + $0x140] sm:$0xff]  }
  0xbc   : > { %v1707_v31 = vor.u32 %v20016_v29, %v14363_v58  ;;  %v1705_v22 = vsel %vm14099_vm7, %v14367_v48, %v14363_v58  ;;  %v11095_v7 = vcombine.low %v2348_v60, %v2357_v4  ;;  %v11064_v57 = vrot.slane %v2359_v47, 11  ;;  %v382_v48 = vld [vmem:[#allocation2 + $0x8c] sm:$0x1]  ;;  %12509 = vmatpush3.bf16.msra.mxu1 %v13191_v5  ;;  %12546 = vmatprep.subr.bf16.mxu0 %v14409_v41 }
  0xbd   : > { %v1721_v28 = vor.u32 %v20019_v12, %v14383_v51  ;;  %12379 = vmatmul.mubr.bf16.gmra.mxu0 %v11039_v42  ;;  %v611_v38 = vld [vmem:[#allocation2 + $0x6c] sm:$0x1]  ;;  %v1719_v56 = vsel %vm14099_vm7, %v14402_v0, %v14383_v51  ;;  %v19728_v58 = vshll.u32 %v14373_v2, 16  ;;  %v19715_v17 = vshrl.u32 %v14375_v16, 16  ;;  %12510 = vmatprep.subr.bf16.mxu1 %v13193_v52 }
  0xbe   : > { %v1708_v40 = vrot.slane %v1707_v31, 4  ;;  %12427 = vmatmul.mubr.bf16.gmra.mxu1 %v11095_v7  ;;  %v1710_v60 = vshll.u32 %v611_v38, 16  ;;  %v19718_v18 = vshll.u32 %v14375_v16, 16  ;;  %v2381_v3 = vshrl.u32 %v2190_v9, 16 }
  0xbf   : > { %v1722_v36 = vrot.slane %v1721_v28, 4  ;;  %v2366_v29 = vrot.slane %v19716_v53, 7  ;;  %v2375_v31 = vrot.slane %v19715_v17, 7  ;;  %v19717_v45 = vshrl.u32 %v14385_v39, 16  ;;  %v388_v28 = vld [vmem:[#allocation2 + $0x9c] sm:$0x1] }
  0xc0   : > { %v19727_v50 = vshll.u32 %v14385_v39, 16  ;;  %v1712_v51 = vrot.slane %v1710_v60, 5  ;;  %v11065_v47 = vrot.slane %v2381_v3, 11  ;;  %v19724_v42 = vshrl.u32 %v14404_v14, 16  ;;  %v615_v4 = vld [vmem:[#allocation2 + $0x7c] sm:$0x1]  ;;  %12511 = vmatpush3.bf16.msra.mxu1 %v13193_v52 }
  0xc1   : > { %v19726_v9 = vshll.u32 %v14404_v14, 16  ;;  %v2369_v0 = vor.u32 %v19728_v58, %v2366_v29  ;;  %v2371_v7 = vrot.slane %v2366_v29, 4  ;;  %v2378_v5 = vor.u32 %v19718_v18, %v2375_v31  ;;  %v2194_v18 = vld [vmem:[#allocation2 + $0x90] sm:$0xf]  ;;  %12512 = vmatprep.subr.bf16.mxu1 %v13194_v20  ;;  %v14531_v58 = vld [vmem:[#allocation2 + $0xb8] sm:$0xf] }
  0xc2   : > { %v2388_v12 = vrot.slane %v19717_v45, 7  ;;  %v1713_v38 = vsel %vm14099_vm7, %v1708_v40, %v1712_v51  ;;  %v1724_v60 = vshll.u32 %v615_v4, 16  ;;  %v2397_v3 = vrot.slane %v19724_v42, 7  ;;  %v14454_v40 = vld [vmem:[%s19675_s1 + $0x1f8] sm:$0xff]   ;;  %v14523_v42 = vld [vmem:[#allocation2 + $0xb4] sm:$0xf] }
  0xc3   : > { %v383_v17 = vsel %vm13913_vm4, 0, %v382_v48  ;;  %v11040_v53 = vcombine.low %v1705_v22, %v1713_v38  ;;  %v2370_v29 = vsel %vm13652_vm2, %v11064_v57, %v2369_v0  ;;  %v2379_v31 = vsel %vm13652_vm2, %v2371_v7, %v2378_v5  ;;  %v14466_v5 = vld [vmem:[#allocation2 + $0x94] sm:$0xf] }
  0xc4   : > { %v2391_v45 = vor.u32 %v19727_v50, %v2388_v12  ;;  %384 = vst [vmem:[#allocation2 + $0x8c] sm:$0x1] %v383_v17  ;;  %v1726_v51 = vrot.slane %v1724_v60, 5  ;;  %v11096_v48 = vcombine.low %v2370_v29, %v2379_v31  ;;  %v2393_v22 = vrot.slane %v2388_v12, 4  ;;  %v14468_v12 = vld [vmem:[#allocation2 + $0x98] sm:$0xf]  ;;  %12513 = vmatpush3.bf16.msra.mxu1 %v13194_v20 }
  0xc5   : > { %v2400_v57 = vor.u32 %v19726_v9, %v2397_v3  ;;  %12382 = vmatprep.mubr.bf16.mxu0 %v11040_v53  ;;  %v1730_v17 = vor.u32 %v13956_v37, %v13954_v11  ;;  %v20020_v52 = vshll.u32 %v13937_v24, 16  ;;  %v389_v7 = vsel %vm13913_vm4, 0, %v388_v28  ;;  %v20021_v11 = vld [vmem:[#allocation10_spill] sm:$0xff]  ;;  %v20023_v29 = vld [vmem:[#allocation9_spill] sm:$0xff]  ;;  %12594 = vmatprep.subr.bf16.mxu1 %v14454_v40  ;;  %v20027_v9 = vld [vmem:[#allocation12_spill] sm:$0xff] }
  0xc6   : > { %v2392_v4 = vsel %vm13652_vm2, %v11065_v47, %v2391_v45  ;;  %v1727_v38 = vsel %vm14099_vm7, %v1722_v36, %v1726_v51  ;;  %12430 = vmatprep.mubr.bf16.mxu1 %v11096_v48  ;;  %390 = vst [vmem:[#allocation2 + $0x9c] sm:$0x1] %v389_v7  ;;  %v1744_v37 = vor.u32 %v20021_v11, %v13965_v62  ;;  %v20022_v24 = vshll.u32 %v13950_v34, 16  ;;  %v2198_v47 = vld [vmem:[#allocation2 + $0xa0] sm:$0xf]  ;;  %v20024_v51 = vld [vmem:[#allocation11_spill] sm:$0xff] }
  0xc7   : > { %v1732_v0 = vrot.slane %v20020_v52, 5  ;;  %v2401_v53 = vsel %vm13652_vm2, %v2393_v22, %v2400_v57  ;;  %v11041_v28 = vcombine.low %v1719_v56, %v1727_v38  ;;  %v1731_v3 = vrot.slane %v1730_v17, 4  ;;  %v14481_v52 = vld [vmem:[#allocation2 + $0xa4] sm:$0xf]  ;;  %v14486_v57 = vld [vmem:[#allocation2 + $0xa8] sm:$0xf] }
  0xc8   : > { %v14478_v45 = vrot.slane %v20022_v24, 5  ;;  %v11097_v60 = vcombine.low %v2392_v4, %v2401_v53  ;;  %v1745_v36 = vrot.slane %v1744_v37, 4  ;;  %v2403_v22 = vshrl.u32 %v2194_v18, 16 }
  0xc9   : > { %v1735_v31 = vor.u32 %v20023_v29, %v1732_v0  ;;  %v19721_v62 = vshrl.u32 %v14466_v5, 16  ;;  %12383 = vmatmul.mubr.bf16.gmra.mxu0 %v11041_v28  ;;  %v1733_v34 = vsel %vm14099_vm7, %v1731_v3, %v1732_v0  ;;  %v19720_v4 = vshll.u32 %v14466_v5, 16  ;;  %v394_v28 = vld [vmem:[#allocation2 + $0xac] sm:$0x1] }
  0xca   : > { %v1749_v48 = vor.u32 %v20024_v51, %v14478_v45  ;;  %12431 = vmatmul.mubr.bf16.gmra.mxu1 %v11097_v60  ;;  %v19719_v20 = vshrl.u32 %v14468_v12, 16  ;;  %v1747_v18 = vsel %vm14099_vm7, %v1745_v36, %v14478_v45  ;;  %v11066_v38 = vrot.slane %v2403_v22, 11 }
  0xcb   : > { %v1736_v56 = vrot.slane %v1735_v31, 4  ;;  %v619_v17 = vld [vmem:[#allocation2 + $0x8c] sm:$0x1]  ;;  %v2410_v53 = vrot.slane %v19721_v62, 7  ;;  %v19722_v0 = vshll.u32 %v14468_v12, 16  ;;  %v2425_v24 = vshrl.u32 %v2198_v47, 16 }
  0xcc   : > { %v1750_v7 = vrot.slane %v1749_v48, 4  ;;  %v1738_v11 = vshll.u32 %v619_v17, 16  ;;  %v2419_v37 = vrot.slane %v19719_v20, 7  ;;  %v19723_v29 = vshrl.u32 %v14481_v52, 16 }
  0xcd   : > { %v2413_v60 = vor.u32 %v19720_v4, %v2410_v53  ;;  %v2415_v3 = vrot.slane %v2410_v53, 4  ;;  %v19735_v45 = vshll.u32 %v14481_v52, 16  ;;  %v623_v36 = vld [vmem:[#allocation2 + $0x9c] sm:$0x1]  ;;  %v11067_v48 = vrot.slane %v2425_v24, 11 }
  0xce   : > { %v1740_v31 = vrot.slane %v1738_v11, 5  ;;  %v2422_v51 = vor.u32 %v19722_v0, %v2419_v37  ;;  %v19725_v22 = vshrl.u32 %v14486_v57, 16  ;;  %v1752_v17 = vshll.u32 %v623_v36, 16  ;;  %v400_v4 = vld [vmem:[#allocation2 + $0xbc] sm:$0x1] }
  0xcf   : > { %v2414_v47 = vsel %vm13652_vm2, %v11066_v38, %v2413_v60  ;;  %v2432_v20 = vrot.slane %v19723_v29, 7  ;;  %v19731_v53 = vshll.u32 %v14486_v57, 16  ;;  %v395_v24 = vsel %vm13913_vm4, 0, %v394_v28  ;;  %v2202_v36 = vld [vmem:[#allocation2 + $0xb0] sm:$0xf] }
  0xd0   : > { %v1741_v11 = vsel %vm14099_vm7, %v1736_v56, %v1740_v31  ;;  %v2423_v62 = vsel %vm13652_vm2, %v2415_v3, %v2422_v51  ;;  %v2441_v37 = vrot.slane %v19725_v22, 7  ;;  %v1754_v60 = vrot.slane %v1752_v17, 5  ;;  %396 = vst [vmem:[#allocation2 + $0xac] sm:$0x1] %v395_v24  ;;  %v20025_v31 = vld [vmem:[#allocation13_spill] sm:$0xff]  ;;  %v20026_v51 = vld [vmem:[#allocation14_spill] sm:$0xff] }
  0xd1   : > { %v11042_v38 = vcombine.low %v1733_v34, %v1741_v11  ;;  %v11098_v0 = vcombine.low %v2414_v47, %v2423_v62  ;;  %v2435_v29 = vor.u32 %v19735_v45, %v2432_v20  ;;  %v2437_v56 = vrot.slane %v2432_v20, 4  ;;  %v20029_v17 = vld [vmem:[#allocation16_spill] sm:$0xff]  ;;  %v20030_v47 = vld [vmem:[#allocation17_spill] sm:$0xff] }
  0xd2   : > { %v2444_v3 = vor.u32 %v19731_v53, %v2441_v37  ;;  %v1758_v22 = vor.u32 %v20026_v51, %v20025_v31  ;;  %v20028_v50 = vshll.u32 %v20027_v9, 16  ;;  %v1755_v62 = vsel %vm14099_vm7, %v1750_v7, %v1754_v60  ;;  %v2206_v37 = vld [vmem:[#allocation2 + $0xc0] sm:$0xf]  ;;  %v14541_v24 = vld [vmem:[#allocation2 + $0xc4] sm:$0xf]  ;;  %v20031_v31 = vld [vmem:[#allocation15_spill] sm:$0xff] }
  0xd3   : > { %12386 = vmatprep.mubr.bf16.mxu0 %v11042_v38  ;;  %12434 = vmatprep.mubr.bf16.mxu1 %v11098_v0  ;;  %v2436_v34 = vsel %vm13652_vm2, %v11067_v48, %v2435_v29  ;;  %v401_v20 = vsel %vm13913_vm4, 0, %v400_v4  ;;  %v1772_v11 = vor.u32 %v20030_v47, %v20029_v17  ;;  %v20032_v29 = vshll.u32 %v13986_v1, 16 }
  0xd4   : > { %v1760_v28 = vrot.slane %v20028_v50, 5  ;;  %v11043_v50 = vcombine.low %v1747_v18, %v1755_v62  ;;  %v2445_v9 = vsel %vm13652_vm2, %v2437_v56, %v2444_v3  ;;  %v1759_v38 = vrot.slane %v1758_v22, 4  ;;  %402 = vst [vmem:[#allocation2 + $0xbc] sm:$0x1] %v401_v20  ;;  %v14552_v56 = vld [vmem:[#allocation2 + $0xc8] sm:$0xf] }
  0xd5   : > { %v11099_v0 = vcombine.low %v2436_v34, %v2445_v9  ;;  %v1773_v60 = vrot.slane %v1772_v11, 4  ;;  %v1774_v48 = vrot.slane %v20032_v29, 5  ;;  %v2447_v4 = vshrl.u32 %v2202_v36, 16  ;;  %v20033_v3 = vld [vmem:[#allocation19_spill] sm:$0xff] }
  0xd6   : > { %v1763_v7 = vor.u32 %v20031_v31, %v1760_v28  ;;  %12387 = vmatmul.mubr.bf16.gmra.mxu0 %v11043_v50  ;;  %v1761_v51 = vsel %vm14099_vm7, %v1759_v38, %v1760_v28  ;;  %v19730_v18 = vshrl.u32 %v14523_v42, 16  ;;  %v19732_v62 = vshll.u32 %v14523_v42, 16 }
  0xd7   : > { %12435 = vmatmul.mubr.bf16.gmra.mxu1 %v11099_v0  ;;  %v1775_v22 = vsel %vm14099_vm7, %v1773_v60, %v1774_v48  ;;  %v1777_v34 = vor.u32 %v20033_v3, %v1774_v48  ;;  %v11068_v1 = vrot.slane %v2447_v4, 11  ;;  %v19729_v36 = vshrl.u32 %v14531_v58, 16  ;;  %v627_v20 = vld [vmem:[#allocation2 + $0xac] sm:$0x1] }
  0xd8   : > { %v1764_v17 = vrot.slane %v1763_v7, 4  ;;  %v2454_v28 = vrot.slane %v19730_v18, 7  ;;  %v19734_v47 = vshll.u32 %v14531_v58, 16  ;;  %v2469_v11 = vshrl.u32 %v2206_v37, 16  ;;  %v406_v0 = vld [vmem:[#allocation2 + $0xcc] sm:$0x1] }
  0xd9   : > { %v19733_v50 = vshrl.u32 %v14541_v24, 16  ;;  %v1766_v9 = vshll.u32 %v627_v20, 16  ;;  %v1778_v38 = vrot.slane %v1777_v34, 4  ;;  %v2463_v31 = vrot.slane %v19729_v36, 7 }
  0xda   : > { %v19736_v7 = vshll.u32 %v14541_v24, 16  ;;  %v2457_v60 = vor.u32 %v19732_v62, %v2454_v28  ;;  %v2459_v29 = vrot.slane %v2454_v28, 4  ;;  %v11069_v48 = vrot.slane %v2469_v11, 11  ;;  %v412_v62 = vld [vmem:[#allocation2 + $0xdc] sm:$0x1] }
  0xdb   : > { %v2476_v4 = vrot.slane %v19733_v50, 7  ;;  %v1768_v3 = vrot.slane %v1766_v9, 5  ;;  %v631_v37 = vld [vmem:[#allocation2 + $0xbc] sm:$0x1]  ;;  %v2466_v20 = vor.u32 %v19734_v47, %v2463_v31  ;;  %v19738_v34 = vshrl.u32 %v14552_v56, 16 }
  0xdc   : > { %v19740_v36 = vshll.u32 %v14552_v56, 16  ;;  %v1780_v18 = vshll.u32 %v631_v37, 16  ;;  %v2458_v53 = vsel %vm13652_vm2, %v11068_v1, %v2457_v60  ;;  %v407_v37 = vsel %vm13913_vm4, 0, %v406_v0  ;;  %v2210_v47 = vld [vmem:[#allocation2 + $0xd0] sm:$0xf] }
  0xdd   : > { %v2479_v28 = vor.u32 %v19736_v7, %v2476_v4  ;;  %v2481_v11 = vrot.slane %v2476_v4, 4  ;;  %v1769_v9 = vsel %vm14099_vm7, %v1764_v17, %v1768_v3  ;;  %v2467_v50 = vsel %vm13652_vm2, %v2459_v29, %v2466_v20  ;;  %408 = vst [vmem:[#allocation2 + $0xcc] sm:$0x1] %v407_v37  ;;  %v20034_v3 = vld [vmem:[#allocation21_spill] sm:$0xff]  ;;  %v20035_v7 = vld [vmem:[#allocation22_spill] sm:$0xff] }
  0xde   : > { %v2485_v31 = vrot.slane %v19738_v34, 7  ;;  %v11044_v45 = vcombine.low %v1761_v51, %v1769_v9  ;;  %v1782_v1 = vrot.slane %v1780_v18, 5  ;;  %v11100_v60 = vcombine.low %v2458_v53, %v2467_v50  ;;  %v20036_v20 = vld [vmem:[#allocation18_spill] sm:$0xff]  ;;  %v20038_v51 = vld [vmem:[#allocation25_spill] sm:$0xff]  ;;  %v20039_v50 = vld [vmem:[#allocation20_spill] sm:$0xff] }
  0xdf   : > { %v2480_v4 = vsel %vm13652_vm2, %v11069_v48, %v2479_v28  ;;  %v1786_v29 = vor.u32 %v20035_v7, %v20034_v3  ;;  %v20037_v49 = vshll.u32 %v20036_v20, 16  ;;  %v413_v0 = vsel %vm13913_vm4, 0, %v412_v62  ;;  %v14605_v7 = vld [vmem:[#allocation2 + $0xd4] sm:$0xf] }
  0xe0   : > { %v2488_v17 = vor.u32 %v19740_v36, %v2485_v31  ;;  %12390 = vmatprep.mubr.bf16.mxu0 %v11044_v45  ;;  %v1783_v53 = vsel %vm14099_vm7, %v1778_v38, %v1782_v1  ;;  %12438 = vmatprep.mubr.bf16.mxu1 %v11100_v60  ;;  %414 = vst [vmem:[#allocation2 + $0xdc] sm:$0x1] %v413_v0  ;;  %v20040_v48 = vshll.u32 %v20039_v50, 16  ;;  %v2491_v9 = vshrl.u32 %v2210_v47, 16  ;;  %v20041_v38 = vld [vmem:[#allocation23_spill] sm:$0xff]  ;;  %v20042_v20 = vld [vmem:[#allocation26_spill] sm:$0xff] }
  0xe1   : > { %v14593_v34 = vrot.slane %v20037_v49, 5  ;;  %v1800_v18 = vor.u32 %v20038_v51, %v14048_v55  ;;  %v14607_v49 = vld [vmem:[#allocation2 + $0xd8] sm:$0xf]  ;;  %v11045_v31 = vcombine.low %v1775_v22, %v1783_v53  ;;  %v1787_v62 = vrot.slane %v1786_v29, 4  ;;  %v2214_v1 = vld [vmem:[#allocation2 + $0xe0] sm:$0xf] }
  0xe2   : > { %v14603_v28 = vrot.slane %v20040_v48, 5  ;;  %v2489_v45 = vsel %vm13652_vm2, %v2481_v11, %v2488_v17  ;;  %v14613_v60 = vld [vmem:[#allocation2 + $0xe4] sm:$0xf]  ;;  %v11070_v51 = vrot.slane %v2491_v9, 11  ;;  %v14617_v50 = vld [vmem:[#allocation2 + $0xe8] sm:$0xf] }
  0xe3   : > { %v1791_v37 = vor.u32 %v20041_v38, %v14593_v34  ;;  %v11101_v55 = vcombine.low %v2480_v4, %v2489_v45  ;;  %v1801_v3 = vrot.slane %v1800_v18, 4  ;;  %12391 = vmatmul.mubr.bf16.gmra.mxu0 %v11045_v31  ;;  %v1789_v22 = vsel %vm14099_vm7, %v1787_v62, %v14593_v34 }
  0xe4   : > { %v1805_v0 = vor.u32 %v20042_v20, %v14603_v28  ;;  %v19739_v11 = vshrl.u32 %v14605_v7, 16  ;;  %v19745_v17 = vshll.u32 %v14605_v7, 16  ;;  %v19742_v53 = vshrl.u32 %v14607_v49, 16  ;;  %v635_v48 = vld [vmem:[#allocation2 + $0xcc] sm:$0x1] }
  0xe5   : > { %v1792_v47 = vrot.slane %v1791_v37, 4  ;;  %12439 = vmatmul.mubr.bf16.gmra.mxu1 %v11101_v55  ;;  %v1803_v4 = vsel %vm14099_vm7, %v1801_v3, %v14603_v28  ;;  %v19749_v18 = vshll.u32 %v14607_v49, 16  ;;  %v2513_v34 = vshrl.u32 %v2214_v1, 16  ;;  %v418_v55 = vld [vmem:[#allocation2 + $0xec] sm:$0x1] }
  0xe6   : > { %v1806_v29 = vrot.slane %v1805_v0, 4  ;;  %v2498_v9 = vrot.slane %v19739_v11, 7  ;;  %v19747_v31 = vshrl.u32 %v14613_v60, 16  ;;  %v19748_v45 = vshll.u32 %v14613_v60, 16 }
  0xe7   : > { %v1794_v62 = vshll.u32 %v635_v48, 16  ;;  %v2507_v38 = vrot.slane %v19742_v53, 7  ;;  %v19746_v28 = vshrl.u32 %v14617_v50, 16  ;;  %v2530_v37 = vshll.u32 %v14617_v50, 16  ;;  %v639_v3 = vld [vmem:[#allocation2 + $0xdc] sm:$0x1] }
  0xe8   : > { %v2501_v20 = vor.u32 %v19745_v17, %v2498_v9  ;;  %v2503_v0 = vrot.slane %v2498_v9, 4  ;;  %v11071_v11 = vrot.slane %v2513_v34, 11  ;;  %v2520_v1 = vrot.slane %v19747_v31, 7  ;;  %v424_v34 = vld [vmem:[#allocation2 + $0xfc] sm:$0x1] }
  0xe9   : > { %v1796_v36 = vrot.slane %v1794_v62, 5  ;;  %v1808_v32 = vshll.u32 %v639_v3, 16  ;;  %v2510_v48 = vor.u32 %v19749_v18, %v2507_v38  ;;  %v2529_v53 = vrot.slane %v19746_v28, 7  ;;  %v14661_v18 = vld [vmem:[#allocation2 + $0xf4] sm:$0xf] }
  0xea   : > { %v2502_v63 = vsel %vm13652_vm2, %v11070_v51, %v2501_v20  ;;  %v2523_v15 = vor.u32 %v19748_v45, %v2520_v1  ;;  %v2525_v17 = vrot.slane %v2520_v1, 4  ;;  %v419_v9 = vsel %vm13913_vm4, 0, %v418_v55  ;;  %v2218_v51 = vld [vmem:[#allocation2 + $0xf0] sm:$0xf]  ;;  %v20043_v55 = vld [vmem:[#allocation27_spill] sm:$0xff] }
  0xeb   : > { %v1797_v62 = vsel %vm14099_vm7, %v1792_v47, %v1796_v36  ;;  %v1810_v3 = vrot.slane %v1808_v32, 5  ;;  %v2511_v38 = vsel %vm13652_vm2, %v2503_v0, %v2510_v48  ;;  %v2532_v28 = vor.u32 %v2530_v37, %v2529_v53  ;;  %420 = vst [vmem:[#allocation2 + $0xec] sm:$0x1] %v419_v9  ;;  %v20044_v47 = vld [vmem:[#allocation24_spill] sm:$0xff] }
  0xec   : > { %v11046_v20 = vcombine.low %v1789_v22, %v1797_v62  ;;  %v11102_v31 = vcombine.low %v2502_v63, %v2511_v38  ;;  %v2524_v1 = vsel %vm13652_vm2, %v11071_v11, %v2523_v15  ;;  %v1814_v45 = vor.u32 %v20043_v55, %v14068_v43  ;;  %v14671_v22 = vld [vmem:[#allocation2 + $0xf8] sm:$0xf]  ;;  %v20047_v9 = vld [vmem:[#allocation28_spill] sm:$0xff]  ;;  %v310_v38 = vld [vmem:[%s13632_s9 + $0xf0] sm:$0xff] }
  0xed   : > { %v1811_v32 = vsel %vm14099_vm7, %v1806_v29, %v1810_v3  ;;  %v2533_v36 = vsel %vm13652_vm2, %v2525_v17, %v2532_v28  ;;  %v20045_v53 = vshll.u32 %v20044_v47, 16  ;;  %v425_v63 = vsel %vm13913_vm4, 0, %v424_v34  ;;  %v20046_v29 = vld [vmem:[#allocation29_spill] sm:$0xff]  ;;  %v311_v55 = vld [vmem:[%s13632_s9 + $0xf8] sm:$0xff] }
  0xee   : > { %12394 = vmatprep.mubr.bf16.mxu0 %v11046_v20  ;;  %v11047_v15 = vcombine.low %v1803_v4, %v1811_v32  ;;  %12442 = vmatprep.mubr.bf16.mxu1 %v11102_v31  ;;  %v11103_v43 = vcombine.low %v2524_v1, %v2533_v36  ;;  %v1815_v11 = vrot.slane %v1814_v45, 4  ;;  %426 = vst [vmem:[#allocation2 + $0xfc] sm:$0x1] %v425_v63  ;;  %v20048_v28 = vshll.u32 %v14064_v46, 16 }
  0xef   : > { %v1816_v0 = vrot.slane %v20045_v53, 5  ;;  %v1828_v48 = vor.u32 %v20046_v29, %v14082_v27  ;;  %v2535_v3 = vshrl.u32 %v2218_v51, 16  ;;  %v2540_v34 = vshrl.u32 %v14661_v18, 16  ;;  %v2222_v53 = vld [vmem:[#allocation2 + $0x100] sm:$0xf] }
  0xf0   : > { %v1830_v62 = vrot.slane %v20048_v28, 5  ;;  %12395 = vmatmul.mubr.bf16.gmra.mxu0 %v11047_v15  ;;  %12443 = vmatmul.mubr.bf16.gmra.mxu1 %v11103_v43  ;;  %v19752_v31 = vshll.u32 %v14661_v18, 16  ;;  %v19750_v45 = vshrl.u32 %v14671_v22, 16  ;;  %v19751_v36 = vshll.u32 %v14671_v22, 16 }
  0xf1   : > { %v1819_v17 = vor.u32 %v20047_v9, %v1816_v0  ;;  %v1829_v4 = vrot.slane %v1828_v48, 4  ;;  %v11072_v1 = vrot.slane %v2535_v3, 11  ;;  %v2542_v27 = vrot.slane %v2540_v34, 7  ;;  %v2165_v9 = vld [vmem:[#allocation2 + $0x1c] sm:$0x1] }
  0xf2   : > { %v1833_v20 = vor.u32 %v14088_v25, %v1830_v62  ;;  %v643_v46 = vld [vmem:[#allocation2 + $0xec] sm:$0x1]  ;;  %v1817_v51 = vsel %vm14099_vm7, %v1815_v11, %v1816_v0  ;;  %v2551_v32 = vrot.slane %v19750_v45, 7  ;;  %v11792_v47 = vpack.c.bf16 %v310_v38, %v310_v38 }
  0xf3   : > { %v1820_v63 = vrot.slane %v1819_v17, 4  ;;  %v1822_v15 = vshll.u32 %v643_v46, 16  ;;  %v2545_v25 = vor.u32 %v19752_v31, %v2542_v27  ;;  %v2547_v43 = vrot.slane %v2542_v27, 4 }
  0xf4   : > { %v1831_v29 = vsel %vm14099_vm7, %v1829_v4, %v1830_v62  ;;  %v1834_v48 = vrot.slane %v1833_v20, 4  ;;  %v2554_v0 = vor.u32 %v19751_v36, %v2551_v32  ;;  %v11793_v11 = vpack.c.bf16 %v311_v55, %v311_v55  ;;  %582 = vst [vmem:[#allocation2 + $0x104] sm:$0xf] %v11792_v47  ;;  %v13364_v4 = vld [vmem:[#allocation2 + $0x14] sm:$0xf] }
  0xf5   : > { %v1824_v28 = vrot.slane %v1822_v15, 5  ;;  %v647_v3 = vld [vmem:[#allocation2 + $0xfc] sm:$0x1]  ;;  %v2546_v17 = vsel %vm13652_vm2, %v11072_v1, %v2545_v25  ;;  %v2557_v38 = vshrl.u32 %v2222_v53, 16  ;;  %v20049_v46 = vshrl.u32 %v14092_v44, 16 }
  0xf6   : > { %v1836_v27 = vshll.u32 %v647_v3, 16  ;;  %v2555_v62 = vsel %vm13652_vm2, %v2547_v43, %v2554_v0  ;;  %583 = vst [vmem:[#allocation2 + $0x108] sm:$0xf] %v11793_v11  ;;  %v13365_v20 = vld [vmem:[#allocation2 + $0x18] sm:$0xf]  ;;  %v20050_v55 = vshll.u32 %v14092_v44, 16 }
  0xf7   : > { %v3254_v45 = vrot.slane %v20049_v46, 4  ;;  %v11130_v32 = vcombine.low %v13364_v4, %v13365_v20  ;;  %v1825_v15 = vsel %vm14099_vm7, %v1820_v63, %v1824_v28  ;;  %v11104_v36 = vcombine.low %v2546_v17, %v2555_v62  ;;  %v2169_v11 = vld [vmem:[#allocation2 + $0x2c] sm:$0x1] }
  0xf8   : > { %v3255_v47 = vrot.slane %v20050_v55, 5  ;;  %v20051_v1 = vshll.u32 %v14103_v61, 16  ;;  %v20052_v25 = vshrl.u32 %v14103_v61, 16  ;;  %v11048_v46 = vcombine.low %v1817_v51, %v1825_v15 }
  0xf9   : > { %v1838_v31 = vrot.slane %v1836_v27, 5  ;;  %v3264_v0 = vshll.u32 %v2165_v9, 16  ;;  %12446 = vmatprep.mubr.bf16.mxu1 %v11104_v36  ;;  %v20053_v44 = vshrl.u32 %v14116_v59, 16  ;;  %v20054_v55 = vshll.u32 %v14116_v59, 16 }
  0xfa   : > { %v3258_v53 = vrot.slane %v20051_v1, 5  ;;  %v3260_v3 = vrot.slane %v20052_v25, 4  ;;  %v3256_v43 = vor.u32 %v3255_v47, %v3254_v45  ;;  %v20055_v28 = vshll.u32 %v14118_v8, 16  ;;  %12398 = vmatprep.mubr.bf16.mxu0 %v11048_v46  ;;  %v13366_v46 = vld [vmem:[#allocation2 + $0x24] sm:$0xf] }
  0xfb   : > { %v3268_v20 = vrot.slane %v20053_v44, 4  ;;  %v3269_v63 = vrot.slane %v20054_v55, 5  ;;  %v1839_v61 = vsel %vm14099_vm7, %v1834_v48, %v1838_v31  ;;  %v3266_v45 = vrot.slane %v3264_v0, 5  ;;  %v14723_v62 = vld [vmem:[#allocation2 + $0x104] sm:$0xf] }
  0xfc   : > { %v3261_v4 = vor.u32 %v3260_v3, %v3258_v53  ;;  %v14717_v17 = vrot.slane %v20055_v28, 5  ;;  %v3257_v51 = vrot.slane %v3256_v43, 4  ;;  %v20056_v9 = vshrl.u32 %v14118_v8, 16  ;;  %v2173_v55 = vld [vmem:[#allocation2 + $0x3c] sm:$0x1] }
  0xfd   : > { %v11049_v27 = vcombine.low %v1831_v29, %v1839_v61  ;;  %v3270_v15 = vor.u32 %v3269_v63, %v3268_v20  ;;  %v3278_v59 = vshll.u32 %v2169_v11, 16  ;;  %v2562_v1 = vshrl.u32 %v14723_v62, 16  ;;  %v14730_v48 = vld [vmem:[#allocation2 + $0x108] sm:$0xf]  ;;  %v13369_v61 = vld [vmem:[#allocation2 + $0x38] sm:$0xf] }
  0xfe   : > { %v3274_v36 = vrot.slane %v20056_v9, 4  ;;  %v3262_v47 = vrot.slane %v3261_v4, 4  ;;  %v2565_v25 = vshll.u32 %v14723_v62, 16  ;;  %v3259_v3 = vsel %vm14099_vm7, %v3257_v51, %v3258_v53  ;;  %v13367_v29 = vld [vmem:[#allocation2 + $0x28] sm:$0xf] }
  0xff   : > { %12399 = vmatmul.mubr.bf16.gmra.mxu0 %v11049_v27  ;;  %v11073_v8 = vrot.slane %v2557_v38, 11  ;;  %v11131_v43 = vcombine.low %v13366_v46, %v13367_v29  ;;  %v3271_v11 = vrot.slane %v3270_v15, 4  ;;  %v2564_v4 = vrot.slane %v2562_v1, 7  ;;  %v13368_v38 = vld [vmem:[#allocation2 + $0x34] sm:$0xf] }
 0x100   : > { %v3275_v31 = vor.u32 %v3274_v36, %v14717_v17  ;;  %v3267_v0 = vsel %vm14099_vm7, %v3262_v47, %v3266_v45  ;;  %v19753_v44 = vshrl.u32 %v14730_v48, 16  ;;  %v19754_v53 = vshll.u32 %v14730_v48, 16  ;;  %12466 = vmatprep.mubr.bf16.mxu0 %v11130_v32 }
 0x101   : > { %v3280_v20 = vrot.slane %v3278_v59, 5  ;;  %v11170_v63 = vcombine.low %v3259_v3, %v3267_v0  ;;  %v11132_v51 = vcombine.low %v13368_v38, %v13369_v61  ;;  %v20057_v9 = vshrl.u32 %v14148_v19, 16 }
 0x102   : > { %v3276_v28 = vrot.slane %v3275_v31, 4  ;;  %v2567_v45 = vor.u32 %v2565_v25, %v2564_v4  ;;  %v2569_v27 = vrot.slane %v2564_v4, 4  ;;  %v2573_v47 = vrot.slane %v19753_v44, 7 }
 0x103   : > { %v3282_v36 = vrot.slane %v20057_v9, 4  ;;  %v20058_v15 = vshll.u32 %v14148_v19, 16  ;;  %v3273_v59 = vsel %vm14099_vm7, %v3271_v11, %v14717_v17  ;;  %v20059_v3 = vshll.u32 %v14159_v6, 16  ;;  %v2177_v9 = vld [vmem:[#allocation2 + $0x4c] sm:$0x1]  ;;  %v13198_v17 = vld [vmem:[%s19675_s1 + $0x1b0] sm:$0xff]  }
 0x104   : > { %v20060_v46 = vshrl.u32 %v14159_v6, 16  ;;  %v3292_v0 = vshll.u32 %v2173_v55, 16  ;;  %v2568_v4 = vsel %vm13652_vm2, %v11073_v8, %v2567_v45  ;;  %v2576_v38 = vor.u32 %v19754_v53, %v2573_v47 }
 0x105   : > { %v3283_v32 = vrot.slane %v20058_v15, 5  ;;  %v3286_v31 = vrot.slane %v20059_v3, 5  ;;  %v3281_v19 = vsel %vm14099_vm7, %v3276_v28, %v3280_v20  ;;  %v20061_v6 = vshrl.u32 %v14201_v21, 16 }
 0x106   : > { %v3288_v29 = vrot.slane %v20060_v46, 4  ;;  %v3294_v15 = vrot.slane %v3292_v0, 5  ;;  %v20062_v3 = vshll.u32 %v14201_v21, 16  ;;  %v2577_v45 = vsel %vm13652_vm2, %v2569_v27, %v2576_v38  ;;  %v13370_v21 = vld [vmem:[#allocation2 + $0x44] sm:$0xf] }
 0x107   : > { %v3284_v61 = vor.u32 %v3283_v32, %v3282_v36  ;;  %v3296_v55 = vrot.slane %v20061_v6, 4  ;;  %v20063_v20 = vshll.u32 %v14207_v30, 16  ;;  %v20064_v36 = vshrl.u32 %v14207_v30, 16  ;;  %12467 = vmatmul.mubr.bf16.vlgmr.msra.gmra.mxu0 %v11131_v43  ;;  %v2181_v38 = vld [vmem:[#allocation2 + $0x5c] sm:$0x1] }
 0x108   : > { %v3289_v11 = vor.u32 %v3288_v29, %v3286_v31  ;;  %v3297_v8 = vrot.slane %v20062_v3, 5  ;;  %v11105_v46 = vcombine.low %v2568_v4, %v2577_v45  ;;  %v3306_v44 = vshll.u32 %v2177_v9, 16  ;;  %12547 = vmatpush3.bf16.msra.mxu0 %v14409_v41  ;;  %12470 = vmatprep.mubr.bf16.mxu0 %v11132_v51  ;;  %v13371_v3 = vld [vmem:[#allocation2 + $0x48] sm:$0xf]  ;;  %v13372_v9 = vld [vmem:[#allocation2 + $0x54] sm:$0xf] }
 0x109   : > { %v3285_v47 = vrot.slane %v3284_v61, 4  ;;  %v3300_v28 = vrot.slane %v20063_v20, 5  ;;  %v3302_v32 = vrot.slane %v20064_v36, 4  ;;  %v11171_v6 = vcombine.low %v3273_v59, %v3281_v19  ;;  %12548 = vmatprep.subr.bf16.mxu0 %v13198_v17  ;;  %v13200_v51 = vld [vmem:[%s19675_s1 + $0x1a8] sm:$0xff]  }
 0x10a   : > { %v3290_v29 = vrot.slane %v3289_v11, 4  ;;  %v3298_v0 = vor.u32 %v3297_v8, %v3296_v55  ;;  %v11133_v53 = vcombine.low %v13370_v21, %v13371_v3  ;;  %v20065_v61 = vshrl.u32 %v14262_v35, 16  ;;  %12447 = vmatmul.mubr.bf16.gmra.mxu1 %v11105_v46  ;;  %v13373_v11 = vld [vmem:[#allocation2 + $0x58] sm:$0xf] }
 0x10b   : > { %v3303_v27 = vor.u32 %v3302_v32, %v3300_v28  ;;  %v3287_v30 = vsel %vm14099_vm7, %v3285_v47, %v3286_v31  ;;  %v3308_v4 = vrot.slane %v3306_v44, 5  ;;  %v11134_v41 = vcombine.low %v13372_v9, %v13373_v11  ;;  %12514 = vmatprep.mubr.bf16.mxu1 %v11170_v63  ;;  %v2185_v44 = vld [vmem:[#allocation2 + $0x6c] sm:$0x1] }
 0x10c   : > { %v3310_v20 = vrot.slane %v20065_v61, 4  ;;  %v3299_v43 = vrot.slane %v3298_v0, 4  ;;  %v3295_v59 = vsel %vm14099_vm7, %v3290_v29, %v3294_v15  ;;  %v20066_v55 = vshll.u32 %v14262_v35, 16  ;;  %12549 = vmatpush3.bf16.msra.mxu0 %v13198_v17 }
 0x10d   : > { %v3304_v19 = vrot.slane %v3303_v27, 4  ;;  %v20067_v45 = vshll.u32 %v14272_v23, 16  ;;  %v20068_v36 = vshrl.u32 %v14272_v23, 16  ;;  %v3320_v46 = vshll.u32 %v2181_v38, 16  ;;  %v13375_v23 = vld [vmem:[#allocation2 + $0x68] sm:$0xf]  ;;  %12550 = vmatprep.subr.bf16.mxu0 %v13200_v51 }
 0x10e   : > { %v3311_v8 = vrot.slane %v20066_v55, 5  ;;  %v3301_v47 = vsel %vm14099_vm7, %v3299_v43, %v3300_v28  ;;  %v20069_v63 = vshrl.u32 %v14298_v13, 16  ;;  %v20070_v29 = vshll.u32 %v14298_v13, 16  ;;  %v14800_v28 = vld [vmem:[#allocation2 + $0x64] sm:$0xf] }
 0x10f   : > { %v14786_v31 = vrot.slane %v20067_v45, 5  ;;  %v3316_v32 = vrot.slane %v20068_v36, 4  ;;  %v3309_v35 = vsel %vm14099_vm7, %v3304_v19, %v3308_v4  ;;  %v20071_v3 = vshll.u32 %v14319_v26, 16  ;;  %v13202_v13 = vld [vmem:[%s19675_s1 + $0x1a0] sm:$0xff]   ;;  %12471 = vmatmul.mubr.bf16.gmra.mxu0 %v11133_v53  ;;  %v2189_v45 = vld [vmem:[#allocation2 + $0x7c] sm:$0x1] }
 0x110   : > { %v3324_v0 = vrot.slane %v20069_v63, 4  ;;  %v3312_v15 = vor.u32 %v3311_v8, %v3310_v20  ;;  %v3325_v21 = vrot.slane %v20070_v29, 5  ;;  %v11172_v61 = vcombine.low %v3287_v30, %v3295_v59  ;;  %v13206_v30 = vld [vmem:[%s19675_s1 + $0x1f0] sm:$0xff]   ;;  %12474 = vmatprep.mubr.bf16.mxu0 %v11134_v41  ;;  %12551 = vmatpush3.bf16.msra.mxu0 %v13200_v51  ;;  %v13204_v29 = vld [vmem:[%s19675_s1 + $0x198] sm:$0xff]  }
 0x111   : > { %v3328_v27 = vrot.slane %v20071_v3, 5  ;;  %v11135_v38 = vcombine.low %v14800_v28, %v13375_v23  ;;  %v3317_v43 = vor.u32 %v3316_v32, %v14786_v31  ;;  %v20072_v17 = vshrl.u32 %v14319_v26, 16  ;;  %12552 = vmatprep.subr.bf16.mxu0 %v13202_v13  ;;  %v2193_v3 = vld [vmem:[#allocation2 + $0x8c] sm:$0x1] }
 0x112   : > { %v3313_v20 = vrot.slane %v3312_v15, 4  ;;  %v3322_v4 = vrot.slane %v3320_v46, 5  ;;  %v3326_v11 = vor.u32 %v3325_v21, %v3324_v0  ;;  %v3334_v19 = vshll.u32 %v2185_v44, 16  ;;  %12515 = vmatmul.mubr.bf16.vlgmr.msra.gmra.mxu1 %v11171_v6 }
 0x113   : > { %v3330_v9 = vrot.slane %v20072_v17, 4  ;;  %v14812_v59 = vcombine.low %v3301_v47, %v3309_v35  ;;  %v3318_v55 = vrot.slane %v3317_v43, 4  ;;  %v20073_v26 = vshrl.u32 %v14373_v2, 16  ;;  %12518 = vmatprep.mubr.bf16.mxu1 %v11172_v61  ;;  %12595 = vmatpush3.bf16.msra.mxu1 %v14454_v40 }
 0x114   : > { %v3327_v32 = vrot.slane %v3326_v11, 4  ;;  %v3336_v63 = vrot.slane %v3334_v19, 5  ;;  %v11136_v44 = vcombine.low %v14373_v2, %v14375_v16  ;;  %v20074_v46 = vshll.u32 %v14373_v2, 16  ;;  %12596 = vmatprep.subr.bf16.mxu1 %v13206_v30  ;;  %12553 = vmatpush3.bf16.msra.mxu0 %v13202_v13 }
 0x115   : > { %v3331_v8 = vor.u32 %v3330_v9, %v3328_v27  ;;  %v3338_v36 = vrot.slane %v20073_v26, 4  ;;  %v3315_v53 = vsel %vm14099_vm7, %v3313_v20, %v14786_v31  ;;  %v20075_v35 = vshll.u32 %v14375_v16, 16  ;;  %v14847_v9 = vld [vmem:[#allocation2 + $0x84] sm:$0xf]  ;;  %12554 = vmatprep.subr.bf16.mxu0 %v13204_v29 }
 0x116   : > { %v3339_v0 = vrot.slane %v20074_v46, 5  ;;  %v20076_v41 = vshrl.u32 %v14375_v16, 16  ;;  %v3323_v2 = vsel %vm14099_vm7, %v3318_v55, %v3322_v4  ;;  %v3329_v6 = vsel %vm14099_vm7, %v3327_v32, %v3328_v27  ;;  %v13209_v27 = vld [vmem:[%s19675_s1 + $0x1e8] sm:$0xff]   ;;  %v2197_v55 = vld [vmem:[#allocation2 + $0x9c] sm:$0x1]  ;;  %v13208_v32 = vld [vmem:[%s19675_s1 + $0x190] sm:$0xff]  }
 0x117   : > { %v3332_v47 = vrot.slane %v3331_v8, 4  ;;  %v14825_v15 = vrot.slane %v20075_v35, 5  ;;  %v3348_v21 = vshll.u32 %v2189_v45, 16  ;;  %v20077_v23 = vshrl.u32 %v14385_v39, 16  ;;  %12597 = vmatpush3.bf16.msra.mxu1 %v13206_v30  ;;  %v13210_v35 = vld [vmem:[%s19675_s1 + $0x1e0] sm:$0xff]   ;;  %12475 = vmatmul.mubr.bf16.gmra.mxu0 %v11135_v38 }
 0x118   : > { %v3344_v51 = vrot.slane %v20076_v41, 4  ;;  %v3340_v31 = vor.u32 %v3339_v0, %v3338_v36  ;;  %v20078_v61 = vshll.u32 %v14385_v39, 16  ;;  %v11137_v40 = vcombine.low %v14847_v9, %v14404_v14  ;;  %12598 = vmatprep.subr.bf16.mxu1 %v13209_v27  ;;  %12478 = vmatprep.mubr.bf16.mxu0 %v11136_v44 }
 0x119   : > { %v3337_v16 = vsel %vm14099_vm7, %v3332_v47, %v3336_v63  ;;  %v3352_v43 = vrot.slane %v20077_v23, 4  ;;  %v3350_v4 = vrot.slane %v3348_v21, 5  ;;  %v20079_v11 = vshll.u32 %v14404_v14, 16  ;;  %12555 = vmatpush3.bf16.msra.mxu0 %v13204_v29 }
 0x11a   : > { %v3345_v28 = vor.u32 %v3344_v51, %v14825_v15  ;;  %v3353_v17 = vrot.slane %v20078_v61, 5  ;;  %v3341_v20 = vrot.slane %v3340_v31, 4  ;;  %v20080_v45 = vshrl.u32 %v14404_v14, 16  ;;  %12519 = vmatmul.mubr.bf16.gmra.mxu1 %v14812_v59  ;;  %12556 = vmatprep.subr.bf16.mxu0 %v13208_v32  ;;  %v13214_v14 = vld [vmem:[%s19675_s1 + $0x1d0] sm:$0xff]  }
 0x11b   : > { %v3356_v19 = vrot.slane %v20079_v11, 5  ;;  %v3362_v36 = vshll.u32 %v2193_v3, 16  ;;  %v11174_v63 = vcombine.low %v3315_v53, %v3323_v2  ;;  %v14858_v46 = vcombine.low %v3329_v6, %v3337_v16  ;;  %v2201_v2 = vld [vmem:[#allocation2 + $0xac] sm:$0x1]  ;;  %v14870_v6 = vpop.f32.mrf.mxu0  ;;  %12599 = vmatpush3.bf16.msra.mxu1 %v13209_v27 }
 0x11c   : > { %v3346_v8 = vrot.slane %v3345_v28, 4  ;;  %v3354_v39 = vor.u32 %v3353_v17, %v3352_v43  ;;  %v3358_v26 = vrot.slane %v20080_v45, 4  ;;  %v3343_v13 = vsel %vm14099_vm7, %v3341_v20, %v14825_v15  ;;  %12600 = vmatprep.subr.bf16.mxu1 %v13210_v35 }
 0x11d   : > { %v20081_v0 = vshrl.u32 %v14466_v5, 16  ;;  %v3364_v31 = vrot.slane %v3362_v36, 5  ;;  %v11138_v53 = vcombine.low %v14466_v5, %v14468_v12  ;;  %v20082_v30 = vshll.u32 %v14466_v5, 16  ;;  %v13212_v5 = vld [vmem:[%s19675_s1 + $0x188] sm:$0xff]   ;;  %v14890_v20 = vpop.f32.mrf.mxu0  ;;  %12522 = vmatprep.mubr.bf16.mxu1 %v11174_v63  ;;  %v2205_v36 = vld [vmem:[#allocation2 + $0xbc] sm:$0x1]  ;;  %12557 = vmatpush3.bf16.msra.mxu0 %v13208_v32 }
 0x11e   : > { %v3355_v41 = vrot.slane %v3354_v39, 4  ;;  %v3359_v51 = vor.u32 %v3358_v26, %v3356_v19  ;;  %v3351_v15 = vsel %vm14099_vm7, %v3346_v8, %v3350_v4  ;;  %v20083_v3 = vshll.u32 %v14468_v12, 16  ;;  %v13213_v63 = vld [vmem:[%s19675_s1 + $0x1d8] sm:$0xff]   ;;  %12558 = vmatprep.subr.bf16.mxu0 %v13212_v5 }
 0x11f   : > { %v3366_v47 = vrot.slane %v20081_v0, 4  ;;  %v3367_v21 = vrot.slane %v20082_v30, 5  ;;  %v20084_v16 = vshrl.u32 %v14468_v12, 16  ;;  %v3376_v43 = vshll.u32 %v2197_v55, 16  ;;  %v14908_v0 = vpop.f32.mrf.mxu0  ;;  %12601 = vmatpush3.bf16.msra.mxu1 %v13210_v35  ;;  %12479 = vmatmul.mubr.bf16.gmra.mxu0 %v11137_v40  ;;  %v2209_v35 = vld [vmem:[#allocation2 + $0xcc] sm:$0x1] }
 0x120   : > { %v14878_v38 = vrot.slane %v20083_v3, 5  ;;  %v3357_v23 = vsel %vm14099_vm7, %v3355_v41, %v3356_v19  ;;  %v3360_v44 = vrot.slane %v3359_v51, 4  ;;  %v20085_v61 = vshrl.u32 %v14481_v52, 16  ;;  %v13217_v3 = vld [vmem:[%s19675_s1 + $0x180] sm:$0xff]   ;;  %12602 = vmatprep.subr.bf16.mxu1 %v13213_v63  ;;  %12482 = vmatprep.mubr.bf16.mxu0 %v11138_v53 }
 0x121   : > { %v3372_v28 = vrot.slane %v20084_v16, 4  ;;  %v3368_v12 = vor.u32 %v3367_v21, %v3366_v47  ;;  %v20086_v59 = vshll.u32 %v14481_v52, 16  ;;  %v20087_v11 = vshll.u32 %v14486_v57, 16  ;;  %v14920_v16 = vpop.f32.mrf.mxu0  ;;  %12559 = vmatpush3.bf16.msra.mxu0 %v13212_v5 }
 0x122   : > { %v3380_v17 = vrot.slane %v20085_v61, 4  ;;  %v3365_v55 = vsel %vm14099_vm7, %v3360_v44, %v3364_v31  ;;  %v14901_v8 = vrot.slane %v3376_v43, 5  ;;  %v20088_v39 = vshrl.u32 %v14486_v57, 16  ;;  %20089 = vst [vmem:[#allocation6_spill] sm:$0xff] %v14920_v16  ;;  %12523 = vmatmul.mubr.bf16.gmra.mxu1 %v14858_v46  ;;  %12560 = vmatprep.subr.bf16.mxu0 %v13217_v3 }
 0x123   : > { %v3373_v29 = vor.u32 %v3372_v28, %v14878_v38  ;;  %v3381_v4 = vrot.slane %v20086_v59, 5  ;;  %v14897_v19 = vrot.slane %v20087_v11, 5  ;;  %v3390_v26 = vshll.u32 %v2201_v2, 16  ;;  %v14960_v53 = vpop.f32.mrf.mxu0  ;;  %12603 = vmatpush3.bf16.msra.mxu1 %v13213_v63 }
 0x124   : > { %v3386_v45 = vrot.slane %v20088_v39, 4  ;;  %v11139_v27 = vcombine.low %v14481_v52, %v14486_v57  ;;  %v14912_v47 = vrot.slane %v3368_v12, 4  ;;  %v11176_v31 = vcombine.low %v3343_v13, %v3351_v15  ;;  %v14956_v39 = vld [vmem:[%s19675_s1 + $0x238] sm:$0xff]   ;;  %12604 = vmatprep.subr.bf16.mxu1 %v13214_v14 }
 0x125   : > { %v3374_v41 = vrot.slane %v3373_v29, 4  ;;  %v3382_v51 = vor.u32 %v3381_v4, %v3380_v17  ;;  %v14914_v30 = vcombine.low %v3357_v23, %v3365_v55  ;;  %v3392_v21 = vrot.slane %v3390_v26, 5  ;;  %v14928_v23 = vpop.f32.mrf.mxu1  ;;  %12561 = vmatpush3.bf16.msra.mxu0 %v13217_v3 }
 0x126   : > { %v3387_v2 = vor.u32 %v3386_v45, %v14897_v19  ;;  %v11140_v44 = vcombine.low %v14523_v42, %v14531_v58  ;;  %v11141_v32 = vcombine.low %v14541_v24, %v14552_v56  ;;  %v20090_v13 = vshrl.u32 %v14523_v42, 16  ;;  %12526 = vmatprep.mubr.bf16.mxu1 %v11176_v31  ;;  %12642 = vmatprep.subr.bf16.mxu0 %v14956_v39 }
 0x127   : > { %v3383_v28 = vrot.slane %v3382_v51, 4  ;;  %v3371_v43 = vsel %vm14099_vm7, %v14912_v47, %v14878_v38  ;;  %v20091_v17 = vshll.u32 %v14523_v42, 16  ;;  %v20092_v29 = vshll.u32 %v14531_v58, 16  ;;  %v14958_v45 = vpop.f32.mrf.mxu1  ;;  %v13218_v51 = vld [vmem:[%s19675_s1 + $0x1c8] sm:$0xff]   ;;  %12605 = vmatpush3.bf16.msra.mxu1 %v13214_v14  ;;  %12483 = vmatmul.mubr.bf16.gmra.mxu0 %v11139_v27 }
 0x128   : > { %v3394_v15 = vrot.slane %v20090_v13, 4  ;;  %v3388_v61 = vrot.slane %v3387_v2, 4  ;;  %v3379_v9 = vsel %vm14099_vm7, %v3374_v41, %v14901_v8  ;;  %v20093_v40 = vshrl.u32 %v14531_v58, 16  ;;  %12606 = vmatprep.subr.bf16.mxu1 %v13218_v51  ;;  %12486 = vmatprep.mubr.bf16.mxu0 %v11140_v44 }
 0x129   : > { %v3395_v12 = vrot.slane %v20091_v17, 5  ;;  %v14941_v59 = vrot.slane %v20092_v29, 5  ;;  %v3404_v4 = vshll.u32 %v2205_v36, 16  ;;  %v20094_v11 = vshrl.u32 %v14541_v24, 16  ;;  %v14982_v17 = vpop.f32.mrf.mxu0 }
 0x12a   : > { %v3400_v38 = vrot.slane %v20093_v40, 4  ;;  %v3385_v8 = vsel %vm14099_vm7, %v3383_v28, %v14897_v19  ;;  %v20095_v36 = vshll.u32 %v14541_v24, 16  ;;  %v20096_v5 = vshll.u32 %v14552_v56, 16  ;;  %12527 = vmatmul.mubr.bf16.gmra.mxu1 %v14914_v30 }
 0x12b   : > { %v3408_v55 = vrot.slane %v20094_v11, 4  ;;  %v3396_v26 = vor.u32 %v3395_v12, %v3394_v15  ;;  %v3393_v46 = vsel %vm14099_vm7, %v3388_v61, %v3392_v21  ;;  %v3406_v19 = vrot.slane %v3404_v4, 5  ;;  %v14980_v15 = vpop.f32.mrf.mxu1  ;;  %v2213_v11 = vld [vmem:[#allocation2 + $0xdc] sm:$0x1]  ;;  %12607 = vmatpush3.bf16.msra.mxu1 %v13218_v51 }
 0x12c   : > { %v3409_v47 = vrot.slane %v20095_v36, 5  ;;  %v14970_v41 = vrot.slane %v20096_v5, 5  ;;  %v3401_v2 = vor.u32 %v3400_v38, %v14941_v59  ;;  %v20097_v28 = vshrl.u32 %v14552_v56, 16  ;;  %v2217_v38 = vld [vmem:[#allocation2 + $0xec] sm:$0x1] }
 0x12d   : > { %v3397_v12 = vrot.slane %v3396_v26, 4  ;;  %v3418_v40 = vshll.u32 %v2209_v35, 16  ;;  %v11142_v31 = vcombine.low %v14605_v7, %v14607_v49  ;;  %v20098_v63 = vshrl.u32 %v14605_v7, 16  ;;  %v14991_v36 = vpop.f32.mrf.mxu1  ;;  %v14993_v26 = vpop.f32.mrf.mxu0 }
 0x12e   : > { %v3414_v13 = vrot.slane %v20097_v28, 4  ;;  %v3410_v29 = vor.u32 %v3409_v47, %v3408_v55  ;;  %v3402_v21 = vrot.slane %v3401_v2, 4  ;;  %20099 = vst [vmem:[#allocation5_spill] sm:$0xff] %v14991_v36  ;;  %v11178_v35 = vcombine.low %v3371_v43, %v3379_v9 }
 0x12f   : > { %v3422_v4 = vrot.slane %v20098_v63, 4  ;;  %v3399_v55 = vsel %vm14099_vm7, %v3397_v12, %v14941_v59  ;;  %v20100_v5 = vshll.u32 %v14605_v7, 16  ;;  %v15003_v28 = vcombine.low %v3385_v8, %v3393_v46  ;;  %v15011_v59 = vpop.f32.mrf.mxu1  ;;  %v15013_v12 = vpop.f32.mrf.mxu0  ;;  %12487 = vmatmul.mubr.bf16.gmra.mxu0 %v11141_v32 }
 0x130   : > { %v3415_v61 = vor.u32 %v3414_v13, %v14970_v41  ;;  %v14998_v47 = vrot.slane %v3410_v29, 4  ;;  %v3407_v3 = vsel %vm14099_vm7, %v3402_v21, %v3406_v19  ;;  %v20101_v13 = vshll.u32 %v14607_v49, 16  ;;  %20103 = vst [vmem:[#allocation7_spill] sm:$0xff] %v15013_v12  ;;  %v13219_v21 = vld [vmem:[%s19675_s1 + $0x1c0] sm:$0xff]   ;;  %12530 = vmatprep.mubr.bf16.mxu1 %v11178_v35  ;;  %12490 = vmatprep.mubr.bf16.mxu0 %v11142_v31  ;;  %v15270_v12 = vld [vmem:[#allocation2 + $0x78] sm:$0xf] }
 0x131   : > { %v3423_v2 = vrot.slane %v20100_v5, 5  ;;  %v20102_v43 = vshrl.u32 %v14607_v49, 16  ;;  %v15020_v46 = vrot.slane %v3418_v40, 5  ;;  %v3432_v29 = vshll.u32 %v2213_v11, 16  ;;  %v15036_v11 = vpop.f32.mrf.mxu0  ;;  %12608 = vmatprep.subr.bf16.mxu1 %v13219_v21  ;;  %v3801_v35 = vld [vmem:[#allocation2 + $0x20] sm:$0xf] }
 0x132   : > { %v3426_v63 = vrot.slane %v20101_v13, 5  ;;  %v15018_v8 = vrot.slane %v3415_v61, 4  ;;  %v15028_v14 = vcombine.low %v3399_v55, %v3407_v3  ;;  %v20104_v52 = vshrl.u32 %v14613_v60, 16  ;;  %v15034_v61 = vpop.f32.mrf.mxu1  ;;  %v2221_v55 = vld [vmem:[#allocation2 + $0xfc] sm:$0x1]  ;;  %12609 = vmatpush3.bf16.msra.mxu1 %v13219_v21  ;;  %20127 = vst [vmem:[#allocation22_spill] sm:$0xff] %v15270_v12 }
 0x133   : > { %v3428_v9 = vrot.slane %v20102_v43, 4  ;;  %v3424_v19 = vor.u32 %v3423_v2, %v3422_v4  ;;  %v20105_v27 = vshll.u32 %v14613_v60, 16  ;;  %v3413_v58 = vsel %vm14099_vm7, %v14998_v47, %v14970_v41  ;;  %v430_v2 = vld [vmem:[#allocation2 + $0x10c] sm:$0x1]  ;;  %12531 = vmatmul.mubr.bf16.gmra.mxu1 %v15003_v28  ;;  %v3805_v49 = vld [vmem:[#allocation2 + $0x30] sm:$0xf] }
 0x134   : > { %v3436_v57 = vrot.slane %v20104_v52, 4  ;;  %v3434_v44 = vrot.slane %v3432_v29, 5  ;;  %v3440_v4 = vrot.slane %v2530_v37, 5  ;;  %v20106_v43 = vshrl.u32 %v14617_v50, 16  ;;  %v15047_v30 = vpop.f32.mrf.mxu1  ;;  %12534 = vmatprep.mubr.bf16.mxu1 %v15028_v14 }
 0x135   : > { %v3429_v5 = vor.u32 %v3428_v9, %v3426_v63  ;;  %v3437_v40 = vrot.slane %v20105_v27, 5  ;;  %v3425_v42 = vrot.slane %v3424_v19, 4  ;;  %v3446_v52 = vshll.u32 %v2217_v38, 16  ;;  %v15049_v27 = vpop.f32.mrf.mxu0 }
 0x136   : > { %v3442_v9 = vrot.slane %v20106_v43, 4  ;;  %v3421_v41 = vsel %vm14099_vm7, %v15018_v8, %v15020_v46  ;;  %v3450_v47 = vrot.slane %v2540_v34, 4  ;;  %v20110_v34 = vshrl.u32 %v14671_v22, 16 }
 0x137   : > { %v3430_v3 = vrot.slane %v3429_v5, 4  ;;  %v3438_v13 = vor.u32 %v3437_v40, %v3436_v57  ;;  %v3427_v37 = vsel %vm14099_vm7, %v3425_v42, %v3426_v63  ;;  %v3448_v29 = vrot.slane %v3446_v52, 5  ;;  %v15063_v5 = vpop.f32.mrf.mxu1  ;;  %v15065_v57 = vpop.f32.mrf.mxu0 }
 0x138   : > { %v3443_v19 = vor.u32 %v3442_v9, %v3440_v4  ;;  %20107 = vst [vmem:[#allocation10_spill] sm:$0xff] %v15063_v5  ;;  %v20108_v63 = vshll.u32 %v14661_v18, 16  ;;  %v20109_v40 = vshll.u32 %v14671_v22, 16  ;;  %v3456_v43 = vrot.slane %v20110_v34, 4 }
 0x139   : > { %v3435_v51 = vsel %vm14099_vm7, %v3430_v3, %v3434_v44  ;;  %v3439_v38 = vrot.slane %v3438_v13, 4  ;;  %v15075_v44 = vld [vmem:[#allocation2 + $0x24] sm:$0xf]  ;;  %v3460_v9 = vshll.u32 %v2221_v55, 16  ;;  %v431_v52 = vsel %vm13913_vm4, 0, %v430_v2 }
 0x13a   : > { %v15067_v8 = vcombine.low %v3427_v37, %v3435_v51  ;;  %v3451_v46 = vrot.slane %v20108_v63, 5  ;;  %v3454_v42 = vrot.slane %v20109_v40, 5  ;;  %v3444_v13 = vrot.slane %v3443_v19, 4  ;;  %v15081_v37 = vpop.f32.mrf.mxu1  ;;  %v15083_v51 = vpop.f32.mrf.mxu0  ;;  %432 = vst [vmem:[#allocation2 + $0x10c] sm:$0x1] %v431_v52 }
 0x13b   : > { %v3441_v3 = vsel %vm14099_vm7, %v3439_v38, %v3440_v4  ;;  %20111 = vst [vmem:[#allocation9_spill] sm:$0xff] %v15083_v51  ;;  %v3464_v4 = vrot.slane %v2562_v1, 4  ;;  %v3465_v55 = vrot.slane %v2565_v25, 5  ;;  %v15092_v38 = vld [vmem:[#allocation2 + $0x28] sm:$0xf]  ;;  %v3462_v24 = vrot.slane %v3460_v9, 5 }
 0x13c   : > { %v3452_v63 = vor.u32 %v3451_v46, %v3450_v47  ;;  %v3457_v40 = vor.u32 %v3456_v43, %v3454_v42  ;;  %v3449_v21 = vsel %vm14099_vm7, %v3444_v13, %v3448_v29  ;;  %v20112_v56 = vshll.u32 %v14730_v48, 16  ;;  %v15105_v47 = vpop.f32.mrf.mxu1  ;;  %v15110_v31 = vpop.f32.mrf.mxu0  ;;  %v15122_v52 = vld [vmem:[#allocation2 + $0x34] sm:$0xf] }
 0x13d   : > { %v20113_v2 = vshrl.u32 %v14730_v48, 16  ;;  %v15108_v25 = vcombine.low %v3441_v3, %v3449_v21  ;;  %v3866_v29 = vshrl.u32 %v3801_v35, 16  ;;  %v19758_v46 = vshrl.u32 %v15075_v44, 16  ;;  %v15128_v21 = vld [vmem:[#allocation2 + $0x38] sm:$0xf] }
 0x13e   : > { %v15101_v32 = vrot.slane %v20112_v56, 5  ;;  %v3453_v19 = vrot.slane %v3452_v63, 4  ;;  %v3458_v7 = vrot.slane %v3457_v40, 4  ;;  %v19757_v34 = vshll.u32 %v15075_v44, 16  ;;  %v15115_v43 = vpop.f32.mrf.mxu1 }
 0x13f   : > { %v3470_v1 = vrot.slane %v20113_v2, 4  ;;  %v11181_v13 = vcombine.low %v3413_v58, %v3421_v41  ;;  %v19755_v9 = vshrl.u32 %v15092_v38, 16  ;;  %v3466_v14 = vor.u32 %v3465_v55, %v3464_v4  ;;  %v15140_v4 = vpop.f32.mrf.mxu0 }
 0x140   : > { %v3455_v28 = vsel %vm14099_vm7, %v3453_v19, %v3454_v42  ;;  %v3463_v3 = vsel %vm14099_vm7, %v3458_v7, %v3462_v24  ;;  %v11194_v35 = vrot.slane %v3866_v29, 11  ;;  %v3873_v40 = vrot.slane %v19758_v46, 7  ;;  %v15130_v58 = vpop.f32.mrf.mxu1  ;;  %v15181_v46 = vld [vmem:[#allocation2 + $0x54] sm:$0xf] }
 0x141   : > { %v15124_v63 = vcombine.low %v3455_v28, %v3463_v3  ;;  %20114 = vst [vmem:[#allocation11_spill] sm:$0xff] %v15130_v58  ;;  %v3471_v41 = vor.u32 %v3470_v1, %v15101_v32  ;;  %v3882_v42 = vrot.slane %v19755_v9, 7  ;;  %v19756_v24 = vshll.u32 %v15092_v38, 16  ;;  %v2225_v55 = vld [vmem:[#allocation2 + $0x10c] sm:$0x1]  ;;  %12535 = vmatmul.mubr.bf16.gmra.mxu1 %v11181_v13 }
 0x142   : > { %v15138_v56 = vadd.f32 %v14928_v23, %v14870_v6  ;;  %v3876_v2 = vor.u32 %v19757_v34, %v3873_v40  ;;  %v3878_v19 = vrot.slane %v3873_v40, 4  ;;  %v3888_v7 = vshrl.u32 %v3805_v49, 16  ;;  %v15152_v9 = vpop.f32.mrf.mxu1  ;;  %12538 = vmatprep.mubr.bf16.mxu1 %v15067_v8  ;;  %v15175_v34 = vld [vmem:[#allocation2 + $0x48] sm:$0xf]  ;;  %v15260_v58 = vld [vmem:[#allocation2 + $0x74] sm:$0xf] }
 0x143   : > { %v3893_v29 = vshrl.u32 %v15122_v52, 16  ;;  %v20115_v1 = vcombine.low %v14613_v60, %v14617_v50  ;;  %v3474_v28 = vshll.u32 %v2225_v55, 16  ;;  %v3885_v3 = vor.u32 %v19756_v24, %v3882_v42  ;;  %20124 = vst [vmem:[#allocation19_spill] sm:$0xff] %v15260_v58 }
 0x144   : > { %v19760_v6 = vshll.u32 %v15122_v52, 16  ;;  %v19759_v23 = vshrl.u32 %v15128_v21, 16  ;;  %v20116_v40 = vcombine.low %v14661_v18, %v14671_v22  ;;  %v15157_v49 = vrot.slane %v3466_v14, 4  ;;  %v3809_v18 = vld [vmem:[#allocation2 + $0x40] sm:$0xf]  ;;  %v15170_v14 = vpop.f32.mrf.mxu0 }
 0x145   : > { %12491 = vmatmul.mubr.bf16.gmra.mxu0 %v20115_v1  ;;  %v3895_v60 = vrot.slane %v3893_v29, 7  ;;  %v19762_v50 = vshll.u32 %v15128_v21, 16  ;;  %v3877_v42 = vsel %vm13652_vm2, %v11194_v35, %v3876_v2  ;;  %v3886_v55 = vsel %vm13652_vm2, %v3878_v19, %v3885_v3  ;;  %v15168_v22 = vld [vmem:[#allocation2 + $0x44] sm:$0xf]  ;;  %v3813_v35 = vld [vmem:[#allocation2 + $0x50] sm:$0xf] }
 0x146   : > { %12494 = vmatprep.mubr.bf16.mxu0 %v20116_v40  ;;  %v11195_v1 = vrot.slane %v3888_v7, 11  ;;  %v3904_v24 = vrot.slane %v19759_v23, 7  ;;  %v11145_v2 = vcombine.low %v14723_v62, %v14730_v48  ;;  %v3472_v19 = vrot.slane %v3471_v41, 4  ;;  %v15183_v23 = vpop.f32.mrf.mxu1 }
 0x147   : > { %v3898_v13 = vor.u32 %v19760_v6, %v3895_v60  ;;  %v3900_v40 = vrot.slane %v3895_v60, 4  ;;  %v3476_v7 = vrot.slane %v3474_v28, 5  ;;  %v11226_v8 = vcombine.low %v3877_v42, %v3886_v55  ;;  %v15189_v60 = vld [vmem:[#allocation2 + $0x58] sm:$0xf] }
 0x148   : > { %v3907_v3 = vor.u32 %v19762_v50, %v3904_v24  ;;  %v15187_v6 = vadd.f32 %v14958_v45, %v14890_v20  ;;  %20117 = vst [vmem:[#allocation13_spill] sm:$0xff] %v15189_v60  ;;  %v3469_v62 = vsel %vm14099_vm7, %v15157_v49, %v15101_v32  ;;  %v15199_v41 = vadd.f32 %v14980_v15, %v14908_v0  ;;  %v15201_v24 = vpop.f32.mrf.mxu0  ;;  %v15213_v15 = vpop.f32.mrf.mxu1 }
 0x149   : > { %v3899_v48 = vsel %vm13652_vm2, %v11195_v1, %v3898_v13  ;;  %20118 = vst [vmem:[#allocation14_spill] sm:$0xff] %v15201_v24  ;;  %v3910_v45 = vshrl.u32 %v3809_v18, 16  ;;  %v19761_v28 = vshrl.u32 %v15168_v22, 16  ;;  %v19767_v42 = vshll.u32 %v15168_v22, 16  ;;  %12539 = vmatmul.mubr.bf16.gmra.mxu1 %v15108_v25 }
 0x14a   : > { %v3908_v20 = vsel %vm13652_vm2, %v3900_v40, %v3907_v3  ;;  %v19763_v32 = vshrl.u32 %v15175_v34, 16  ;;  %v19766_v49 = vshll.u32 %v15175_v34, 16  ;;  %v15211_v55 = vadd.f32 %v15011_v59, %v14960_v53  ;;  %v3817_v3 = vld [vmem:[#allocation2 + $0x60] sm:$0xf]  ;;  %12542 = vmatprep.mubr.bf16.mxu1 %v15124_v63  ;;  %v13223_v63 = vld [vmem:[%s19675_s1 + $0x230] sm:$0xff]  }
 0x14b   : > { %v3932_v0 = vshrl.u32 %v3813_v35, 16  ;;  %v11196_v1 = vrot.slane %v3910_v45, 11  ;;  %v3917_v18 = vrot.slane %v19761_v28, 7  ;;  %v19764_v13 = vshrl.u32 %v15181_v46, 16  ;;  %v15228_v45 = vpop.f32.mrf.mxu0 }
 0x14c   : > { %v3926_v53 = vrot.slane %v19763_v32, 7  ;;  %v19765_v59 = vshrl.u32 %v15189_v60, 16  ;;  %v11227_v28 = vcombine.low %v3899_v48, %v3908_v20  ;;  %v15246_v48 = vadd.f32 %v15034_v61, %v14982_v17  ;;  %v15248_v20 = vpop.f32.mrf.mxu1 }
 0x14d   : > { %12495 = vmatmul.mubr.bf16.gmra.mxu0 %v11145_v2  ;;  %v3477_v2 = vsel %vm14099_vm7, %v3472_v19, %v3476_v7  ;;  %v3920_v25 = vor.u32 %v19767_v42, %v3917_v18  ;;  %v3922_v50 = vrot.slane %v3917_v18, 4  ;;  %v3939_v19 = vrot.slane %v19764_v13, 7  ;;  %v15235_v7 = vld [vmem:[#allocation2 + $0x68] sm:$0xf]  ;;  %20122 = vst [vmem:[#allocation15_spill] sm:$0xff] %v15248_v20  ;;  %v15250_v18 = vpop.f32.mrf.mxu0 }
 0x14e   : > { %12562 = vmatprep.mubr.bf16.mxu0 %v11226_v8  ;;  %v15226_v8 = vld [vmem:[#allocation2 + $0x64] sm:$0xf]  ;;  %20120 = vst [vmem:[#allocation16_spill] sm:$0xff] %v15235_v7  ;;  %v3929_v32 = vor.u32 %v19766_v49, %v3926_v53  ;;  %v11197_v35 = vrot.slane %v3932_v0, 11  ;;  %v3948_v40 = vrot.slane %v19765_v59, 7  ;;  %20121 = vst [vmem:[#allocation17_spill] sm:$0xff] %v15246_v48  ;;  %v11185_v17 = vcombine.low %v3469_v62, %v3477_v2 }
 0x14f   : > { %20119 = vst [vmem:[#allocation12_spill] sm:$0xff] %v15226_v8  ;;  %v15254_v13 = vrot.slane %v3893_v29, 4  ;;  %v3921_v0 = vsel %vm13652_vm2, %v11196_v1, %v3920_v25  ;;  %v20123_v53 = vshll.u32 %v15181_v46, 16  ;;  %v3944_v49 = vrot.slane %v3939_v19, 4  ;;  %v3821_v42 = vld [vmem:[#allocation2 + $0x70] sm:$0xf]  ;;  %v15272_v1 = vpop.f32.mrf.mxu0 }
 0x150   : > { %v3930_v61 = vsel %vm13652_vm2, %v3922_v50, %v3929_v32  ;;  %v20125_v51 = vshll.u32 %v15189_v60, 16  ;;  %v15268_v29 = vadd.f32 %v15047_v30, %v14993_v26  ;;  %v11266_v25 = vcombine.low %v15075_v44, %v15092_v38  ;;  %v13226_v32 = vld [vmem:[%s19675_s1 + $0x228] sm:$0xff]  }
 0x151   : > { %v3942_v59 = vor.u32 %v20123_v53, %v3939_v19  ;;  %v11228_v19 = vcombine.low %v3921_v0, %v3930_v61  ;;  %v3954_v53 = vshrl.u32 %v3817_v3, 16  ;;  %v19769_v62 = vshrl.u32 %v15226_v8, 16  ;;  %v15287_v2 = vpop.f32.mrf.mxu0  ;;  %12543 = vmatmul.mubr.bf16.gmra.mxu1 %v11185_v17 }
 0x152   : > { %v3951_v5 = vor.u32 %v20125_v51, %v3948_v40  ;;  %20126 = vst [vmem:[#allocation21_spill] sm:$0xff] %v15268_v29  ;;  %v19770_v51 = vshll.u32 %v15226_v8, 16  ;;  %v19768_v26 = vshrl.u32 %v15235_v7, 16  ;;  %v15285_v40 = vpop.f32.mrf.mxu1  ;;  %20128 = vst [vmem:[#allocation18_spill] sm:$0xff] %v15287_v2  ;;  %v15296_v3 = vadd.f32 %v15081_v37, %v15036_v11  ;;  %12610 = vmatprep.mubr.bf16.mxu1 %v11266_v25  ;;  %v15316_v25 = vld [vmem:[#allocation2 + $0x88] sm:$0xf] }
 0x153   : > { %v3943_v50 = vsel %vm13652_vm2, %v11197_v35, %v3942_v59  ;;  %v11198_v59 = vrot.slane %v3954_v53, 11  ;;  %v3961_v35 = vrot.slane %v19769_v62, 7  ;;  %v3976_v61 = vshrl.u32 %v3821_v42, 16  ;;  %v3825_v53 = vld [vmem:[#allocation2 + $0x80] sm:$0xf]  ;;  %20133 = vst [vmem:[#allocation23_spill] sm:$0xff] %v15316_v25 }
 0x154   : > { %20129 = vst [vmem:[#allocation25_spill] sm:$0xff] %v15296_v3  ;;  %v3970_v0 = vrot.slane %v19768_v26, 7  ;;  %v15302_v30 = vpop.f32.mrf.mxu1  ;;  %v19773_v37 = vshrl.u32 %v15270_v12, 16  ;;  %v15310_v26 = vld [vmem:[#allocation2 + $0x84] sm:$0xf]  ;;  %v20131_v62 = vshll.u32 %v15235_v7, 16 }
 0x155   : > { %12563 = vmatmul.mubr.bf16.vlgmr.msra.gmra.mxu0 %v11227_v28  ;;  %v3952_v28 = vsel %vm13652_vm2, %v3944_v49, %v3951_v5  ;;  %v15304_v5 = vpop.f32.mrf.mxu0  ;;  %v3964_v49 = vor.u32 %v19770_v51, %v3961_v35  ;;  %v3966_v11 = vrot.slane %v3961_v35, 4  ;;  %20130 = vst [vmem:[#allocation20_spill] sm:$0xff] %v15310_v26  ;;  %v20132_v2 = vshrl.u32 %v15260_v58, 16 }
 0x156   : > { %12643 = vmatpush3.bf16.msra.mxu0 %v14956_v39  ;;  %12566 = vmatprep.mubr.bf16.mxu0 %v11228_v19  ;;  %v11229_v42 = vcombine.low %v3943_v50, %v3952_v28  ;;  %v3973_v19 = vor.u32 %v20131_v62, %v3970_v0  ;;  %v11199_v39 = vrot.slane %v3976_v61, 11  ;;  %v15318_v16 = vpop.f32.mrf.mxu1  ;;  %v20134_v51 = vshll.u32 %v15122_v52, 16  ;;  %v3829_v28 = vld [vmem:[#allocation2 + $0x90] sm:$0xf] }
 0x157   : > { %12644 = vmatprep.subr.bf16.mxu0 %v13223_v63  ;;  %v3983_v36 = vrot.slane %v20132_v2, 7  ;;  %v15320_v35 = vpop.f32.mrf.mxu0  ;;  %v3965_v50 = vsel %vm13652_vm2, %v11198_v59, %v3964_v49  ;;  %v3992_v62 = vrot.slane %v19773_v37, 7  ;;  %v15332_v2 = vadd.f32 %v15105_v47, %v15049_v27  ;;  %v15340_v59 = vld [vmem:[#allocation2 + $0x94] sm:$0xf]  ;;  %v15342_v49 = vld [vmem:[#allocation2 + $0x98] sm:$0xf] }
 0x158   : > { %v15324_v17 = vrot.slane %v20134_v51, 5  ;;  %v11267_v0 = vcombine.low %v15122_v52, %v15128_v21  ;;  %v3974_v61 = vsel %vm13652_vm2, %v3966_v11, %v3973_v19  ;;  %v20136_v51 = vshll.u32 %v15260_v58, 16  ;;  %v13229_v27 = vld [vmem:[%s19675_s1 + $0x220] sm:$0xff]   ;;  %v15347_v47 = vpop.f32.mrf.mxu1 }
 0x159   : > { %20135 = vst [vmem:[#allocation26_spill] sm:$0xff] %v15332_v2  ;;  %v3988_v10 = vrot.slane %v3983_v36, 4  ;;  %20137 = vst [vmem:[#allocation27_spill] sm:$0xff] %v15347_v47  ;;  %v15349_v37 = vpop.f32.mrf.mxu0  ;;  %v11268_v52 = vcombine.low %v15168_v22, %v15175_v34  ;;  %v11230_v19 = vcombine.low %v3965_v50, %v3974_v61  ;;  %v20138_v11 = vshll.u32 %v15270_v12, 16  ;;  %v13232_v50 = vld [vmem:[%s19675_s1 + $0x218] sm:$0xff]  }
 0x15a   : > { %12645 = vmatpush3.bf16.msra.mxu0 %v13223_v63  ;;  %v3986_v63 = vor.u32 %v20136_v51, %v3983_v36  ;;  %v15357_v51 = vadd.f32 %v15115_v43, %v15065_v57  ;;  %v3998_v24 = vshrl.u32 %v3825_v53, 16  ;;  %v19774_v47 = vshrl.u32 %v15310_v26, 16  ;;  %v15366_v61 = vpop.f32.mrf.mxu1  ;;  %12611 = vmatmul.mubr.bf16.vlgmr.msra.gmra.mxu1 %v11267_v0 }
 0x15b   : > { %12646 = vmatprep.subr.bf16.mxu0 %v13226_v32  ;;  %v3995_v36 = vor.u32 %v20138_v11, %v3992_v62  ;;  %v15368_v62 = vpop.f32.mrf.mxu0  ;;  %v19775_v43 = vshrl.u32 %v15316_v25, 16  ;;  %v15376_v53 = vadd.f32 %v15152_v9, %v15110_v31  ;;  %v4020_v2 = vshrl.u32 %v3829_v28, 16  ;;  %12614 = vmatprep.mubr.bf16.mxu1 %v11268_v52 }
 0x15c   : > { %20139 = vst [vmem:[#allocation24_spill] sm:$0xff] %v15357_v51  ;;  %v3987_v20 = vsel %vm13652_vm2, %v11199_v39, %v3986_v63  ;;  %20140 = vst [vmem:[#allocation29_spill] sm:$0xff] %v15368_v62  ;;  %v11200_v11 = vrot.slane %v3998_v24, 11  ;;  %v3833_v24 = vld [vmem:[#allocation2 + $0xa0] sm:$0xf]  ;;  %v20145_v0 = vshrl.u32 %v15340_v59, 16  ;;  %v11270_v62 = vcombine.low %v15226_v8, %v15235_v7 }
 0x15d   : > { %12567 = vmatmul.mubr.bf16.gmra.mxu0 %v11229_v42  ;;  %v3996_v57 = vsel %vm13652_vm2, %v3988_v10, %v3995_v36  ;;  %20141 = vst [vmem:[#allocation28_spill] sm:$0xff] %v15376_v53  ;;  %v20142_v42 = vshll.u32 %v15128_v21, 16  ;;  %v15384_v10 = vpop.f32.mrf.mxu1  ;;  %v4014_v31 = vrot.slane %v19775_v43, 7  ;;  %v15396_v53 = vld [vmem:[#allocation2 + $0xa4] sm:$0xf]  ;;  %v20144_v43 = vshll.u32 %v15316_v25, 16 }
 0x15e   : > { %12570 = vmatprep.mubr.bf16.mxu0 %v11230_v19  ;;  %12647 = vmatpush3.bf16.msra.mxu0 %v13226_v32  ;;  %v4005_v19 = vrot.slane %v19774_v47, 7  ;;  %v15386_v32 = vpop.f32.mrf.mxu0  ;;  %v20143_v47 = vshll.u32 %v15310_v26, 16  ;;  %v11201_v36 = vrot.slane %v4020_v2, 11  ;;  %v4027_v3 = vrot.slane %v20145_v0, 7 }
 0x15f   : > { %v15380_v63 = vrot.slane %v20142_v42, 5  ;;  %12648 = vmatprep.subr.bf16.mxu0 %v13229_v27  ;;  %v11231_v42 = vcombine.low %v3987_v20, %v3996_v57  ;;  %v15398_v52 = vpop.f32.mrf.mxu1  ;;  %v4017_v9 = vor.u32 %v20144_v43, %v4014_v31  ;;  %v20146_v20 = vshrl.u32 %v15342_v49, 16  ;;  %v3837_v43 = vld [vmem:[#allocation2 + $0xb0] sm:$0xf]  ;;  %v15420_v31 = vld [vmem:[#allocation2 + $0xb4] sm:$0xf] }
 0x160   : > { %v4008_v28 = vor.u32 %v20143_v47, %v4005_v19  ;;  %v4010_v39 = vrot.slane %v4005_v19, 4  ;;  %v15400_v51 = vpop.f32.mrf.mxu0  ;;  %v15408_v47 = vld [vmem:[#allocation2 + $0xa8] sm:$0xf]  ;;  %v11269_v19 = vcombine.low %v15181_v46, %v15189_v60  ;;  %v15418_v2 = vadd.f32 %v15183_v23, %v15140_v4  ;;  %v15432_v4 = vld [vmem:[#allocation2 + $0xb8] sm:$0xf]  ;;  %v13235_v23 = vld [vmem:[%s19675_s1 + $0x210] sm:$0xff]  }
 0x161   : > { %v4036_v57 = vrot.slane %v20146_v20, 7  ;;  %v20149_v7 = vshll.u32 %v15340_v59, 16  ;;  %v4032_v48 = vrot.slane %v4027_v3, 4 }
 0x162   : > { %12649 = vmatpush3.bf16.msra.mxu0 %v13229_v27  ;;  %v4009_v29 = vsel %vm13652_vm2, %v11200_v11, %v4008_v28  ;;  %20147 = vst [vmem:[#allocation31_spill] sm:$0xff] %v15418_v2  ;;  %v15422_v27 = vpop.f32.mrf.mxu1  ;;  %v15424_v0 = vpop.f32.mrf.mxu0  ;;  %v4018_v20 = vsel %vm13652_vm2, %v4010_v39, %v4017_v9  ;;  %v20150_v11 = vshll.u32 %v15342_v49, 16  ;;  %v15443_v39 = vadd.f32 %v15213_v15, %v15170_v14 }
 0x163   : > { %12650 = vmatprep.subr.bf16.mxu0 %v13232_v50  ;;  %20148 = vst [vmem:[#allocation32_spill] sm:$0xff] %v15422_v27  ;;  %v4030_v8 = vor.u32 %v20149_v7, %v4027_v3  ;;  %v20151_v27 = vshrl.u32 %v15128_v21, 16  ;;  %v11232_v60 = vcombine.low %v4009_v29, %v4018_v20  ;;  %v4042_v7 = vshrl.u32 %v3833_v24, 16  ;;  %12615 = vmatmul.mubr.bf16.gmra.mxu1 %v11269_v19 }
 0x164   : > { %v4039_v28 = vor.u32 %v20150_v11, %v4036_v57  ;;  %20152 = vst [vmem:[#allocation33_spill] sm:$0xff] %v15443_v39  ;;  %v15445_v3 = vpop.f32.mrf.mxu1  ;;  %v15447_v9 = vpop.f32.mrf.mxu0  ;;  %v19782_v21 = vshrl.u32 %v15396_v53, 16  ;;  %v19783_v29 = vshrl.u32 %v15408_v47, 16  ;;  %12618 = vmatprep.mubr.bf16.mxu1 %v11270_v62  ;;  %v4064_v19 = vshrl.u32 %v3837_v43, 16 }
 0x165   : > { %v15439_v2 = vrot.slane %v20151_v27, 4  ;;  %12571 = vmatmul.mubr.bf16.gmra.mxu0 %v11231_v42  ;;  %20153 = vst [vmem:[#allocation34_spill] sm:$0xff] %v15447_v9  ;;  %v4031_v57 = vsel %vm13652_vm2, %v11201_v36, %v4030_v8  ;;  %v19784_v42 = vshll.u32 %v15396_v53, 16  ;;  %v11202_v15 = vrot.slane %v4042_v7, 11  ;;  %v13238_v8 = vld [vmem:[%s19675_s1 + $0x208] sm:$0xff]  }
 0x166   : > { %v4040_v11 = vsel %vm13652_vm2, %v4032_v48, %v4039_v28  ;;  %12651 = vmatpush3.bf16.msra.mxu0 %v13232_v50  ;;  %12574 = vmatprep.mubr.bf16.mxu0 %v11232_v60  ;;  %v15460_v36 = vpop.f32.mrf.mxu1  ;;  %v15462_v48 = vpop.f32.mrf.mxu0  ;;  %v4049_v50 = vrot.slane %v19782_v21, 7  ;;  %v15468_v60 = vadd.f32 %v15285_v40, %v15228_v45  ;;  %v19785_v27 = vshrl.u32 %v15420_v31, 16  ;;  %v15486_v28 = vld [vmem:[#allocation2 + $0xc8] sm:$0xf] }
 0x167   : > { %v11233_v14 = vcombine.low %v4031_v57, %v4040_v11  ;;  %12652 = vmatprep.subr.bf16.mxu0 %v13235_v23  ;;  %v4058_v20 = vrot.slane %v19783_v29, 7  ;;  %v3841_v57 = vld [vmem:[#allocation2 + $0xc0] sm:$0xf]  ;;  %v15476_v11 = vld [vmem:[#allocation2 + $0xc4] sm:$0xf]  ;;  %v11203_v24 = vrot.slane %v4064_v19, 11  ;;  %v11271_v62 = vcombine.low %v15260_v58, %v15270_v12 }
 0x168   : > { %20154 = vst [vmem:[#allocation35_spill] sm:$0xff] %v15468_v60  ;;  %v15478_v21 = vpop.f32.mrf.mxu1  ;;  %v15480_v45 = vpop.f32.mrf.mxu0  ;;  %v4052_v40 = vor.u32 %v19784_v42, %v4049_v50  ;;  %v4054_v43 = vrot.slane %v4049_v50, 4  ;;  %v4071_v29 = vrot.slane %v19785_v27, 7  ;;  %20155 = vst [vmem:[#allocation36_spill] sm:$0xff] %v15486_v28  ;;  %v20156_v7 = vshll.u32 %v15408_v47, 16 }
 0x169   : > { %v20157_v60 = vshrl.u32 %v15432_v4, 16  ;;  %v15496_v42 = vadd.f32 %v15302_v30, %v15250_v18  ;;  %v11272_v27 = vcombine.low %v15310_v26, %v15316_v25  ;;  %v3845_v30 = vld [vmem:[#allocation2 + $0xd0] sm:$0xf]  ;;  %v20161_v12 = vshll.u32 %v15432_v4, 16  ;;  %v15521_v26 = vld [vmem:[#allocation2 + $0xd8] sm:$0xf] }
 0x16a   : > { %12653 = vmatpush3.bf16.msra.mxu0 %v13235_v23  ;;  %v4061_v9 = vor.u32 %v20156_v7, %v4058_v20  ;;  %v15498_v50 = vpop.f32.mrf.mxu1  ;;  %v13241_v23 = vld [vmem:[%s19675_s1 + $0x200] sm:$0xff]   ;;  %v15503_v19 = vpop.f32.mrf.mxu0  ;;  %v4053_v20 = vsel %vm13652_vm2, %v11202_v15, %v4052_v40  ;;  %v4076_v18 = vrot.slane %v4071_v29, 4  ;;  %v15519_v25 = vadd.f32 %v15318_v16, %v15272_v1 }
 0x16b   : > { %v4080_v39 = vrot.slane %v20157_v60, 7  ;;  %20158 = vst [vmem:[#allocation37_spill] sm:$0xff] %v15496_v42  ;;  %12654 = vmatprep.subr.bf16.mxu0 %v13238_v8  ;;  %20159 = vst [vmem:[#allocation38_spill] sm:$0xff] %v15498_v50  ;;  %v20160_v60 = vshll.u32 %v15420_v31, 16  ;;  %v15511_v42 = vld [vmem:[#allocation2 + $0xd4] sm:$0xf]  ;;  %12619 = vmatmul.mubr.bf16.gmra.mxu1 %v11271_v62  ;;  %v15541_v62 = vadd.f32 %v15366_v61, %v15304_v5 }
 0x16c   : > { %v4062_v50 = vsel %vm13652_vm2, %v4054_v43, %v4061_v9  ;;  %20162 = vst [vmem:[#allocation39_spill] sm:$0xff] %v15519_v25  ;;  %v15523_v15 = vpop.f32.mrf.mxu1  ;;  %v15528_v9 = vpop.f32.mrf.mxu0  ;;  %v19796_v16 = vshll.u32 %v15476_v11, 16  ;;  %v19794_v1 = vshrl.u32 %v15486_v28, 16  ;;  %12622 = vmatprep.mubr.bf16.mxu1 %v11272_v27  ;;  %v15553_v5 = vld [vmem:[#allocation2 + $0xe8] sm:$0xf]  ;;  %v15581_v25 = vadd.f32 %v15398_v52, %v15349_v37 }
 0x16d   : > { %v4074_v7 = vor.u32 %v20160_v60, %v4071_v29  ;;  %12575 = vmatmul.mubr.bf16.gmra.mxu0 %v11233_v14  ;;  %v4083_v58 = vor.u32 %v20161_v12, %v4080_v39  ;;  %v11234_v40 = vcombine.low %v4053_v20, %v4062_v50  ;;  %v4086_v60 = vshrl.u32 %v3841_v57, 16  ;;  %20163 = vst [vmem:[#allocation40_spill] sm:$0xff] %v15528_v9 }
 0x16e   : > { %v19795_v14 = vshrl.u32 %v15476_v11, 16  ;;  %12655 = vmatpush3.bf16.msra.mxu0 %v13238_v8  ;;  %v19798_v39 = vshll.u32 %v15486_v28, 16  ;;  %v15535_v43 = vpop.f32.mrf.mxu1  ;;  %20164 = vst [vmem:[#allocation41_spill] sm:$0xff] %v15541_v62  ;;  %v4108_v50 = vshrl.u32 %v3845_v30, 16  ;;  %v19797_v20 = vshrl.u32 %v15511_v42, 16  ;;  %v15555_v61 = vpop.f32.mrf.mxu0  ;;  %20167 = vst [vmem:[#allocation43_spill] sm:$0xff] %v15581_v25 }
 0x16f   : > { %v4075_v29 = vsel %vm13652_vm2, %v11203_v24, %v4074_v7  ;;  %v4084_v12 = vsel %vm13652_vm2, %v4076_v18, %v4083_v58  ;;  %12656 = vmatprep.subr.bf16.mxu0 %v13241_v23  ;;  %12578 = vmatprep.mubr.bf16.mxu0 %v11234_v40  ;;  %v11204_v57 = vrot.slane %v4086_v60, 11  ;;  %v4102_v58 = vrot.slane %v19794_v1, 7  ;;  %v3849_v18 = vld [vmem:[#allocation2 + $0xe0] sm:$0xf] }
 0x170   : > { %v11235_v24 = vcombine.low %v4075_v29, %v4084_v12  ;;  %v4093_v8 = vrot.slane %v19795_v14, 7  ;;  %v19799_v29 = vshrl.u32 %v15521_v26, 16  ;;  %v15551_v12 = vld [vmem:[#allocation2 + $0xe4] sm:$0xf]  ;;  %v11273_v30 = vcombine.low %v15340_v59, %v15342_v49 }
 0x171   : > { %v4105_v1 = vor.u32 %v19798_v39, %v4102_v58  ;;  %v11205_v14 = vrot.slane %v4108_v50, 11  ;;  %v11274_v60 = vcombine.low %v15396_v53, %v15408_v47  ;;  %v15573_v9 = vadd.f32 %v15384_v10, %v15320_v35  ;;  %v3853_v58 = vld [vmem:[#allocation2 + $0xf0] sm:$0xf] }
 0x172   : > { %v4096_v27 = vor.u32 %v19796_v16, %v4093_v8  ;;  %v4098_v40 = vrot.slane %v4093_v8, 4  ;;  %12657 = vmatpush3.bf16.msra.mxu0 %v13241_v23  ;;  %v4115_v8 = vrot.slane %v19797_v20, 7  ;;  %v15563_v16 = vpop.f32.mrf.mxu1  ;;  %v4124_v7 = vrot.slane %v19799_v29, 7 }
 0x173   : > { %20165 = vst [vmem:[#allocation42_spill] sm:$0xff] %v15573_v9  ;;  %v20166_v20 = vshll.u32 %v15511_v42, 16  ;;  %v11275_v35 = vcombine.low %v15420_v31, %v15432_v4  ;;  %12623 = vmatmul.mubr.bf16.gmra.mxu1 %v11273_v30  ;;  %v19801_v37 = vshrl.u32 %v15551_v12, 16  ;;  %v19803_v52 = vshll.u32 %v15551_v12, 16 }
 0x174   : > { %v4097_v23 = vsel %vm13652_vm2, %v11204_v57, %v4096_v27  ;;  %v4106_v50 = vsel %vm13652_vm2, %v4098_v40, %v4105_v1  ;;  %v4120_v62 = vrot.slane %v4115_v8, 4  ;;  %v15583_v57 = vld [vmem:[#allocation2 + $0xf4] sm:$0xf]  ;;  %v15585_v27 = vld [vmem:[#allocation2 + $0xf8] sm:$0xf]  ;;  %v4130_v1 = vshrl.u32 %v3849_v18, 16  ;;  %v15591_v40 = vpop.f32.mrf.mxu0  ;;  %v15598_v25 = vpop.f32.mrf.mxu1  ;;  %12626 = vmatprep.mubr.bf16.mxu1 %v11274_v60 }
 0x175   : > { %12579 = vmatmul.mubr.bf16.gmra.mxu0 %v11235_v24  ;;  %v4118_v39 = vor.u32 %v20166_v20, %v4115_v8  ;;  %20168 = vst [vmem:[#allocation44_spill] sm:$0xff] %v15585_v27  ;;  %v11236_v10 = vcombine.low %v4097_v23, %v4106_v50  ;;  %v20169_v24 = vshll.u32 %v15521_v26, 16  ;;  %v19800_v8 = vshrl.u32 %v15553_v5, 16  ;;  %20170 = vst [vmem:[#allocation45_spill] sm:$0xff] %v15598_v25 }
 0x176   : > { %v11206_v18 = vrot.slane %v4130_v1, 11  ;;  %v19802_v23 = vshll.u32 %v15553_v5, 16  ;;  %v15605_v30 = vadd.f32 %v15445_v3, %v15386_v32  ;;  %v15611_v60 = vpop.f32.mrf.mxu1  ;;  %v3857_v32 = vld [vmem:[#allocation2 + $0x100] sm:$0xf]  ;;  %v15617_v3 = vld [vmem:[#allocation2 + $0x104] sm:$0xf]  ;;  %v11276_v1 = vcombine.low %v15476_v11, %v15486_v28 }
 0x177   : > { %v4127_v29 = vor.u32 %v20169_v24, %v4124_v7  ;;  %v4119_v20 = vsel %vm13652_vm2, %v11205_v14, %v4118_v39  ;;  %12582 = vmatprep.mubr.bf16.mxu0 %v11236_v10  ;;  %v4137_v39 = vrot.slane %v19801_v37, 7  ;;  %v4146_v50 = vrot.slane %v19800_v8, 7  ;;  %v15625_v10 = vld [vmem:[#allocation2 + $0x108] sm:$0xf] }
 0x178   : > { %20171 = vst [vmem:[#allocation46_spill] sm:$0xff] %v15605_v30  ;;  %v4152_v24 = vshrl.u32 %v3853_v58, 16  ;;  %v20173_v30 = vshrl.u32 %v15585_v27, 16 }
 0x179   : > { %v4128_v7 = vsel %vm13652_vm2, %v4120_v62, %v4127_v29  ;;  %v4142_v8 = vrot.slane %v4137_v39, 4  ;;  %v4149_v58 = vor.u32 %v19802_v23, %v4146_v50  ;;  %v15627_v62 = vpop.f32.mrf.mxu1  ;;  %v20172_v29 = vshrl.u32 %v15583_v57, 16 }
 0x17a   : > { %v11237_v14 = vcombine.low %v4119_v20, %v4128_v7  ;;  %v15619_v20 = vpop.f32.mrf.mxu0  ;;  %v4140_v7 = vor.u32 %v19803_v52, %v4137_v39  ;;  %v11207_v37 = vrot.slane %v4152_v24, 11  ;;  %v4168_v9 = vrot.slane %v20173_v30, 7  ;;  %v3861_v52 = vld [vmem:[#allocation2 + $0x110] sm:$0xf] }
 0x17b   : > { %v4159_v25 = vrot.slane %v20172_v29, 7  ;;  %v15637_v39 = vadd.f32 %v15460_v36, %v15400_v51  ;;  %v4150_v24 = vsel %vm13652_vm2, %v4142_v8, %v4149_v58  ;;  %v15645_v23 = vadd.f32 %v15478_v21, %v15424_v0  ;;  %v15647_v29 = vld [vmem:[#allocation2 + $0x114] sm:$0xf]  ;;  %v15649_v28 = vpop.f32.mrf.mxu1  ;;  %12627 = vmatmul.mubr.bf16.gmra.mxu1 %v11275_v35 }
 0x17c   : > { %v4141_v50 = vsel %vm13652_vm2, %v11206_v18, %v4140_v7  ;;  %v20176_v51 = vshll.u32 %v15583_v57, 16  ;;  %v15655_v7 = vld [vmem:[#allocation2 + $0x118] sm:$0xf]  ;;  %v15657_v8 = vpop.f32.mrf.mxu0  ;;  %v11277_v0 = vcombine.low %v15511_v42, %v15521_v26  ;;  %v4174_v21 = vshrl.u32 %v3857_v32, 16  ;;  %12630 = vmatprep.mubr.bf16.mxu1 %v11276_v1 }
 0x17d   : > { %20174 = vst [vmem:[#allocation47_spill] sm:$0xff] %v15637_v39  ;;  %12583 = vmatmul.mubr.bf16.gmra.mxu0 %v11237_v14  ;;  %20175 = vst [vmem:[#allocation48_spill] sm:$0xff] %v15645_v23  ;;  %v11238_v30 = vcombine.low %v4141_v50, %v4150_v24  ;;  %v4164_v14 = vrot.slane %v4159_v25, 4  ;;  %v20177_v39 = vshll.u32 %v15585_v27, 16  ;;  %v19806_v58 = vshrl.u32 %v15617_v3, 16  ;;  %v15663_v24 = vpop.f32.mrf.mxu1 }
 0x17e   : > { %v4162_v36 = vor.u32 %v20176_v51, %v4159_v25  ;;  %20178 = vst [vmem:[#allocation49_spill] sm:$0xff] %v15657_v8  ;;  %20179 = vst [vmem:[#allocation50_spill] sm:$0xff] %v15663_v24  ;;  %v19807_v35 = vshrl.u32 %v15625_v10, 16  ;;  %v11208_v32 = vrot.slane %v4174_v21, 11  ;;  %v15675_v50 = vadd.f32 %v15523_v15, %v15462_v48 }
 0x17f   : > { %v4171_v18 = vor.u32 %v20177_v39, %v4168_v9  ;;  %12586 = vmatprep.mubr.bf16.mxu0 %v11238_v30  ;;  %v19809_v39 = vshll.u32 %v15625_v10, 16  ;;  %v4181_v8 = vrot.slane %v19806_v58, 7  ;;  %v19808_v30 = vshrl.u32 %v15647_v29, 16 }
 0x180   : > { %v4163_v25 = vsel %vm13652_vm2, %v11207_v37, %v4162_v36  ;;  %20180 = vst [vmem:[#allocation51_spill] sm:$0xff] %v15675_v50  ;;  %v4190_v1 = vrot.slane %v19807_v35, 7  ;;  %v4196_v37 = vshrl.u32 %v3861_v52, 16  ;;  %v20181_v21 = vshll.u32 %v15617_v3, 16 }
 0x181   : > { %v4172_v9 = vsel %vm13652_vm2, %v4164_v14, %v4171_v18  ;;  %v15681_v14 = vpop.f32.mrf.mxu0  ;;  %v15683_v18 = vpop.f32.mrf.mxu1  ;;  %v19812_v58 = vshrl.u32 %v15655_v7, 16  ;;  %v11278_v15 = vcombine.low %v15551_v12, %v15553_v5  ;;  %v4203_v36 = vrot.slane %v19808_v30, 7 }
 0x182   : > { %v11239_v51 = vcombine.low %v4163_v25, %v4172_v9  ;;  %v4184_v25 = vor.u32 %v20181_v21, %v4181_v8  ;;  %v4186_v9 = vrot.slane %v4181_v8, 4  ;;  %v4193_v52 = vor.u32 %v19809_v39, %v4190_v1 }
 0x183   : > { %v11209_v35 = vrot.slane %v4196_v37, 11  ;;  %v15695_v24 = vpop.f32.mrf.mxu0  ;;  %v15697_v50 = vpop.f32.mrf.mxu1  ;;  %v11279_v8 = vcombine.low %v15583_v57, %v15585_v27  ;;  %v4212_v48 = vrot.slane %v19812_v58, 7  ;;  %v15707_v1 = vadd.f32 %v15535_v43, %v15480_v45  ;;  %v3804_v27 = vld [vmem:[#allocation2 + $0x2c] sm:$0x1]  ;;  %12631 = vmatmul.mubr.bf16.gmra.mxu1 %v11277_v0 }
 0x184   : > { %v4185_v21 = vsel %vm13652_vm2, %v11208_v32, %v4184_v25  ;;  %v4194_v37 = vsel %vm13652_vm2, %v4186_v9, %v4193_v52  ;;  %v20183_v30 = vshll.u32 %v15647_v29, 16  ;;  %v15715_v23 = vadd.f32 %v15563_v16, %v15503_v19  ;;  %12634 = vmatprep.mubr.bf16.mxu1 %v11278_v15 }
 0x185   : > { %12587 = vmatmul.mubr.bf16.gmra.mxu0 %v11239_v51  ;;  %20182 = vst [vmem:[#allocation52_spill] sm:$0xff] %v15707_v1  ;;  %v4208_v51 = vrot.slane %v4203_v36, 4  ;;  %v11240_v32 = vcombine.low %v4185_v21, %v4194_v37  ;;  %v20185_v25 = vshll.u32 %v15655_v7, 16  ;;  %v11280_v45 = vcombine.low %v15617_v3, %v15625_v10  ;;  %v15723_v52 = vpop.f32.mrf.mxu0  ;;  %v3808_v37 = vld [vmem:[#allocation2 + $0x3c] sm:$0x1] }
 0x186   : > { %v4206_v39 = vor.u32 %v20183_v30, %v4203_v36  ;;  %20184 = vst [vmem:[#allocation53_spill] sm:$0xff] %v15715_v23  ;;  %v20186_v43 = vshrl.u32 %v15075_v44, 16  ;;  %v20187_v19 = vshll.u32 %v15075_v44, 16  ;;  %v20188_v0 = vshll.u32 %v15092_v38, 16 }
 0x187   : > { %v4215_v58 = vor.u32 %v20185_v25, %v4212_v48  ;;  %v20189_v48 = vshrl.u32 %v15092_v38, 16  ;;  %v15733_v25 = vpop.f32.mrf.mxu1  ;;  %12590 = vmatprep.mubr.bf16.mxu0 %v11240_v32  ;;  %v4903_v15 = vshll.u32 %v3804_v27, 16  ;;  %v4909_v44 = vor.u32 %v15324_v17, %v15254_v13 }
 0x188   : > { %v4893_v9 = vrot.slane %v20186_v43, 4  ;;  %v4207_v30 = vsel %vm13652_vm2, %v11209_v35, %v4206_v39  ;;  %v4894_v16 = vrot.slane %v20187_v19, 5  ;;  %v4897_v36 = vrot.slane %v20188_v0, 5 }
 0x189   : > { %v4899_v21 = vrot.slane %v20189_v48, 4  ;;  %v4216_v43 = vsel %vm13652_vm2, %v4208_v51, %v4215_v58  ;;  %v2132_v35 = vadd.f32 %v15555_v61, %v15138_v56  ;;  %v4914_v38 = vor.u32 %v15439_v2, %v15380_v63  ;;  %v15745_v58 = vpop.f32.mrf.mxu0  ;;  %v15750_v13 = vpop.f32.mrf.mxu1 }
 0x18a   : > { %v11241_v39 = vcombine.low %v4207_v30, %v4216_v43  ;;  %v4895_v19 = vor.u32 %v4894_v16, %v4893_v9  ;;  %v4905_v48 = vrot.slane %v4903_v15, 5  ;;  %v4910_v23 = vrot.slane %v4909_v44, 4 }
 0x18b   : > { %v4900_v0 = vor.u32 %v4899_v21, %v4897_v36  ;;  %v4917_v1 = vshll.u32 %v3808_v37, 16  ;;  %v2130_v32 = vadd.f32 %v15591_v40, %v15187_v6  ;;  %v4915_v56 = vrot.slane %v4914_v38, 4  ;;  %v3812_v40 = vld [vmem:[#allocation2 + $0x4c] sm:$0x1]  ;;  %12635 = vmatmul.mubr.bf16.gmra.mxu1 %v11279_v8  ;;  %v12380_v15 = vpop.f32.mrf.mxu0 }
 0x18c   : > { %v4896_v27 = vrot.slane %v4895_v19, 4  ;;  %v15748_v61 = vadd.f32 %v15611_v60, %v2132_v35  ;;  %v20190_v17 = vshll.u32 %v15181_v46, 16  ;;  %v2133_v30 = vadd.f32 %v15619_v20, %v15199_v41  ;;  %12638 = vmatprep.mubr.bf16.mxu1 %v11280_v45  ;;  %v3816_v19 = vld [vmem:[#allocation2 + $0x5c] sm:$0x1] }
 0x18d   : > { %v4901_v51 = vrot.slane %v4900_v0, 4  ;;  %12591 = vmatmul.mubr.bf16.gmra.mxu0 %v11241_v39  ;;  %v4919_v2 = vrot.slane %v4917_v1, 5  ;;  %v15757_v6 = vadd.f32 %v15627_v62, %v2130_v32  ;;  %v4912_v21 = vsel %vm14099_vm7, %v4910_v23, %v15380_v63  ;;  %v12428_v0 = vpop.f32.mrf.mxu1  ;;  %v2035_v32 = vpop.f32.mrf.mxu0 }
 0x18e   : > { %v4936_v9 = vrot.slane %v20190_v17, 5  ;;  %v4898_v16 = vsel %vm14099_vm7, %v4896_v27, %v4897_v36  ;;  %v20191_v37 = vshrl.u32 %v15168_v22, 16  ;;  %v15771_v62 = vadd.f32 %v15649_v28, %v2133_v30 }
 0x18f   : > { %v4906_v60 = vsel %vm14099_vm7, %v4901_v51, %v4905_v48  ;;  %v4920_v41 = vsel %vm14099_vm7, %v4915_v56, %v4919_v2  ;;  %v20192_v20 = vshll.u32 %v15168_v22, 16  ;;  %v11281_v35 = vcombine.low %v15647_v29, %v15655_v7  ;;  %v20196_v56 = vld [vmem:[#allocation13_spill] sm:$0xff] }
 0x190   : > { %v4921_v1 = vrot.slane %v20191_v37, 4  ;;  %v11306_v43 = vcombine.low %v4898_v16, %v4906_v60  ;;  %v20193_v63 = vshll.u32 %v15175_v34, 16  ;;  %v20194_v8 = vshrl.u32 %v15175_v34, 16  ;;  %v20199_v37 = vld [vmem:[#allocation17_spill] sm:$0xff] }
 0x191   : > { %v4922_v36 = vrot.slane %v20192_v20, 5  ;;  %v4931_v39 = vshll.u32 %v3812_v40, 16  ;;  %v11307_v28 = vcombine.low %v4912_v21, %v4920_v41  ;;  %v2136_v22 = vadd.f32 %v15681_v14, %v15211_v55  ;;  %v2773_v40 = vpop.f32.mrf.mxu1  ;;  %v12381_v55 = vpop.f32.mrf.mxu0  ;;  %v20200_v41 = vld [vmem:[#allocation21_spill] sm:$0xff] }
 0x192   : > { %v4925_v23 = vrot.slane %v20193_v63, 5  ;;  %v4927_v44 = vrot.slane %v20194_v8, 4  ;;  %12658 = vmatprep.mubr.bf16.mxu0 %v11306_v43  ;;  %v20195_v45 = vshrl.u32 %v15181_v46, 16  ;;  %v20197_v17 = vshll.u32 %v20196_v56, 16 }
 0x193   : > { %v4923_v38 = vor.u32 %v4922_v36, %v4921_v1  ;;  %v4933_v51 = vrot.slane %v4931_v39, 5  ;;  %v20198_v34 = vshrl.u32 %v20196_v56, 16  ;;  %v4945_v21 = vshll.u32 %v3816_v19, 16  ;;  %v12429_v36 = vpop.f32.mrf.mxu1  ;;  %v20201_v39 = vld [vmem:[#allocation19_spill] sm:$0xff]  ;;  %12639 = vmatmul.mubr.bf16.gmra.mxu1 %v11281_v35 }
 0x194   : > { %v4935_v48 = vrot.slane %v20195_v45, 4  ;;  %v4928_v27 = vor.u32 %v4927_v44, %v4925_v23  ;;  %v4939_v2 = vrot.slane %v20197_v17, 5  ;;  %v2134_v1 = vadd.f32 %v15695_v24, %v20199_v37  ;;  %v3820_v24 = vld [vmem:[#allocation2 + $0x6c] sm:$0x1]  ;;  %v20203_v45 = vld [vmem:[#allocation12_spill] sm:$0xff]  ;;  %v15814_v17 = vpop.f32.mrf.mxu0 }
 0x195   : > { %v4941_v30 = vrot.slane %v20198_v34, 4  ;;  %v4924_v16 = vrot.slane %v4923_v38, 4  ;;  %v15792_v43 = vadd.f32 %v15683_v18, %v2136_v22  ;;  %v2137_v20 = vadd.f32 %v15723_v52, %v20200_v41  ;;  %12659 = vmatmul.mubr.bf16.vlgmr.msra.gmra.mxu0 %v11307_v28  ;;  %v15816_v34 = vpop.f32.mrf.mxu1 }
 0x196   : > { %v4937_v60 = vor.u32 %v4936_v9, %v4935_v48  ;;  %v4929_v14 = vrot.slane %v4928_v27, 4  ;;  %v4947_v9 = vrot.slane %v4945_v21, 5  ;;  %v15799_v44 = vadd.f32 %v15697_v50, %v2134_v1  ;;  %20206 = vst [vmem:[#allocation13_spill] sm:$0xff] %v15816_v34  ;;  %v3824_v21 = vld [vmem:[#allocation2 + $0x7c] sm:$0x1] }
 0x197   : > { %v4942_v46 = vor.u32 %v4941_v30, %v4939_v2  ;;  %v4926_v63 = vsel %vm14099_vm7, %v4924_v16, %v4925_v23  ;;  %v20202_v19 = vshll.u32 %v20201_v39, 16  ;;  %v15806_v52 = vadd.f32 %v15733_v25, %v2137_v20  ;;  %v20207_v25 = vld [vmem:[#allocation16_spill] sm:$0xff] }
 0x198   : > { %v4938_v8 = vrot.slane %v4937_v60, 4  ;;  %v4934_v18 = vsel %vm14099_vm7, %v4929_v14, %v4933_v51  ;;  %v20204_v48 = vshrl.u32 %v20203_v45, 16  ;;  %v20205_v27 = vshll.u32 %v20203_v45, 16  ;;  %v20210_v14 = vld [vmem:[#allocation25_spill] sm:$0xff] }
 0x199   : > { %v4964_v38 = vrot.slane %v20202_v19, 5  ;;  %v4943_v22 = vrot.slane %v4942_v46, 4  ;;  %v11308_v28 = vcombine.low %v4926_v63, %v4934_v18  ;;  %v20208_v30 = vshll.u32 %v20207_v25, 16  ;;  %v20212_v19 = vld [vmem:[#allocation22_spill] sm:$0xff] }
 0x19a   : > { %v4940_v23 = vsel %vm14099_vm7, %v4938_v8, %v4939_v2  ;;  %v4949_v50 = vrot.slane %v20204_v48, 4  ;;  %v4950_v56 = vrot.slane %v20205_v27, 5  ;;  %v20209_v16 = vshrl.u32 %v20207_v25, 16 }
 0x19b   : > { %v4948_v51 = vsel %vm14099_vm7, %v4943_v22, %v4947_v9  ;;  %v4953_v35 = vrot.slane %v20208_v30, 5  ;;  %v4959_v2 = vshll.u32 %v3820_v24, 16  ;;  %12662 = vmatprep.mubr.bf16.mxu0 %v11308_v28  ;;  %v2140_v46 = vadd.f32 %v12380_v15, %v20210_v14  ;;  %v20215_v24 = vld [vmem:[#allocation26_spill] sm:$0xff]  ;;  %v12384_v28 = vpop.f32.mrf.mxu0 }
 0x19c   : > { %v4955_v60 = vrot.slane %v20209_v16, 4  ;;  %v11309_v37 = vcombine.low %v4940_v23, %v4948_v51  ;;  %v4951_v1 = vor.u32 %v4950_v56, %v4949_v50  ;;  %v20211_v63 = vshrl.u32 %v20201_v39, 16  ;;  %v12432_v23 = vpop.f32.mrf.mxu1  ;;  %v20216_v51 = vld [vmem:[#allocation24_spill] sm:$0xff] }
 0x19d   : > { %v4961_v20 = vrot.slane %v4959_v2, 5  ;;  %v20213_v9 = vshll.u32 %v20212_v19, 16  ;;  %v20214_v45 = vshrl.u32 %v20212_v19, 16  ;;  %v4973_v27 = vshll.u32 %v3824_v21, 16  ;;  %v2051_v21 = vpop.f32.mrf.mxu0 }
 0x19e   : > { %v4956_v41 = vor.u32 %v4955_v60, %v4953_v35  ;;  %v4963_v8 = vrot.slane %v20211_v63, 4  ;;  %v4952_v22 = vrot.slane %v4951_v1, 4  ;;  %v2138_v25 = vadd.f32 %v2035_v32, %v20215_v24  ;;  %12663 = vmatmul.mubr.bf16.gmra.mxu0 %v11309_v37  ;;  %v3828_v1 = vld [vmem:[#allocation2 + $0x8c] sm:$0x1]  ;;  %v2789_v14 = vpop.f32.mrf.mxu1 }
 0x19f   : > { %v4967_v18 = vrot.slane %v20213_v9, 5  ;;  %v4969_v48 = vrot.slane %v20214_v45, 4  ;;  %v15832_v15 = vadd.f32 %v12428_v0, %v2140_v46  ;;  %v2141_v30 = vadd.f32 %v12381_v55, %v20216_v51  ;;  %v12385_v9 = vpop.f32.mrf.mxu0  ;;  %v20221_v45 = vld [vmem:[#allocation23_spill] sm:$0xff] }
 0x1a0   : > { %v4957_v50 = vrot.slane %v4956_v41, 4  ;;  %v4965_v56 = vor.u32 %v4964_v38, %v4963_v8  ;;  %v4954_v39 = vsel %vm14099_vm7, %v4952_v22, %v4953_v35  ;;  %v4975_v60 = vrot.slane %v4973_v27, 5  ;;  %v20218_v41 = vld [vmem:[#allocation20_spill] sm:$0xff]  ;;  %v20225_v51 = vld [vmem:[#allocation15_spill] sm:$0xff] }
 0x1a1   : > { %v4970_v16 = vor.u32 %v4969_v48, %v4967_v18  ;;  %v15837_v2 = vadd.f32 %v2773_v40, %v2138_v25  ;;  %v20217_v32 = vshll.u32 %v15340_v59, 16  ;;  %v15843_v46 = vadd.f32 %v12429_v36, %v2141_v30  ;;  %v3832_v25 = vld [vmem:[#allocation2 + $0x9c] sm:$0x1] }
 0x1a2   : > { %v4962_v0 = vsel %vm14099_vm7, %v4957_v50, %v4961_v20  ;;  %v4966_v38 = vrot.slane %v4965_v56, 4  ;;  %v20219_v35 = vshrl.u32 %v20218_v41, 16  ;;  %v20220_v40 = vshll.u32 %v20218_v41, 16  ;;  %v12433_v50 = vpop.f32.mrf.mxu1  ;;  %v20224_v56 = vld [vmem:[#allocation14_spill] sm:$0xff] }
 0x1a3   : > { %v4992_v63 = vrot.slane %v20217_v32, 5  ;;  %v11310_v55 = vcombine.low %v4954_v39, %v4962_v0  ;;  %v4971_v37 = vrot.slane %v4970_v16, 4  ;;  %v20222_v48 = vshll.u32 %v20221_v45, 16  ;;  %v20226_v32 = vld [vmem:[#allocation28_spill] sm:$0xff] }
 0x1a4   : > { %v4977_v8 = vrot.slane %v20219_v35, 4  ;;  %v4978_v19 = vrot.slane %v20220_v40, 5  ;;  %v4968_v22 = vsel %vm14099_vm7, %v4966_v38, %v4967_v18  ;;  %v20223_v20 = vshrl.u32 %v20221_v45, 16 }
 0x1a5   : > { %v4981_v27 = vrot.slane %v20222_v48, 5  ;;  %v4987_v36 = vshll.u32 %v3828_v1, 16  ;;  %v1538_v30 = vadd.f32 %v20225_v51, %v20224_v56  ;;  %12666 = vmatprep.mubr.bf16.mxu0 %v11310_v55  ;;  %v4976_v39 = vsel %vm14099_vm7, %v4971_v37, %v4975_v60  ;;  %v2054_v51 = vpop.f32.mrf.mxu0  ;;  %v20230_v37 = vld [vmem:[#allocation31_spill] sm:$0xff] }
 0x1a6   : > { %v4983_v24 = vrot.slane %v20223_v20, 4  ;;  %v4979_v16 = vor.u32 %v4978_v19, %v4977_v8  ;;  %v2144_v0 = vadd.f32 %v12384_v28, %v20226_v32  ;;  %v11311_v18 = vcombine.low %v4968_v22, %v4976_v39  ;;  %v15869_v19 = vpop.f32.mrf.mxu1 }
 0x1a7   : > { %v4989_v41 = vrot.slane %v4987_v36, 5  ;;  %v20227_v35 = vshrl.u32 %v15340_v59, 16  ;;  %v20228_v1 = vshll.u32 %v15342_v49, 16  ;;  %v20229_v20 = vshrl.u32 %v15342_v49, 16  ;;  %v20231_v36 = vld [vmem:[#allocation33_spill] sm:$0xff] }
 0x1a8   : > { %v4984_v38 = vor.u32 %v4983_v24, %v4981_v27  ;;  %v4980_v45 = vrot.slane %v4979_v16, 4  ;;  %v5001_v55 = vshll.u32 %v3832_v25, 16  ;;  %v2142_v8 = vadd.f32 %v2051_v21, %v20230_v37  ;;  %12667 = vmatmul.mubr.bf16.gmra.mxu0 %v11311_v18 }
 0x1a9   : > { %v4991_v40 = vrot.slane %v20227_v35, 4  ;;  %v4995_v48 = vrot.slane %v20228_v1, 5  ;;  %v4997_v56 = vrot.slane %v20229_v20, 4  ;;  %v15867_v28 = vadd.f32 %v12432_v23, %v2144_v0  ;;  %v3836_v23 = vld [vmem:[#allocation2 + $0xac] sm:$0x1]  ;;  %v20236_v20 = vld [vmem:[#allocation35_spill] sm:$0xff] }
 0x1aa   : > { %v4985_v34 = vrot.slane %v4984_v38, 4  ;;  %v4982_v59 = vsel %vm14099_vm7, %v4980_v45, %v4981_v27  ;;  %v5003_v24 = vrot.slane %v5001_v55, 5  ;;  %v2145_v39 = vadd.f32 %v12385_v9, %v20231_v36  ;;  %v12388_v38 = vpop.f32.mrf.mxu0  ;;  %v12436_v45 = vpop.f32.mrf.mxu1  ;;  %v3840_v55 = vld [vmem:[#allocation2 + $0xbc] sm:$0x1] }
 0x1ab   : > { %v4993_v60 = vor.u32 %v4992_v63, %v4991_v40  ;;  %v4998_v22 = vor.u32 %v4997_v56, %v4995_v48  ;;  %v15876_v16 = vadd.f32 %v2789_v14, %v2142_v8  ;;  %v15878_v63 = vadd.f32 %v2054_v51, %v1538_v30 }
 0x1ac   : > { %v4990_v49 = vsel %vm14099_vm7, %v4985_v34, %v4989_v41  ;;  %v15880_v0 = vadd.f32 %v12433_v50, %v2145_v39  ;;  %v20232_v18 = vshrl.u32 %v15396_v53, 16  ;;  %v20233_v35 = vshll.u32 %v15396_v53, 16  ;;  %v2067_v51 = vpop.f32.mrf.mxu0 }
 0x1ad   : > { %v4994_v25 = vrot.slane %v4993_v60, 4  ;;  %v11312_v21 = vcombine.low %v4982_v59, %v4990_v49  ;;  %v4999_v32 = vrot.slane %v4998_v22, 4  ;;  %v20234_v14 = vshll.u32 %v15408_v47, 16  ;;  %v2805_v59 = vpop.f32.mrf.mxu1 }
 0x1ae   : > { %v5005_v27 = vrot.slane %v20232_v18, 4  ;;  %v5006_v34 = vrot.slane %v20233_v35, 5  ;;  %v20235_v30 = vshrl.u32 %v15408_v47, 16  ;;  %v5015_v1 = vshll.u32 %v3836_v23, 16  ;;  %v12389_v23 = vpop.f32.mrf.mxu0 }
 0x1af   : > { %v4996_v9 = vsel %vm14099_vm7, %v4994_v25, %v4995_v48  ;;  %v5009_v41 = vrot.slane %v20234_v14, 5  ;;  %12670 = vmatprep.mubr.bf16.mxu0 %v11312_v21  ;;  %v5004_v50 = vsel %vm14099_vm7, %v4999_v32, %v5003_v24  ;;  %v2148_v56 = vadd.f32 %v12388_v38, %v20236_v20  ;;  %v20242_v14 = vld [vmem:[#allocation39_spill] sm:$0xff]  ;;  %v3844_v20 = vld [vmem:[#allocation2 + $0xcc] sm:$0x1] }
 0x1b0   : > { %v5011_v40 = vrot.slane %v20235_v30, 4  ;;  %v11313_v48 = vcombine.low %v4996_v9, %v5004_v50  ;;  %v5007_v60 = vor.u32 %v5006_v34, %v5005_v27  ;;  %v20237_v37 = vshrl.u32 %v15420_v31, 16  ;;  %v20241_v27 = vld [vmem:[#allocation37_spill] sm:$0xff]  ;;  %v12437_v30 = vpop.f32.mrf.mxu1 }
 0x1b1   : > { %v5017_v22 = vrot.slane %v5015_v1, 5  ;;  %v20238_v47 = vshll.u32 %v15420_v31, 16  ;;  %v20239_v39 = vshll.u32 %v15432_v4, 16  ;;  %v20240_v24 = vshrl.u32 %v15432_v4, 16 }
 0x1b2   : > { %v5012_v53 = vor.u32 %v5011_v40, %v5009_v41  ;;  %v5019_v8 = vrot.slane %v20237_v37, 4  ;;  %v5008_v21 = vrot.slane %v5007_v60, 4  ;;  %v5029_v18 = vshll.u32 %v3840_v55, 16  ;;  %12671 = vmatmul.mubr.bf16.gmra.mxu0 %v11313_v48  ;;  %v15913_v60 = vpop.f32.mrf.mxu0 }
 0x1b3   : > { %v5020_v36 = vrot.slane %v20238_v47, 5  ;;  %v5023_v49 = vrot.slane %v20239_v39, 5  ;;  %v5025_v25 = vrot.slane %v20240_v24, 4  ;;  %v2146_v38 = vadd.f32 %v2067_v51, %v20241_v27 }
 0x1b4   : > { %v5013_v32 = vrot.slane %v5012_v53, 4  ;;  %v15904_v34 = vadd.f32 %v12436_v45, %v2148_v56  ;;  %v2149_v31 = vadd.f32 %v12389_v23, %v20242_v14  ;;  %v5010_v40 = vsel %vm14099_vm7, %v5008_v21, %v5009_v41  ;;  %v15929_v23 = vpop.f32.mrf.mxu1  ;;  %v3848_v21 = vld [vmem:[#allocation2 + $0xdc] sm:$0x1] }
 0x1b5   : > { %v5021_v9 = vor.u32 %v5020_v36, %v5019_v8  ;;  %v5026_v35 = vor.u32 %v5025_v25, %v5023_v49  ;;  %v5031_v50 = vrot.slane %v5029_v18, 5  ;;  %v15911_v1 = vadd.f32 %v2805_v59, %v2146_v38  ;;  %v20245_v8 = vld [vmem:[#allocation36_spill] sm:$0xff] }
 0x1b6   : > { %v5018_v4 = vsel %vm14099_vm7, %v5013_v32, %v5017_v22  ;;  %v15915_v45 = vadd.f32 %v12437_v30, %v2149_v31  ;;  %v20243_v56 = vshrl.u32 %v15476_v11, 16  ;;  %v20244_v37 = vshll.u32 %v15476_v11, 16 }
 0x1b7   : > { %v11314_v55 = vcombine.low %v5010_v40, %v5018_v4  ;;  %v5022_v51 = vrot.slane %v5021_v9, 4  ;;  %v5027_v48 = vrot.slane %v5026_v35, 4  ;;  %v20246_v47 = vshll.u32 %v20245_v8, 16  ;;  %v12392_v40 = vpop.f32.mrf.mxu0 }
 0x1b8   : > { %v5033_v53 = vrot.slane %v20243_v56, 4  ;;  %v5034_v41 = vrot.slane %v20244_v37, 5  ;;  %v20247_v39 = vshrl.u32 %v20245_v8, 16  ;;  %v5043_v25 = vshll.u32 %v3844_v20, 16  ;;  %v20253_v56 = vld [vmem:[#allocation41_spill] sm:$0xff] }
 0x1b9   : > { %v5037_v22 = vrot.slane %v20246_v47, 5  ;;  %12674 = vmatprep.mubr.bf16.mxu0 %v11314_v55  ;;  %v5024_v59 = vsel %vm14099_vm7, %v5022_v51, %v5023_v49  ;;  %v5032_v36 = vsel %vm14099_vm7, %v5027_v48, %v5031_v50  ;;  %v20248_v18 = vshrl.u32 %v15511_v42, 16 }
 0x1ba   : > { %v5039_v24 = vrot.slane %v20247_v39, 4  ;;  %v11315_v32 = vcombine.low %v5024_v59, %v5032_v36  ;;  %v5035_v11 = vor.u32 %v5034_v41, %v5033_v53  ;;  %v5045_v9 = vrot.slane %v5043_v25, 5  ;;  %v12440_v41 = vpop.f32.mrf.mxu1  ;;  %v3852_v39 = vld [vmem:[#allocation2 + $0xec] sm:$0x1] }
 0x1bb   : > { %v5047_v27 = vrot.slane %v20248_v18, 4  ;;  %v20249_v35 = vshll.u32 %v15511_v42, 16  ;;  %v20250_v14 = vshll.u32 %v15521_v26, 16  ;;  %v20251_v4 = vshrl.u32 %v15521_v26, 16  ;;  %v2083_v26 = vpop.f32.mrf.mxu0 }
 0x1bc   : > { %v5040_v38 = vor.u32 %v5039_v24, %v5037_v22  ;;  %v5036_v30 = vrot.slane %v5035_v11, 4  ;;  %v5057_v20 = vshll.u32 %v3848_v21, 16  ;;  %v20252_v55 = vshrl.u32 %v15551_v12, 16  ;;  %12675 = vmatmul.mubr.bf16.gmra.mxu0 %v11315_v32  ;;  %v20256_v11 = vld [vmem:[#allocation42_spill] sm:$0xff] }
 0x1bd   : > { %v5048_v49 = vrot.slane %v20249_v35, 5  ;;  %v5051_v31 = vrot.slane %v20250_v14, 5  ;;  %v5053_v50 = vrot.slane %v20251_v4, 4  ;;  %v2152_v53 = vadd.f32 %v12392_v40, %v20253_v56  ;;  %v13244_v40 = vld [vmem:[%s19676_s2 + $0x78] sm:$0xff]  }
 0x1be   : > { %v5061_v51 = vrot.slane %v20252_v55, 4  ;;  %v5041_v48 = vrot.slane %v5040_v38, 4  ;;  %v20254_v42 = vshll.u32 %v15551_v12, 16  ;;  %v5038_v47 = vsel %vm14099_vm7, %v5036_v30, %v5037_v22  ;;  %v2821_v12 = vpop.f32.mrf.mxu1  ;;  %v20258_v4 = vld [vmem:[#allocation43_spill] sm:$0xff]  ;;  %12690 = vmatprep.subr.bf16.mxu1 %v13244_v40 }
 0x1bf   : > { %v5049_v37 = vor.u32 %v5048_v49, %v5047_v27  ;;  %v5054_v59 = vor.u32 %v5053_v50, %v5051_v31  ;;  %v5059_v36 = vrot.slane %v5057_v20, 5  ;;  %v20255_v24 = vshll.u32 %v15553_v5, 16  ;;  %v12393_v49 = vpop.f32.mrf.mxu0  ;;  %12691 = vmatpush3.bf16.msra.mxu1 %v13244_v40 }
 0x1c0   : > { %v5062_v8 = vrot.slane %v20254_v42, 5  ;;  %v5046_v21 = vsel %vm14099_vm7, %v5041_v48, %v5045_v9  ;;  %v2150_v18 = vadd.f32 %v2083_v26, %v20256_v11  ;;  %v15951_v27 = vadd.f32 %v12440_v41, %v2152_v53  ;;  %v12441_v55 = vpop.f32.mrf.mxu1  ;;  %v3856_v53 = vld [vmem:[#allocation2 + $0xfc] sm:$0x1] }
 0x1c1   : > { %v5065_v25 = vrot.slane %v20255_v24, 5  ;;  %v5050_v32 = vrot.slane %v5049_v37, 4  ;;  %v11316_v38 = vcombine.low %v5038_v47, %v5046_v21  ;;  %v5055_v35 = vrot.slane %v5054_v59, 4  ;;  %v15969_v47 = vpop.f32.mrf.mxu0  ;;  %v20261_v21 = vld [vmem:[#allocation44_spill] sm:$0xff] }
 0x1c2   : > { %v5063_v22 = vor.u32 %v5062_v8, %v5061_v51  ;;  %v20257_v14 = vshrl.u32 %v15553_v5, 16  ;;  %v2153_v50 = vadd.f32 %v12393_v49, %v20258_v4  ;;  %v15961_v20 = vadd.f32 %v2821_v12, %v2150_v18  ;;  %v436_v18 = vld [vmem:[#allocation2 + $0x11c] sm:$0x1]  ;;  %v3860_v49 = vld [vmem:[#allocation2 + $0x10c] sm:$0x1] }
 0x1c3   : > { %v5052_v9 = vsel %vm14099_vm7, %v5050_v32, %v5051_v31  ;;  %v5071_v48 = vshll.u32 %v3852_v39, 16  ;;  %12678 = vmatprep.mubr.bf16.mxu0 %v11316_v38  ;;  %v5060_v51 = vsel %vm14099_vm7, %v5055_v35, %v5059_v36  ;;  %v20259_v37 = vshrl.u32 %v15583_v57, 16  ;;  %v15973_v39 = vpop.f32.mrf.mxu1 }
 0x1c4   : > { %v5067_v30 = vrot.slane %v20257_v14, 4  ;;  %v5064_v56 = vrot.slane %v5063_v22, 4  ;;  %v11317_v42 = vcombine.low %v5052_v9, %v5060_v51  ;;  %v15967_v8 = vadd.f32 %v12441_v55, %v2153_v50 }
 0x1c5   : > { %v5075_v41 = vrot.slane %v20259_v37, 4  ;;  %v5073_v31 = vrot.slane %v5071_v48, 5  ;;  %v20260_v36 = vshll.u32 %v15583_v57, 16  ;;  %v20262_v32 = vshll.u32 %v20261_v21, 16  ;;  %v12444_v37 = vpop.f32.mrf.mxu1 }
 0x1c6   : > { %v5068_v5 = vor.u32 %v5067_v30, %v5065_v25  ;;  %v5066_v59 = vsel %vm14099_vm7, %v5064_v56, %v5065_v25  ;;  %12679 = vmatmul.mubr.bf16.gmra.mxu0 %v11317_v42  ;;  %v20263_v12 = vshrl.u32 %v20261_v21, 16  ;;  %v5085_v35 = vshll.u32 %v3856_v53, 16  ;;  %v20335_v21 = vld [vmem:[#allocation18_spill] sm:$0xff] }
 0x1c7   : > { %v5076_v24 = vrot.slane %v20260_v36, 5  ;;  %v5079_v11 = vrot.slane %v20262_v32, 5  ;;  %v20264_v22 = vshrl.u32 %v15617_v3, 16  ;;  %v20265_v57 = vshll.u32 %v15617_v3, 16  ;;  %v13245_v3 = vld [vmem:[%s19676_s2 + $0x70] sm:$0xff]  }
 0x1c8   : > { %v5069_v26 = vrot.slane %v5068_v5, 4  ;;  %v5081_v38 = vrot.slane %v20263_v12, 4  ;;  %v20266_v9 = vshll.u32 %v15625_v10, 16  ;;  %v5087_v48 = vrot.slane %v5085_v35, 5  ;;  %v12396_v5 = vpop.f32.mrf.mxu0  ;;  %v2837_v35 = vpop.f32.mrf.mxu1  ;;  %12692 = vmatprep.subr.bf16.mxu1 %v13245_v3 }
 0x1c9   : > { %v5089_v14 = vrot.slane %v20264_v22, 4  ;;  %v5077_v30 = vor.u32 %v5076_v24, %v5075_v41  ;;  %v5090_v40 = vrot.slane %v20265_v57, 5  ;;  %v20267_v51 = vshrl.u32 %v15625_v10, 16  ;;  %12693 = vmatpush3.bf16.msra.mxu1 %v13245_v3 }
 0x1ca   : > { %v5074_v25 = vsel %vm14099_vm7, %v5069_v26, %v5073_v31  ;;  %v5093_v4 = vrot.slane %v20266_v9, 5  ;;  %v5082_v55 = vor.u32 %v5081_v38, %v5079_v11  ;;  %v5099_v36 = vshll.u32 %v3860_v49, 16  ;;  %v20269_v31 = vld [vmem:[#allocation46_spill] sm:$0xff]  ;;  %v2099_v38 = vpop.f32.mrf.mxu0 }
 0x1cb   : > { %v11318_v50 = vcombine.low %v5066_v59, %v5074_v25  ;;  %v5095_v56 = vrot.slane %v20267_v51, 4  ;;  %v5078_v53 = vrot.slane %v5077_v30, 4  ;;  %v5091_v42 = vor.u32 %v5090_v40, %v5089_v14  ;;  %v20272_v30 = vld [vmem:[#allocation47_spill] sm:$0xff] }
 0x1cc   : > { %v437_v41 = vsel %vm13913_vm4, 0, %v436_v18  ;;  %v2156_v59 = vadd.f32 %v12396_v5, %v20269_v31  ;;  %v5083_v26 = vrot.slane %v5082_v55, 4  ;;  %v20270_v10 = vshrl.u32 %v15647_v29, 16  ;;  %v12397_v55 = vpop.f32.mrf.mxu0 }
 0x1cd   : > { %12682 = vmatprep.mubr.bf16.mxu0 %v11318_v50  ;;  %v5096_v24 = vor.u32 %v5095_v56, %v5093_v4  ;;  %438 = vst [vmem:[#allocation2 + $0x11c] sm:$0x1] %v437_v41  ;;  %v5080_v12 = vsel %vm14099_vm7, %v5078_v53, %v5079_v11  ;;  %v5092_v49 = vrot.slane %v5091_v42, 4  ;;  %v5101_v18 = vrot.slane %v5099_v36, 5  ;;  %v12445_v11 = vpop.f32.mrf.mxu1  ;;  %v20274_v53 = vld [vmem:[#allocation48_spill] sm:$0xff] }
 0x1ce   : > { %v5103_v32 = vrot.slane %v20270_v10, 4  ;;  %v20271_v22 = vshll.u32 %v15647_v29, 16  ;;  %v5088_v25 = vsel %vm14099_vm7, %v5083_v26, %v5087_v48  ;;  %v2154_v57 = vadd.f32 %v2099_v38, %v20272_v30  ;;  %v13246_v10 = vld [vmem:[%s19676_s2 + $0x68] sm:$0xff]   ;;  %v20277_v30 = vld [vmem:[#allocation52_spill] sm:$0xff] }
 0x1cf   : > { %v16006_v40 = vadd.f32 %v12444_v37, %v2156_v59  ;;  %v5097_v9 = vrot.slane %v5096_v24, 4  ;;  %v11319_v50 = vcombine.low %v5080_v12, %v5088_v25  ;;  %v5094_v51 = vsel %vm14099_vm7, %v5092_v49, %v5093_v4  ;;  %12694 = vmatprep.subr.bf16.mxu1 %v13246_v10 }
 0x1d0   : > { %v5104_v14 = vrot.slane %v20271_v22, 5  ;;  %v20273_v29 = vshll.u32 %v15655_v7, 16  ;;  %v2157_v42 = vadd.f32 %v12397_v55, %v20274_v53  ;;  %v16013_v36 = vadd.f32 %v2837_v35, %v2154_v57  ;;  %12695 = vmatpush3.bf16.msra.mxu1 %v13246_v10  ;;  %v20278_v55 = vld [vmem:[#allocation53_spill] sm:$0xff] }
 0x1d1   : > { %v5102_v48 = vsel %vm14099_vm7, %v5097_v9, %v5101_v18  ;;  %v20275_v37 = vshrl.u32 %v15655_v7, 16  ;;  %12683 = vmatmul.mubr.bf16.gmra.mxu0 %v11319_v50  ;;  %v20276_v18 = vld [vmem:[#allocation51_spill] sm:$0xff]  ;;  %v13247_v9 = vld [vmem:[%s19676_s2 + $0x60] sm:$0xff]  }
 0x1d2   : > { %v5105_v56 = vor.u32 %v5104_v14, %v5103_v32  ;;  %v5107_v5 = vrot.slane %v20273_v29, 5  ;;  %v11320_v3 = vcombine.low %v5094_v51, %v5102_v48  ;;  %v16019_v59 = vadd.f32 %v12445_v11, %v2157_v42  ;;  %v16026_v32 = vpop.f32.mrf.mxu0  ;;  %12696 = vmatprep.subr.bf16.mxu1 %v13247_v9  ;;  %v16036_v51 = vpop.f32.mrf.mxu1 }
 0x1d3   : > { %v5109_v41 = vrot.slane %v20275_v37, 4 }
 0x1d4   : > { %v5106_v31 = vrot.slane %v5105_v56, 4  ;;  %12686 = vmatprep.mubr.bf16.mxu0 %v11320_v3  ;;  %v3864_v26 = vld [vmem:[#allocation2 + $0x11c] sm:$0x1]  ;;  %v12400_v35 = vpop.f32.mrf.mxu0  ;;  %12697 = vmatpush3.bf16.msra.mxu1 %v13247_v9  ;;  %v12448_v53 = vpop.f32.mrf.mxu1 }
 0x1d5   : > { %v5110_v4 = vor.u32 %v5109_v41, %v5107_v5  ;;  %v5113_v7 = vshll.u32 %v3864_v26, 16  ;;  %v2160_v22 = vadd.f32 %v12400_v35, %v20276_v18  ;;  %v13248_v41 = vld [vmem:[%s19676_s2 + $0x58] sm:$0xff]  }
 0x1d6   : > { %v5108_v24 = vsel %vm14099_vm7, %v5106_v31, %v5107_v5  ;;  %v2115_v25 = vpop.f32.mrf.mxu0  ;;  %v2853_v3 = vpop.f32.mrf.mxu1  ;;  %12698 = vmatprep.subr.bf16.mxu1 %v13248_v41 }
 0x1d7   : > { %v5111_v12 = vrot.slane %v5110_v4, 4  ;;  %v5115_v38 = vrot.slane %v5113_v7, 5  ;;  %v2158_v57 = vadd.f32 %v2115_v25, %v20277_v30  ;;  %v16043_v48 = vadd.f32 %v12448_v53, %v2160_v22  ;;  %v13249_v7 = vld [vmem:[%s19676_s2 + $0x38] sm:$0xff]  }
 0x1d8   : > { %v12401_v50 = vpop.f32.mrf.mxu0  ;;  %12699 = vmatpush3.bf16.msra.mxu1 %v13248_v41  ;;  %12738 = vmatprep.subr.bf16.mxu0 %v13249_v7  ;;  %v13254_v41 = vld [vmem:[%s19676_s2 + $0x20] sm:$0xff]  }
 0x1d9   : > { %v5116_v49 = vsel %vm14099_vm7, %v5111_v12, %v5115_v38  ;;  %v2161_v11 = vadd.f32 %v12401_v50, %v20278_v55  ;;  %v16051_v4 = vadd.f32 %v2853_v3, %v2158_v57  ;;  %12739 = vmatpush3.bf16.msra.mxu0 %v13249_v7 }
 0x1da   : > { %v11321_v14 = vcombine.low %v5108_v24, %v5116_v49  ;;  %v16038_v56 = vpop.f32.mrf.mxu0 }
 0x1dc   : > { %12687 = vmatmul.mubr.bf16.gmra.mxu0 %v11321_v14  ;;  %v12468_v29 = vpop.f32.mrf.mxu0  ;;  %v13251_v14 = vld [vmem:[%s19676_s2 + $0x30] sm:$0xff]  }
 0x1dd   : > { %v16041_v5 = vadd.f32 %v12468_v29, %v15748_v61  ;;  %v12449_v61 = vpop.f32.mrf.mxu1  ;;  %12740 = vmatprep.subr.bf16.mxu0 %v13251_v14 }
 0x1de   : > { %v3095_v42 = vpop.f32.mrf.mxu0  ;;  %v16058_v10 = vadd.f32 %v12449_v61, %v2161_v11  ;;  %12741 = vmatpush3.bf16.msra.mxu0 %v13251_v14 }
 0x1df   : > { %v16046_v37 = vadd.f32 %v3095_v42, %v15757_v6  ;;  %v16060_v6 = vpop.f32.mrf.mxu1 }
 0x1e0   : > { %v12469_v31 = vpop.f32.mrf.mxu0 }
 0x1e1   : > { %v16054_v26 = vadd.f32 %v12469_v31, %v15771_v62  ;;  %v16068_v35 = vpop.f32.mrf.mxu1 }
 0x1e2   : > { %v16056_v24 = vpop.f32.mrf.mxu0 }
 0x1e3   : > { %v16073_v18 = vpop.f32.mrf.mxu1 }
 0x1e4   : > { %v12472_v12 = vpop.f32.mrf.mxu0 }
 0x1e5   : > { %v16066_v38 = vadd.f32 %v12472_v12, %v15792_v43  ;;  %v13250_v43 = vld [vmem:[%s19676_s2 + $0x50] sm:$0xff]   ;;  %v16084_v30 = vpop.f32.mrf.mxu1 }
 0x1e6   : > { %v3111_v62 = vpop.f32.mrf.mxu0  ;;  %12700 = vmatprep.subr.bf16.mxu1 %v13250_v43 }
 0x1e7   : > { %v16071_v49 = vadd.f32 %v3111_v62, %v15799_v44  ;;  %v16088_v44 = vpop.f32.mrf.mxu1  ;;  %12701 = vmatpush3.bf16.msra.mxu1 %v13250_v43 }
 0x1e8   : > { %v12473_v22 = vpop.f32.mrf.mxu0 }
 0x1e9   : > { %v16079_v25 = vadd.f32 %v12473_v22, %v15806_v52  ;;  %v13252_v52 = vld [vmem:[%s19676_s2 + $0x28] sm:$0xff]   ;;  %v16096_v55 = vpop.f32.mrf.mxu1 }
 0x1ea   : > { %v16086_v57 = vpop.f32.mrf.mxu0  ;;  %12742 = vmatprep.subr.bf16.mxu0 %v13252_v52 }
 0x1eb   : > { %12743 = vmatpush3.bf16.msra.mxu0 %v13252_v52  ;;  %v16101_v53 = vpop.f32.mrf.mxu1  ;;  %v13257_v52 = vld [vmem:[%s19676_s2 + $0x10] sm:$0xff]  }
 0x1ec   : > { %v12476_v9 = vpop.f32.mrf.mxu0  ;;  %12744 = vmatprep.subr.bf16.mxu0 %v13254_v41 }
 0x1ed   : > { %v16094_v50 = vadd.f32 %v12476_v9, %v15832_v15  ;;  %v13253_v15 = vld [vmem:[%s19676_s2 + $0x48] sm:$0xff]   ;;  %v16112_v31 = vpop.f32.mrf.mxu1 }
 0x1ee   : > { %v3127_v11 = vpop.f32.mrf.mxu0  ;;  %12702 = vmatprep.subr.bf16.mxu1 %v13253_v15 }
 0x1ef   : > { %v16099_v29 = vadd.f32 %v3127_v11, %v15837_v2  ;;  %12745 = vmatpush3.bf16.msra.mxu0 %v13254_v41  ;;  %v16116_v2 = vpop.f32.mrf.mxu1  ;;  %12703 = vmatpush3.bf16.msra.mxu1 %v13253_v15  ;;  %v16146_v15 = vld [vmem:[#allocation3 + $0x8] sm:$0xf] }
 0x1f0   : > { %v12477_v42 = vpop.f32.mrf.mxu0  ;;  %20285 = vst [vmem:[#allocation22_spill] sm:$0xff] %v16146_v15 }
 0x1f1   : > { %v16107_v3 = vadd.f32 %v12477_v42, %v15843_v46  ;;  %v13255_v46 = vld [vmem:[%s19676_s2 + $0x18] sm:$0xff]   ;;  %v16124_v62 = vpop.f32.mrf.mxu1 }
 0x1f2   : > { %v16114_v61 = vpop.f32.mrf.mxu0  ;;  %12746 = vmatprep.subr.bf16.mxu0 %v13255_v46 }
 0x1f3   : > { %20279 = vst [vmem:[#allocation17_spill] sm:$0xff] %v16107_v3  ;;  %12747 = vmatpush3.bf16.msra.mxu0 %v13255_v46  ;;  %v16129_v43 = vpop.f32.mrf.mxu1 }
 0x1f4   : > { %v12480_v12 = vpop.f32.mrf.mxu0  ;;  %12748 = vmatprep.subr.bf16.mxu0 %v13257_v52 }
 0x1f5   : > { %v16122_v7 = vadd.f32 %v12480_v12, %v15867_v28  ;;  %v13256_v28 = vld [vmem:[%s19676_s2 + $0x40] sm:$0xff]   ;;  %v16140_v42 = vpop.f32.mrf.mxu1 }
 0x1f6   : > { %v3143_v22 = vpop.f32.mrf.mxu0  ;;  %20283 = vst [vmem:[#allocation16_spill] sm:$0xff] %v16140_v42  ;;  %12704 = vmatprep.subr.bf16.mxu1 %v13256_v28  ;;  %v20296_v42 = vshll.u32 %v16146_v15, 16 }
 0x1f7   : > { %20280 = vst [vmem:[#allocation21_spill] sm:$0xff] %v16122_v7  ;;  %v16127_v14 = vadd.f32 %v3143_v22, %v15876_v16  ;;  %12749 = vmatpush3.bf16.msra.mxu0 %v13257_v52  ;;  %v16144_v16 = vld [vmem:[#allocation3 + $0x4] sm:$0xf]  ;;  %v16148_v12 = vpop.f32.mrf.mxu1  ;;  %12705 = vmatpush3.bf16.msra.mxu1 %v13256_v28 }
 0x1f8   : > { %v12481_v9 = vpop.f32.mrf.mxu0  ;;  %20286 = vst [vmem:[#allocation26_spill] sm:$0xff] %v16148_v12  ;;  %12750 = vmatprep.subr.bf16.mxu0 %v13259_v54 }
 0x1f9   : > { %20281 = vst [vmem:[#allocation19_spill] sm:$0xff] %v16127_v14  ;;  %v16135_v11 = vadd.f32 %v12481_v9, %v15880_v0  ;;  %v19815_v0 = vshrl.u32 %v16144_v16, 16  ;;  %v11396_v9 = vcombine.low %v16144_v16, %v16146_v15 }
 0x1fa   : > { %v16142_v41 = vpop.f32.mrf.mxu0 }
 0x1fb   : > { %20282 = vst [vmem:[#allocation12_spill] sm:$0xff] %v16135_v11  ;;  %20284 = vst [vmem:[#allocation25_spill] sm:$0xff] %v16142_v41  ;;  %v16160_v11 = vpop.f32.mrf.mxu1  ;;  %12706 = vmatprep.mubr.bf16.mxu1 %v11396_v9  ;;  %v5890_v22 = vrot.slane %v19815_v0, 7  ;;  %v19817_v41 = vshll.u32 %v16144_v16, 16  ;;  %12751 = vmatpush3.bf16.msra.mxu0 %v13259_v54 }
 0x1fc   : > { %v12484_v46 = vpop.f32.mrf.mxu0  ;;  %20288 = vst [vmem:[#allocation20_spill] sm:$0xff] %v16160_v11  ;;  %v5818_v11 = vld [vmem:[#allocation3] sm:$0xf] }
 0x1fd   : > { %v16158_v52 = vadd.f32 %v12484_v46, %v15904_v34  ;;  %v16168_v7 = vpop.f32.mrf.mxu1  ;;  %v20291_v34 = vshrl.u32 %v16146_v15, 16  ;;  %v5883_v54 = vshrl.u32 %v5818_v11, 16 }
 0x1fe   : > { %v3159_v14 = vpop.f32.mrf.mxu0  ;;  %20290 = vst [vmem:[#allocation14_spill] sm:$0xff] %v16168_v7 }
 0x1ff   : > { %20287 = vst [vmem:[#allocation24_spill] sm:$0xff] %v16158_v52  ;;  %v16163_v28 = vadd.f32 %v3159_v14, %v15911_v1  ;;  %v5899_v46 = vrot.slane %v20291_v34, 7  ;;  %v16177_v1 = vld [vmem:[%s19676_s2 + $0xb8] sm:$0xff]   ;;  %v16179_v14 = vpop.f32.mrf.mxu1  ;;  %v13263_v34 = vld [vmem:[%s19676_s2] sm:$0xff]   ;;  %v5893_v52 = vor.u32 %v19817_v41, %v5890_v22  ;;  %v11364_v7 = vrot.slane %v5883_v54, 11 }
 0x200   : > { %v12485_v12 = vpop.f32.mrf.mxu0  ;;  %20292 = vst [vmem:[#allocation15_spill] sm:$0xff] %v16177_v1  ;;  %20293 = vst [vmem:[#allocation28_spill] sm:$0xff] %v16179_v14  ;;  %12786 = vmatprep.subr.bf16.mxu1 %v16177_v1  ;;  %12752 = vmatprep.subr.bf16.mxu0 %v13263_v34 }
 0x201   : > { %20289 = vst [vmem:[#allocation23_spill] sm:$0xff] %v16163_v28  ;;  %v3241_v9 = vadd.f32 %v12485_v12, %v15915_v45  ;;  %v5895_v45 = vrot.slane %v5890_v22, 4  ;;  %v16189_v12 = vpop.f32.mrf.mxu1  ;;  %v5902_v14 = vor.u32 %v20296_v42, %v5899_v46  ;;  %12753 = vmatpush3.bf16.msra.mxu0 %v13263_v34  ;;  %v5894_v3 = vsel %vm13652_vm2, %v11364_v7, %v5893_v52 }
 0x202   : > { %v16181_v0 = vpop.f32.mrf.mxu0  ;;  %20295 = vst [vmem:[#allocation33_spill] sm:$0xff] %v16189_v12 }
 0x203   : > { %20294 = vst [vmem:[#allocation31_spill] sm:$0xff] %v16181_v0  ;;  %v16194_v11 = vpop.f32.mrf.mxu1  ;;  %v5903_v22 = vsel %vm13652_vm2, %v5895_v45, %v5902_v14 }
 0x204   : > { %v12488_v28 = vpop.f32.mrf.mxu0  ;;  %v11420_v12 = vcombine.low %v5894_v3, %v5903_v22 }
 0x205   : > { %v3244_v0 = vadd.f32 %v12488_v28, %v15951_v27  ;;  %v16201_v54 = vpop.f32.mrf.mxu1 }
 0x206   : > { %v3175_v1 = vpop.f32.mrf.mxu0  ;;  %12754 = vmatprep.mubr.bf16.mxu0 %v11420_v12 }
 0x207   : > { %v3242_v41 = vadd.f32 %v3175_v1, %v15961_v20  ;;  %v12533_v27 = vpop.f32.mrf.mxu1 }
 0x208   : > { %v12489_v15 = vpop.f32.mrf.mxu0  ;;  %v16206_v46 = vadd.f32 %v12533_v27, %v3241_v9 }
 0x209   : > { %v3245_v42 = vadd.f32 %v12489_v15, %v15967_v8  ;;  %v16208_v34 = vpop.f32.mrf.mxu1 }
 0x20a   : > { %v16204_v28 = vpop.f32.mrf.mxu0 }
 0x20b   : > { %v12536_v14 = vpop.f32.mrf.mxu1 }
 0x20c   : > { %v12492_v7 = vpop.f32.mrf.mxu0  ;;  %v16211_v20 = vadd.f32 %v12536_v14, %v3244_v0 }
 0x20d   : > { %v3248_v52 = vadd.f32 %v12492_v7, %v16006_v40  ;;  %v3721_v1 = vpop.f32.mrf.mxu1  ;;  %v5574_v7 = vld [vmem:[#allocation3 + $0x1c] sm:$0x1] }
 0x20e   : > { %v3191_v45 = vpop.f32.mrf.mxu0  ;;  %v16214_v8 = vadd.f32 %v3721_v1, %v3242_v41 }
 0x20f   : > { %v3246_v3 = vadd.f32 %v3191_v45, %v16013_v36  ;;  %v12537_v12 = vpop.f32.mrf.mxu1  ;;  %v5575_v36 = vsel %vm13913_vm4, 0, %v5574_v7 }
 0x210   : > { %v12493_v22 = vpop.f32.mrf.mxu0  ;;  %20297 = vst [vmem:[#allocation35_spill] sm:$0xff] %v16214_v8  ;;  %v16219_v27 = vadd.f32 %v12537_v12, %v3245_v42  ;;  %5576 = vst [vmem:[#allocation3 + $0x1c] sm:$0x1] %v5575_v36 }
 0x211   : > { %v3249_v15 = vadd.f32 %v12493_v22, %v16019_v59  ;;  %v16221_v33 = vpop.f32.mrf.mxu1 }
 0x212   : > { %v16217_v9 = vpop.f32.mrf.mxu0  ;;  %20298 = vst [vmem:[#allocation37_spill] sm:$0xff] %v16219_v27 }
 0x213   : > { %v12540_v14 = vpop.f32.mrf.mxu1 }
 0x214   : > { %v12496_v40 = vpop.f32.mrf.mxu0  ;;  %v16226_v41 = vadd.f32 %v12540_v14, %v3248_v52 }
 0x215   : > { %v3252_v0 = vadd.f32 %v12496_v40, %v16043_v48  ;;  %v3737_v1 = vpop.f32.mrf.mxu1 }
 0x216   : > { %v3207_v45 = vpop.f32.mrf.mxu0  ;;  %20299 = vst [vmem:[#allocation39_spill] sm:$0xff] %v16226_v41  ;;  %v16229_v42 = vadd.f32 %v3737_v1, %v3246_v3 }
 0x217   : > { %v3250_v59 = vadd.f32 %v3207_v45, %v16051_v4  ;;  %v12541_v27 = vpop.f32.mrf.mxu1 }
 0x218   : > { %v12497_v22 = vpop.f32.mrf.mxu0  ;;  %20300 = vst [vmem:[#allocation36_spill] sm:$0xff] %v16229_v42  ;;  %v16234_v48 = vadd.f32 %v12541_v27, %v3249_v15 }
 0x219   : > { %v3253_v12 = vadd.f32 %v12497_v22, %v16058_v10  ;;  %v16236_v40 = vpop.f32.mrf.mxu1 }
 0x21a   : > { %v16232_v8 = vpop.f32.mrf.mxu0  ;;  %20301 = vst [vmem:[#allocation41_spill] sm:$0xff] %v16234_v48  ;;  %20302 = vst [vmem:[#allocation42_spill] sm:$0xff] %v16236_v40  ;;  %v20340_v40 = vld [vmem:[#allocation38_spill] sm:$0xff] }
 0x21b   : > { %v12544_v36 = vpop.f32.mrf.mxu1 }
 0x21c   : > { %v16238_v7 = vpop.f32.mrf.mxu0  ;;  %v16242_v14 = vadd.f32 %v12544_v36, %v3252_v0 }
 0x21d   : > { %20303 = vst [vmem:[#allocation43_spill] sm:$0xff] %v16238_v7  ;;  %v3753_v4 = vpop.f32.mrf.mxu1  ;;  %v20341_v7 = vld [vmem:[#allocation40_spill] sm:$0xff] }
 0x21e   : > { %v16240_v52 = vpop.f32.mrf.mxu0  ;;  %20305 = vst [vmem:[#allocation46_spill] sm:$0xff] %v16242_v14  ;;  %v16246_v3 = vadd.f32 %v3753_v4, %v3250_v59 }
 0x21f   : > { %20304 = vst [vmem:[#allocation44_spill] sm:$0xff] %v16240_v52  ;;  %v12545_v10 = vpop.f32.mrf.mxu1  ;;  %v20337_v52 = vld [vmem:[#allocation29_spill] sm:$0xff] }
 0x220   : > { %v16244_v45 = vpop.f32.mrf.mxu0  ;;  %20307 = vst [vmem:[#allocation48_spill] sm:$0xff] %v16246_v3  ;;  %v16250_v22 = vadd.f32 %v12545_v10, %v3253_v12 }
 0x221   : > { %20306 = vst [vmem:[#allocation47_spill] sm:$0xff] %v16244_v45  ;;  %v16252_v15 = vpop.f32.mrf.mxu1 }
 0x222   : > { %v16248_v1 = vpop.f32.mrf.mxu0  ;;  %20309 = vst [vmem:[#allocation52_spill] sm:$0xff] %v16250_v22  ;;  %20310 = vst [vmem:[#allocation53_spill] sm:$0xff] %v16252_v15  ;;  %v20327_v15 = vld [vmem:[#allocation10_spill] sm:$0xff] }
 0x223   : > { %20308 = vst [vmem:[#allocation51_spill] sm:$0xff] %v16248_v1  ;;  %v16256_v48 = vpop.f32.mrf.mxu1  ;;  %v20331_v1 = vld [vmem:[#allocation9_spill] sm:$0xff] }
 0x224   : > { %v16254_v27 = vpop.f32.mrf.mxu0  ;;  %20312 = vst [vmem:[#allocation55_spill] sm:$0xff] %v16256_v48 }
 0x225   : > { %20311 = vst [vmem:[#allocation54_spill] sm:$0xff] %v16254_v27  ;;  %v16260_v0 = vpop.f32.mrf.mxu1 }
 0x226   : > { %v16258_v42 = vpop.f32.mrf.mxu0  ;;  %20314 = vst [vmem:[#allocation57_spill] sm:$0xff] %v16260_v0  ;;  %v20325_v0 = vld [vmem:[#allocation5_spill] sm:$0xff] }
 0x227   : > { %20313 = vst [vmem:[#allocation56_spill] sm:$0xff] %v16258_v42  ;;  %v16264_v14 = vpop.f32.mrf.mxu1  ;;  %v20324_v42 = vld [vmem:[#allocation6_spill] sm:$0xff] }
 0x228   : > { %v16262_v36 = vpop.f32.mrf.mxu0  ;;  %20316 = vst [vmem:[#allocation59_spill] sm:$0xff] %v16264_v14  ;;  %v1490_v48 = vadd.f32 %v20325_v0, %v20324_v42  ;;  %v20336_v42 = vld [vmem:[#allocation27_spill] sm:$0xff] }
 0x229   : > { %20315 = vst [vmem:[#allocation58_spill] sm:$0xff] %v16262_v36  ;;  %v16268_v4 = vpop.f32.mrf.mxu1  ;;  %v20326_v36 = vld [vmem:[#allocation7_spill] sm:$0xff]  ;;  %v1554_v0 = vadd.f32 %v20336_v42, %v20335_v21 }
 0x22a   : > { %v16266_v59 = vpop.f32.mrf.mxu0  ;;  %20318 = vst [vmem:[#allocation61_spill] sm:$0xff] %v16268_v4  ;;  %v1506_v14 = vadd.f32 %v20327_v15, %v20326_v36  ;;  %v20330_v4 = vld [vmem:[#allocation49_spill] sm:$0xff]  ;;  %v20338_v15 = vld [vmem:[#allocation32_spill] sm:$0xff] }
 0x22b   : > { %20317 = vst [vmem:[#allocation60_spill] sm:$0xff] %v16266_v59  ;;  %v16272_v10 = vpop.f32.mrf.mxu1  ;;  %v1570_v36 = vadd.f32 %v20338_v15, %v20337_v52  ;;  %v20344_v15 = vld [vmem:[#allocation13_spill] sm:$0xff] }
 0x22c   : > { %v16270_v12 = vpop.f32.mrf.mxu0  ;;  %20320 = vst [vmem:[#allocation63_spill] sm:$0xff] %v16272_v10  ;;  %v20332_v10 = vld [vmem:[#allocation11_spill] sm:$0xff] }
 0x22d   : > { %20319 = vst [vmem:[#allocation62_spill] sm:$0xff] %v16270_v12  ;;  %v16276_v3 = vpop.f32.mrf.mxu1  ;;  %v2131_v12 = vadd.f32 %v20330_v4, %v1490_v48  ;;  %v1522_v45 = vadd.f32 %v20332_v10, %v20331_v1  ;;  %v20342_v48 = vld [vmem:[#allocation45_spill] sm:$0xff]  ;;  %v2151_v21 = vadd.f32 %v15969_v47, %v1570_v36 }
 0x22e   : > { %v16274_v22 = vpop.f32.mrf.mxu0  ;;  %20322 = vst [vmem:[#allocation65_spill] sm:$0xff] %v16276_v3  ;;  %v1602_v4 = vadd.f32 %v20342_v48, %v20341_v7  ;;  %v20349_v36 = vld [vmem:[#allocation21_spill] sm:$0xff] }
 0x22f   : > { %20321 = vst [vmem:[#allocation64_spill] sm:$0xff] %v16274_v22  ;;  %v16284_v27 = vpop.f32.mrf.mxu1  ;;  %v2135_v22 = vadd.f32 %v15745_v58, %v1506_v14  ;;  %v2139_v1 = vadd.f32 %v15814_v17, %v1522_v45  ;;  %v20343_v14 = vld [vmem:[#allocation50_spill] sm:$0xff]  ;;  %v5826_v45 = vld [vmem:[#allocation3 + $0x20] sm:$0xf] }
 0x230   : > { %v16278_v41 = vpop.f32.mrf.mxu0  ;;  %20328 = vst [vmem:[#allocation6_spill] sm:$0xff] %v16284_v27  ;;  %v20339_v27 = vld [vmem:[#allocation34_spill] sm:$0xff] }
 0x231   : > { %20323 = vst [vmem:[#allocation66_spill] sm:$0xff] %v16278_v41  ;;  %v16292_v3 = vpop.f32.mrf.mxu1  ;;  %v2873_v52 = vadd.f32 %v15750_v13, %v2135_v22  ;;  %v2877_v48 = vadd.f32 %v20344_v15, %v2139_v1  ;;  %v2881_v13 = vadd.f32 %v15869_v19, %v15878_v63  ;;  %v5822_v19 = vld [vmem:[#allocation3 + $0x10] sm:$0xf]  ;;  %v5927_v63 = vshrl.u32 %v5826_v45, 16  ;;  %v20355_v45 = vld [vmem:[#allocation31_spill] sm:$0xff] }
 0x232   : > { %v16286_v59 = vpop.f32.mrf.mxu0  ;;  %20333 = vst [vmem:[#allocation7_spill] sm:$0xff] %v16292_v3  ;;  %v2147_v3 = vadd.f32 %v15913_v60, %v1554_v0 }
 0x233   : > { %20329 = vst [vmem:[#allocation5_spill] sm:$0xff] %v16286_v59  ;;  %v1586_v59 = vadd.f32 %v20340_v40, %v20339_v27  ;;  %v16305_v10 = vpop.f32.mrf.mxu1  ;;  %v2159_v40 = vadd.f32 %v16038_v56, %v1602_v4  ;;  %v2889_v56 = vadd.f32 %v15973_v39, %v2151_v21  ;;  %v3231_v22 = vadd.f32 %v16114_v61, %v2877_v48  ;;  %v20350_v4 = vld [vmem:[#allocation20_spill] sm:$0xff] }
 0x234   : > { %v16294_v41 = vpop.f32.mrf.mxu0  ;;  %v3768_v39 = vadd.f32 %v16073_v18, %v16046_v37  ;;  %v16360_v61 = vadd.f32 %v16101_v53, %v16071_v49  ;;  %v5834_v18 = vld [vmem:[#allocation3 + $0x40] sm:$0xf]  ;;  %v16379_v49 = vadd.f32 %v16129_v43, %v16099_v29  ;;  %v5830_v53 = vld [vmem:[#allocation3 + $0x30] sm:$0xf]  ;;  %v16390_v1 = vadd.f32 %v20350_v4, %v20349_v36 }
 0x235   : > { %20334 = vst [vmem:[#allocation10_spill] sm:$0xff] %v16294_v41  ;;  %v2869_v41 = vadd.f32 %v20343_v14, %v2131_v12  ;;  %v2155_v42 = vadd.f32 %v16026_v32, %v1586_v59  ;;  %v16315_v27 = vpop.f32.mrf.mxu1  ;;  %v3227_v12 = vadd.f32 %v16086_v57, %v2873_v52  ;;  %v2885_v32 = vadd.f32 %v15929_v23, %v2147_v3  ;;  %v20351_v14 = vld [vmem:[#allocation25_spill] sm:$0xff]  ;;  %v5838_v43 = vld [vmem:[#allocation3 + $0x50] sm:$0xf]  ;;  %v5842_v52 = vld [vmem:[#allocation3 + $0x60] sm:$0xf] }
 0x236   : > { %v16307_v58 = vpop.f32.mrf.mxu0  ;;  %v2897_v57 = vadd.f32 %v16060_v6, %v2159_v40  ;;  %v3770_v23 = vadd.f32 %v16068_v35, %v16041_v5  ;;  %v16348_v3 = vadd.f32 %v16084_v30, %v16054_v26  ;;  %v16356_v6 = vadd.f32 %v16096_v55, %v16066_v38  ;;  %v20346_v30 = vld [vmem:[#allocation17_spill] sm:$0xff]  ;;  %v20354_v40 = vld [vmem:[#allocation14_spill] sm:$0xff] }
 0x237   : > { %v3223_v17 = vadd.f32 %v16056_v24, %v2869_v41  ;;  %v16322_v60 = vpop.f32.mrf.mxu1  ;;  %v16333_v24 = vld [vmem:[%s19676_s2 + $0xf8] sm:$0xff]   ;;  %v2893_v41 = vadd.f32 %v16036_v51, %v2155_v42  ;;  %v16364_v5 = vadd.f32 %v16112_v31, %v16079_v25  ;;  %v16367_v37 = vadd.f32 %v16116_v2, %v3227_v12  ;;  %v20348_v31 = vld [vmem:[#allocation26_spill] sm:$0xff] }
 0x238   : > { %v16317_v7 = vpop.f32.mrf.mxu0  ;;  %20345 = vst [vmem:[#allocation49_spill] sm:$0xff] %v16333_v24  ;;  %12834 = vmatprep.subr.bf16.mxu0 %v16333_v24  ;;  %v16375_v38 = vadd.f32 %v16124_v62, %v16094_v50  ;;  %v5905_v55 = vshrl.u32 %v5822_v19, 16  ;;  %v16386_v2 = vadd.f32 %v20348_v31, %v3231_v22  ;;  %v3235_v50 = vadd.f32 %v20351_v14, %v2881_v13  ;;  %v20353_v42 = vld [vmem:[#allocation19_spill] sm:$0xff]  ;;  %v20361_v14 = vld [vmem:[#allocation12_spill] sm:$0xff] }
 0x239   : > { %v16338_v59 = vpop.f32.mrf.mxu1  ;;  %v16351_v51 = vadd.f32 %v16088_v44, %v3223_v17  ;;  %v20347_v44 = vld [vmem:[#allocation16_spill] sm:$0xff]  ;;  %v16395_v29 = vrot.slane %v5927_v63, 11  ;;  %v16399_v17 = vadd.f32 %v20354_v40, %v20353_v42  ;;  %v3239_v15 = vadd.f32 %v20355_v45, %v2885_v32  ;;  %v20358_v32 = vld [vmem:[#allocation22_spill] sm:$0xff]  ;;  %v20363_v40 = vld [vmem:[#allocation33_spill] sm:$0xff] }
 0x23a   : > { %v16324_v47 = vpop.f32.mrf.mxu0  ;;  %v16383_v25 = vadd.f32 %v20347_v44, %v20346_v30  ;;  %v5971_v12 = vshrl.u32 %v5834_v18, 16  ;;  %v3243_v22 = vadd.f32 %v16204_v28, %v2889_v56  ;;  %v20356_v63 = vshrl.u32 %v16144_v16, 16 }
 0x23b   : > { %v16369_v26 = vpop.f32.mrf.mxu1  ;;  %20352 = vst [vmem:[#allocation9_spill] sm:$0xff] %v16395_v29  ;;  %v20357_v44 = vshll.u32 %v16144_v16, 16  ;;  %v5949_v36 = vshrl.u32 %v5830_v53, 16  ;;  %v20359_v4 = vshrl.u32 %v20358_v32, 16  ;;  %v16422_v18 = vrot.slane %v5905_v55, 11  ;;  %v20365_v29 = vld [vmem:[#allocation23_spill] sm:$0xff] }
 0x23c   : > { %v16340_v0 = vpop.f32.mrf.mxu0  ;;  %v16412_v30 = vrot.slane %v20356_v63, 4  ;;  %v5993_v28 = vshrl.u32 %v5838_v43, 16  ;;  %v6015_v56 = vshrl.u32 %v5842_v52, 16  ;;  %v16429_v45 = vadd.f32 %v20363_v40, %v3235_v50  ;;  %v20364_v63 = vld [vmem:[#allocation24_spill] sm:$0xff] }
 0x23d   : > { %v16393_v62 = vpop.f32.mrf.mxu1  ;;  %v16416_v31 = vrot.slane %v20357_v44, 5  ;;  %20360 = vst [vmem:[#allocation11_spill] sm:$0xff] %v16422_v18  ;;  %v16433_v16 = vadd.f32 %v16194_v11, %v20364_v63  ;;  %v3247_v53 = vadd.f32 %v16217_v9, %v2893_v41  ;;  %v5850_v55 = vld [vmem:[#allocation3 + $0x80] sm:$0xf]  ;;  %v16440_v43 = vadd.f32 %v16201_v54, %v20365_v29  ;;  %v5846_v11 = vld [vmem:[#allocation3 + $0x70] sm:$0xf] }
 0x23e   : > { %v16371_v35 = vpop.f32.mrf.mxu0  ;;  %v16443_v52 = vadd.f32 %v16208_v34, %v3239_v15  ;;  %v3251_v9 = vadd.f32 %v16232_v8, %v2897_v57  ;;  %v20367_v41 = vld [vmem:[#allocation43_spill] sm:$0xff]  ;;  %v16457_v29 = vrot.slane %v5949_v36, 11  ;;  %v20374_v8 = vld [vmem:[#allocation44_spill] sm:$0xff]  ;;  %v6037_v24 = vshrl.u32 %v5846_v11, 16 }
 0x23f   : > { %v16406_v13 = vpop.f32.mrf.mxu1  ;;  %v4509_v40 = vadd.f32 %v20367_v41, %v3770_v23  ;;  %v20369_v34 = vld [vmem:[#allocation35_spill] sm:$0xff]  ;;  %v4507_v57 = vadd.f32 %v20374_v8, %v3768_v39  ;;  %v5858_v36 = vld [vmem:[#allocation3 + $0xa0] sm:$0xf]  ;;  %v5854_v39 = vld [vmem:[#allocation3 + $0x90] sm:$0xf] }
 0x240   : > { %v12581_v21 = vpop.f32.mrf.mxu0  ;;  %20368 = vst [vmem:[#allocation27_spill] sm:$0xff] %v16457_v29  ;;  %v20381_v8 = vld [vmem:[#allocation53_spill] sm:$0xff]  ;;  %v20383_v18 = vld [vmem:[#allocation55_spill] sm:$0xff] }
 0x241   : > { %v16403_v48 = vadd.f32 %v12581_v21, %v16206_v46  ;;  %v16420_v46 = vrot.slane %v20359_v4, 4  ;;  %v20362_v21 = vld [vmem:[#allocation28_spill] sm:$0xff]  ;;  %v16436_v44 = vpop.f32.mrf.mxu1  ;;  %v16484_v11 = vadd.f32 %v20381_v8, %v3251_v9  ;;  %v6103_v9 = vshrl.u32 %v5858_v36, 16  ;;  %v20393_v36 = vld [vmem:[#allocation61_spill] sm:$0xff] }
 0x242   : > { %v16408_v19 = vpop.f32.mrf.mxu0  ;;  %v16426_v42 = vadd.f32 %v20362_v21, %v20361_v14  ;;  %v16448_v14 = vrot.slane %v5971_v12, 11  ;;  %v16451_v21 = vadd.f32 %v16221_v33, %v3243_v22  ;;  %v16464_v12 = vrot.slane %v6015_v56, 11  ;;  %v20372_v33 = vld [vmem:[#allocation42_spill] sm:$0xff]  ;;  %v20377_v56 = vld [vmem:[#allocation51_spill] sm:$0xff] }
 0x243   : > { %v16455_v63 = vpop.f32.mrf.mxu1  ;;  %v16467_v22 = vadd.f32 %v20372_v33, %v3247_v53  ;;  %v20379_v33 = vld [vmem:[#allocation37_spill] sm:$0xff]  ;;  %20382 = vst [vmem:[#allocation40_spill] sm:$0xff] %v16484_v11  ;;  %v16510_v11 = vrot.slane %v6037_v24, 11  ;;  %v20398_v24 = vld [vmem:[#allocation6_spill] sm:$0xff] }
 0x244   : > { %v12584_v4 = vpop.f32.mrf.mxu0  ;;  %20366 = vst [vmem:[#allocation18_spill] sm:$0xff] %v16448_v14  ;;  %20371 = vst [vmem:[#allocation32_spill] sm:$0xff] %v16464_v12  ;;  %v5580_v14 = vld [vmem:[#allocation3 + $0x2c] sm:$0x1]  ;;  %v20378_v12 = vld [vmem:[#allocation54_spill] sm:$0xff] }
 0x245   : > { %v16446_v50 = vadd.f32 %v12584_v4, %v16211_v20  ;;  %v16462_v20 = vrot.slane %v5993_v28, 11  ;;  %v6059_v4 = vshrl.u32 %v5850_v55, 16  ;;  %20373 = vst [vmem:[#allocation34_spill] sm:$0xff] %v16467_v22  ;;  %v16470_v23 = vpop.f32.mrf.mxu1  ;;  %v20376_v28 = vld [vmem:[#allocation47_spill] sm:$0xff]  ;;  %v4508_v55 = vadd.f32 %v20377_v56, %v16351_v51  ;;  %20391 = vst [vmem:[#allocation13_spill] sm:$0xff] %v16510_v11 }
 0x246   : > { %v4460_v54 = vpop.f32.mrf.mxu0  ;;  %v4513_v53 = vadd.f32 %v20378_v12, %v16356_v6  ;;  %v16487_v22 = vadd.f32 %v20383_v18, %v4509_v40  ;;  %v5568_v12 = vld [vmem:[#allocation3 + $0xc] sm:$0x1] }
 0x247   : > { %v16460_v15 = vadd.f32 %v4460_v54, %v20369_v34  ;;  %20370 = vst [vmem:[#allocation29_spill] sm:$0xff] %v16462_v20  ;;  %v5581_v54 = vsel %vm13913_vm4, 0, %v5580_v14  ;;  %v4510_v34 = vadd.f32 %v20376_v28, %v16348_v3  ;;  %v20384_v14 = vld [vmem:[#allocation56_spill] sm:$0xff]  ;;  %v20385_v28 = vld [vmem:[#allocation58_spill] sm:$0xff]  ;;  %v16493_v56 = vpop.f32.mrf.mxu1  ;;  %v5569_v18 = vsel %vm13913_vm4, 0, %v5568_v12  ;;  %v20388_v40 = vld [vmem:[#allocation57_spill] sm:$0xff] }
 0x248   : > { %v12585_v41 = vpop.f32.mrf.mxu0  ;;  %5582 = vst [vmem:[#allocation3 + $0x2c] sm:$0x1] %v5581_v54  ;;  %v4511_v3 = vadd.f32 %v20384_v14, %v16360_v61  ;;  %v4514_v51 = vadd.f32 %v20385_v28, %v16364_v5  ;;  %v16504_v8 = vadd.f32 %v20388_v40, %v4507_v57  ;;  %v20390_v61 = vld [vmem:[#allocation62_spill] sm:$0xff]  ;;  %5570 = vst [vmem:[#allocation3 + $0xc] sm:$0x1] %v5569_v18  ;;  %v20394_v12 = vld [vmem:[#allocation63_spill] sm:$0xff] }
 0x249   : > { %v16481_v20 = vadd.f32 %v12585_v41, %v20379_v33  ;;  %v20386_v41 = vld [vmem:[#allocation60_spill] sm:$0xff]  ;;  %v16499_v33 = vrot.slane %v6059_v4, 11  ;;  %v4517_v5 = vadd.f32 %v20390_v61, %v16375_v38  ;;  %v16508_v14 = vpop.f32.mrf.mxu1  ;;  %v20395_v57 = vld [vmem:[#allocation39_spill] sm:$0xff]  ;;  %v5862_v38 = vld [vmem:[#allocation3 + $0xb0] sm:$0xf] }
 0x24a   : > { %v16495_v6 = vpop.f32.mrf.mxu0  ;;  %v4512_v54 = vadd.f32 %v20386_v41, %v16367_v37  ;;  %20389 = vst [vmem:[#allocation50_spill] sm:$0xff] %v16504_v8  ;;  %v20392_v37 = vld [vmem:[#allocation59_spill] sm:$0xff]  ;;  %v16516_v41 = vadd.f32 %v20393_v36, %v4508_v55  ;;  %v20396_v61 = vld [vmem:[#allocation65_spill] sm:$0xff]  ;;  %v16528_v11 = vadd.f32 %v20398_v24, %v4514_v51  ;;  %v20401_v18 = vld [vmem:[#allocation66_spill] sm:$0xff]  ;;  %v16544_v51 = vrot.slane %v6103_v9, 11 }
 0x24b   : > { %20380 = vst [vmem:[#allocation38_spill] sm:$0xff] %v16481_v20  ;;  %20387 = vst [vmem:[#allocation45_spill] sm:$0xff] %v16499_v33  ;;  %v6081_v20 = vshrl.u32 %v5854_v39, 16  ;;  %v16513_v4 = vadd.f32 %v20392_v37, %v4510_v34  ;;  %v16519_v33 = vadd.f32 %v20394_v12, %v4513_v53  ;;  %v16525_v8 = vadd.f32 %v20396_v61, %v4511_v3  ;;  %v20400_v39 = vld [vmem:[#allocation64_spill] sm:$0xff]  ;;  %v16534_v37 = vpop.f32.mrf.mxu1  ;;  %v20402_v12 = vld [vmem:[#allocation7_spill] sm:$0xff] }
 0x24c   : > { %v12588_v28 = vpop.f32.mrf.mxu0  ;;  %20399 = vst [vmem:[#allocation16_spill] sm:$0xff] %v16528_v11  ;;  %v4515_v34 = vadd.f32 %v20400_v39, %v16379_v49  ;;  %v4518_v55 = vadd.f32 %v20401_v18, %v16383_v25  ;;  %v5866_v36 = vld [vmem:[#allocation3 + $0xc0] sm:$0xf]  ;;  %20406 = vst [vmem:[#allocation21_spill] sm:$0xff] %v16544_v51  ;;  %v16547_v49 = vadd.f32 %v16305_v10, %v4517_v5  ;;  %v20407_v25 = vld [vmem:[#allocation10_spill] sm:$0xff] }
 0x24d   : > { %v16522_v40 = vadd.f32 %v12588_v28, %v20395_v57  ;;  %20397 = vst [vmem:[#allocation17_spill] sm:$0xff] %v16525_v8  ;;  %v16537_v28 = vadd.f32 %v20402_v12, %v4512_v54  ;;  %v20404_v57 = vld [vmem:[#allocation5_spill] sm:$0xff]  ;;  %v20405_v61 = vld [vmem:[#allocation36_spill] sm:$0xff]  ;;  %v4521_v24 = vadd.f32 %v20407_v25, %v16390_v1  ;;  %v16551_v39 = vpop.f32.mrf.mxu1  ;;  %v16553_v11 = vrot.slane %v6081_v20, 11  ;;  %v20412_v25 = vld [vmem:[#allocation46_spill] sm:$0xff] }
 0x24e   : > { %v4476_v53 = vpop.f32.mrf.mxu0  ;;  %v4516_v3 = vadd.f32 %v20404_v57, %v16386_v2  ;;  %v6125_v54 = vshrl.u32 %v5862_v38, 16  ;;  %v20409_v12 = vld [vmem:[#allocation41_spill] sm:$0xff]  ;;  %v6147_v2 = vshrl.u32 %v5866_v36, 16  ;;  %v6847_v9 = vor.u32 %v16416_v31, %v16412_v30  ;;  %v5870_v31 = vld [vmem:[#allocation3 + $0xd0] sm:$0xf] }
 0x24f   : > { %20403 = vst [vmem:[#allocation26_spill] sm:$0xff] %v16537_v28  ;;  %v16542_v8 = vadd.f32 %v4476_v53, %v20405_v61  ;;  %20408 = vst [vmem:[#allocation20_spill] sm:$0xff] %v16553_v11  ;;  %v20410_v53 = vshll.u32 %v20358_v32, 16  ;;  %v16563_v5 = vadd.f32 %v16315_v27, %v4515_v34  ;;  %v16566_v1 = vadd.f32 %v16322_v60, %v4518_v55  ;;  %v16572_v57 = vpop.f32.mrf.mxu1  ;;  %v5821_v32 = vld [vmem:[#allocation3 + $0xc] sm:$0x1] }
 0x250   : > { %v12589_v18 = vpop.f32.mrf.mxu0  ;;  %v4519_v20 = vadd.f32 %v16307_v58, %v16399_v17  ;;  %v4522_v38 = vadd.f32 %v16317_v7, %v16426_v42  ;;  %v16577_v30 = vadd.f32 %v16338_v59, %v4516_v3  ;;  %v4520_v27 = vadd.f32 %v16324_v47, %v16429_v45  ;;  %v5874_v59 = vld [vmem:[#allocation3 + $0xe0] sm:$0xf]  ;;  %v5825_v61 = vld [vmem:[#allocation3 + $0x1c] sm:$0x1]  ;;  %v7391_v47 = vld [vmem:[#allocation3 + $0x10] sm:$0xf] }
 0x251   : > { %v16556_v28 = vadd.f32 %v12589_v18, %v20409_v12  ;;  %v6849_v10 = vrot.slane %v20410_v53, 5  ;;  %v6848_v60 = vrot.slane %v6847_v9, 4  ;;  %v16583_v58 = vadd.f32 %v16369_v26, %v4521_v24  ;;  %v16587_v17 = vpop.f32.mrf.mxu1  ;;  %v7395_v18 = vld [vmem:[#allocation3 + $0x20] sm:$0xf] }
 0x252   : > { %v16574_v36 = vpop.f32.mrf.mxu0  ;;  %v4525_v7 = vadd.f32 %v16340_v0, %v16433_v16  ;;  %v16589_v55 = vrot.slane %v6125_v54, 11  ;;  %v6855_v3 = vshll.u32 %v5821_v32, 16  ;;  %v4523_v45 = vadd.f32 %v16371_v35, %v16440_v43  ;;  %v5592_v0 = vld [vmem:[#allocation3 + $0x4c] sm:$0x1]  ;;  %v5878_v54 = vld [vmem:[#allocation3 + $0xf0] sm:$0xf] }
 0x253   : > { %v6852_v34 = vor.u32 %v16420_v46, %v6849_v10  ;;  %v16596_v26 = vrot.slane %v6147_v2, 11  ;;  %v12636_v16 = vpop.f32.mrf.mxu1  ;;  %v6169_v9 = vshrl.u32 %v5870_v31, 16  ;;  %v6850_v32 = vsel %vm14099_vm7, %v6848_v60, %v6849_v10  ;;  %v20415_v2 = vld [vmem:[#allocation48_spill] sm:$0xff] }
 0x254   : > { %v12592_v42 = vpop.f32.mrf.mxu0  ;;  %20411 = vst [vmem:[#allocation25_spill] sm:$0xff] %v16589_v55  ;;  %v6857_v55 = vrot.slane %v6855_v3, 5  ;;  %v5593_v51 = vsel %vm13913_vm4, 0, %v5592_v0  ;;  %v16603_v35 = vadd.f32 %v16393_v62, %v4519_v20  ;;  %v4524_v43 = vadd.f32 %v16408_v19, %v16443_v52  ;;  %v5829_v3 = vld [vmem:[#allocation3 + $0x2c] sm:$0x1]  ;;  %v20416_v20 = vld [vmem:[#allocation52_spill] sm:$0xff] }
 0x255   : > { %v16594_v46 = vadd.f32 %v12592_v42, %v20412_v25  ;;  %20413 = vst [vmem:[#allocation19_spill] sm:$0xff] %v16596_v26  ;;  %v6853_v24 = vrot.slane %v6852_v34, 4  ;;  %v6191_v42 = vshrl.u32 %v5874_v59, 16  ;;  %v5586_v25 = vld [vmem:[#allocation3 + $0x3c] sm:$0x1]  ;;  %v4830_v31 = vpop.f32.mrf.mxu1  ;;  %v7456_v60 = vshrl.u32 %v7391_v47, 16 }
 0x256   : > { %v4492_v12 = vpop.f32.mrf.mxu0  ;;  %5594 = vst [vmem:[#allocation3 + $0x4c] sm:$0x1] %v5593_v51  ;;  %v7478_v0 = vshrl.u32 %v7395_v18, 16  ;;  %v5587_v62 = vsel %vm13913_vm4, 0, %v5586_v25  ;;  %v6213_v19 = vshrl.u32 %v5878_v54, 16  ;;  %v6869_v59 = vshll.u32 %v5825_v61, 16 }
 0x257   : > { %v16608_v34 = vadd.f32 %v4492_v12, %v20415_v2  ;;  %v6858_v10 = vsel %vm14099_vm7, %v6853_v24, %v6857_v55  ;;  %5588 = vst [vmem:[#allocation3 + $0x3c] sm:$0x1] %v5587_v62  ;;  %v16620_v51 = vadd.f32 %v16406_v13, %v4522_v38  ;;  %v16623_v12 = vadd.f32 %v16436_v44, %v4520_v27  ;;  %v12637_v47 = vpop.f32.mrf.mxu1  ;;  %v7403_v38 = vld [vmem:[#allocation3 + $0x40] sm:$0xf]  ;;  %v5604_v62 = vld [vmem:[#allocation3 + $0x6c] sm:$0x1] }
 0x258   : > { %v12593_v26 = vpop.f32.mrf.mxu0  ;;  %v16617_v52 = vcombine.low %v6850_v32, %v6858_v10  ;;  %v16626_v55 = vadd.f32 %v16455_v63, %v4525_v7  ;;  %v16628_v18 = vrot.slane %v6169_v9, 11  ;;  %v4528_v61 = vadd.f32 %v16495_v6, %v16451_v21  ;;  %v7399_v9 = vld [vmem:[#allocation3 + $0x30] sm:$0xf] }
 0x259   : > { %v16615_v11 = vadd.f32 %v12593_v26, %v20416_v20  ;;  %v16631_v26 = vadd.f32 %v16470_v23, %v4523_v45  ;;  %v16635_v54 = vrot.slane %v6191_v42, 11  ;;  %v6883_v13 = vshll.u32 %v5829_v3, 16  ;;  %v4833_v27 = vpop.f32.mrf.mxu1  ;;  %v16647_v23 = vld [vmem:[%s19677_s3] ss:$0 sm:$0xff]  ;;  %v20419_v42 = vld [vmem:[#allocation34_spill] sm:$0xff] }
 0x25a   : > { %v4495_v24 = vpop.f32.mrf.mxu0  ;;  %v16639_v44 = vadd.f32 %v16493_v56, %v16403_v48  ;;  %v16642_v63 = vadd.f32 %v16508_v14, %v4524_v43  ;;  %v16649_v45 = vrot.slane %v7456_v60, 11  ;;  %v16651_v21 = vrot.slane %v7478_v0, 11  ;;  %v20418_v43 = vld [vmem:[#allocation38_spill] sm:$0xff] }
 0x25b   : > { %v16655_v6 = vadd.f32 %v16534_v37, %v16446_v50  ;;  %v16658_v56 = vrot.slane %v6213_v19, 11  ;;  %v16660_v14 = vrot.slane %v6869_v59, 5  ;;  %v16664_v32 = vadd.f32 %v16551_v39, %v16460_v15  ;;  %v12640_v50 = vpop.f32.mrf.mxu1  ;;  %v20420_v39 = vld [vmem:[#allocation50_spill] sm:$0xff] }
 0x25c   : > { %v12660_v7 = vpop.f32.mrf.mxu0  ;;  %20417 = vst [vmem:[#allocation14_spill] sm:$0xff] %v16651_v21  ;;  %v16668_v2 = vadd.f32 %v16572_v57, %v20418_v43  ;;  %v4532_v25 = vadd.f32 %v16574_v36, %v20419_v42  ;;  %v7522_v10 = vshrl.u32 %v7403_v38, 16  ;;  %v16678_v60 = vadd.f32 %v16587_v17, %v4528_v61 }
 0x25d   : > { %v5409_v48 = vadd.f32 %v12660_v7, %v16487_v22  ;;  %v16675_v22 = vld [vmem:[%s19678_s4] ss:$0 sm:$0xff]  ;;  %v16682_v57 = vrot.slane %v6883_v13, 5  ;;  %v5837_v0 = vld [vmem:[#allocation3 + $0x4c] sm:$0x1]  ;;  %v16685_v36 = vadd.f32 %v12636_v16, %v16522_v40  ;;  %v16688_v20 = vadd.f32 %v4830_v31, %v16542_v8  ;;  %v4846_v19 = vpop.f32.mrf.mxu1 }
 0x25e   : > { %v5280_v37 = vpop.f32.mrf.mxu0  ;;  %v5833_v38 = vld [vmem:[#allocation3 + $0x3c] sm:$0x1]  ;;  %v7500_v7 = vshrl.u32 %v7399_v9, 16  ;;  %v5605_v17 = vsel %vm13913_vm4, 0, %v5604_v62  ;;  %v16693_v61 = vadd.f32 %v12637_v47, %v16556_v28  ;;  %v20421_v8 = vld [vmem:[#allocation40_spill] sm:$0xff]  ;;  %v16699_v9 = vrot.slane %v7522_v10, 11 }
 0x25f   : > { %v5448_v15 = vmul.f32 %v16647_v23, %v5409_v48  ;;  %v5407_v3 = vadd.f32 %v5280_v37, %v20420_v39  ;;  %v5598_v16 = vld [vmem:[#allocation3 + $0x5c] sm:$0x1]  ;;  %5606 = vst [vmem:[#allocation3 + $0x6c] sm:$0x1] %v5605_v17  ;;  %v4536_v31 = vadd.f32 %v4495_v24, %v20421_v8  ;;  %v12641_v43 = vpop.f32.mrf.mxu1  ;;  %v6911_v37 = vshll.u32 %v5837_v0, 16 }
 0x260   : > { %v12661_v59 = vpop.f32.mrf.mxu0  ;;  %20422 = vst [vmem:[#allocation31_spill] sm:$0xff] %v16699_v9  ;;  %v5599_v39 = vsel %vm13913_vm4, 0, %v5598_v16  ;;  %v16708_v62 = vadd.f32 %v12640_v50, %v16594_v46  ;;  %v16711_v10 = vrot.slane %v7500_v7, 11  ;;  %v7407_v7 = vld [vmem:[#allocation3 + $0x50] sm:$0xf]  ;;  %v20425_v16 = vld [vmem:[#allocation17_spill] sm:$0xff] }
 0x261   : > { %v5487_v13 = vadd.f32 %v16675_v22, %v5448_v15  ;;  %v5446_v48 = vmul.f32 %v16647_v23, %v5407_v3  ;;  %v5410_v40 = vadd.f32 %v12661_v59, %v16513_v4  ;;  %v6897_v3 = vshll.u32 %v5833_v38, 16  ;;  %5600 = vst [vmem:[#allocation3 + $0x5c] sm:$0x1] %v5599_v39  ;;  %v4849_v17 = vpop.f32.mrf.mxu1  ;;  %v7411_v38 = vld [vmem:[#allocation3 + $0x60] sm:$0xf]  ;;  %v20443_v9 = vld [vmem:[#allocation49_spill] sm:$0xff] }
 0x262   : > { %v5283_v42 = vpop.f32.mrf.mxu0  ;;  %v16705_v4 = vadd.f32 %v4833_v27, %v4532_v25  ;;  %20423 = vst [vmem:[#allocation22_spill] sm:$0xff] %v16711_v10  ;;  %v16714_v59 = vadd.f32 %v4846_v19, %v16608_v34  ;;  %v16718_v27 = vadd.f32 %v12641_v43, %v16615_v11  ;;  %v16722_v50 = vrot.slane %v6911_v37, 5 }
 0x263   : > { %v5519_v28 = vmax.f32 %v5487_v13, 0.0  ;;  %v5485_v47 = vadd.f32 %v16675_v22, %v5446_v48  ;;  %v5449_v15 = vmul.f32 %v16647_v23, %v5410_v40  ;;  %v5408_v24 = vadd.f32 %v5283_v42, %v16516_v41 }
 0x264   : > { %v12664_v0 = vpop.f32.mrf.mxu0  ;;  %20424 = vst [vmem:[#allocation12_spill] sm:$0xff] %v16722_v50  ;;  %v16725_v42 = vrot.slane %v6897_v3, 5  ;;  %v16727_v39 = vadd.f32 %v4849_v17, %v4536_v31 }
 0x265   : > { %v11796_v13 = vpack.c.bf16 %v5519_v28, %v5519_v28  ;;  %v5517_v48 = vmax.f32 %v5485_v47, 0.0  ;;  %v5488_v40 = vadd.f32 %v16675_v22, %v5449_v15  ;;  %v5447_v46 = vmul.f32 %v16647_v23, %v5408_v24  ;;  %v20427_v24 = vld [vmem:[#allocation16_spill] sm:$0xff] }
 0x266   : > { %v5413_v25 = vadd.f32 %v12664_v0, %v16519_v33  ;;  %v5296_v41 = vpop.f32.mrf.mxu0  ;;  %20426 = vst [vmem:[#allocation28_spill] sm:$0xff] %v16725_v42  ;;  %v5845_v47 = vld [vmem:[#allocation3 + $0x6c] sm:$0x1]  ;;  %v7566_v33 = vshrl.u32 %v7411_v38, 16 }
 0x267   : > { %5788 = vst [vmem:[#allocation3 + $0x24] sm:$0xf] %v11796_v13  ;;  %v11794_v34 = vpack.c.bf16 %v5517_v48, %v5517_v48  ;;  %v5520_v19 = vmax.f32 %v5488_v40, 0.0  ;;  %v5411_v8 = vadd.f32 %v5296_v41, %v20425_v16  ;;  %v5486_v11 = vadd.f32 %v16675_v22, %v5447_v46  ;;  %v5616_v48 = vld [vmem:[#allocation3 + $0x8c] sm:$0x1] }
 0x268   : > { %v5452_v43 = vmul.f32 %v16647_v23, %v5413_v25  ;;  %v12665_v28 = vpop.f32.mrf.mxu0  ;;  %v7544_v13 = vshrl.u32 %v7407_v7, 16  ;;  %v5841_v17 = vld [vmem:[#allocation3 + $0x5c] sm:$0x1]  ;;  %v6939_v41 = vshll.u32 %v5845_v47, 16  ;;  %v5617_v46 = vsel %vm13913_vm4, 0, %v5616_v48 }
 0x269   : > { %5786 = vst [vmem:[#allocation3 + $0x14] sm:$0xf] %v11794_v34  ;;  %v11797_v37 = vpack.c.bf16 %v5520_v19, %v5520_v19  ;;  %v5450_v15 = vmul.f32 %v16647_v23, %v5411_v8  ;;  %v5414_v0 = vadd.f32 %v12665_v28, %v20427_v24  ;;  %v5518_v40 = vmax.f32 %v5486_v11, 0.0  ;;  %v20428_v34 = vld [vmem:[#allocation26_spill] sm:$0xff]  ;;  %v5610_v8 = vld [vmem:[#allocation3 + $0x7c] sm:$0x1] }
 0x26a   : > { %v5491_v3 = vadd.f32 %v16675_v22, %v5452_v43  ;;  %v5299_v31 = vpop.f32.mrf.mxu0  ;;  %v6925_v16 = vshll.u32 %v5841_v17, 16  ;;  %5618 = vst [vmem:[#allocation3 + $0x8c] sm:$0x1] %v5617_v46  ;;  %v16739_v43 = vrot.slane %v7566_v33, 11  ;;  %v5611_v47 = vsel %vm13913_vm4, 0, %v5610_v8 }
 0x26b   : > { %5789 = vst [vmem:[#allocation3 + $0x28] sm:$0xf] %v11797_v37  ;;  %v5489_v38 = vadd.f32 %v16675_v22, %v5450_v15  ;;  %v5453_v25 = vmul.f32 %v16647_v23, %v5414_v0  ;;  %v5412_v19 = vadd.f32 %v5299_v31, %v20428_v34  ;;  %v11795_v7 = vpack.c.bf16 %v5518_v40, %v5518_v40  ;;  %v16746_v48 = vld [vmem:[#allocation3 + $0x80] sm:$0xf] }
 0x26c   : > { %v5523_v11 = vmax.f32 %v5491_v3, 0.0  ;;  %v12668_v28 = vpop.f32.mrf.mxu0  ;;  %20429 = vst [vmem:[#allocation33_spill] sm:$0xff] %v16739_v43  ;;  %5612 = vst [vmem:[#allocation3 + $0x7c] sm:$0x1] %v5611_v47  ;;  %v16750_v33 = vrot.slane %v6925_v16, 5  ;;  %v16752_v17 = vrot.slane %v7544_v13, 11 }
 0x26d   : > { %v5521_v24 = vmax.f32 %v5489_v38, 0.0  ;;  %v5492_v37 = vadd.f32 %v16675_v22, %v5453_v25  ;;  %v5451_v15 = vmul.f32 %v16647_v23, %v5412_v19  ;;  %v5417_v0 = vadd.f32 %v12668_v28, %v16547_v49  ;;  %20430 = vst [vmem:[#allocation24_spill] sm:$0xff] %v16746_v48  ;;  %5787 = vst [vmem:[#allocation3 + $0x18] sm:$0xf] %v11795_v7 }
 0x26e   : > { %v11800_v31 = vpack.c.bf16 %v5523_v11, %v5523_v11  ;;  %v5312_v40 = vpop.f32.mrf.mxu0  ;;  %v16748_v3 = vld [vmem:[#allocation3 + $0x24] sm:$0xf]  ;;  %20431 = vst [vmem:[#allocation23_spill] sm:$0xff] %v16750_v33  ;;  %20432 = vst [vmem:[#allocation43_spill] sm:$0xff] %v16752_v17  ;;  %v16754_v46 = vrot.slane %v6939_v41, 5 }
 0x26f   : > { %v11798_v38 = vpack.c.bf16 %v5521_v24, %v5521_v24  ;;  %v5524_v25 = vmax.f32 %v5492_v37, 0.0  ;;  %v5490_v34 = vadd.f32 %v16675_v22, %v5451_v15  ;;  %v5456_v49 = vmul.f32 %v16647_v23, %v5417_v0 }
 0x270   : > { %20433 = vst [vmem:[#allocation35_spill] sm:$0xff] %v16754_v46  ;;  %5792 = vst [vmem:[#allocation3 + $0x44] sm:$0xf] %v11800_v31  ;;  %v5415_v19 = vadd.f32 %v5312_v40, %v16563_v5  ;;  %v12669_v8 = vpop.f32.mrf.mxu0  ;;  %v16759_v7 = vld [vmem:[#allocation3 + $0x14] sm:$0xf]  ;;  %v19824_v11 = vshrl.u32 %v16748_v3, 16 }
 0x271   : > { %5790 = vst [vmem:[#allocation3 + $0x34] sm:$0xf] %v11798_v38  ;;  %v11801_v41 = vpack.c.bf16 %v5524_v25, %v5524_v25  ;;  %v5522_v28 = vmax.f32 %v5490_v34, 0.0  ;;  %v5495_v47 = vadd.f32 %v16675_v22, %v5456_v49  ;;  %v5418_v24 = vadd.f32 %v12669_v8, %v16566_v1 }
 0x272   : > { %v5454_v37 = vmul.f32 %v16647_v23, %v5415_v19  ;;  %v5315_v15 = vpop.f32.mrf.mxu0  ;;  %v5910_v5 = vshrl.u32 %v16759_v7, 16  ;;  %v19825_v0 = vshll.u32 %v16759_v7, 16  ;;  %v16771_v31 = vrot.slane %v19824_v11, 7 }
 0x273   : > { %5793 = vst [vmem:[#allocation3 + $0x48] sm:$0xf] %v11801_v41  ;;  %v11799_v40 = vpack.c.bf16 %v5522_v28, %v5522_v28  ;;  %v5527_v38 = vmax.f32 %v5495_v47, 0.0  ;;  %v5457_v25 = vmul.f32 %v16647_v23, %v5418_v24  ;;  %v5416_v34 = vadd.f32 %v5315_v15, %v16577_v30  ;;  %v16789_v24 = vld [vmem:[#allocation3 + $0x28] sm:$0xf] }
 0x274   : > { %v5493_v1 = vadd.f32 %v16675_v22, %v5454_v37  ;;  %v12672_v49 = vpop.f32.mrf.mxu0  ;;  %v16776_v19 = vrot.slane %v5910_v5, 7  ;;  %v16778_v8 = vrot.slane %v5910_v5, 4  ;;  %v16782_v13 = vrot.slane %v19825_v0, 5  ;;  %v16787_v30 = vld [vmem:[#allocation3 + $0x18] sm:$0xf] }
 0x275   : > { %5791 = vst [vmem:[#allocation3 + $0x38] sm:$0xf] %v11799_v40  ;;  %v11804_v16 = vpack.c.bf16 %v5527_v38, %v5527_v38  ;;  %v5496_v41 = vadd.f32 %v16675_v22, %v5457_v25  ;;  %v5455_v28 = vmul.f32 %v16647_v23, %v5416_v34  ;;  %v5421_v47 = vadd.f32 %v12672_v49, %v16583_v58  ;;  %v13265_v38 = vld [vmem:[%s19676_s2 + $0xb0] sm:$0xff]  }
 0x276   : > { %v5525_v37 = vmax.f32 %v5493_v1, 0.0  ;;  %v5328_v15 = vpop.f32.mrf.mxu0  ;;  %v5919_v5 = vshrl.u32 %v16787_v30, 16  ;;  %v11397_v40 = vcombine.low %v16759_v7, %v16787_v30  ;;  %v5941_v48 = vshrl.u32 %v16789_v24, 16 }
 0x277   : > { %5796 = vst [vmem:[#allocation3 + $0x64] sm:$0xf] %v11804_v16  ;;  %v5528_v25 = vmax.f32 %v5496_v41, 0.0  ;;  %v5494_v58 = vadd.f32 %v16675_v22, %v5455_v28  ;;  %v5460_v34 = vmul.f32 %v16647_v23, %v5421_v47  ;;  %v5419_v1 = vadd.f32 %v5328_v15, %v16603_v35  ;;  %v20434_v41 = vld [vmem:[#allocation15_spill] sm:$0xff] }
 0x278   : > { %v11802_v49 = vpack.c.bf16 %v5525_v37, %v5525_v37  ;;  %v5921_v0 = vrot.slane %v5919_v5, 7  ;;  %12707 = vmatmul.mubr.bf16.vlgmr.msra.gmra.mxu1 %v11397_v40  ;;  %v16801_v29 = vrot.slane %v5919_v5, 4  ;;  %v12673_v11 = vpop.f32.mrf.mxu0  ;;  %v16808_v35 = vrot.slane %v5941_v48, 7  ;;  %v13268_v5 = vld [vmem:[%s19676_s2 + $0xa8] sm:$0xff]  }
 0x279   : > { %v11805_v43 = vpack.c.bf16 %v5528_v25, %v5528_v25  ;;  %v5526_v46 = vmax.f32 %v5494_v58, 0.0  ;;  %v5499_v17 = vadd.f32 %v16675_v22, %v5460_v34  ;;  %v5458_v16 = vmul.f32 %v16647_v23, %v5419_v1  ;;  %12787 = vmatpush3.bf16.msra.mxu1 %v20434_v41 }
 0x27a   : > { %5794 = vst [vmem:[#allocation3 + $0x54] sm:$0xf] %v11802_v49  ;;  %v5422_v28 = vadd.f32 %v12673_v11, %v16620_v51  ;;  %v11398_v37 = vcombine.low %v16748_v3, %v16789_v24  ;;  %v5331_v15 = vpop.f32.mrf.mxu0  ;;  %12788 = vmatprep.subr.bf16.mxu1 %v13265_v38  ;;  %v20435_v51 = vshrl.u32 %v16748_v3, 16  ;;  %v20436_v1 = vshll.u32 %v16748_v3, 16 }
 0x27b   : > { %5797 = vst [vmem:[#allocation3 + $0x68] sm:$0xf] %v11805_v43  ;;  %v11803_v40 = vpack.c.bf16 %v5526_v46, %v5526_v46  ;;  %v5531_v25 = vmax.f32 %v5499_v17, 0.0  ;;  %v5497_v58 = vadd.f32 %v16675_v22, %v5458_v16  ;;  %v16826_v41 = vrot.slane %v5941_v48, 4 }
 0x27c   : > { %v16819_v11 = vrot.slane %v20435_v51, 4  ;;  %v5461_v34 = vmul.f32 %v16647_v23, %v5422_v28  ;;  %12710 = vmatprep.mubr.bf16.mxu1 %v11398_v37  ;;  %v16824_v49 = vrot.slane %v20436_v1, 5  ;;  %v5420_v47 = vadd.f32 %v5331_v15, %v16623_v12  ;;  %v12676_v43 = vpop.f32.mrf.mxu0  ;;  %v16833_v28 = vld [vmem:[#allocation3 + $0x34] sm:$0xf] }
 0x27d   : > { %5795 = vst [vmem:[#allocation3 + $0x58] sm:$0xf] %v11803_v40  ;;  %v11808_v17 = vpack.c.bf16 %v5531_v25, %v5531_v25  ;;  %v5529_v46 = vmax.f32 %v5497_v58, 0.0  ;;  %v5425_v16 = vadd.f32 %v12676_v43, %v16626_v55  ;;  %v20437_v51 = vshll.u32 %v16759_v7, 16  ;;  %12789 = vmatpush3.bf16.msra.mxu1 %v13265_v38  ;;  %v13271_v55 = vld [vmem:[%s19676_s2 + $0xa0] sm:$0xff]   ;;  %v20439_v58 = vld [vmem:[#allocation11_spill] sm:$0xff] }
 0x27e   : > { %v5500_v37 = vadd.f32 %v16675_v22, %v5461_v34  ;;  %v5459_v48 = vmul.f32 %v16647_v23, %v5420_v47  ;;  %v5344_v1 = vpop.f32.mrf.mxu0  ;;  %v5917_v12 = vrot.slane %v16776_v19, 4  ;;  %v20438_v15 = vshll.u32 %v16787_v30, 16  ;;  %12790 = vmatprep.subr.bf16.mxu1 %v13268_v5  ;;  %v16848_v43 = vld [vmem:[#allocation3 + $0x38] sm:$0xf] }
 0x27f   : > { %v5915_v33 = vor.u32 %v20437_v51, %v16776_v19  ;;  %5800 = vst [vmem:[#allocation3 + $0x84] sm:$0xf] %v11808_v17  ;;  %v11806_v7 = vpack.c.bf16 %v5529_v46, %v5529_v46  ;;  %v5464_v25 = vmul.f32 %v16647_v23, %v5425_v16  ;;  %v5423_v38 = vadd.f32 %v5344_v1, %v16631_v26 }
 0x280   : > { %v5924_v40 = vor.u32 %v20438_v15, %v5921_v0  ;;  %20441 = vst [vmem:[#allocation42_spill] sm:$0xff] %v16848_v43  ;;  %v5532_v19 = vmax.f32 %v5500_v37, 0.0  ;;  %v5498_v0 = vadd.f32 %v16675_v22, %v5459_v48  ;;  %v5954_v15 = vshrl.u32 %v16833_v28, 16  ;;  %v12677_v17 = vpop.f32.mrf.mxu0 }
 0x281   : > { %v5916_v47 = vsel %vm13652_vm2, %v20439_v58, %v5915_v33  ;;  %5798 = vst [vmem:[#allocation3 + $0x74] sm:$0xf] %v11806_v7  ;;  %v5503_v46 = vadd.f32 %v16675_v22, %v5464_v25  ;;  %v5462_v26 = vmul.f32 %v16647_v23, %v5423_v38  ;;  %12791 = vmatpush3.bf16.msra.mxu1 %v13268_v5  ;;  %v13280_v33 = vld [vmem:[%s19676_s2 + $0xf0] sm:$0xff]  }
 0x282   : > { %v5925_v51 = vsel %vm13652_vm2, %v5917_v12, %v5924_v40  ;;  %v11809_v37 = vpack.c.bf16 %v5532_v19, %v5532_v19  ;;  %v5530_v48 = vmax.f32 %v5498_v0, 0.0  ;;  %v16860_v58 = vrot.slane %v5954_v15, 7  ;;  %v5347_v40 = vpop.f32.mrf.mxu0  ;;  %12792 = vmatprep.subr.bf16.mxu1 %v13271_v55  ;;  %v13274_v19 = vld [vmem:[%s19676_s2 + $0x98] sm:$0xff]  }
 0x283   : > { %v11421_v16 = vcombine.low %v5916_v47, %v5925_v51  ;;  %v5963_v12 = vshrl.u32 %v16848_v43, 16  ;;  %v5535_v7 = vmax.f32 %v5503_v46, 0.0  ;;  %v5501_v25 = vadd.f32 %v16675_v22, %v5462_v26  ;;  %v16867_v47 = vld [vmem:[#allocation3 + $0x44] sm:$0xf] }
 0x284   : > { %v11399_v5 = vcombine.low %v16833_v28, %v16848_v43  ;;  %5801 = vst [vmem:[#allocation3 + $0x88] sm:$0xf] %v11809_v37  ;;  %v11807_v0 = vpack.c.bf16 %v5530_v48, %v5530_v48  ;;  %v16872_v1 = vrot.slane %v5954_v15, 4  ;;  %v20442_v46 = vshll.u32 %v16833_v28, 16  ;;  %v13281_v15 = vld [vmem:[%s19676_s2 + $0xe8] sm:$0xff]  }
 0x285   : > { %12755 = vmatmul.mubr.bf16.vlgmr.msra.gmra.mxu0 %v11421_v16  ;;  %v5965_v51 = vrot.slane %v5963_v12, 7  ;;  %v16878_v16 = vld [vmem:[#allocation3 + $0x48] sm:$0xf]  ;;  %v11812_v50 = vpack.c.bf16 %v5535_v7, %v5535_v7  ;;  %v5533_v10 = vmax.f32 %v5501_v25, 0.0  ;;  %v16881_v42 = vrot.slane %v5963_v12, 4  ;;  %12793 = vmatpush3.bf16.msra.mxu1 %v13271_v55 }
 0x286   : > { %v16876_v26 = vrot.slane %v20442_v46, 5  ;;  %v12680_v38 = vpop.f32.mrf.mxu0  ;;  %12835 = vmatpush3.bf16.msra.mxu0 %v20443_v9  ;;  %12711 = vmatmul.mubr.bf16.gmra.mxu1 %v11399_v5  ;;  %v20445_v37 = vshll.u32 %v16748_v3, 16  ;;  %5799 = vst [vmem:[#allocation3 + $0x78] sm:$0xf] %v11807_v0  ;;  %v5939_v46 = vrot.slane %v16771_v31, 4  ;;  %v20446_v9 = vshll.u32 %v16789_v24, 16 }
 0x287   : > { %20444 = vst [vmem:[#allocation44_spill] sm:$0xff] %v16881_v42  ;;  %12836 = vmatprep.subr.bf16.mxu0 %v13280_v33  ;;  %v5426_v25 = vadd.f32 %v12677_v17, %v16639_v44  ;;  %v5976_v12 = vshrl.u32 %v16867_v47, 16  ;;  %5804 = vst [vmem:[#allocation3 + $0xa4] sm:$0xf] %v11812_v50  ;;  %v11810_v3 = vpack.c.bf16 %v5533_v10, %v5533_v10  ;;  %v19828_v0 = vshll.u32 %v16867_v47, 16  ;;  %v13278_v10 = vld [vmem:[%s19676_s2 + $0x90] sm:$0xff]  }
 0x288   : > { %v5937_v48 = vor.u32 %v20445_v37, %v16771_v31  ;;  %v5946_v7 = vor.u32 %v20446_v9, %v16808_v35  ;;  %v5360_v5 = vpop.f32.mrf.mxu0  ;;  %v20447_v37 = vld [vmem:[#allocation9_spill] sm:$0xff]  ;;  %v5985_v31 = vshrl.u32 %v16878_v16, 16  ;;  %12794 = vmatprep.subr.bf16.mxu1 %v13274_v19 }
 0x289   : > { %v5465_v44 = vmul.f32 %v16647_v23, %v5426_v25  ;;  %v16903_v17 = vrot.slane %v5976_v12, 7  ;;  %5802 = vst [vmem:[#allocation3 + $0x94] sm:$0xf] %v11810_v3  ;;  %v16917_v25 = vld [vmem:[#allocation3 + $0x54] sm:$0xf]  ;;  %v5424_v3 = vadd.f32 %v5347_v40, %v16642_v63  ;;  %12795 = vmatpush3.bf16.msra.mxu1 %v13274_v19  ;;  %v20452_v19 = vshll.u32 %v16848_v43, 16 }
 0x28a   : > { %v5938_v42 = vsel %vm13652_vm2, %v20447_v37, %v5937_v48  ;;  %v5947_v35 = vsel %vm13652_vm2, %v5939_v46, %v5946_v7  ;;  %v16906_v50 = vpop.f32.mrf.mxu0  ;;  %12837 = vmatpush3.bf16.msra.mxu0 %v13280_v33  ;;  %v16911_v9 = vrot.slane %v5985_v31, 7  ;;  %v11400_v46 = vcombine.low %v16867_v47, %v16878_v16  ;;  %v13285_v37 = vld [vmem:[%s19676_s2 + $0xe0] sm:$0xff]   ;;  %12796 = vmatprep.subr.bf16.mxu1 %v13278_v10 }
 0x28b   : > { %v11422_v48 = vcombine.low %v5938_v42, %v5947_v35  ;;  %v16915_v7 = vrot.slane %v5976_v12, 4  ;;  %12838 = vmatprep.subr.bf16.mxu0 %v13281_v15  ;;  %v5504_v55 = vadd.f32 %v16675_v22, %v5465_v44  ;;  %v16925_v33 = vrot.slane %v19828_v0, 5 }
 0x28c   : > { %v16927_v42 = vrot.slane %v5985_v31, 4  ;;  %v16930_v35 = vpop.f32.mrf.mxu0  ;;  %12714 = vmatprep.mubr.bf16.mxu1 %v11400_v46  ;;  %v5429_v12 = vadd.f32 %v12680_v38, %v16655_v6  ;;  %v20451_v44 = vshll.u32 %v16833_v28, 16  ;;  %v5961_v0 = vrot.slane %v16860_v58, 4  ;;  %v13283_v31 = vld [vmem:[%s19676_s2 + $0x88] sm:$0xff]   ;;  %v16944_v46 = vld [vmem:[#allocation3 + $0x58] sm:$0xf] }
 0x28d   : > { %20448 = vst [vmem:[#allocation47_spill] sm:$0xff] %v16915_v7  ;;  %20449 = vst [vmem:[#allocation51_spill] sm:$0xff] %v16925_v33  ;;  %12758 = vmatprep.mubr.bf16.mxu0 %v11422_v48  ;;  %v5427_v7 = vadd.f32 %v5360_v5, %v16664_v32  ;;  %v5536_v63 = vmax.f32 %v5504_v55, 0.0  ;;  %v5463_v40 = vmul.f32 %v16647_v23, %v5424_v3  ;;  %v5998_v6 = vshrl.u32 %v16917_v25, 16 }
 0x28e   : > { %20450 = vst [vmem:[#allocation54_spill] sm:$0xff] %v16927_v42  ;;  %v5959_v21 = vor.u32 %v20451_v44, %v16860_v58  ;;  %v5968_v48 = vor.u32 %v20452_v19, %v5965_v51  ;;  %12839 = vmatpush3.bf16.msra.mxu0 %v13281_v15  ;;  %v5468_v32 = vmul.f32 %v16647_v23, %v5429_v12  ;;  %v20453_v58 = vld [vmem:[#allocation27_spill] sm:$0xff] }
 0x28f   : > { %v5466_v28 = vmul.f32 %v16647_v23, %v5427_v7  ;;  %12840 = vmatprep.subr.bf16.mxu0 %v13285_v37  ;;  %v13286_v51 = vld [vmem:[%s19676_s2 + $0xd8] sm:$0xff]   ;;  %v11813_v55 = vpack.c.bf16 %v5536_v63, %v5536_v63  ;;  %v5502_v3 = vadd.f32 %v16675_v22, %v5463_v40  ;;  %v16959_v12 = vrot.slane %v5998_v6, 7  ;;  %12797 = vmatpush3.bf16.msra.mxu1 %v13278_v10  ;;  %v13288_v63 = vld [vmem:[%s19676_s2 + $0x80] sm:$0xff]  }
 0x290   : > { %v5960_v38 = vsel %vm13652_vm2, %v20453_v58, %v5959_v21  ;;  %v5969_v15 = vsel %vm13652_vm2, %v5961_v0, %v5968_v48  ;;  %v5507_v21 = vadd.f32 %v16675_v22, %v5468_v32  ;;  %v6007_v58 = vshrl.u32 %v16944_v46, 16  ;;  %12798 = vmatprep.subr.bf16.mxu1 %v13283_v31  ;;  %v16974_v32 = vld [vmem:[#allocation3 + $0x64] sm:$0xf]  ;;  %v16983_v0 = vld [vmem:[#allocation3 + $0x68] sm:$0xf] }
 0x291   : > { %v16961_v7 = vpop.f32.mrf.mxu0  ;;  %v5505_v44 = vadd.f32 %v16675_v22, %v5466_v28  ;;  %v11423_v19 = vcombine.low %v5960_v38, %v5969_v15  ;;  %5805 = vst [vmem:[#allocation3 + $0xa8] sm:$0xf] %v11813_v55  ;;  %v5534_v40 = vmax.f32 %v5502_v3, 0.0  ;;  %v11401_v48 = vcombine.low %v16917_v25, %v16944_v46  ;;  %v13289_v28 = vld [vmem:[%s19676_s2 + $0xd0] sm:$0xff]  }
 0x292   : > { %v16972_v10 = vrot.slane %v5998_v6, 4  ;;  %12841 = vmatpush3.bf16.msra.mxu0 %v13285_v37  ;;  %v5539_v38 = vmax.f32 %v5507_v21, 0.0  ;;  %v6009_v5 = vrot.slane %v6007_v58, 7  ;;  %v20455_v55 = vshll.u32 %v16917_v25, 16 }
 0x293   : > { %v5537_v15 = vmax.f32 %v5505_v44, 0.0  ;;  %12759 = vmatmul.mubr.bf16.gmra.mxu0 %v11423_v19  ;;  %12842 = vmatprep.subr.bf16.mxu0 %v13286_v51  ;;  %v11811_v6 = vpack.c.bf16 %v5534_v40, %v5534_v40  ;;  %v20457_v37 = vshll.u32 %v16867_v47, 16  ;;  %v5983_v21 = vrot.slane %v16903_v17, 4  ;;  %v5376_v44 = vpop.f32.mrf.mxu0 }
 0x294   : > { %20454 = vst [vmem:[#allocation37_spill] sm:$0xff] %v16972_v10  ;;  %v16981_v3 = vrot.slane %v20455_v55, 5  ;;  %12715 = vmatmul.mubr.bf16.gmra.mxu1 %v11401_v48  ;;  %v16985_v10 = vrot.slane %v6007_v58, 4  ;;  %v11816_v19 = vpack.c.bf16 %v5539_v38, %v5539_v38  ;;  %v20458_v55 = vshll.u32 %v16878_v16, 16  ;;  %v20459_v58 = vld [vmem:[#allocation18_spill] sm:$0xff] }
 0x295   : > { %v5981_v42 = vor.u32 %v20457_v37, %v16903_v17  ;;  %v11814_v33 = vpack.c.bf16 %v5537_v15, %v5537_v15  ;;  %v5430_v43 = vadd.f32 %v16906_v50, %v16668_v2  ;;  %12799 = vmatpush3.bf16.msra.mxu1 %v13283_v31  ;;  %5803 = vst [vmem:[#allocation3 + $0x98] sm:$0xf] %v11811_v6  ;;  %v6020_v47 = vshrl.u32 %v16974_v32, 16  ;;  %v13290_v31 = vld [vmem:[%s19676_s2 + $0xc8] sm:$0xff]   ;;  %v12685_v6 = vpop.f32.mrf.mxu0 }
 0x296   : > { %20456 = vst [vmem:[#allocation53_spill] sm:$0xff] %v16981_v3  ;;  %v5990_v3 = vor.u32 %v20458_v55, %v16911_v9  ;;  %v6023_v17 = vshll.u32 %v16974_v32, 16  ;;  %v6029_v48 = vshrl.u32 %v16983_v0, 16  ;;  %12800 = vmatprep.subr.bf16.mxu1 %v13288_v63  ;;  %12843 = vmatpush3.bf16.msra.mxu0 %v13286_v51  ;;  %5808 = vst [vmem:[#allocation3 + $0xc4] sm:$0xf] %v11816_v19  ;;  %v17014_v51 = vld [vmem:[%s19676_s2 + $0x138] sm:$0xff]  }
 0x297   : > { %v5982_v40 = vsel %vm13652_vm2, %v20459_v58, %v5981_v42  ;;  %5806 = vst [vmem:[#allocation3 + $0xb4] sm:$0xf] %v11814_v33  ;;  %v5469_v2 = vmul.f32 %v16647_v23, %v5430_v43  ;;  %v11402_v42 = vcombine.low %v16974_v32, %v16983_v0  ;;  %12844 = vmatprep.subr.bf16.mxu0 %v13289_v28  ;;  %v17016_v38 = vrot.slane %v6020_v47, 7 }
 0x298   : > { %v5991_v9 = vsel %vm13652_vm2, %v5983_v21, %v5990_v3  ;;  %v6031_v15 = vrot.slane %v6029_v48, 7  ;;  %v17018_v43 = vrot.slane %v6020_v47, 4  ;;  %v17020_v3 = vld [vmem:[#allocation3 + $0x74] sm:$0xf]  ;;  %v17025_v21 = vrot.slane %v6023_v17, 5 }
 0x299   : > { %v11424_v33 = vcombine.low %v5982_v40, %v5991_v9  ;;  %v5508_v37 = vadd.f32 %v16675_v22, %v5469_v2  ;;  %12718 = vmatprep.mubr.bf16.mxu1 %v11402_v42  ;;  %v17027_v19 = vrot.slane %v6029_v48, 4  ;;  %v5428_v55 = vadd.f32 %v16930_v35, %v16678_v60  ;;  %12801 = vmatpush3.bf16.msra.mxu1 %v13288_v63  ;;  %v17041_v35 = vld [vmem:[#allocation3 + $0x78] sm:$0xf] }
 0x29a   : > { %v5433_v58 = vadd.f32 %v16961_v7, %v16685_v36  ;;  %v5431_v40 = vadd.f32 %v5376_v44, %v16688_v20  ;;  %v20461_v47 = vshll.u32 %v16917_v25, 16  ;;  %v6005_v2 = vrot.slane %v16959_v12, 4  ;;  %12845 = vmatpush3.bf16.msra.mxu0 %v13289_v28  ;;  %12882 = vmatprep.subr.bf16.mxu1 %v17014_v51  ;;  %v13292_v36 = vld [vmem:[%s19676_s2 + $0xc0] sm:$0xff]   ;;  %v5379_v28 = vpop.f32.mrf.mxu0 }
 0x29b   : > { %20460 = vst [vmem:[#allocation55_spill] sm:$0xff] %v17027_v19  ;;  %12762 = vmatprep.mubr.bf16.mxu0 %v11424_v33  ;;  %v5540_v42 = vmax.f32 %v5508_v37, 0.0  ;;  %v5467_v48 = vmul.f32 %v16647_v23, %v5428_v55  ;;  %v20462_v50 = vshll.u32 %v16944_v46, 16  ;;  %v6042_v63 = vshrl.u32 %v17020_v3, 16  ;;  %12846 = vmatprep.subr.bf16.mxu0 %v13290_v31  ;;  %v20467_v19 = vld [vmem:[#allocation32_spill] sm:$0xff] }
 0x29c   : > { %v6003_v9 = vor.u32 %v20461_v47, %v16959_v12  ;;  %v5472_v20 = vmul.f32 %v16647_v23, %v5433_v58  ;;  %v5470_v25 = vmul.f32 %v16647_v23, %v5431_v40  ;;  %v20463_v12 = vld [vmem:[#allocation29_spill] sm:$0xff]  ;;  %v6051_v47 = vshrl.u32 %v17041_v35, 16 }
 0x29d   : > { %v6012_v60 = vor.u32 %v20462_v50, %v6009_v5  ;;  %v6045_v5 = vshll.u32 %v17020_v3, 16  ;;  %v11817_v44 = vpack.c.bf16 %v5540_v42, %v5540_v42  ;;  %v5506_v50 = vadd.f32 %v16675_v22, %v5467_v48 }
 0x29e   : > { %v6004_v7 = vsel %vm13652_vm2, %v20463_v12, %v6003_v9  ;;  %v17057_v37 = vrot.slane %v6042_v63, 7  ;;  %v5511_v55 = vadd.f32 %v16675_v22, %v5472_v20  ;;  %v5509_v58 = vadd.f32 %v16675_v22, %v5470_v25  ;;  %12847 = vmatpush3.bf16.msra.mxu0 %v13290_v31 }
 0x29f   : > { %v6013_v33 = vsel %vm13652_vm2, %v6005_v2, %v6012_v60  ;;  %5809 = vst [vmem:[#allocation3 + $0xc8] sm:$0xf] %v11817_v44  ;;  %v5538_v9 = vmax.f32 %v5506_v50, 0.0  ;;  %v11403_v42 = vcombine.low %v17020_v3, %v17041_v35  ;;  %v17065_v48 = vrot.slane %v6042_v63, 4  ;;  %v17067_v2 = vld [vmem:[#allocation3 + $0x84] sm:$0xf]  ;;  %12848 = vmatprep.subr.bf16.mxu0 %v13292_v36  ;;  %v12688_v50 = vpop.f32.mrf.mxu0 }
 0x2a0   : > { %v11425_v40 = vcombine.low %v6004_v7, %v6013_v33  ;;  %v17072_v60 = vld [vmem:[%s19676_s2 + $0x178] sm:$0xff]   ;;  %v5543_v20 = vmax.f32 %v5511_v55, 0.0  ;;  %v5541_v25 = vmax.f32 %v5509_v58, 0.0  ;;  %v6053_v31 = vrot.slane %v6051_v47, 7  ;;  %v17076_v44 = vld [vmem:[#allocation3 + $0x88] sm:$0xf] }
 0x2a1   : > { %20464 = vst [vmem:[#allocation56_spill] sm:$0xff] %v17065_v48  ;;  %v17074_v7 = vrot.slane %v6045_v5, 5  ;;  %v11815_v3 = vpack.c.bf16 %v5538_v9, %v5538_v9  ;;  %12719 = vmatmul.mubr.bf16.gmra.mxu1 %v11403_v42  ;;  %v17078_v63 = vrot.slane %v6051_v47, 4  ;;  %v6025_v33 = vor.u32 %v6023_v17, %v17016_v38 }
 0x2a2   : > { %12763 = vmatmul.mubr.bf16.gmra.mxu0 %v11425_v40  ;;  %v6027_v12 = vrot.slane %v17016_v38, 4  ;;  %v11820_v48 = vpack.c.bf16 %v5543_v20, %v5543_v20  ;;  %v11818_v55 = vpack.c.bf16 %v5541_v25, %v5541_v25  ;;  %v20466_v58 = vshll.u32 %v16983_v0, 16 }
 0x2a3   : > { %20465 = vst [vmem:[#allocation58_spill] sm:$0xff] %v17074_v7  ;;  %v5434_v7 = vadd.f32 %v12685_v6, %v16693_v61  ;;  %12849 = vmatpush3.bf16.msra.mxu0 %v13292_v36  ;;  %5807 = vst [vmem:[#allocation3 + $0xb8] sm:$0xf] %v11815_v3  ;;  %v6026_v47 = vsel %vm13652_vm2, %v20467_v19, %v6025_v33  ;;  %v6064_v9 = vshrl.u32 %v17067_v2, 16  ;;  %v6067_v32 = vshll.u32 %v17067_v2, 16  ;;  %v5392_v19 = vpop.f32.mrf.mxu0 }
 0x2a4   : > { %v6034_v40 = vor.u32 %v20466_v58, %v6031_v15  ;;  %v6073_v17 = vshrl.u32 %v17076_v44, 16  ;;  %12930 = vmatprep.subr.bf16.mxu0 %v17072_v60  ;;  %5812 = vst [vmem:[#allocation3 + $0xe4] sm:$0xf] %v11820_v48  ;;  %5810 = vst [vmem:[#allocation3 + $0xd4] sm:$0xf] %v11818_v55  ;;  %v19830_v15 = vshll.u32 %v17076_v44, 16  ;;  %v11404_v6 = vcombine.low %v17067_v2, %v17076_v44 }
 0x2a5   : > { %v5473_v61 = vmul.f32 %v16647_v23, %v5434_v7  ;;  %v17100_v42 = vrot.slane %v6064_v9, 7  ;;  %v17102_v25 = vrot.slane %v6064_v9, 4  ;;  %v17104_v3 = vld [vmem:[#allocation3 + $0x94] sm:$0xf]  ;;  %v5432_v33 = vadd.f32 %v5379_v28, %v16705_v4  ;;  %v20469_v28 = vld [vmem:[#allocation13_spill] sm:$0xff] }
 0x2a6   : > { %v6035_v38 = vsel %vm13652_vm2, %v6027_v12, %v6034_v40  ;;  %v6075_v20 = vrot.slane %v6073_v17, 7  ;;  %12722 = vmatprep.mubr.bf16.mxu1 %v11404_v6  ;;  %v17107_v12 = vrot.slane %v6067_v32, 5  ;;  %v17109_v7 = vrot.slane %v6073_v17, 4  ;;  %v17119_v6 = vld [vmem:[#allocation3 + $0x98] sm:$0xf] }
 0x2a7   : > { %v11426_v36 = vcombine.low %v6026_v47, %v6035_v38  ;;  %v5512_v48 = vadd.f32 %v16675_v22, %v5473_v61  ;;  %v5437_v2 = vadd.f32 %v12688_v50, %v16708_v62  ;;  %v5435_v55 = vadd.f32 %v5392_v19, %v16714_v59 }
 0x2a8   : > { %v6047_v58 = vor.u32 %v6045_v5, %v17057_v37  ;;  %v6049_v40 = vrot.slane %v17057_v37, 4  ;;  %v5471_v9 = vmul.f32 %v16647_v23, %v5432_v33  ;;  %v20468_v38 = vshll.u32 %v17041_v35, 16 }
 0x2a9   : > { %12766 = vmatprep.mubr.bf16.mxu0 %v11426_v36  ;;  %v5544_v47 = vmax.f32 %v5512_v48, 0.0  ;;  %v6086_v17 = vshrl.u32 %v17104_v3, 16  ;;  %v5476_v4 = vmul.f32 %v16647_v23, %v5437_v2  ;;  %v5474_v62 = vmul.f32 %v16647_v23, %v5435_v55 }
 0x2aa   : > { %v6056_v61 = vor.u32 %v20468_v38, %v6053_v31  ;;  %v6048_v59 = vsel %vm13652_vm2, %v20469_v28, %v6047_v58  ;;  %v6089_v5 = vshll.u32 %v17104_v3, 16  ;;  %v5510_v50 = vadd.f32 %v16675_v22, %v5471_v9  ;;  %v12689_v38 = vpop.f32.mrf.mxu0 }
 0x2ab   : > { %v11821_v37 = vpack.c.bf16 %v5544_v47, %v5544_v47  ;;  %v17131_v19 = vrot.slane %v6086_v17, 7  ;;  %v5515_v36 = vadd.f32 %v16675_v22, %v5476_v4  ;;  %v5513_v48 = vadd.f32 %v16675_v22, %v5474_v62 }
 0x2ac   : > { %v6057_v31 = vsel %vm13652_vm2, %v6049_v40, %v6056_v61  ;;  %v6095_v2 = vshrl.u32 %v17119_v6, 16  ;;  %v5542_v55 = vmax.f32 %v5510_v50, 0.0  ;;  %v11405_v47 = vcombine.low %v17104_v3, %v17119_v6  ;;  %v17141_v40 = vld [vmem:[#allocation3 + $0xa4] sm:$0xf] }
 0x2ad   : > { %v11427_v33 = vcombine.low %v6048_v59, %v6057_v31  ;;  %5813 = vst [vmem:[#allocation3 + $0xe8] sm:$0xf] %v11821_v37  ;;  %v17139_v9 = vrot.slane %v6086_v17, 4  ;;  %v5547_v61 = vmax.f32 %v5515_v36, 0.0  ;;  %v5545_v28 = vmax.f32 %v5513_v48, 0.0 }
 0x2ae   : > { %v6097_v4 = vrot.slane %v6095_v2, 7  ;;  %v17143_v62 = vrot.slane %v6089_v5, 5  ;;  %v17145_v59 = vld [vmem:[#allocation3 + $0xa8] sm:$0xf]  ;;  %v11819_v37 = vpack.c.bf16 %v5542_v55, %v5542_v55  ;;  %12723 = vmatmul.mubr.bf16.gmra.mxu1 %v11405_v47  ;;  %v17147_v50 = vrot.slane %v6095_v2, 4  ;;  %v5395_v47 = vpop.f32.mrf.mxu0 }
 0x2af   : > { %12767 = vmatmul.mubr.bf16.gmra.mxu0 %v11427_v33  ;;  %v6069_v31 = vor.u32 %v6067_v32, %v17100_v42  ;;  %v6071_v3 = vrot.slane %v17100_v42, 4  ;;  %v11824_v17 = vpack.c.bf16 %v5547_v61, %v5547_v61  ;;  %v11822_v58 = vpack.c.bf16 %v5545_v28, %v5545_v28  ;;  %v20471_v33 = vld [vmem:[#allocation45_spill] sm:$0xff]  ;;  %v5863_v61 = vld [vmem:[#allocation3 + $0xb4] sm:$0xf] }
 0x2b0   : > { %20470 = vst [vmem:[#allocation60_spill] sm:$0xff] %v17143_v62  ;;  %v6078_v36 = vor.u32 %v19830_v15, %v6075_v20  ;;  %v5438_v48 = vadd.f32 %v12689_v38, %v16718_v27  ;;  %5811 = vst [vmem:[#allocation3 + $0xd8] sm:$0xf] %v11819_v37  ;;  %v6108_v55 = vshrl.u32 %v17141_v40, 16  ;;  %v6111_v2 = vshll.u32 %v17141_v40, 16  ;;  %v20477_v27 = vld [vmem:[#allocation20_spill] sm:$0xff] }
 0x2b1   : > { %v6070_v62 = vsel %vm13652_vm2, %v20471_v33, %v6069_v31  ;;  %v6117_v32 = vshrl.u32 %v17145_v59, 16  ;;  %5816 = vst [vmem:[#allocation3 + $0x104] sm:$0xf] %v11824_v17  ;;  %5814 = vst [vmem:[#allocation3 + $0xf4] sm:$0xf] %v11822_v58  ;;  %v11406_v38 = vcombine.low %v17141_v40, %v17145_v59  ;;  %v6091_v40 = vor.u32 %v6089_v5, %v17131_v19 }
 0x2b2   : > { %v6079_v42 = vsel %vm13652_vm2, %v6071_v3, %v6078_v36  ;;  %v5477_v20 = vmul.f32 %v16647_v23, %v5438_v48  ;;  %v6110_v37 = vrot.slane %v6108_v55, 7  ;;  %v17166_v33 = vrot.slane %v6108_v55, 4  ;;  %v17168_v15 = vld [vmem:[#allocation3 + $0xb8] sm:$0xf] }
 0x2b3   : > { %v11428_v28 = vcombine.low %v6070_v62, %v6079_v42  ;;  %v6119_v31 = vrot.slane %v6117_v32, 7  ;;  %20473 = vst [vmem:[#allocation62_spill] sm:$0xff] %v17168_v15  ;;  %12726 = vmatprep.mubr.bf16.mxu1 %v11406_v38  ;;  %v17171_v17 = vrot.slane %v6111_v2, 5  ;;  %v17173_v3 = vrot.slane %v6117_v32, 4 }
 0x2b4   : > { %20472 = vst [vmem:[#allocation57_spill] sm:$0xff] %v17166_v33  ;;  %v5516_v58 = vadd.f32 %v16675_v22, %v5477_v20  ;;  %v5436_v23 = vadd.f32 %v5395_v47, %v16727_v39  ;;  %v6093_v62 = vrot.slane %v17131_v19, 4  ;;  %v20476_v36 = vshll.u32 %v17119_v6, 16  ;;  %v13377_v22 = vld [vmem:[%s19677_s3] ss:$0 sm:$0xff] }
 0x2b5   : > { %20474 = vst [vmem:[#allocation59_spill] sm:$0xff] %v17171_v17  ;;  %20475 = vst [vmem:[#allocation61_spill] sm:$0xff] %v17173_v3  ;;  %12770 = vmatprep.mubr.bf16.mxu0 %v11428_v28  ;;  %v6130_v55 = vshrl.u32 %v5863_v61, 16  ;;  %v6133_v38 = vshll.u32 %v5863_v61, 16  ;;  %v6139_v32 = vshrl.u32 %v17168_v15, 16  ;;  %v6092_v39 = vsel %vm13652_vm2, %v20477_v27, %v6091_v40 }
 0x2b6   : > { %v6100_v48 = vor.u32 %v20476_v36, %v6097_v4  ;;  %v5548_v42 = vmax.f32 %v5516_v58, 0.0  ;;  %v5475_v20 = vmul.f32 %v13377_v22, %v5436_v23  ;;  %v13378_v28 = vld [vmem:[%s19678_s4] ss:$0 sm:$0xff]  ;;  %v5867_v22 = vld [vmem:[#allocation3 + $0xc4] sm:$0xf]  ;;  %v11407_v17 = vcombine.low %v5863_v61, %v17168_v15 }
 0x2b7   : > { %v6132_v19 = vrot.slane %v6130_v55, 7  ;;  %v6141_v36 = vrot.slane %v6139_v32, 7  ;;  %v17193_v3 = vld [vmem:[#allocation3 + $0xc8] sm:$0xf]  ;;  %v17196_v27 = vrot.slane %v6130_v55, 4  ;;  %v17198_v40 = vrot.slane %v6133_v38, 5 }
 0x2b8   : > { %v6101_v5 = vsel %vm13652_vm2, %v6093_v62, %v6100_v48  ;;  %v11825_v47 = vpack.c.bf16 %v5548_v42, %v5548_v42  ;;  %v5514_v58 = vadd.f32 %v13378_v28, %v5475_v20  ;;  %v17200_v62 = vrot.slane %v6139_v32, 4  ;;  %12727 = vmatmul.mubr.bf16.gmra.mxu1 %v11407_v17 }
 0x2b9   : > { %v11429_v23 = vcombine.low %v6092_v39, %v6101_v5  ;;  %20478 = vst [vmem:[#allocation63_spill] sm:$0xff] %v17196_v27  ;;  %v6113_v42 = vor.u32 %v6111_v2, %v6110_v37  ;;  %v6115_v4 = vrot.slane %v6110_v37, 4  ;;  %v20480_v20 = vshll.u32 %v17145_v59, 16  ;;  %v20481_v27 = vld [vmem:[#allocation21_spill] sm:$0xff]  ;;  %v5871_v37 = vld [vmem:[#allocation3 + $0xd4] sm:$0xf] }
 0x2ba   : > { %20479 = vst [vmem:[#allocation39_spill] sm:$0xff] %v17200_v62  ;;  %5817 = vst [vmem:[#allocation3 + $0x108] sm:$0xf] %v11825_v47  ;;  %v5546_v48 = vmax.f32 %v5514_v58, 0.0  ;;  %v6152_v5 = vshrl.u32 %v5867_v22, 16  ;;  %v6155_v28 = vshll.u32 %v5867_v22, 16  ;;  %v11408_v2 = vcombine.low %v5867_v22, %v17193_v3 }
 0x2bb   : > { %12771 = vmatmul.mubr.bf16.gmra.mxu0 %v11429_v23  ;;  %v6122_v39 = vor.u32 %v20480_v20, %v6119_v31  ;;  %v6161_v33 = vshrl.u32 %v17193_v3, 16  ;;  %v6114_v32 = vsel %vm13652_vm2, %v20481_v27, %v6113_v42  ;;  %v17212_v58 = vld [vmem:[#allocation3 + $0xd8] sm:$0xf]  ;;  %v6135_v27 = vor.u32 %v6133_v38, %v6132_v19 }
 0x2bc   : > { %v11823_v55 = vpack.c.bf16 %v5546_v48, %v5546_v48  ;;  %v6154_v17 = vrot.slane %v6152_v5, 7  ;;  %v17214_v20 = vrot.slane %v6152_v5, 4  ;;  %12730 = vmatprep.mubr.bf16.mxu1 %v11408_v2  ;;  %v17216_v48 = vrot.slane %v6155_v28, 5 }
 0x2bd   : > { %v6123_v47 = vsel %vm13652_vm2, %v6115_v4, %v6122_v39  ;;  %v6163_v23 = vrot.slane %v6161_v33, 7  ;;  %v17218_v61 = vrot.slane %v6161_v33, 4  ;;  %v6137_v42 = vrot.slane %v6132_v19, 4 }
 0x2be   : > { %v11430_v31 = vcombine.low %v6114_v32, %v6123_v47  ;;  %20482 = vst [vmem:[#allocation65_spill] sm:$0xff] %v17214_v20  ;;  %5815 = vst [vmem:[#allocation3 + $0xf8] sm:$0xf] %v11823_v55  ;;  %v20485_v4 = vshll.u32 %v17168_v15, 16  ;;  %v6174_v39 = vshrl.u32 %v5871_v37, 16  ;;  %v6177_v62 = vshll.u32 %v5871_v37, 16 }
 0x2bf   : > { %20483 = vst [vmem:[#allocation6_spill] sm:$0xff] %v17216_v48  ;;  %20484 = vst [vmem:[#allocation64_spill] sm:$0xff] %v17218_v61  ;;  %v6183_v32 = vshrl.u32 %v17212_v58, 16  ;;  %v20486_v47 = vld [vmem:[#allocation25_spill] sm:$0xff]  ;;  %v11409_v2 = vcombine.low %v5871_v37, %v17212_v58  ;;  %v6157_v33 = vor.u32 %v6155_v28, %v6154_v17  ;;  %v5875_v61 = vld [vmem:[#allocation3 + $0xe4] sm:$0xf] }
 0x2c0   : > { %12774 = vmatprep.mubr.bf16.mxu0 %v11430_v31  ;;  %v6144_v22 = vor.u32 %v20485_v4, %v6141_v36  ;;  %v6136_v5 = vsel %vm13652_vm2, %v20486_v47, %v6135_v27  ;;  %v6176_v19 = vrot.slane %v6174_v39, 7  ;;  %v17230_v36 = vrot.slane %v6174_v39, 4  ;;  %v17232_v4 = vld [vmem:[#allocation3 + $0xe8] sm:$0xf]  ;;  %v20489_v27 = vld [vmem:[#allocation19_spill] sm:$0xff] }
 0x2c1   : > { %v6185_v31 = vrot.slane %v6183_v32, 7  ;;  %v17234_v20 = vrot.slane %v6177_v62, 5  ;;  %v17236_v15 = vrot.slane %v6183_v32, 4  ;;  %v6158_v37 = vsel %vm13652_vm2, %v20489_v27, %v6157_v33  ;;  %12731 = vmatmul.mubr.bf16.gmra.mxu1 %v11409_v2 }
 0x2c2   : > { %v6145_v38 = vsel %vm13652_vm2, %v6137_v42, %v6144_v22  ;;  %v6159_v28 = vrot.slane %v6154_v17, 4  ;;  %v20490_v47 = vshll.u32 %v17193_v3, 16  ;;  %v6196_v22 = vshrl.u32 %v5875_v61, 16 }
 0x2c3   : > { %v11431_v48 = vcombine.low %v6136_v5, %v6145_v38  ;;  %20487 = vst [vmem:[#allocation66_spill] sm:$0xff] %v17234_v20  ;;  %20488 = vst [vmem:[#allocation7_spill] sm:$0xff] %v17236_v15  ;;  %v6199_v55 = vshll.u32 %v5875_v61, 16  ;;  %v6205_v39 = vshrl.u32 %v17232_v4, 16  ;;  %v11410_v38 = vcombine.low %v5875_v61, %v17232_v4  ;;  %v5879_v15 = vld [vmem:[#allocation3 + $0xf4] sm:$0xf] }
 0x2c4   : > { %v6166_v42 = vor.u32 %v20490_v47, %v6163_v23  ;;  %v6179_v32 = vor.u32 %v6177_v62, %v6176_v19  ;;  %v6198_v33 = vrot.slane %v6196_v22, 7  ;;  %v17248_v2 = vrot.slane %v6196_v22, 4 }
 0x2c5   : > { %12775 = vmatmul.mubr.bf16.gmra.mxu0 %v11431_v48  ;;  %v17250_v17 = vrot.slane %v6199_v55, 5  ;;  %v17252_v23 = vld [vmem:[#allocation3 + $0xf8] sm:$0xf]  ;;  %v6207_v48 = vrot.slane %v6205_v39, 7  ;;  %12734 = vmatprep.mubr.bf16.mxu1 %v11410_v38  ;;  %v17254_v47 = vrot.slane %v6205_v39, 4  ;;  %v6181_v61 = vrot.slane %v6176_v19, 4 }
 0x2c6   : > { %v6167_v20 = vsel %vm13652_vm2, %v6159_v28, %v6166_v42  ;;  %20491 = vst [vmem:[#allocation5_spill] sm:$0xff] %v17248_v2  ;;  %v6180_v62 = vsel %vm13652_vm2, %v16628_v18, %v6179_v32  ;;  %v20494_v5 = vshll.u32 %v17212_v58, 16  ;;  %v6218_v42 = vshrl.u32 %v5879_v15, 16  ;;  %v17270_v19 = vld [vmem:[#allocation3 + $0x14] sm:$0xf] }
 0x2c7   : > { %20492 = vst [vmem:[#allocation36_spill] sm:$0xff] %v17250_v17  ;;  %v11432_v27 = vcombine.low %v6158_v37, %v6167_v20  ;;  %20493 = vst [vmem:[#allocation10_spill] sm:$0xff] %v17254_v47  ;;  %v6221_v22 = vshll.u32 %v5879_v15, 16  ;;  %v6227_v17 = vshrl.u32 %v17252_v23, 16  ;;  %v11411_v20 = vcombine.low %v5879_v15, %v17252_v23  ;;  %v17277_v15 = vld [vmem:[#allocation3 + $0x18] sm:$0xf] }
 0x2c8   : > { %v6188_v28 = vor.u32 %v20494_v5, %v6185_v31  ;;  %v6201_v37 = vor.u32 %v6199_v55, %v6198_v33  ;;  %v6220_v38 = vrot.slane %v6218_v42, 7  ;;  %v17266_v47 = vrot.slane %v6218_v42, 4 }
 0x2c9   : > { %12778 = vmatprep.mubr.bf16.mxu0 %v11432_v27  ;;  %v17268_v18 = vrot.slane %v6221_v22, 5  ;;  %v6229_v5 = vrot.slane %v6227_v17, 7  ;;  %v17272_v32 = vrot.slane %v6227_v17, 4  ;;  %12735 = vmatmul.mubr.bf16.gmra.mxu1 %v11411_v20  ;;  %v6203_v55 = vrot.slane %v6198_v33, 4 }
 0x2ca   : > { %v6189_v39 = vsel %vm13652_vm2, %v6181_v61, %v6188_v28  ;;  %v6202_v27 = vsel %vm13652_vm2, %v16635_v54, %v6201_v37  ;;  %v20496_v61 = vshll.u32 %v17232_v4, 16  ;;  %v6223_v42 = vor.u32 %v6221_v22, %v6220_v38  ;;  %12802 = vmatprep.mubr.bf16.mxu1 %v16617_v52 }
 0x2cb   : > { %20495 = vst [vmem:[#allocation41_spill] sm:$0xff] %v17268_v18  ;;  %v11433_v31 = vcombine.low %v6180_v62, %v6189_v39  ;;  %v6225_v2 = vrot.slane %v6220_v38, 4  ;;  %v20497_v18 = vshll.u32 %v17252_v23, 16  ;;  %v6861_v17 = vor.u32 %v16782_v13, %v16778_v8  ;;  %v17299_v38 = vld [vmem:[#allocation3 + $0x24] sm:$0xf] }
 0x2cc   : > { %v6210_v28 = vor.u32 %v20496_v61, %v6207_v48  ;;  %v20498_v54 = vshll.u32 %v16787_v30, 16  ;;  %v7461_v20 = vshrl.u32 %v17270_v19, 16  ;;  %v6224_v48 = vsel %vm13652_vm2, %v16658_v56, %v6223_v42 }
 0x2cd   : > { %12779 = vmatmul.mubr.bf16.gmra.mxu0 %v11433_v31  ;;  %v6232_v62 = vor.u32 %v20497_v18, %v6229_v5  ;;  %v7464_v22 = vshll.u32 %v17270_v19, 16  ;;  %v19879_v39 = vshrl.u32 %v17277_v15, 16  ;;  %v6862_v8 = vrot.slane %v6861_v17, 4  ;;  %v17316_v17 = vld [vmem:[#allocation3 + $0x28] sm:$0xf] }
 0x2ce   : > { %v6863_v37 = vrot.slane %v20498_v54, 5  ;;  %v6211_v33 = vsel %vm13652_vm2, %v6203_v55, %v6210_v28  ;;  %v7463_v31 = vrot.slane %v7461_v20, 7  ;;  %v7473_v5 = vshll.u32 %v17277_v15, 16 }
 0x2cf   : > { %v11434_v52 = vcombine.low %v6202_v27, %v6211_v33  ;;  %v6233_v13 = vsel %vm13652_vm2, %v6225_v2, %v6232_v62  ;;  %v7472_v56 = vrot.slane %v19879_v39, 7  ;;  %v6875_v2 = vor.u32 %v16824_v49, %v16819_v11 }
 0x2d0   : > { %v6866_v30 = vor.u32 %v16801_v29, %v6863_v37  ;;  %v11435_v18 = vcombine.low %v6224_v48, %v6233_v13  ;;  %v6864_v27 = vsel %vm14099_vm7, %v6862_v8, %v6863_v37  ;;  %v20499_v29 = vshll.u32 %v16789_v24, 16  ;;  %v17331_v8 = vld [vmem:[#allocation3 + $0x34] sm:$0xf] }
 0x2d1   : > { %12782 = vmatprep.mubr.bf16.mxu0 %v11434_v52  ;;  %v7466_v28 = vor.u32 %v7464_v22, %v7463_v31  ;;  %v7468_v42 = vrot.slane %v7463_v31, 4  ;;  %v7475_v62 = vor.u32 %v7473_v5, %v7472_v56  ;;  %v19838_v54 = vshrl.u32 %v17299_v38, 16 }
 0x2d2   : > { %v6867_v55 = vrot.slane %v6866_v30, 4  ;;  %v6877_v61 = vrot.slane %v20499_v29, 5  ;;  %v6876_v33 = vrot.slane %v6875_v2, 4  ;;  %v19837_v24 = vshll.u32 %v17299_v38, 16  ;;  %v17344_v29 = vld [vmem:[#allocation3 + $0x38] sm:$0xf] }
 0x2d3   : > { %v7467_v48 = vsel %vm13652_vm2, %v16649_v45, %v7466_v28  ;;  %v7476_v52 = vsel %vm13652_vm2, %v7468_v42, %v7475_v62  ;;  %v7485_v13 = vrot.slane %v19838_v54, 7  ;;  %v19833_v45 = vshrl.u32 %v17316_v17, 16  ;;  %v20500_v28 = vld [vmem:[#allocation42_spill] sm:$0xff] }
 0x2d4   : > { %v6872_v37 = vsel %vm14099_vm7, %v6867_v55, %v16660_v14  ;;  %v6880_v11 = vor.u32 %v16826_v41, %v6877_v61  ;;  %v13293_v14 = vld [vmem:[%s19676_s2 + $0x130] sm:$0xff]   ;;  %v11516_v41 = vcombine.low %v7467_v48, %v7476_v52  ;;  %v6878_v30 = vsel %vm14099_vm7, %v6876_v33, %v6877_v61  ;;  %v20503_v48 = vld [vmem:[#allocation44_spill] sm:$0xff] }
 0x2d5   : > { %v11461_v49 = vcombine.low %v6864_v27, %v6872_v37  ;;  %12783 = vmatmul.mubr.bf16.gmra.mxu0 %v11435_v18  ;;  %v7488_v56 = vor.u32 %v19837_v24, %v7485_v13  ;;  %v7490_v27 = vrot.slane %v7485_v13, 4  ;;  %v19836_v55 = vshll.u32 %v17316_v17, 16  ;;  %v20511_v24 = vld [vmem:[#allocation53_spill] sm:$0xff] }
 0x2d6   : > { %v6881_v31 = vrot.slane %v6880_v11, 4  ;;  %v6889_v2 = vor.u32 %v16876_v26, %v16872_v1  ;;  %12850 = vmatprep.mubr.bf16.mxu0 %v11516_v41  ;;  %v7494_v61 = vrot.slane %v19833_v45, 7  ;;  %v20501_v42 = vshll.u32 %v20500_v28, 16  ;;  %v20502_v11 = vld [vmem:[#allocation14_spill] sm:$0xff] }
 0x2d7   : > { %12803 = vmatmul.mubr.bf16.vlgmr.msra.gmra.mxu1 %v11461_v49  ;;  %v19832_v37 = vshrl.u32 %v17331_v8, 16  ;;  %v7489_v1 = vsel %vm13652_vm2, %v20502_v11, %v7488_v56  ;;  %v19835_v49 = vshll.u32 %v17331_v8, 16  ;;  %v19834_v41 = vshrl.u32 %v17344_v29, 16  ;;  %v20504_v56 = vld [vmem:[#allocation47_spill] sm:$0xff] }
 0x2d8   : > { %v6886_v18 = vsel %vm14099_vm7, %v6881_v31, %v16682_v57  ;;  %12883 = vmatpush3.bf16.msra.mxu1 %v17014_v51  ;;  %v6891_v62 = vrot.slane %v20501_v42, 5  ;;  %v6890_v26 = vrot.slane %v6889_v2, 4  ;;  %v13294_v57 = vld [vmem:[%s19676_s2 + $0x128] sm:$0xff]   ;;  %v7497_v51 = vor.u32 %v19836_v55, %v7494_v61  ;;  %v20505_v2 = vld [vmem:[#allocation51_spill] sm:$0xff]  ;;  %v17375_v61 = vld [vmem:[#allocation3 + $0x44] sm:$0xf] }
 0x2d9   : > { %v11462_v33 = vcombine.low %v6878_v30, %v6886_v18  ;;  %12884 = vmatprep.subr.bf16.mxu1 %v13293_v14  ;;  %v7507_v13 = vrot.slane %v19832_v37, 7  ;;  %v19870_v31 = vshll.u32 %v17344_v29, 16  ;;  %v6903_v18 = vor.u32 %v20505_v2, %v20504_v56  ;;  %v20507_v56 = vld [vmem:[#allocation54_spill] sm:$0xff]  ;;  %v20510_v55 = vld [vmem:[#allocation37_spill] sm:$0xff] }
 0x2da   : > { %v6894_v52 = vor.u32 %v20503_v48, %v6891_v62  ;;  %v6892_v30 = vsel %vm14099_vm7, %v6890_v26, %v6891_v62  ;;  %v20506_v28 = vshll.u32 %v16878_v16, 16  ;;  %v7498_v11 = vsel %vm13652_vm2, %v7490_v27, %v7497_v51  ;;  %v17384_v16 = vld [vmem:[#allocation3 + $0x48] sm:$0xf]  ;;  %v13295_v27 = vld [vmem:[%s19676_s2 + $0x120] sm:$0xff]  }
 0x2db   : > { %12806 = vmatprep.mubr.bf16.mxu1 %v11462_v33  ;;  %v7510_v33 = vor.u32 %v19835_v49, %v7507_v13  ;;  %v7512_v37 = vrot.slane %v7507_v13, 4  ;;  %v11517_v62 = vcombine.low %v7489_v1, %v7498_v11  ;;  %v7516_v26 = vrot.slane %v19834_v41, 7  ;;  %v20508_v51 = vld [vmem:[#allocation28_spill] sm:$0xff]  ;;  %v20509_v13 = vld [vmem:[#allocation22_spill] sm:$0xff] }
 0x2dc   : > { %v6905_v42 = vrot.slane %v20506_v28, 5  ;;  %v6895_v48 = vrot.slane %v6894_v52, 4  ;;  %12885 = vmatpush3.bf16.msra.mxu1 %v13293_v14  ;;  %v6904_v45 = vrot.slane %v6903_v18, 4  ;;  %v19845_v1 = vshrl.u32 %v17375_v61, 16  ;;  %v17397_v28 = vld [vmem:[#allocation3 + $0x54] sm:$0xf] }
 0x2dd   : > { %12886 = vmatprep.subr.bf16.mxu1 %v13294_v57  ;;  %v7511_v14 = vsel %vm13652_vm2, %v20509_v13, %v7510_v33  ;;  %v19841_v18 = vshll.u32 %v17375_v61, 16  ;;  %v13299_v11 = vld [vmem:[%s19676_s2 + $0x170] sm:$0xff]   ;;  %12851 = vmatmul.mubr.bf16.vlgmr.msra.gmra.mxu0 %v11517_v62  ;;  %v7519_v41 = vor.u32 %v19870_v31, %v7516_v26  ;;  %v19840_v13 = vshrl.u32 %v17384_v16, 16  ;;  %v20512_v62 = vld [vmem:[#allocation12_spill] sm:$0xff] }
 0x2de   : > { %v6908_v2 = vor.u32 %v20507_v56, %v6905_v42  ;;  %v6900_v52 = vsel %vm14099_vm7, %v6895_v48, %v20508_v51  ;;  %v6906_v48 = vsel %vm14099_vm7, %v6904_v45, %v6905_v42  ;;  %v7529_v33 = vrot.slane %v19845_v1, 7  ;;  %12931 = vmatpush3.bf16.msra.mxu0 %v17072_v60  ;;  %v7415_v1 = vld [vmem:[#allocation3 + $0x70] sm:$0xf] }
 0x2df   : > { %v11463_v56 = vcombine.low %v6892_v30, %v6900_v52  ;;  %v19844_v49 = vshll.u32 %v17384_v16, 16  ;;  %v6917_v54 = vor.u32 %v20511_v24, %v20510_v55  ;;  %v7520_v30 = vsel %vm13652_vm2, %v7512_v37, %v7519_v41  ;;  %v13296_v37 = vld [vmem:[%s19676_s2 + $0x118] sm:$0xff]   ;;  %12932 = vmatprep.subr.bf16.mxu0 %v13299_v11 }
 0x2e0   : > { %v6909_v51 = vrot.slane %v6908_v2, 4  ;;  %12887 = vmatpush3.bf16.msra.mxu1 %v13294_v57  ;;  %v20513_v42 = vshll.u32 %v16944_v46, 16  ;;  %v17420_v2 = vld [vmem:[#allocation3 + $0x58] sm:$0xf]  ;;  %v19839_v52 = vshrl.u32 %v17397_v28, 16  ;;  %v11518_v24 = vcombine.low %v7511_v14, %v7520_v30  ;;  %v13300_v46 = vld [vmem:[%s19676_s2 + $0x168] sm:$0xff]  }
 0x2e1   : > { %12807 = vmatmul.mubr.bf16.gmra.mxu1 %v11463_v56  ;;  %12888 = vmatprep.subr.bf16.mxu1 %v13295_v27  ;;  %v7532_v60 = vor.u32 %v19841_v18, %v7529_v33  ;;  %v7534_v57 = vrot.slane %v7529_v33, 4  ;;  %v7538_v41 = vrot.slane %v19840_v13, 7  ;;  %v6918_v56 = vrot.slane %v6917_v54, 4 }
 0x2e2   : > { %v6914_v45 = vsel %vm14099_vm7, %v6909_v51, %v20512_v62  ;;  %v6919_v26 = vrot.slane %v20513_v42, 5  ;;  %12854 = vmatprep.mubr.bf16.mxu0 %v11518_v24  ;;  %v20514_v51 = vld [vmem:[#allocation31_spill] sm:$0xff]  ;;  %v19843_v30 = vshll.u32 %v17397_v28, 16  ;;  %v19842_v62 = vshrl.u32 %v17420_v2, 16  ;;  %v17442_v42 = vld [vmem:[#allocation3 + $0x64] sm:$0xf]  ;;  %12933 = vmatpush3.bf16.msra.mxu0 %v13299_v11 }
 0x2e3   : > { %v11464_v55 = vcombine.low %v6906_v48, %v6914_v45  ;;  %v7551_v48 = vrot.slane %v19839_v52, 7  ;;  %v7533_v33 = vsel %vm13652_vm2, %v20514_v51, %v7532_v60  ;;  %v19867_v45 = vshll.u32 %v17420_v2, 16  ;;  %12934 = vmatprep.subr.bf16.mxu0 %v13300_v46  ;;  %v20516_v11 = vld [vmem:[#allocation23_spill] sm:$0xff] }
 0x2e4   : > { %v6922_v14 = vor.u32 %v16985_v10, %v6919_v26  ;;  %v7541_v10 = vor.u32 %v19844_v49, %v7538_v41  ;;  %v6920_v54 = vsel %vm14099_vm7, %v6918_v56, %v6919_v26  ;;  %12889 = vmatpush3.bf16.msra.mxu1 %v13295_v27  ;;  %v7560_v51 = vrot.slane %v19842_v62, 7  ;;  %v17456_v41 = vld [vmem:[#allocation3 + $0x68] sm:$0xf] }
 0x2e5   : > { %12810 = vmatprep.mubr.bf16.mxu1 %v11464_v55  ;;  %v7556_v55 = vrot.slane %v7551_v48, 4  ;;  %v7554_v60 = vor.u32 %v19843_v30, %v7551_v48  ;;  %v6931_v52 = vor.u32 %v17025_v21, %v17018_v43  ;;  %v20515_v13 = vshll.u32 %v16983_v0, 16  ;;  %12890 = vmatprep.subr.bf16.mxu1 %v13296_v37  ;;  %v13298_v0 = vld [vmem:[%s19676_s2 + $0x110] sm:$0xff]   ;;  %v13302_v43 = vld [vmem:[%s19676_s2 + $0x160] sm:$0xff]   ;;  %v20517_v48 = vld [vmem:[#allocation43_spill] sm:$0xff] }
 0x2e6   : > { %v6923_v24 = vrot.slane %v6922_v14, 4  ;;  %v7542_v27 = vsel %vm13652_vm2, %v7534_v57, %v7541_v10  ;;  %v19848_v56 = vshrl.u32 %v17442_v42, 16  ;;  %v19846_v14 = vshll.u32 %v17442_v42, 16  ;;  %12935 = vmatpush3.bf16.msra.mxu0 %v13300_v46 }
 0x2e7   : > { %v6933_v18 = vrot.slane %v20515_v13, 5  ;;  %v11519_v21 = vcombine.low %v7533_v33, %v7542_v27  ;;  %v7555_v57 = vsel %vm13652_vm2, %v20517_v48, %v7554_v60  ;;  %v7563_v10 = vor.u32 %v19867_v45, %v7560_v51  ;;  %v5849_v60 = vld [vmem:[#allocation3 + $0x7c] sm:$0x1]  ;;  %v20519_v51 = vld [vmem:[#allocation56_spill] sm:$0xff]  ;;  %12936 = vmatprep.subr.bf16.mxu0 %v13302_v43 }
 0x2e8   : > { %v6928_v26 = vsel %vm14099_vm7, %v6923_v24, %v20516_v11  ;;  %v6932_v24 = vrot.slane %v6931_v52, 4  ;;  %v20518_v11 = vld [vmem:[#allocation55_spill] sm:$0xff]  ;;  %v7573_v30 = vrot.slane %v19848_v56, 7  ;;  %v19847_v49 = vshrl.u32 %v17456_v41, 16  ;;  %12891 = vmatpush3.bf16.msra.mxu1 %v13296_v37  ;;  %v20520_v52 = vld [vmem:[#allocation58_spill] sm:$0xff] }
 0x2e9   : > { %v11465_v13 = vcombine.low %v6920_v54, %v6928_v26  ;;  %v6936_v62 = vor.u32 %v20518_v11, %v6933_v18  ;;  %12855 = vmatmul.mubr.bf16.gmra.mxu0 %v11519_v21  ;;  %v7564_v33 = vsel %vm13652_vm2, %v7556_v55, %v7563_v10  ;;  %v19849_v54 = vshll.u32 %v17456_v41, 16  ;;  %v13301_v11 = vld [vmem:[%s19676_s2 + $0x108] sm:$0xff]   ;;  %12892 = vmatprep.subr.bf16.mxu1 %v13298_v0 }
 0x2ea   : > { %v6945_v27 = vor.u32 %v20520_v52, %v20519_v51  ;;  %v20521_v26 = vshll.u32 %v17041_v35, 16  ;;  %v11520_v37 = vcombine.low %v7555_v57, %v7564_v33  ;;  %v6934_v46 = vsel %vm14099_vm7, %v6932_v24, %v6933_v18  ;;  %v17500_v33 = vld [vmem:[#allocation3 + $0x74] sm:$0xf]  ;;  %v20522_v18 = vld [vmem:[#allocation35_spill] sm:$0xff]  ;;  %v20523_v24 = vld [vmem:[#allocation33_spill] sm:$0xff]  ;;  %12937 = vmatpush3.bf16.msra.mxu0 %v13302_v43 }
 0x2eb   : > { %12811 = vmatmul.mubr.bf16.gmra.mxu1 %v11465_v13  ;;  %v6937_v21 = vrot.slane %v6936_v62, 4  ;;  %v7576_v55 = vor.u32 %v19846_v14, %v7573_v30  ;;  %v13303_v13 = vld [vmem:[%s19676_s2 + $0x158] sm:$0xff]   ;;  %v7578_v35 = vrot.slane %v7573_v30, 4  ;;  %v7582_v10 = vrot.slane %v19847_v49, 7  ;;  %v5853_v56 = vld [vmem:[#allocation3 + $0x8c] sm:$0x1] }
 0x2ec   : > { %v6947_v48 = vrot.slane %v20521_v26, 5  ;;  %v6946_v51 = vrot.slane %v6945_v27, 4  ;;  %12858 = vmatprep.mubr.bf16.mxu0 %v11520_v37  ;;  %v6953_v26 = vshll.u32 %v5849_v60, 16  ;;  %v17508_v14 = vld [vmem:[#allocation3 + $0x78] sm:$0xf]  ;;  %v7588_v30 = vshrl.u32 %v7415_v1, 16  ;;  %12893 = vmatpush3.bf16.msra.mxu1 %v13298_v0 }
 0x2ed   : > { %v6942_v62 = vsel %vm14099_vm7, %v6937_v21, %v20522_v18  ;;  %v7577_v52 = vsel %vm13652_vm2, %v20523_v24, %v7576_v55  ;;  %12894 = vmatprep.subr.bf16.mxu1 %v13301_v11  ;;  %v13304_v21 = vld [vmem:[%s19676_s2 + $0x100] sm:$0xff]   ;;  %v19865_v1 = vshrl.u32 %v17500_v33, 16  ;;  %v19862_v0 = vshll.u32 %v17500_v33, 16  ;;  %12938 = vmatprep.subr.bf16.mxu0 %v13303_v13 }
 0x2ee   : > { %v6950_v57 = vor.u32 %v17078_v63, %v6947_v48  ;;  %v11466_v49 = vcombine.low %v6934_v46, %v6942_v62  ;;  %v7585_v63 = vor.u32 %v19849_v54, %v7582_v10  ;;  %v6948_v27 = vsel %vm14099_vm7, %v6946_v51, %v6947_v48  ;;  %v13306_v46 = vld [vmem:[%s19676_s2 + $0x150] sm:$0xff]   ;;  %12939 = vmatpush3.bf16.msra.mxu0 %v13303_v13  ;;  %v13307_v13 = vld [vmem:[%s19676_s2 + $0x148] sm:$0xff]  }
 0x2ef   : > { %v6955_v60 = vrot.slane %v6953_v26, 5  ;;  %v11490_v55 = vrot.slane %v7588_v30, 11  ;;  %v19850_v43 = vshrl.u32 %v17508_v14, 16  ;;  %v19858_v10 = vshll.u32 %v17508_v14, 16  ;;  %v17534_v26 = vld [vmem:[#allocation3 + $0x84] sm:$0xf]  ;;  %12940 = vmatprep.subr.bf16.mxu0 %v13306_v46 }
 0x2f0   : > { %v6951_v37 = vrot.slane %v6950_v57, 4  ;;  %12814 = vmatprep.mubr.bf16.mxu1 %v11466_v49  ;;  %v7586_v48 = vsel %vm13652_vm2, %v7578_v35, %v7585_v63  ;;  %v6959_v51 = vor.u32 %v17107_v12, %v17102_v25  ;;  %v7595_v62 = vrot.slane %v19865_v1, 7  ;;  %12895 = vmatpush3.bf16.msra.mxu1 %v13301_v11  ;;  %v17538_v25 = vld [vmem:[#allocation3 + $0x88] sm:$0xf]  ;;  %v17543_v12 = vld [vmem:[%s19676_s2 + $0x1b8] sm:$0xff]  }
 0x2f1   : > { %v11521_v57 = vcombine.low %v7577_v52, %v7586_v48  ;;  %v20524_v24 = vshll.u32 %v17076_v44, 16  ;;  %v7604_v30 = vrot.slane %v19850_v43, 7  ;;  %v6967_v54 = vshll.u32 %v5853_v56, 16  ;;  %12896 = vmatprep.subr.bf16.mxu1 %v13304_v21  ;;  %v5622_v56 = vld [vmem:[#allocation3 + $0x9c] sm:$0x1] }
 0x2f2   : > { %v6956_v18 = vsel %vm14099_vm7, %v6951_v37, %v6955_v60  ;;  %v6960_v63 = vrot.slane %v6959_v51, 4  ;;  %v7598_v44 = vor.u32 %v19862_v0, %v7595_v62  ;;  %v7600_v11 = vrot.slane %v7595_v62, 4  ;;  %v17569_v43 = vld [vmem:[#allocation3 + $0x94] sm:$0xf]  ;;  %12941 = vmatpush3.bf16.msra.mxu0 %v13306_v46  ;;  %v13311_v46 = vld [vmem:[%s19676_s2 + $0x140] sm:$0xff]  }
 0x2f3   : > { %v6961_v49 = vrot.slane %v20524_v24, 5  ;;  %v11467_v35 = vcombine.low %v6948_v27, %v6956_v18  ;;  %12859 = vmatmul.mubr.bf16.gmra.mxu0 %v11521_v57  ;;  %v20525_v27 = vld [vmem:[#allocation24_spill] sm:$0xff]  ;;  %v7607_v48 = vor.u32 %v19858_v10, %v7604_v30  ;;  %v6969_v57 = vrot.slane %v6967_v54, 5  ;;  %12942 = vmatprep.subr.bf16.mxu0 %v13307_v13 }
 0x2f4   : > { %v20526_v37 = vshrl.u32 %v20525_v27, 16  ;;  %v19856_v18 = vshrl.u32 %v17534_v26, 16  ;;  %v19855_v24 = vshll.u32 %v17534_v26, 16  ;;  %v19851_v27 = vshrl.u32 %v17538_v25, 16  ;;  %12897 = vmatpush3.bf16.msra.mxu1 %v13304_v21  ;;  %v17685_v1 = vld [vmem:[#allocation3 + $0xc4] sm:$0xf] }
 0x2f5   : > { %v6964_v52 = vor.u32 %v17109_v7, %v6961_v49  ;;  %12815 = vmatmul.mubr.bf16.gmra.mxu1 %v11467_v35  ;;  %v6962_v51 = vsel %vm14099_vm7, %v6960_v63, %v6961_v49  ;;  %v7599_v7 = vsel %vm13652_vm2, %v11490_v55, %v7598_v44  ;;  %v7608_v35 = vsel %vm13652_vm2, %v7600_v11, %v7607_v48  ;;  %v20528_v11 = vld [vmem:[#allocation60_spill] sm:$0xff]  ;;  %v17578_v48 = vld [vmem:[#allocation3 + $0x98] sm:$0xf] }
 0x2f6   : > { %v11491_v60 = vrot.slane %v20526_v37, 11  ;;  %v7423_v37 = vld [vmem:[#allocation3 + $0x90] sm:$0xf]  ;;  %v7617_v30 = vrot.slane %v19856_v18, 7  ;;  %v19852_v54 = vshll.u32 %v17538_v25, 16  ;;  %v5623_v63 = vsel %vm13913_vm4, 0, %v5622_v56  ;;  %12978 = vmatprep.subr.bf16.mxu1 %v17543_v12  ;;  %12943 = vmatpush3.bf16.msra.mxu0 %v13307_v13 }
 0x2f7   : > { %v6965_v62 = vrot.slane %v6964_v52, 4  ;;  %v11522_v55 = vcombine.low %v7599_v7, %v7608_v35  ;;  %v7626_v44 = vrot.slane %v19851_v27, 7  ;;  %5624 = vst [vmem:[#allocation3 + $0x9c] sm:$0x1] %v5623_v63  ;;  %v6973_v52 = vor.u32 %v20528_v11, %v17139_v9  ;;  %12944 = vmatprep.subr.bf16.mxu0 %v13311_v46 }
 0x2f8   : > { %v7620_v7 = vor.u32 %v19855_v24, %v7617_v30  ;;  %v7622_v35 = vrot.slane %v7617_v30, 4  ;;  %v7632_v11 = vshrl.u32 %v7423_v37, 16  ;;  %v19854_v27 = vshrl.u32 %v17569_v43, 16 }
 0x2f9   : > { %v6970_v21 = vsel %vm14099_vm7, %v6965_v62, %v6969_v57  ;;  %v20529_v57 = vshll.u32 %v17119_v6, 16  ;;  %12862 = vmatprep.mubr.bf16.mxu0 %v11522_v55  ;;  %v7629_v9 = vor.u32 %v19852_v54, %v7626_v44  ;;  %v6974_v63 = vrot.slane %v6973_v52, 4  ;;  %v7427_v52 = vld [vmem:[#allocation3 + $0xa0] sm:$0xf] }
 0x2fa   : > { %v11468_v56 = vcombine.low %v6962_v51, %v6970_v21  ;;  %v7621_v51 = vsel %vm13652_vm2, %v11491_v60, %v7620_v7  ;;  %v19857_v30 = vshll.u32 %v17569_v43, 16  ;;  %v19853_v6 = vshrl.u32 %v17578_v48, 16  ;;  %12945 = vmatpush3.bf16.msra.mxu0 %v13311_v46 }
 0x2fb   : > { %v17587_v62 = vrot.slane %v20529_v57, 5  ;;  %v5628_v57 = vld [vmem:[#allocation3 + $0xac] sm:$0x1]  ;;  %v7630_v55 = vsel %vm13652_vm2, %v7622_v35, %v7629_v9  ;;  %v11492_v44 = vrot.slane %v7632_v11, 11  ;;  %v7639_v60 = vrot.slane %v19854_v27, 7  ;;  %v17613_v35 = vld [vmem:[%s19676_s2 + $0x1f8] sm:$0xff]  }
 0x2fc   : > { %12818 = vmatprep.mubr.bf16.mxu1 %v11468_v56  ;;  %v17605_v56 = vld [vmem:[#allocation3 + $0xa4] sm:$0xf]  ;;  %v7648_v13 = vrot.slane %v19853_v6, 7  ;;  %v19859_v54 = vshll.u32 %v17578_v48, 16  ;;  %v20530_v11 = vld [vmem:[#allocation57_spill] sm:$0xff]  ;;  %v20532_v24 = vshll.u32 %v17145_v59, 16  ;;  %13026 = vmatprep.subr.bf16.mxu0 %v17613_v35 }
 0x2fd   : > { %v6978_v21 = vor.u32 %v17147_v50, %v17587_v62  ;;  %v6976_v37 = vsel %vm14099_vm7, %v6974_v63, %v17587_v62  ;;  %v11523_v50 = vcombine.low %v7621_v51, %v7630_v55  ;;  %v7642_v62 = vor.u32 %v19857_v30, %v7639_v60  ;;  %v20531_v51 = vld [vmem:[#allocation59_spill] sm:$0xff]  ;;  %v17621_v55 = vld [vmem:[#allocation3 + $0xa8] sm:$0xf] }
 0x2fe   : > { %v7644_v9 = vrot.slane %v7639_v60, 4  ;;  %v5629_v63 = vsel %vm13913_vm4, 0, %v5628_v57  ;;  %v5857_v6 = vld [vmem:[#allocation3 + $0x9c] sm:$0x1]  ;;  %v7651_v27 = vor.u32 %v19859_v54, %v7648_v13  ;;  %v17627_v18 = vrot.slane %v20532_v24, 5  ;;  %v20533_v13 = vld [vmem:[#allocation61_spill] sm:$0xff] }
 0x2ff   : > { %v6979_v7 = vrot.slane %v6978_v21, 4  ;;  %v6987_v21 = vor.u32 %v20531_v51, %v20530_v11  ;;  %12863 = vmatmul.mubr.bf16.gmra.mxu0 %v11523_v50  ;;  %5630 = vst [vmem:[#allocation3 + $0xac] sm:$0x1] %v5629_v63  ;;  %v7654_v30 = vshrl.u32 %v7427_v52, 16  ;;  %v19861_v60 = vshrl.u32 %v17605_v56, 16 }
 0x300   : > { %v6981_v10 = vshll.u32 %v5857_v6, 16  ;;  %v7643_v57 = vsel %vm13652_vm2, %v11492_v44, %v7642_v62  ;;  %v19860_v51 = vshll.u32 %v17605_v56, 16  ;;  %v7652_v50 = vsel %vm13652_vm2, %v7644_v9, %v7651_v27  ;;  %v5634_v52 = vld [vmem:[#allocation3 + $0xbc] sm:$0x1]  ;;  %v7431_v62 = vld [vmem:[#allocation3 + $0xb0] sm:$0xf] }
 0x301   : > { %v6988_v11 = vrot.slane %v6987_v21, 4  ;;  %v6992_v63 = vor.u32 %v20533_v13, %v17627_v18  ;;  %v11493_v59 = vrot.slane %v7654_v30, 11  ;;  %v7661_v24 = vrot.slane %v19861_v60, 7  ;;  %v17647_v13 = vld [vmem:[#allocation3 + $0xb4] sm:$0xf] }
 0x302   : > { %v6983_v6 = vrot.slane %v6981_v10, 5  ;;  %v11524_v54 = vcombine.low %v7643_v57, %v7652_v50  ;;  %v19863_v46 = vshrl.u32 %v17621_v55, 16  ;;  %v19864_v21 = vshll.u32 %v17621_v55, 16  ;;  %v20535_v60 = vld [vmem:[#allocation62_spill] sm:$0xff] }
 0x303   : > { %v6990_v44 = vsel %vm14099_vm7, %v6988_v11, %v17627_v18  ;;  %v6993_v27 = vrot.slane %v6992_v63, 4  ;;  %v7664_v9 = vor.u32 %v19860_v51, %v7661_v24  ;;  %v7666_v30 = vrot.slane %v7661_v24, 4  ;;  %v20534_v11 = vld [vmem:[#allocation63_spill] sm:$0xff] }
 0x304   : > { %v6984_v10 = vsel %vm14099_vm7, %v6979_v7, %v6983_v6  ;;  %12866 = vmatprep.mubr.bf16.mxu0 %v11524_v54  ;;  %v7670_v57 = vrot.slane %v19863_v46, 7  ;;  %v5635_v18 = vsel %vm13913_vm4, 0, %v5634_v52  ;;  %v7001_v50 = vor.u32 %v17198_v40, %v20534_v11  ;;  %v17657_v63 = vld [vmem:[#allocation3 + $0xb8] sm:$0xf] }
 0x305   : > { %v11469_v24 = vcombine.low %v6976_v37, %v6984_v10  ;;  %v7665_v51 = vsel %vm13652_vm2, %v11493_v59, %v7664_v9  ;;  %5636 = vst [vmem:[#allocation3 + $0xbc] sm:$0x1] %v5635_v18  ;;  %v20536_v0 = vshll.u32 %v20535_v60, 16  ;;  %v7676_v54 = vshrl.u32 %v7431_v62, 16  ;;  %v20537_v59 = vld [vmem:[#allocation39_spill] sm:$0xff] }
 0x306   : > { %v5861_v6 = vld [vmem:[#allocation3 + $0xac] sm:$0x1]  ;;  %v7673_v46 = vor.u32 %v19864_v21, %v7670_v57  ;;  %v17667_v52 = vrot.slane %v7001_v50, 4  ;;  %v19866_v40 = vshrl.u32 %v17647_v13, 16  ;;  %v19869_v11 = vshll.u32 %v17647_v13, 16 }
 0x307   : > { %v17663_v7 = vrot.slane %v20536_v0, 5  ;;  %12819 = vmatmul.mubr.bf16.gmra.mxu1 %v11469_v24  ;;  %v6995_v37 = vshll.u32 %v5861_v6, 16  ;;  %v11494_v10 = vrot.slane %v7676_v54, 11  ;;  %v19868_v0 = vshrl.u32 %v17657_v63, 16  ;;  %v5640_v60 = vld [vmem:[#allocation3 + $0xcc] sm:$0x1] }
 0x308   : > { %v7674_v62 = vsel %vm13652_vm2, %v7666_v30, %v7673_v46  ;;  %v7683_v18 = vrot.slane %v19866_v40, 7  ;;  %v19878_v50 = vshll.u32 %v17657_v63, 16  ;;  %v7435_v24 = vld [vmem:[#allocation3 + $0xc0] sm:$0xf]  ;;  %v20539_v40 = vld [vmem:[#allocation6_spill] sm:$0xff] }
 0x309   : > { %v7006_v9 = vor.u32 %v20537_v59, %v17663_v7  ;;  %v7004_v57 = vsel %vm14099_vm7, %v17667_v52, %v17663_v7  ;;  %v6997_v6 = vrot.slane %v6995_v37, 5  ;;  %v11525_v59 = vcombine.low %v7665_v51, %v7674_v62  ;;  %v20538_v52 = vld [vmem:[#allocation65_spill] sm:$0xff] }
 0x30a   : > { %v7692_v21 = vrot.slane %v19868_v0, 7  ;;  %v7686_v46 = vor.u32 %v19869_v11, %v7683_v18  ;;  %v7688_v30 = vrot.slane %v7683_v18, 4  ;;  %v5641_v7 = vsel %vm13913_vm4, 0, %v5640_v60 }
 0x30b   : > { %v7007_v54 = vrot.slane %v7006_v9, 4  ;;  %v7015_v45 = vor.u32 %v20539_v40, %v20538_v52  ;;  %v6998_v37 = vsel %vm14099_vm7, %v6993_v27, %v6997_v6  ;;  %12867 = vmatmul.mubr.bf16.gmra.mxu0 %v11525_v59  ;;  %5642 = vst [vmem:[#allocation3 + $0xcc] sm:$0x1] %v5641_v7  ;;  %v20540_v9 = vshll.u32 %v17193_v3, 16  ;;  %v17703_v40 = vld [vmem:[#allocation3 + $0xc8] sm:$0xf] }
 0x30c   : > { %v7695_v51 = vor.u32 %v19878_v50, %v7692_v21  ;;  %v7698_v0 = vshrl.u32 %v7435_v24, 16  ;;  %v11470_v18 = vcombine.low %v6990_v44, %v6998_v37  ;;  %v5865_v11 = vld [vmem:[#allocation3 + $0xbc] sm:$0x1]  ;;  %v7687_v60 = vsel %vm13652_vm2, %v11494_v10, %v7686_v46  ;;  %v20541_v59 = vld [vmem:[#allocation64_spill] sm:$0xff] }
 0x30d   : > { %v17699_v62 = vrot.slane %v20540_v9, 5  ;;  %v7016_v31 = vrot.slane %v7015_v45, 4  ;;  %v19872_v27 = vshrl.u32 %v17685_v1, 16  ;;  %v7009_v6 = vshll.u32 %v5865_v11, 16  ;;  %v5646_v52 = vld [vmem:[#allocation3 + $0xdc] sm:$0x1] }
 0x30e   : > { %v7696_v21 = vsel %vm13652_vm2, %v7688_v30, %v7695_v51  ;;  %v11495_v7 = vrot.slane %v7698_v0, 11  ;;  %12822 = vmatprep.mubr.bf16.mxu1 %v11470_v18  ;;  %v19871_v24 = vshll.u32 %v17685_v1, 16  ;;  %v7439_v11 = vld [vmem:[#allocation3 + $0xd0] sm:$0xf]  ;;  %v19874_v30 = vshrl.u32 %v17703_v40, 16 }
 0x30f   : > { %v7020_v3 = vor.u32 %v20541_v59, %v17699_v62  ;;  %v11526_v44 = vcombine.low %v7687_v60, %v7696_v21  ;;  %v7018_v10 = vsel %vm14099_vm7, %v7016_v31, %v17699_v62  ;;  %v7705_v45 = vrot.slane %v19872_v27, 7  ;;  %v17718_v0 = vld [vmem:[#allocation3 + $0xd4] sm:$0xf] }
 0x310   : > { %v7011_v46 = vrot.slane %v7009_v6, 5  ;;  %v19875_v51 = vshll.u32 %v17703_v40, 16  ;;  %v5647_v31 = vsel %vm13913_vm4, 0, %v5646_v52  ;;  %v20542_v62 = vld [vmem:[#allocation66_spill] sm:$0xff]  ;;  %v7714_v21 = vrot.slane %v19874_v30, 7 }
 0x311   : > { %v7021_v37 = vrot.slane %v7020_v3, 4  ;;  %12870 = vmatprep.mubr.bf16.mxu0 %v11526_v44  ;;  %v7708_v9 = vor.u32 %v19871_v24, %v7705_v45  ;;  %v7710_v18 = vrot.slane %v7705_v45, 4  ;;  %v7029_v60 = vor.u32 %v20542_v62, %v17230_v36  ;;  %5648 = vst [vmem:[#allocation3 + $0xdc] sm:$0x1] %v5647_v31  ;;  %v17734_v44 = vld [vmem:[#allocation3 + $0xd8] sm:$0xf] }
 0x312   : > { %v7012_v6 = vsel %vm14099_vm7, %v7007_v54, %v7011_v46  ;;  %v20543_v59 = vshll.u32 %v17212_v58, 16  ;;  %v7720_v45 = vshrl.u32 %v7439_v11, 16  ;;  %v5869_v27 = vld [vmem:[#allocation3 + $0xcc] sm:$0x1]  ;;  %v19873_v62 = vshrl.u32 %v17718_v0, 16  ;;  %v20544_v31 = vld [vmem:[#allocation7_spill] sm:$0xff] }
 0x313   : > { %v11471_v24 = vcombine.low %v7004_v57, %v7012_v6  ;;  %v7709_v52 = vsel %vm13652_vm2, %v11495_v7, %v7708_v9  ;;  %v7030_v36 = vrot.slane %v7029_v60, 4  ;;  %v7023_v54 = vshll.u32 %v5869_v27, 16  ;;  %v5652_v27 = vld [vmem:[#allocation3 + $0xec] sm:$0x1]  ;;  %v17757_v30 = vld [vmem:[#allocation3 + $0xe4] sm:$0xf] }
 0x314   : > { %v17732_v3 = vrot.slane %v20543_v59, 5  ;;  %v7717_v46 = vor.u32 %v19875_v51, %v7714_v21  ;;  %v11496_v59 = vrot.slane %v7720_v45, 11  ;;  %v7727_v11 = vrot.slane %v19873_v62, 7 }
 0x315   : > { %12823 = vmatmul.mubr.bf16.gmra.mxu1 %v11471_v24  ;;  %v19876_v7 = vshll.u32 %v17718_v0, 16  ;;  %v19877_v9 = vshrl.u32 %v17734_v44, 16  ;;  %v7025_v60 = vrot.slane %v7023_v54, 5  ;;  %v19882_v45 = vshll.u32 %v17734_v44, 16  ;;  %v7443_v24 = vld [vmem:[#allocation3 + $0xe0] sm:$0xf] }
 0x316   : > { %v7034_v58 = vor.u32 %v20544_v31, %v17732_v3  ;;  %v7032_v57 = vsel %vm14099_vm7, %v7030_v36, %v17732_v3  ;;  %v7718_v6 = vsel %vm13652_vm2, %v7710_v18, %v7717_v46  ;;  %v7732_v36 = vrot.slane %v7727_v11, 4  ;;  %v20545_v46 = vld [vmem:[#allocation5_spill] sm:$0xff] }
 0x317   : > { %v11527_v31 = vcombine.low %v7709_v52, %v7718_v6  ;;  %v7730_v3 = vor.u32 %v19876_v7, %v7727_v11  ;;  %v7736_v62 = vrot.slane %v19877_v9, 7  ;;  %v7026_v54 = vsel %vm14099_vm7, %v7021_v37, %v7025_v60  ;;  %v17769_v7 = vld [vmem:[#allocation3 + $0xe8] sm:$0xf] }
 0x318   : > { %v7035_v21 = vrot.slane %v7034_v58, 4  ;;  %v5653_v18 = vsel %vm13913_vm4, 0, %v5652_v27  ;;  %v20546_v58 = vld [vmem:[#allocation36_spill] sm:$0xff]  ;;  %v20547_v52 = vshll.u32 %v17232_v4, 16  ;;  %v11472_v11 = vcombine.low %v7018_v10, %v7026_v54  ;;  %v5873_v9 = vld [vmem:[#allocation3 + $0xdc] sm:$0x1] }
 0x319   : > { %v7043_v51 = vor.u32 %v20546_v58, %v20545_v46  ;;  %12871 = vmatmul.mubr.bf16.gmra.mxu0 %v11527_v31  ;;  %v7731_v50 = vsel %vm13652_vm2, %v11496_v59, %v7730_v3  ;;  %v7739_v37 = vor.u32 %v19882_v45, %v7736_v62  ;;  %5654 = vst [vmem:[#allocation3 + $0xec] sm:$0x1] %v5653_v18  ;;  %v7742_v27 = vshrl.u32 %v7443_v24, 16  ;;  %v20548_v46 = vld [vmem:[#allocation10_spill] sm:$0xff]  ;;  %v17804_v45 = vld [vmem:[#allocation3 + $0xf8] sm:$0xf] }
 0x31a   : > { %v17767_v6 = vrot.slane %v20547_v52, 5  ;;  %v7037_v60 = vshll.u32 %v5873_v9, 16  ;;  %v19881_v58 = vshrl.u32 %v17757_v30, 16  ;;  %v5658_v52 = vld [vmem:[#allocation3 + $0xfc] sm:$0x1]  ;;  %12826 = vmatprep.mubr.bf16.mxu1 %v11472_v11  ;;  %v19887_v59 = vshll.u32 %v17757_v30, 16 }
 0x31b   : > { %v7044_v39 = vrot.slane %v7043_v51, 4  ;;  %v7740_v10 = vsel %vm13652_vm2, %v7732_v36, %v7739_v37  ;;  %v11497_v31 = vrot.slane %v7742_v27, 11  ;;  %v19880_v3 = vshrl.u32 %v17769_v7, 16  ;;  %v7447_v62 = vld [vmem:[#allocation3 + $0xf0] sm:$0xf] }
 0x31c   : > { %v7048_v4 = vor.u32 %v20548_v46, %v17767_v6  ;;  %v7039_v54 = vrot.slane %v7037_v60, 5  ;;  %v11528_v24 = vcombine.low %v7731_v50, %v7740_v10  ;;  %v7749_v18 = vrot.slane %v19881_v58, 7  ;;  %v17792_v27 = vld [vmem:[#allocation3 + $0xf4] sm:$0xf] }
 0x31d   : > { %v7046_v51 = vsel %vm14099_vm7, %v7044_v39, %v17767_v6  ;;  %v7758_v11 = vrot.slane %v19880_v3, 7  ;;  %v19884_v36 = vshll.u32 %v17769_v7, 16  ;;  %v5659_v37 = vsel %vm13913_vm4, 0, %v5658_v52  ;;  %v20549_v39 = vld [vmem:[#allocation41_spill] sm:$0xff] }
 0x31e   : > { %v7049_v9 = vrot.slane %v7048_v4, 4  ;;  %v7040_v50 = vsel %vm14099_vm7, %v7035_v21, %v7039_v54  ;;  %12874 = vmatprep.mubr.bf16.mxu0 %v11528_v24  ;;  %5660 = vst [vmem:[#allocation3 + $0xfc] sm:$0x1] %v5659_v37  ;;  %v7057_v6 = vor.u32 %v20549_v39, %v17266_v47  ;;  %v20550_v60 = vshll.u32 %v17252_v23, 16 }
 0x31f   : > { %v7764_v4 = vshrl.u32 %v7447_v62, 16  ;;  %v11473_v10 = vcombine.low %v7032_v57, %v7040_v50  ;;  %v7752_v3 = vor.u32 %v19887_v59, %v7749_v18  ;;  %v7754_v58 = vrot.slane %v7749_v18, 4  ;;  %v17813_v50 = vld [vmem:[#allocation3 + $0x104] sm:$0xf] }
 0x320   : > { %v7059_v46 = vrot.slane %v20550_v60, 5  ;;  %v7761_v52 = vor.u32 %v19884_v36, %v7758_v11  ;;  %v5877_v21 = vld [vmem:[#allocation3 + $0xec] sm:$0x1]  ;;  %v7058_v54 = vrot.slane %v7057_v6, 4  ;;  %v19883_v47 = vshrl.u32 %v17792_v27, 16 }
 0x321   : > { %v11498_v37 = vrot.slane %v7764_v4, 11  ;;  %12827 = vmatmul.mubr.bf16.gmra.mxu1 %v11473_v10  ;;  %v7051_v23 = vshll.u32 %v5877_v21, 16  ;;  %v7753_v57 = vsel %vm13652_vm2, %v11497_v31, %v7752_v3  ;;  %v19885_v18 = vshll.u32 %v17792_v27, 16  ;;  %v7451_v11 = vld [vmem:[#allocation3 + $0x100] sm:$0xf] }
 0x322   : > { %v7062_v24 = vor.u32 %v17272_v32, %v7059_v46  ;;  %v7762_v62 = vsel %vm13652_vm2, %v7754_v58, %v7761_v52  ;;  %v7060_v32 = vsel %vm14099_vm7, %v7058_v54, %v7059_v46  ;;  %v7771_v60 = vrot.slane %v19883_v47, 7  ;;  %v17819_v4 = vld [vmem:[#allocation3 + $0x108] sm:$0xf] }
 0x323   : > { %v11529_v39 = vcombine.low %v7753_v57, %v7762_v62  ;;  %v7053_v10 = vrot.slane %v7051_v23, 5  ;;  %v19886_v31 = vshrl.u32 %v17804_v45, 16  ;;  %v7781_v58 = vshll.u32 %v17804_v45, 16 }
 0x324   : > { %v7063_v6 = vrot.slane %v7062_v24, 4  ;;  %v11556_v3 = vcombine.low %v17270_v19, %v17277_v15  ;;  %v7774_v52 = vor.u32 %v19885_v18, %v7771_v60  ;;  %v7776_v21 = vrot.slane %v7771_v60, 4 }
 0x325   : > { %12875 = vmatmul.mubr.bf16.gmra.mxu0 %v11529_v39  ;;  %v7786_v46 = vshrl.u32 %v7451_v11, 16  ;;  %v19889_v54 = vshrl.u32 %v17813_v50, 16  ;;  %v7054_v24 = vsel %vm14099_vm7, %v7049_v9, %v7053_v10  ;;  %v5881_v57 = vld [vmem:[#allocation3 + $0xfc] sm:$0x1]  ;;  %v7780_v23 = vrot.slane %v19886_v31, 7 }
 0x326   : > { %v19891_v62 = vshll.u32 %v17813_v50, 16  ;;  %v19888_v47 = vshrl.u32 %v17819_v4, 16  ;;  %v11474_v36 = vcombine.low %v7046_v51, %v7054_v24  ;;  %v7065_v39 = vshll.u32 %v5881_v57, 16 }
 0x327   : > { %v7775_v18 = vsel %vm13652_vm2, %v11498_v37, %v7774_v52  ;;  %v11499_v60 = vrot.slane %v7786_v46, 11  ;;  %v7783_v11 = vor.u32 %v7781_v58, %v7780_v23  ;;  %v7793_v9 = vrot.slane %v19889_v54, 7  ;;  %v7394_v23 = vld [vmem:[#allocation3 + $0x1c] sm:$0x1] }
 0x328   : > { %v7802_v10 = vrot.slane %v19888_v47, 7  ;;  %v19890_v31 = vshll.u32 %v17819_v4, 16  ;;  %12830 = vmatprep.mubr.bf16.mxu1 %v11474_v36  ;;  %v7067_v59 = vrot.slane %v7065_v39, 5  ;;  %v11557_v51 = vcombine.low %v17299_v38, %v17316_v17 }
 0x329   : > { %v8483_v37 = vrot.slane %v7461_v20, 4  ;;  %v8484_v52 = vrot.slane %v7464_v22, 5  ;;  %v7784_v46 = vsel %vm13652_vm2, %v7776_v21, %v7783_v11  ;;  %v7796_v24 = vor.u32 %v19891_v62, %v7793_v9 }
 0x32a   : > { %v7798_v57 = vrot.slane %v7793_v9, 4  ;;  %v7805_v36 = vor.u32 %v19890_v31, %v7802_v10  ;;  %v7068_v39 = vsel %vm14099_vm7, %v7063_v6, %v7067_v59  ;;  %v11530_v47 = vcombine.low %v7775_v18, %v7784_v46  ;;  %v7398_v10 = vld [vmem:[#allocation3 + $0x2c] sm:$0x1] }
 0x32b   : > { %v8485_v54 = vor.u32 %v8484_v52, %v8483_v37  ;;  %v8487_v19 = vrot.slane %v7473_v5, 5  ;;  %v11475_v20 = vcombine.low %v7060_v32, %v7068_v39  ;;  %v7797_v22 = vsel %vm13652_vm2, %v11499_v60, %v7796_v24 }
 0x32c   : > { %v7806_v21 = vsel %vm13652_vm2, %v7798_v57, %v7805_v36  ;;  %v20551_v11 = vshrl.u32 %v17277_v15, 16  ;;  %12878 = vmatprep.mubr.bf16.mxu0 %v11530_v47  ;;  %v8493_v59 = vshll.u32 %v7394_v23, 16  ;;  %v11558_v18 = vcombine.low %v17331_v8, %v17344_v29  ;;  %v7402_v36 = vld [vmem:[#allocation3 + $0x3c] sm:$0x1] }
 0x32d   : > { %v11531_v31 = vcombine.low %v7797_v22, %v7806_v21  ;;  %v8486_v62 = vrot.slane %v8485_v54, 4  ;;  %12831 = vmatmul.mubr.bf16.gmra.mxu1 %v11475_v20  ;;  %v20552_v32 = vshrl.u32 %v17299_v38, 16  ;;  %v20553_v60 = vshll.u32 %v17299_v38, 16 }
 0x32e   : > { %v8489_v9 = vrot.slane %v20551_v11, 4  ;;  %v20554_v52 = vshll.u32 %v17316_v17, 16  ;;  %12898 = vmatprep.mubr.bf16.mxu1 %v11556_v3  ;;  %v8495_v54 = vrot.slane %v8493_v59, 5  ;;  %v20555_v46 = vshrl.u32 %v17316_v17, 16 }
 0x32f   : > { %v8497_v6 = vrot.slane %v20552_v32, 4  ;;  %v8498_v37 = vrot.slane %v20553_v60, 5  ;;  %12879 = vmatmul.mubr.bf16.gmra.mxu0 %v11531_v31  ;;  %v8488_v47 = vsel %vm14099_vm7, %v8486_v62, %v8487_v19  ;;  %v8507_v57 = vshll.u32 %v7398_v10, 16 }
 0x330   : > { %v8490_v5 = vor.u32 %v8489_v9, %v8487_v19  ;;  %v8501_v15 = vrot.slane %v20554_v52, 5  ;;  %v8503_v24 = vrot.slane %v20555_v46, 4  ;;  %v11559_v38 = vcombine.low %v17375_v61, %v17384_v16  ;;  %v7406_v52 = vld [vmem:[#allocation3 + $0x4c] sm:$0x1] }
 0x331   : > { %v8499_v39 = vor.u32 %v8498_v37, %v8497_v6  ;;  %v20556_v20 = vshrl.u32 %v17331_v8, 16  ;;  %v8509_v3 = vrot.slane %v8507_v57, 5  ;;  %v20557_v31 = vshll.u32 %v17331_v8, 16 }
 0x332   : > { %v8491_v23 = vrot.slane %v8490_v5, 4  ;;  %v8504_v21 = vor.u32 %v8503_v24, %v8501_v15  ;;  %v20558_v62 = vshll.u32 %v17344_v29, 16  ;;  %v20559_v10 = vshrl.u32 %v17344_v29, 16 }
 0x333   : > { %v8511_v22 = vrot.slane %v20556_v20, 4  ;;  %v8512_v11 = vrot.slane %v20557_v31, 5  ;;  %v8500_v9 = vrot.slane %v8499_v39, 4  ;;  %v8521_v5 = vshll.u32 %v7402_v36, 16 }
 0x334   : > { %v8515_v19 = vrot.slane %v20558_v62, 5  ;;  %v8496_v17 = vsel %vm14099_vm7, %v8491_v23, %v8495_v54  ;;  %v8517_v59 = vrot.slane %v20559_v10, 4  ;;  %v8505_v6 = vrot.slane %v8504_v21, 4  ;;  %v13313_v54 = vld [vmem:[%s19676_s2 + $0x1b0] sm:$0xff]   ;;  %v7410_v10 = vld [vmem:[#allocation3 + $0x5c] sm:$0x1] }
 0x335   : > { %v11596_v32 = vcombine.low %v8488_v47, %v8496_v17  ;;  %v8513_v60 = vor.u32 %v8512_v11, %v8511_v22  ;;  %v11560_v37 = vcombine.low %v17397_v28, %v17420_v2  ;;  %v8502_v8 = vsel %vm14099_vm7, %v8500_v9, %v8501_v15  ;;  %12899 = vmatmul.mubr.bf16.vlgmr.msra.gmra.mxu1 %v11557_v51  ;;  %v13328_v17 = vld [vmem:[%s19676_s2 + $0x1f0] sm:$0xff]  }
 0x336   : > { %v8518_v46 = vor.u32 %v8517_v59, %v8515_v19  ;;  %v8523_v24 = vrot.slane %v8521_v5, 5  ;;  %v20560_v29 = vshrl.u32 %v17375_v61, 16  ;;  %v8510_v47 = vsel %vm14099_vm7, %v8505_v6, %v8509_v3  ;;  %12902 = vmatprep.mubr.bf16.mxu1 %v11558_v18  ;;  %12979 = vmatpush3.bf16.msra.mxu1 %v17543_v12 }
 0x337   : > { %12946 = vmatprep.mubr.bf16.mxu0 %v11596_v32  ;;  %v8514_v36 = vrot.slane %v8513_v60, 4  ;;  %v20561_v23 = vshll.u32 %v17375_v61, 16  ;;  %v20562_v20 = vshll.u32 %v17384_v16, 16  ;;  %v11597_v22 = vcombine.low %v8502_v8, %v8510_v47  ;;  %12980 = vmatprep.subr.bf16.mxu1 %v13313_v54 }
 0x338   : > { %v8525_v57 = vrot.slane %v20560_v29, 4  ;;  %v8519_v21 = vrot.slane %v8518_v46, 4  ;;  %v20563_v31 = vshrl.u32 %v17384_v16, 16  ;;  %v8535_v62 = vshll.u32 %v7406_v52, 16 }
 0x339   : > { %v8526_v39 = vrot.slane %v20561_v23, 5  ;;  %v8529_v15 = vrot.slane %v20562_v20, 5  ;;  %v8516_v3 = vsel %vm14099_vm7, %v8514_v36, %v8515_v19  ;;  %v11561_v51 = vcombine.low %v17442_v42, %v17456_v41  ;;  %12947 = vmatmul.mubr.bf16.vlgmr.msra.gmra.mxu0 %v11597_v22  ;;  %v13316_v19 = vld [vmem:[%s19676_s2 + $0x1a8] sm:$0xff]  }
 0x33a   : > { %v8531_v11 = vrot.slane %v20563_v31, 4  ;;  %v20564_v59 = vshrl.u32 %v17397_v28, 16  ;;  %v8524_v32 = vsel %vm14099_vm7, %v8519_v21, %v8523_v24  ;;  %v8537_v18 = vrot.slane %v8535_v62, 5  ;;  %13027 = vmatpush3.bf16.msra.mxu0 %v17613_v35  ;;  %v13329_v20 = vld [vmem:[%s19676_s2 + $0x1e8] sm:$0xff]   ;;  %12981 = vmatpush3.bf16.msra.mxu1 %v13313_v54 }
 0x33b   : > { %v8527_v9 = vor.u32 %v8526_v39, %v8525_v57  ;;  %v20565_v12 = vshll.u32 %v17397_v28, 16  ;;  %v11598_v52 = vcombine.low %v8516_v3, %v8524_v32  ;;  %v20566_v46 = vshll.u32 %v17420_v2, 16  ;;  %13028 = vmatprep.subr.bf16.mxu0 %v13328_v17  ;;  %v7414_v31 = vld [vmem:[#allocation3 + $0x6c] sm:$0x1]  ;;  %12982 = vmatprep.subr.bf16.mxu1 %v13316_v19  ;;  %v13322_v28 = vld [vmem:[%s19676_s2 + $0x198] sm:$0xff]  }
 0x33c   : > { %v8539_v5 = vrot.slane %v20564_v59, 4  ;;  %v8532_v6 = vor.u32 %v8531_v11, %v8529_v15  ;;  %v20567_v57 = vshrl.u32 %v17420_v2, 16  ;;  %v8549_v23 = vshll.u32 %v7410_v10, 16  ;;  %v17974_v2 = vpop.f32.mrf.mxu1 }
 0x33d   : > { %v8540_v60 = vrot.slane %v20565_v12, 5  ;;  %v8528_v8 = vrot.slane %v8527_v9, 4  ;;  %v8543_v29 = vrot.slane %v20566_v46, 5  ;;  %v11562_v39 = vcombine.low %v17500_v33, %v17508_v14  ;;  %12950 = vmatprep.mubr.bf16.mxu0 %v11598_v52  ;;  %12903 = vmatmul.mubr.bf16.gmra.mxu1 %v11559_v38 }
 0x33e   : > { %v8545_v47 = vrot.slane %v20567_v57, 4  ;;  %v8533_v24 = vrot.slane %v8532_v6, 4  ;;  %v20568_v35 = vshrl.u32 %v17442_v42, 16  ;;  %v20569_v62 = vshll.u32 %v17442_v42, 16  ;;  %13029 = vmatpush3.bf16.msra.mxu0 %v13328_v17  ;;  %v7418_v57 = vld [vmem:[#allocation3 + $0x7c] sm:$0x1]  ;;  %12906 = vmatprep.mubr.bf16.mxu1 %v11560_v37 }
 0x33f   : > { %v8541_v36 = vor.u32 %v8540_v60, %v8539_v5  ;;  %v8530_v22 = vsel %vm14099_vm7, %v8528_v8, %v8529_v15  ;;  %v8551_v59 = vrot.slane %v8549_v23, 5  ;;  %v20570_v5 = vshll.u32 %v17456_v41, 16  ;;  %v13319_v15 = vld [vmem:[%s19676_s2 + $0x1a0] sm:$0xff]   ;;  %13030 = vmatprep.subr.bf16.mxu0 %v13329_v20  ;;  %12983 = vmatpush3.bf16.msra.mxu1 %v13316_v19 }
 0x340   : > { %v8546_v21 = vor.u32 %v8545_v47, %v8543_v29  ;;  %v8553_v11 = vrot.slane %v20568_v35, 4  ;;  %v8554_v3 = vrot.slane %v20569_v62, 5  ;;  %v8538_v9 = vsel %vm14099_vm7, %v8533_v24, %v8537_v18  ;;  %v13333_v17 = vld [vmem:[%s19676_s2 + $0x1e0] sm:$0xff]   ;;  %12984 = vmatprep.subr.bf16.mxu1 %v13319_v15 }
 0x341   : > { %v8542_v10 = vrot.slane %v8541_v36, 4  ;;  %v8557_v54 = vrot.slane %v20570_v5, 5  ;;  %v11599_v32 = vcombine.low %v8530_v22, %v8538_v9  ;;  %v20571_v60 = vshrl.u32 %v17456_v41, 16 }
 0x342   : > { %v8547_v6 = vrot.slane %v8546_v21, 4  ;;  %v8555_v12 = vor.u32 %v8554_v3, %v8553_v11  ;;  %v8563_v8 = vshll.u32 %v7414_v31, 16  ;;  %v11563_v46 = vcombine.low %v17534_v26, %v17538_v25  ;;  %13031 = vmatpush3.bf16.msra.mxu0 %v13329_v20 }
 0x343   : > { %v8559_v52 = vrot.slane %v20571_v60, 4  ;;  %v8544_v18 = vsel %vm14099_vm7, %v8542_v10, %v8543_v29  ;;  %v20572_v47 = vshrl.u32 %v17500_v33, 16  ;;  %v20573_v29 = vshll.u32 %v17500_v33, 16  ;;  %12951 = vmatmul.mubr.bf16.gmra.mxu0 %v11599_v32  ;;  %13032 = vmatprep.subr.bf16.mxu0 %v13333_v17  ;;  %v17987_v60 = vpop.f32.mrf.mxu1 }
 0x344   : > { %v8552_v61 = vsel %vm14099_vm7, %v8547_v6, %v8551_v59  ;;  %v8556_v16 = vrot.slane %v8555_v12, 4  ;;  %v8565_v22 = vrot.slane %v8563_v8, 5  ;;  %v20574_v21 = vshll.u32 %v17508_v14, 16  ;;  %v7422_v59 = vld [vmem:[#allocation3 + $0x8c] sm:$0x1]  ;;  %12985 = vmatpush3.bf16.msra.mxu1 %v13319_v15 }
 0x345   : > { %v8567_v24 = vrot.slane %v20572_v47, 4  ;;  %v8560_v38 = vor.u32 %v8559_v52, %v8557_v54  ;;  %v8568_v36 = vrot.slane %v20573_v29, 5  ;;  %v11600_v23 = vcombine.low %v8544_v18, %v8552_v61  ;;  %12986 = vmatprep.subr.bf16.mxu1 %v13322_v28  ;;  %v13326_v29 = vld [vmem:[%s19676_s2 + $0x190] sm:$0xff]   ;;  %12907 = vmatmul.mubr.bf16.gmra.mxu1 %v11561_v51 }
 0x346   : > { %v8571_v31 = vrot.slane %v20574_v21, 5  ;;  %v20575_v35 = vshrl.u32 %v17508_v14, 16  ;;  %v8558_v37 = vsel %vm14099_vm7, %v8556_v16, %v8557_v54  ;;  %v8577_v3 = vshll.u32 %v7418_v57, 16  ;;  %v13334_v54 = vld [vmem:[%s19676_s2 + $0x1d8] sm:$0xff]   ;;  %13033 = vmatpush3.bf16.msra.mxu0 %v13333_v17  ;;  %12910 = vmatprep.mubr.bf16.mxu1 %v11562_v39  ;;  %v13331_v14 = vld [vmem:[%s19676_s2 + $0x188] sm:$0xff]  }
 0x347   : > { %v8561_v19 = vrot.slane %v8560_v38, 4  ;;  %v8569_v62 = vor.u32 %v8568_v36, %v8567_v24  ;;  %12954 = vmatprep.mubr.bf16.mxu0 %v11600_v23  ;;  %v11564_v10 = vcombine.low %v17569_v43, %v17578_v48  ;;  %v20576_v5 = vshrl.u32 %v17534_v26, 16  ;;  %13034 = vmatprep.subr.bf16.mxu0 %v13334_v54 }
 0x348   : > { %v8573_v11 = vrot.slane %v20575_v35, 4  ;;  %v20577_v6 = vshll.u32 %v17534_v26, 16  ;;  %v8579_v18 = vrot.slane %v8577_v3, 5  ;;  %v20578_v8 = vshll.u32 %v17538_v25, 16  ;;  %12987 = vmatpush3.bf16.msra.mxu1 %v13322_v28 }
 0x349   : > { %v8581_v32 = vrot.slane %v20576_v5, 4  ;;  %v8566_v20 = vsel %vm14099_vm7, %v8561_v19, %v8565_v22  ;;  %v8570_v52 = vrot.slane %v8569_v62, 4  ;;  %v20579_v16 = vshrl.u32 %v17538_v25, 16  ;;  %v7426_v22 = vld [vmem:[#allocation3 + $0x9c] sm:$0x1]  ;;  %12988 = vmatprep.subr.bf16.mxu1 %v13326_v29 }
 0x34a   : > { %v8574_v9 = vor.u32 %v8573_v11, %v8571_v31  ;;  %v8582_v12 = vrot.slane %v20577_v6, 5  ;;  %v8585_v57 = vrot.slane %v20578_v8, 5  ;;  %v11601_v47 = vcombine.low %v8558_v37, %v8566_v20  ;;  %v18004_v11 = vpop.f32.mrf.mxu1  ;;  %13035 = vmatpush3.bf16.msra.mxu0 %v13334_v54 }
 0x34b   : > { %v8587_v38 = vrot.slane %v20579_v16, 4  ;;  %v8572_v36 = vsel %vm14099_vm7, %v8570_v52, %v8571_v31  ;;  %v8591_v23 = vshll.u32 %v7422_v59, 16  ;;  %v11565_v15 = vcombine.low %v17605_v56, %v17621_v55  ;;  %v7430_v52 = vld [vmem:[#allocation3 + $0xac] sm:$0x1] }
 0x34c   : > { %v8575_v24 = vrot.slane %v8574_v9, 4  ;;  %v8583_v61 = vor.u32 %v8582_v12, %v8581_v32  ;;  %v20580_v21 = vshrl.u32 %v17569_v43, 16  ;;  %v20581_v62 = vshll.u32 %v17569_v43, 16  ;;  %v13337_v9 = vld [vmem:[%s19676_s2 + $0x1d0] sm:$0xff]   ;;  %12955 = vmatmul.mubr.bf16.gmra.mxu0 %v11601_v47  ;;  %v18034_v47 = vpop.f32.mrf.mxu1  ;;  %12989 = vmatpush3.bf16.msra.mxu1 %v13326_v29 }
 0x34d   : > { %v8588_v31 = vor.u32 %v8587_v38, %v8585_v57  ;;  %v8593_v42 = vrot.slane %v8591_v23, 5  ;;  %v20582_v41 = vshll.u32 %v17578_v48, 16  ;;  %v20583_v59 = vshrl.u32 %v17578_v48, 16  ;;  %13036 = vmatprep.subr.bf16.mxu0 %v13337_v9  ;;  %v13338_v23 = vld [vmem:[%s19676_s2 + $0x1c8] sm:$0xff]   ;;  %12990 = vmatprep.subr.bf16.mxu1 %v13331_v14 }
 0x34e   : > { %v8595_v35 = vrot.slane %v20580_v21, 4  ;;  %v8580_v37 = vsel %vm14099_vm7, %v8575_v24, %v8579_v18  ;;  %v8584_v19 = vrot.slane %v8583_v61, 4  ;;  %v8596_v3 = vrot.slane %v20581_v62, 5  ;;  %13037 = vmatpush3.bf16.msra.mxu0 %v13337_v9  ;;  %12911 = vmatmul.mubr.bf16.gmra.mxu1 %v11563_v46  ;;  %v13341_v9 = vld [vmem:[%s19676_s2 + $0x1c0] sm:$0xff]  }
 0x34f   : > { %v11602_v17 = vcombine.low %v8572_v36, %v8580_v37  ;;  %v8599_v51 = vrot.slane %v20582_v41, 5  ;;  %v8601_v5 = vrot.slane %v20583_v59, 4  ;;  %v8589_v6 = vrot.slane %v8588_v31, 4  ;;  %v13336_v59 = vld [vmem:[%s19676_s2 + $0x180] sm:$0xff]   ;;  %13038 = vmatprep.subr.bf16.mxu0 %v13338_v23  ;;  %12914 = vmatprep.mubr.bf16.mxu1 %v11564_v10  ;;  %v18090_v10 = vld [vmem:[%s19676_s2 + $0x238] sm:$0xff]  }
 0x350   : > { %v8586_v32 = vsel %vm14099_vm7, %v8584_v19, %v8585_v57  ;;  %v8597_v12 = vor.u32 %v8596_v3, %v8595_v35  ;;  %v8605_v20 = vshll.u32 %v7426_v22, 16  ;;  %v11566_v39 = vcombine.low %v17647_v13, %v17657_v63  ;;  %v18045_v19 = vpop.f32.mrf.mxu0  ;;  %12991 = vmatpush3.bf16.msra.mxu1 %v13331_v14 }
 0x351   : > { %12958 = vmatprep.mubr.bf16.mxu0 %v11602_v17  ;;  %v8602_v33 = vor.u32 %v8601_v5, %v8599_v51  ;;  %v20584_v28 = vshrl.u32 %v17605_v56, 16  ;;  %v20585_v8 = vshll.u32 %v17605_v56, 16  ;;  %v8594_v24 = vsel %vm14099_vm7, %v8589_v6, %v8593_v42  ;;  %v7434_v17 = vld [vmem:[#allocation3 + $0xbc] sm:$0x1]  ;;  %12992 = vmatprep.subr.bf16.mxu1 %v13336_v59 }
 0x352   : > { %v8598_v61 = vrot.slane %v8597_v12, 4  ;;  %v8607_v16 = vrot.slane %v8605_v20, 5  ;;  %v20586_v38 = vshll.u32 %v17621_v55, 16  ;;  %v11603_v22 = vcombine.low %v8586_v32, %v8594_v24  ;;  %v18060_v12 = vpop.f32.mrf.mxu1  ;;  %v18062_v20 = vpop.f32.mrf.mxu0  ;;  %13039 = vmatpush3.bf16.msra.mxu0 %v13338_v23 }
 0x353   : > { %v8609_v18 = vrot.slane %v20584_v28, 4  ;;  %v8610_v57 = vrot.slane %v20585_v8, 5  ;;  %v8603_v21 = vrot.slane %v8602_v33, 4  ;;  %v20587_v54 = vshrl.u32 %v17621_v55, 16  ;;  %13040 = vmatprep.subr.bf16.mxu0 %v13341_v9 }
 0x354   : > { %v8613_v36 = vrot.slane %v20586_v38, 5  ;;  %v8600_v31 = vsel %vm14099_vm7, %v8598_v61, %v8599_v51  ;;  %v8619_v62 = vshll.u32 %v7430_v52, 16  ;;  %v11567_v3 = vcombine.low %v17685_v1, %v17703_v40  ;;  %v18079_v61 = vpop.f32.mrf.mxu1  ;;  %12959 = vmatmul.mubr.bf16.gmra.mxu0 %v11603_v22  ;;  %12993 = vmatpush3.bf16.msra.mxu1 %v13336_v59 }
 0x355   : > { %v8611_v35 = vor.u32 %v8610_v57, %v8609_v18  ;;  %v8615_v37 = vrot.slane %v20587_v54, 4  ;;  %v20588_v42 = vshrl.u32 %v17647_v13, 16  ;;  %v8608_v29 = vsel %vm14099_vm7, %v8603_v21, %v8607_v16  ;;  %v7438_v21 = vld [vmem:[#allocation3 + $0xcc] sm:$0x1]  ;;  %13074 = vmatprep.subr.bf16.mxu1 %v18090_v10 }
 0x356   : > { %v20589_v51 = vshll.u32 %v17647_v13, 16  ;;  %v11604_v33 = vcombine.low %v8600_v31, %v8608_v29  ;;  %v8621_v52 = vrot.slane %v8619_v62, 5  ;;  %v20590_v28 = vshll.u32 %v17657_v63, 16  ;;  %v18096_v62 = vpop.f32.mrf.mxu0  ;;  %13041 = vmatpush3.bf16.msra.mxu0 %v13341_v9  ;;  %12915 = vmatmul.mubr.bf16.gmra.mxu1 %v11565_v15 }
 0x357   : > { %v8623_v41 = vrot.slane %v20588_v42, 4  ;;  %v8612_v5 = vrot.slane %v8611_v35, 4  ;;  %v8616_v32 = vor.u32 %v8615_v37, %v8613_v36  ;;  %v20591_v8 = vshrl.u32 %v17657_v63, 16  ;;  %12918 = vmatprep.mubr.bf16.mxu1 %v11566_v39 }
 0x358   : > { %v8624_v6 = vrot.slane %v20589_v51, 5  ;;  %v8627_v18 = vrot.slane %v20590_v28, 5  ;;  %v8633_v24 = vshll.u32 %v7434_v17, 16  ;;  %v11568_v38 = vcombine.low %v17718_v0, %v17734_v44  ;;  %12962 = vmatprep.mubr.bf16.mxu0 %v11604_v33  ;;  %v18117_v59 = vpop.f32.mrf.mxu0 }
 0x359   : > { %v8629_v57 = vrot.slane %v20591_v8, 4  ;;  %v8614_v26 = vsel %vm14099_vm7, %v8612_v5, %v8613_v36  ;;  %v8617_v25 = vrot.slane %v8616_v32, 4  ;;  %v20592_v35 = vshrl.u32 %v17685_v1, 16  ;;  %v18100_v32 = vpop.f32.mrf.mxu1 }
 0x35a   : > { %v8625_v46 = vor.u32 %v8624_v6, %v8623_v41  ;;  %v20593_v43 = vshll.u32 %v17685_v1, 16  ;;  %v8635_v22 = vrot.slane %v8633_v24, 5  ;;  %v20594_v37 = vshll.u32 %v17703_v40, 16 }
 0x35b   : > { %v8630_v16 = vor.u32 %v8629_v57, %v8627_v18  ;;  %v8637_v54 = vrot.slane %v20592_v35, 4  ;;  %v8622_v14 = vsel %vm14099_vm7, %v8617_v25, %v8621_v52  ;;  %v20595_v29 = vshrl.u32 %v17703_v40, 16  ;;  %v7442_v52 = vld [vmem:[#allocation3 + $0xdc] sm:$0x1] }
 0x35c   : > { %v8638_v48 = vrot.slane %v20593_v43, 5  ;;  %v8626_v36 = vrot.slane %v8625_v46, 4  ;;  %v8641_v31 = vrot.slane %v20594_v37, 5  ;;  %v11605_v17 = vcombine.low %v8614_v26, %v8622_v14 }
 0x35d   : > { %v8631_v42 = vrot.slane %v8630_v16, 4  ;;  %v8643_v5 = vrot.slane %v20595_v29, 4  ;;  %v8647_v6 = vshll.u32 %v7438_v21, 16  ;;  %v11569_v33 = vcombine.low %v17757_v30, %v17769_v7 }
 0x35e   : > { %v8639_v41 = vor.u32 %v8638_v48, %v8637_v54  ;;  %v8628_v51 = vsel %vm14099_vm7, %v8626_v36, %v8627_v18  ;;  %v20596_v23 = vshrl.u32 %v17718_v0, 16  ;;  %v20597_v25 = vshll.u32 %v17718_v0, 16  ;;  %12963 = vmatmul.mubr.bf16.gmra.mxu0 %v11605_v17  ;;  %12919 = vmatmul.mubr.bf16.gmra.mxu1 %v11567_v3 }
 0x35f   : > { %v8636_v8 = vsel %vm14099_vm7, %v8631_v42, %v8635_v22  ;;  %v8644_v26 = vor.u32 %v8643_v5, %v8641_v31  ;;  %v8649_v24 = vrot.slane %v8647_v6, 5  ;;  %v20598_v16 = vshll.u32 %v17734_v44, 16  ;;  %v18124_v22 = vpop.f32.mrf.mxu1  ;;  %v7446_v42 = vld [vmem:[#allocation3 + $0xec] sm:$0x1]  ;;  %12922 = vmatprep.mubr.bf16.mxu1 %v11568_v38 }
 0x360   : > { %v8651_v28 = vrot.slane %v20596_v23, 4  ;;  %v8640_v57 = vrot.slane %v8639_v41, 4  ;;  %v8652_v46 = vrot.slane %v20597_v25, 5  ;;  %v11606_v18 = vcombine.low %v8628_v51, %v8636_v8 }
 0x361   : > { %v8655_v21 = vrot.slane %v20598_v16, 5  ;;  %v20599_v35 = vshrl.u32 %v17734_v44, 16  ;;  %v8645_v48 = vrot.slane %v8644_v26, 4  ;;  %v8661_v36 = vshll.u32 %v7442_v52, 16  ;;  %v7450_v26 = vld [vmem:[#allocation3 + $0xfc] sm:$0x1] }
 0x362   : > { %v8642_v43 = vsel %vm14099_vm7, %v8640_v57, %v8641_v31  ;;  %v8653_v14 = vor.u32 %v8652_v46, %v8651_v28  ;;  %v11570_v9 = vcombine.low %v17792_v27, %v17804_v45  ;;  %v20600_v56 = vshrl.u32 %v17757_v30, 16  ;;  %12966 = vmatprep.mubr.bf16.mxu0 %v11606_v18  ;;  %v18141_v28 = vpop.f32.mrf.mxu0  ;;  %v18149_v18 = vpop.f32.mrf.mxu1 }
 0x363   : > { %v8657_v54 = vrot.slane %v20599_v35, 4  ;;  %v20601_v15 = vshll.u32 %v17757_v30, 16  ;;  %v8650_v41 = vsel %vm14099_vm7, %v8645_v48, %v8649_v24  ;;  %v8663_v5 = vrot.slane %v8661_v36, 5  ;;  %v9030_v48 = vld [vmem:[#allocation3 + $0x20] sm:$0xf] }
 0x364   : > { %v8665_v55 = vrot.slane %v20600_v56, 4  ;;  %v8654_v29 = vrot.slane %v8653_v14, 4  ;;  %v20602_v13 = vshll.u32 %v17769_v7, 16  ;;  %v11607_v39 = vcombine.low %v8642_v43, %v8650_v41  ;;  %v18157_v14 = vpop.f32.mrf.mxu0 }
 0x365   : > { %v8658_v37 = vor.u32 %v8657_v54, %v8655_v21  ;;  %v8666_v31 = vrot.slane %v20601_v15, 5  ;;  %v20603_v52 = vshrl.u32 %v17769_v7, 16  ;;  %v8675_v8 = vshll.u32 %v7446_v42, 16  ;;  %v18163_v15 = vld [vmem:[#allocation3 + $0x28] sm:$0xf] }
 0x366   : > { %v8669_v63 = vrot.slane %v20602_v13, 5  ;;  %v8656_v17 = vsel %vm14099_vm7, %v8654_v29, %v8655_v21  ;;  %v11571_v57 = vcombine.low %v17813_v50, %v17819_v4  ;;  %v20604_v25 = vshrl.u32 %v17792_v27, 16  ;;  %v18155_v21 = vld [vmem:[#allocation3 + $0x24] sm:$0xf]  ;;  %12967 = vmatmul.mubr.bf16.gmra.mxu0 %v11607_v39  ;;  %12923 = vmatmul.mubr.bf16.gmra.mxu1 %v11569_v33 }
 0x367   : > { %v8659_v51 = vrot.slane %v8658_v37, 4  ;;  %v8667_v6 = vor.u32 %v8666_v31, %v8665_v55  ;;  %v8671_v23 = vrot.slane %v20603_v52, 4  ;;  %v20605_v54 = vshll.u32 %v17792_v27, 16  ;;  %v18165_v31 = vpop.f32.mrf.mxu1  ;;  %12926 = vmatprep.mubr.bf16.mxu1 %v11570_v9 }
 0x368   : > { %v8679_v46 = vrot.slane %v20604_v25, 4  ;;  %v8677_v37 = vrot.slane %v8675_v8, 5  ;;  %v8683_v42 = vrot.slane %v7781_v58, 5  ;;  %v20606_v56 = vshrl.u32 %v17804_v45, 16 }
 0x369   : > { %v8664_v24 = vsel %vm14099_vm7, %v8659_v51, %v8663_v5  ;;  %v8668_v16 = vrot.slane %v8667_v6, 4  ;;  %v8672_v35 = vor.u32 %v8671_v23, %v8669_v63  ;;  %v8680_v43 = vrot.slane %v20605_v54, 5  ;;  %v5664_v23 = vld [vmem:[#allocation3 + $0x10c] sm:$0x1]  ;;  %v18182_v40 = vpop.f32.mrf.mxu1 }
 0x36a   : > { %v11608_v36 = vcombine.low %v8656_v17, %v8664_v24  ;;  %v8685_v55 = vrot.slane %v20606_v56, 4  ;;  %v8689_v13 = vshll.u32 %v7450_v26, 16  ;;  %v9095_v6 = vshrl.u32 %v9030_v48, 16  ;;  %v18174_v17 = vpop.f32.mrf.mxu0 }
 0x36b   : > { %v8670_v41 = vsel %vm14099_vm7, %v8668_v16, %v8669_v63  ;;  %v8673_v29 = vrot.slane %v8672_v35, 4  ;;  %v8681_v5 = vor.u32 %v8680_v43, %v8679_v46  ;;  %v19908_v58 = vshrl.u32 %v18155_v21, 16  ;;  %v18186_v16 = vld [vmem:[#allocation3 + $0x34] sm:$0xf]  ;;  %v9034_v35 = vld [vmem:[#allocation3 + $0x30] sm:$0xf] }
 0x36c   : > { %v8686_v51 = vor.u32 %v8685_v55, %v8683_v42  ;;  %v19907_v52 = vshll.u32 %v18155_v21, 16  ;;  %v8691_v26 = vrot.slane %v8689_v13, 5  ;;  %v19897_v1 = vshrl.u32 %v18163_v15, 16  ;;  %12970 = vmatprep.mubr.bf16.mxu0 %v11608_v36  ;;  %v18203_v56 = vpop.f32.mrf.mxu0 }
 0x36d   : > { %v8678_v63 = vsel %vm14099_vm7, %v8673_v29, %v8677_v37  ;;  %v8682_v8 = vrot.slane %v8681_v5, 4  ;;  %v11620_v46 = vrot.slane %v9095_v6, 11  ;;  %v9102_v24 = vrot.slane %v19908_v58, 7  ;;  %v18213_v6 = vpop.f32.mrf.mxu1 }
 0x36e   : > { %v11609_v3 = vcombine.low %v8670_v41, %v8678_v63  ;;  %v8687_v25 = vrot.slane %v8686_v51, 4  ;;  %v9111_v44 = vrot.slane %v19897_v1, 7  ;;  %v19903_v38 = vshll.u32 %v18163_v15, 16  ;;  %12927 = vmatmul.mubr.bf16.gmra.mxu1 %v11571_v57  ;;  %v18299_v57 = vld [vmem:[#allocation3 + $0x64] sm:$0xf] }
 0x36f   : > { %v8684_v0 = vsel %vm14099_vm7, %v8682_v8, %v8683_v42  ;;  %v5665_v39 = vsel %vm13913_vm4, 0, %v5664_v23  ;;  %v9105_v43 = vor.u32 %v19907_v52, %v9102_v24  ;;  %v9107_v48 = vrot.slane %v9102_v24, 4  ;;  %v18201_v42 = vld [vmem:[#allocation3 + $0x38] sm:$0xf]  ;;  %20611 = vst [vmem:[#allocation46_spill] sm:$0xff] %v18299_v57 }
 0x370   : > { %v8692_v54 = vsel %vm14099_vm7, %v8687_v25, %v8691_v26  ;;  %5666 = vst [vmem:[#allocation3 + $0x10c] sm:$0x1] %v5665_v39  ;;  %v20607_v36 = vshrl.u32 %v17813_v50, 16  ;;  %v9114_v41 = vor.u32 %v19903_v38, %v9111_v44  ;;  %v20608_v29 = vshll.u32 %v17813_v50, 16  ;;  %12971 = vmatmul.mubr.bf16.gmra.mxu0 %v11609_v3 }
 0x371   : > { %v11610_v55 = vcombine.low %v8684_v0, %v8692_v54  ;;  %v20609_v13 = vshll.u32 %v17819_v4, 16  ;;  %v9106_v23 = vsel %vm13652_vm2, %v11620_v46, %v9105_v43  ;;  %v20610_v63 = vshrl.u32 %v17819_v4, 16  ;;  %v9038_v54 = vld [vmem:[#allocation3 + $0x40] sm:$0xf] }
 0x372   : > { %v8693_v37 = vrot.slane %v20607_v36, 4  ;;  %v8694_v5 = vrot.slane %v20608_v29, 5  ;;  %v9117_v26 = vshrl.u32 %v9034_v35, 16  ;;  %v19895_v25 = vshrl.u32 %v18186_v16, 16  ;;  %v18230_v29 = vld [vmem:[#allocation3 + $0x44] sm:$0xf] }
 0x373   : > { %v18211_v51 = vrot.slane %v20609_v13, 5  ;;  %v8699_v8 = vrot.slane %v20610_v63, 4  ;;  %v9115_v24 = vsel %vm13652_vm2, %v9107_v48, %v9114_v41  ;;  %v19893_v44 = vshll.u32 %v18186_v16, 16  ;;  %v18232_v48 = vpop.f32.mrf.mxu0  ;;  %v18242_v41 = vld [vmem:[#allocation3 + $0x48] sm:$0xf]  ;;  %12974 = vmatprep.mubr.bf16.mxu0 %v11610_v55 }
 0x374   : > { %v8695_v0 = vor.u32 %v8694_v5, %v8693_v37  ;;  %v19892_v39 = vshrl.u32 %v18201_v42, 16  ;;  %v11652_v46 = vcombine.low %v9106_v23, %v9115_v24  ;;  %v11621_v36 = vrot.slane %v9117_v26, 11  ;;  %v18244_v5 = vpop.f32.mrf.mxu1  ;;  %v9046_v4 = vld [vmem:[#allocation3 + $0x60] sm:$0xf] }
 0x375   : > { %v8700_v43 = vor.u32 %v8699_v8, %v18211_v51  ;;  %v9124_v35 = vrot.slane %v19895_v25, 7  ;;  %v19894_v7 = vshll.u32 %v18201_v42, 16  ;;  %v11692_v33 = vcombine.low %v18155_v21, %v18163_v15  ;;  %v18248_v9 = vpop.f32.mrf.mxu0 }
 0x376   : > { %v8696_v37 = vrot.slane %v8695_v0, 4  ;;  %v9133_v30 = vrot.slane %v19892_v39, 7  ;;  %v9139_v27 = vshrl.u32 %v9038_v54, 16  ;;  %v19896_v24 = vshrl.u32 %v18230_v29, 16  ;;  %v18257_v0 = vld [vmem:[#allocation3 + $0x54] sm:$0xf]  ;;  %12994 = vmatprep.mubr.bf16.mxu1 %v11652_v46 }
 0x377   : > { %v8701_v13 = vrot.slane %v8700_v43, 4  ;;  %v9127_v23 = vor.u32 %v19893_v44, %v9124_v35  ;;  %v9129_v45 = vrot.slane %v9124_v35, 4  ;;  %v7454_v63 = vld [vmem:[#allocation3 + $0x10c] sm:$0x1]  ;;  %v19899_v3 = vshll.u32 %v18230_v29, 16  ;;  %v18259_v43 = vpop.f32.mrf.mxu1  ;;  %v18275_v25 = vpop.f32.mrf.mxu0 }
 0x378   : > { %v8698_v8 = vsel %vm14099_vm7, %v8696_v37, %v18211_v51  ;;  %v9136_v26 = vor.u32 %v19894_v7, %v9133_v30  ;;  %v8703_v54 = vshll.u32 %v7454_v63, 16  ;;  %v11622_v35 = vrot.slane %v9139_v27, 11  ;;  %v9042_v44 = vld [vmem:[#allocation3 + $0x50] sm:$0xf]  ;;  %v18273_v63 = vld [vmem:[#allocation3 + $0x58] sm:$0xf] }
 0x379   : > { %v9128_v55 = vsel %vm13652_vm2, %v11621_v36, %v9127_v23  ;;  %v19898_v39 = vshrl.u32 %v18242_v41, 16  ;;  %v9146_v37 = vrot.slane %v19896_v24, 7  ;;  %v19902_v30 = vshll.u32 %v18242_v41, 16 }
 0x37a   : > { %v9137_v51 = vsel %vm13652_vm2, %v9129_v45, %v9136_v26  ;;  %v18271_v7 = vadd.f32 %v18045_v19, %v17974_v2  ;;  %v8705_v36 = vrot.slane %v8703_v54, 5  ;;  %v11693_v45 = vcombine.low %v18186_v16, %v18201_v42  ;;  %v18281_v26 = vpop.f32.mrf.mxu1 }
 0x37b   : > { %v11653_v23 = vcombine.low %v9128_v55, %v9137_v51  ;;  %v9155_v27 = vrot.slane %v19898_v39, 7  ;;  %v9149_v24 = vor.u32 %v19899_v3, %v9146_v37  ;;  %v9151_v1 = vrot.slane %v9146_v37, 4 }
 0x37c   : > { %v9161_v2 = vshrl.u32 %v9042_v44, 16  ;;  %v19900_v19 = vshrl.u32 %v18257_v0, 16  ;;  %v8706_v54 = vsel %vm14099_vm7, %v8701_v13, %v8705_v36  ;;  %v19905_v51 = vshll.u32 %v18257_v0, 16  ;;  %v18301_v13 = vpop.f32.mrf.mxu0 }
 0x37d   : > { %v9158_v55 = vor.u32 %v19902_v30, %v9155_v27  ;;  %v19901_v39 = vshrl.u32 %v18273_v63, 16  ;;  %v11611_v3 = vcombine.low %v8698_v8, %v8706_v54  ;;  %v9150_v44 = vsel %vm13652_vm2, %v11622_v35, %v9149_v24  ;;  %v18310_v24 = vld [vmem:[#allocation3 + $0x68] sm:$0xf]  ;;  %v18312_v35 = vpop.f32.mrf.mxu1  ;;  %12995 = vmatmul.mubr.bf16.vlgmr.msra.gmra.mxu1 %v11653_v23 }
 0x37e   : > { %v11623_v37 = vrot.slane %v9161_v2, 11  ;;  %v9168_v50 = vrot.slane %v19900_v19, 7  ;;  %v19904_v46 = vshll.u32 %v18273_v63, 16  ;;  %v11694_v8 = vcombine.low %v18230_v29, %v18242_v41  ;;  %20612 = vst [vmem:[#allocation30_spill] sm:$0xff] %v18310_v24  ;;  %13075 = vmatpush3.bf16.msra.mxu1 %v18090_v10 }
 0x37f   : > { %v9159_v36 = vsel %vm13652_vm2, %v9151_v1, %v9158_v55  ;;  %v9177_v27 = vrot.slane %v19901_v39, 7  ;;  %12975 = vmatmul.mubr.bf16.gmra.mxu0 %v11611_v3  ;;  %v18318_v1 = vadd.f32 %v18062_v20, %v17987_v60  ;;  %v9183_v39 = vshrl.u32 %v9046_v4, 16  ;;  %v9050_v20 = vld [vmem:[#allocation3 + $0x70] sm:$0xf] }
 0x380   : > { %v11654_v2 = vcombine.low %v9150_v44, %v9159_v36  ;;  %v9171_v54 = vor.u32 %v19905_v51, %v9168_v50  ;;  %v9173_v19 = vrot.slane %v9168_v50, 4  ;;  %13042 = vmatprep.mubr.bf16.mxu0 %v11692_v33  ;;  %v19906_v30 = vshrl.u32 %v18299_v57, 16  ;;  %v18332_v33 = vld [vmem:[#allocation3 + $0x74] sm:$0xf]  ;;  %v18334_v36 = vpop.f32.mrf.mxu0 }
 0x381   : > { %v9180_v55 = vor.u32 %v19904_v46, %v9177_v27  ;;  %v19910_v38 = vshll.u32 %v18299_v57, 16  ;;  %v19909_v44 = vshrl.u32 %v18310_v24, 16  ;;  %v19911_v50 = vshll.u32 %v18310_v24, 16  ;;  %v18349_v46 = vpop.f32.mrf.mxu1 }
 0x382   : > { %v9172_v3 = vsel %vm13652_vm2, %v11623_v37, %v9171_v54  ;;  %v18330_v60 = vadd.f32 %v18096_v62, %v18004_v11  ;;  %v13344_v37 = vld [vmem:[%s19676_s2 + $0x230] sm:$0xff]   ;;  %v11624_v27 = vrot.slane %v9183_v39, 11  ;;  %v9190_v54 = vrot.slane %v19906_v30, 7  ;;  %v18347_v62 = vld [vmem:[#allocation3 + $0x78] sm:$0xf]  ;;  %v18359_v30 = vpop.f32.mrf.mxu0  ;;  %12998 = vmatprep.mubr.bf16.mxu1 %v11654_v2 }
 0x383   : > { %v9181_v4 = vsel %vm13652_vm2, %v9173_v19, %v9180_v55  ;;  %v18345_v11 = vadd.f32 %v18117_v59, %v18034_v47  ;;  %v9199_v19 = vrot.slane %v19909_v44, 7  ;;  %v18355_v55 = vadd.f32 %v18141_v28, %v18060_v12  ;;  %v18364_v58 = vpop.f32.mrf.mxu1  ;;  %13076 = vmatprep.subr.bf16.mxu1 %v13344_v37  ;;  %v18385_v39 = vld [vmem:[#allocation3 + $0x88] sm:$0xf] }
 0x384   : > { %v11655_v51 = vcombine.low %v9172_v3, %v9181_v4  ;;  %v9193_v47 = vor.u32 %v19910_v38, %v9190_v54  ;;  %v9195_v59 = vrot.slane %v9190_v54, 4  ;;  %v9205_v52 = vshrl.u32 %v9050_v20, 16  ;;  %v9054_v4 = vld [vmem:[#allocation3 + $0x80] sm:$0xf]  ;;  %v18372_v38 = vld [vmem:[#allocation3 + $0x84] sm:$0xf]  ;;  %v18374_v20 = vpop.f32.mrf.mxu0  ;;  %13077 = vmatpush3.bf16.msra.mxu1 %v13344_v37 }
 0x385   : > { %20613 = vst [vmem:[#allocation48_spill] sm:$0xff] %v18345_v11  ;;  %20614 = vst [vmem:[#allocation52_spill] sm:$0xff] %v18355_v55  ;;  %v19912_v3 = vshrl.u32 %v18332_v33, 16  ;;  %v9202_v12 = vor.u32 %v19911_v50, %v9199_v19  ;;  %v19918_v23 = vshrl.u32 %v18347_v62, 16  ;;  %v11696_v19 = vcombine.low %v18299_v57, %v18310_v24  ;;  %v13347_v50 = vld [vmem:[%s19676_s2 + $0x228] sm:$0xff]   ;;  %v18387_v44 = vpop.f32.mrf.mxu1 }
 0x386   : > { %20615 = vst [vmem:[#allocation38_spill] sm:$0xff] %v18372_v38  ;;  %v9194_v54 = vsel %vm13652_vm2, %v11624_v27, %v9193_v47  ;;  %v11625_v2 = vrot.slane %v9205_v52, 11  ;;  %20616 = vst [vmem:[#allocation34_spill] sm:$0xff] %v18385_v39  ;;  %v18398_v47 = vadd.f32 %v18157_v14, %v18079_v61  ;;  %v20617_v49 = vshll.u32 %v18332_v33, 16  ;;  %v18407_v61 = vld [vmem:[#allocation3 + $0x94] sm:$0xf]  ;;  %v18409_v14 = vpop.f32.mrf.mxu0  ;;  %13078 = vmatprep.subr.bf16.mxu1 %v13347_v50 }
 0x387   : > { %v9212_v10 = vrot.slane %v19912_v3, 7  ;;  %13043 = vmatmul.mubr.bf16.vlgmr.msra.gmra.mxu0 %v11693_v45  ;;  %v9203_v52 = vsel %vm13652_vm2, %v9195_v59, %v9202_v12  ;;  %v9221_v27 = vrot.slane %v19918_v23, 7  ;;  %v9227_v3 = vshrl.u32 %v9054_v4, 16  ;;  %v9058_v4 = vld [vmem:[#allocation3 + $0x90] sm:$0xf]  ;;  %12999 = vmatmul.mubr.bf16.gmra.mxu1 %v11655_v51 }
 0x388   : > { %13046 = vmatprep.mubr.bf16.mxu0 %v11694_v8  ;;  %v11656_v28 = vcombine.low %v9194_v54, %v9203_v52  ;;  %v19919_v55 = vshrl.u32 %v18372_v38, 16  ;;  %v20618_v45 = vshll.u32 %v18347_v62, 16  ;;  %v19922_v23 = vshll.u32 %v18372_v38, 16  ;;  %v13350_v54 = vld [vmem:[%s19676_s2 + $0x220] sm:$0xff]   ;;  %13079 = vmatpush3.bf16.msra.mxu1 %v13347_v50  ;;  %v18457_v50 = vld [vmem:[#allocation3 + $0xa8] sm:$0xf] }
 0x389   : > { %v9215_v24 = vor.u32 %v20617_v49, %v9212_v10  ;;  %v9217_v57 = vrot.slane %v9212_v10, 4  ;;  %v11626_v12 = vrot.slane %v9227_v3, 11  ;;  %v19920_v11 = vshrl.u32 %v18385_v39, 16  ;;  %v18423_v10 = vpop.f32.mrf.mxu1  ;;  %v9062_v51 = vld [vmem:[#allocation3 + $0xa0] sm:$0xf]  ;;  %13080 = vmatprep.subr.bf16.mxu1 %v13350_v54  ;;  %20623 = vst [vmem:[#allocation26_spill] sm:$0xff] %v18457_v50 }
 0x38a   : > { %v9224_v59 = vor.u32 %v20618_v45, %v9221_v27  ;;  %v9234_v49 = vrot.slane %v19919_v55, 7  ;;  %v19921_v37 = vshll.u32 %v18385_v39, 16  ;;  %v18418_v3 = vadd.f32 %v18174_v17, %v18100_v32  ;;  %v18437_v17 = vld [vmem:[#allocation3 + $0x98] sm:$0xf]  ;;  %13002 = vmatprep.mubr.bf16.mxu1 %v11656_v28 }
 0x38b   : > { %v9216_v8 = vsel %vm13652_vm2, %v11625_v2, %v9215_v24  ;;  %v9243_v2 = vrot.slane %v19920_v11, 7  ;;  %v18431_v52 = vadd.f32 %v18203_v56, %v18124_v22  ;;  %v18435_v32 = vadd.f32 %v18232_v48, %v18149_v18 }
 0x38c   : > { %20619 = vst [vmem:[#allocation50_spill] sm:$0xff] %v18418_v3  ;;  %v9225_v24 = vsel %vm13652_vm2, %v9217_v57, %v9224_v59  ;;  %v9237_v45 = vor.u32 %v19922_v23, %v9234_v49  ;;  %v9239_v55 = vrot.slane %v9234_v49, 4  ;;  %v18443_v59 = vld [vmem:[#allocation3 + $0xa4] sm:$0xf]  ;;  %v9249_v18 = vshrl.u32 %v9058_v4, 16  ;;  %v13353_v4 = vld [vmem:[%s19676_s2 + $0x218] sm:$0xff]   ;;  %13081 = vmatpush3.bf16.msra.mxu1 %v13350_v54 }
 0x38d   : > { %20620 = vst [vmem:[#allocation40_spill] sm:$0xff] %v18431_v52  ;;  %20621 = vst [vmem:[#allocation17_spill] sm:$0xff] %v18435_v32  ;;  %v11657_v27 = vcombine.low %v9216_v8, %v9225_v24  ;;  %v9246_v22 = vor.u32 %v19921_v37, %v9243_v2  ;;  %v19923_v56 = vshrl.u32 %v18407_v61, 16  ;;  %v18449_v8 = vpop.f32.mrf.mxu0  ;;  %v19924_v24 = vshrl.u32 %v18437_v17, 16  ;;  %v18462_v2 = vpop.f32.mrf.mxu1  ;;  %13082 = vmatprep.subr.bf16.mxu1 %v13353_v4 }
 0x38e   : > { %20622 = vst [vmem:[#allocation16_spill] sm:$0xff] %v18443_v59  ;;  %v9238_v49 = vsel %vm13652_vm2, %v11626_v12, %v9237_v45  ;;  %v20624_v37 = vcombine.low %v18257_v0, %v18273_v63  ;;  %v11627_v45 = vrot.slane %v9249_v18, 11  ;;  %v18473_v28 = vadd.f32 %v18248_v9, %v18165_v31 }
 0x38f   : > { %v9247_v12 = vsel %vm13652_vm2, %v9239_v55, %v9246_v22  ;;  %v9256_v23 = vrot.slane %v19923_v56, 7  ;;  %v18475_v57 = vpop.f32.mrf.mxu0  ;;  %v9265_v48 = vrot.slane %v19924_v24, 7  ;;  %v9271_v32 = vshrl.u32 %v9062_v51, 16  ;;  %v18480_v52 = vpop.f32.mrf.mxu1  ;;  %v18512_v24 = vld [vmem:[#allocation3 + $0xb8] sm:$0xf]  ;;  %13003 = vmatmul.mubr.bf16.gmra.mxu1 %v11657_v27 }
 0x390   : > { %13047 = vmatmul.mubr.bf16.gmra.mxu0 %v20624_v37  ;;  %20625 = vst [vmem:[#allocation15_spill] sm:$0xff] %v18473_v28  ;;  %v11658_v11 = vcombine.low %v9238_v49, %v9247_v12  ;;  %v19925_v37 = vshrl.u32 %v18443_v59, 16  ;;  %v20626_v55 = vshll.u32 %v18407_v61, 16  ;;  %v19926_v31 = vshrl.u32 %v18457_v50, 16  ;;  %v9066_v28 = vld [vmem:[#allocation3 + $0xb0] sm:$0xf]  ;;  %13083 = vmatpush3.bf16.msra.mxu1 %v13353_v4 }
 0x391   : > { %13050 = vmatprep.mubr.bf16.mxu0 %v11696_v19  ;;  %v9261_v18 = vrot.slane %v9256_v23, 4  ;;  %v18486_v9 = vpop.f32.mrf.mxu0  ;;  %v20627_v19 = vshll.u32 %v18437_v17, 16  ;;  %v11628_v12 = vrot.slane %v9271_v32, 11  ;;  %v18504_v32 = vadd.f32 %v18275_v25, %v18182_v40  ;;  %20631 = vst [vmem:[#allocation9_spill] sm:$0xff] %v18512_v24 }
 0x392   : > { %v9259_v22 = vor.u32 %v20626_v55, %v9256_v23  ;;  %v9278_v51 = vrot.slane %v19925_v37, 7  ;;  %v13356_v23 = vld [vmem:[%s19676_s2 + $0x210] sm:$0xff]   ;;  %v18496_v55 = vpop.f32.mrf.mxu1  ;;  %v18522_v40 = vadd.f32 %v18334_v36, %v18244_v5  ;;  %13006 = vmatprep.mubr.bf16.mxu1 %v11658_v11  ;;  %v20637_v4 = vcombine.low %v18332_v33, %v18347_v62 }
 0x393   : > { %v9268_v49 = vor.u32 %v20627_v19, %v9265_v48  ;;  %v9287_v48 = vrot.slane %v19926_v31, 7  ;;  %20628 = vst [vmem:[#allocation11_spill] sm:$0xff] %v18504_v32  ;;  %v18508_v19 = vadd.f32 %v18301_v13, %v18213_v6  ;;  %v18510_v37 = vld [vmem:[#allocation3 + $0xb4] sm:$0xf]  ;;  %v18514_v56 = vpop.f32.mrf.mxu0  ;;  %v20634_v13 = vshll.u32 %v18457_v50, 16  ;;  %13084 = vmatprep.subr.bf16.mxu1 %v13356_v23 }
 0x394   : > { %v9260_v54 = vsel %vm13652_vm2, %v11627_v45, %v9259_v22  ;;  %20630 = vst [vmem:[#allocation49_spill] sm:$0xff] %v18510_v37  ;;  %v20632_v22 = vshll.u32 %v18443_v59, 16  ;;  %v9283_v3 = vrot.slane %v9278_v51, 4  ;;  %20633 = vst [vmem:[#allocation27_spill] sm:$0xff] %v18522_v40  ;;  %v18524_v6 = vpop.f32.mrf.mxu1  ;;  %v9293_v32 = vshrl.u32 %v9066_v28, 16  ;;  %v13359_v28 = vld [vmem:[%s19676_s2 + $0x208] sm:$0xff]   ;;  %13085 = vmatpush3.bf16.msra.mxu1 %v13356_v23 }
 0x395   : > { %20629 = vst [vmem:[#allocation4_spill] sm:$0xff] %v18508_v19  ;;  %v9269_v45 = vsel %vm13652_vm2, %v9261_v18, %v9268_v49  ;;  %v9290_v19 = vor.u32 %v20634_v13, %v9287_v48  ;;  %v9070_v18 = vld [vmem:[#allocation3 + $0xc0] sm:$0xf]  ;;  %v18530_v49 = vld [vmem:[#allocation3 + $0xc4] sm:$0xf]  ;;  %v19929_v5 = vshrl.u32 %v18510_v37, 16  ;;  %v18552_v13 = vpop.f32.mrf.mxu0  ;;  %v20638_v27 = vcombine.low %v18372_v38, %v18385_v39  ;;  %13086 = vmatprep.subr.bf16.mxu1 %v13359_v28 }
 0x396   : > { %v9281_v31 = vor.u32 %v20632_v22, %v9278_v51  ;;  %v11659_v25 = vcombine.low %v9260_v54, %v9269_v45  ;;  %20635 = vst [vmem:[#allocation18_spill] sm:$0xff] %v18530_v49  ;;  %v18537_v54 = vld [vmem:[#allocation3 + $0xc8] sm:$0xf]  ;;  %v18539_v48 = vpop.f32.mrf.mxu1  ;;  %v11700_v22 = vcombine.low %v18443_v59, %v18457_v50  ;;  %v19934_v45 = vshrl.u32 %v18530_v49, 16  ;;  %v13362_v23 = vld [vmem:[%s19676_s2 + $0x200] sm:$0xff]  }
 0x397   : > { %20636 = vst [vmem:[#allocation29_spill] sm:$0xff] %v18537_v54  ;;  %v9300_v11 = vrot.slane %v19929_v5, 7  ;;  %v20642_v59 = vshll.u32 %v18512_v24, 16  ;;  %v18614_v38 = vld [vmem:[#allocation3 + $0xe4] sm:$0xf] }
 0x398   : > { %v9282_v51 = vsel %vm13652_vm2, %v11628_v12, %v9281_v31  ;;  %13051 = vmatmul.mubr.bf16.gmra.mxu0 %v20637_v4  ;;  %v9291_v31 = vsel %vm13652_vm2, %v9283_v3, %v9290_v19  ;;  %v11629_v12 = vrot.slane %v9293_v32, 11  ;;  %v20639_v4 = vshrl.u32 %v18512_v24, 16  ;;  %v18565_v32 = vpop.f32.mrf.mxu1  ;;  %13007 = vmatmul.mubr.bf16.gmra.mxu1 %v11659_v25  ;;  %20650 = vst [vmem:[#allocation25_spill] sm:$0xff] %v18614_v38 }
 0x399   : > { %13054 = vmatprep.mubr.bf16.mxu0 %v20638_v27  ;;  %v11660_v36 = vcombine.low %v9282_v51, %v9291_v31  ;;  %v18563_v3 = vadd.f32 %v18359_v30, %v18259_v43  ;;  %v9315_v19 = vshrl.u32 %v9070_v18, 16  ;;  %v18570_v51 = vpop.f32.mrf.mxu0  ;;  %v20641_v31 = vshll.u32 %v18510_v37, 16  ;;  %13087 = vmatpush3.bf16.msra.mxu1 %v13359_v28 }
 0x39a   : > { %v9309_v40 = vrot.slane %v20639_v4, 7  ;;  %v9305_v4 = vrot.slane %v9300_v11, 4  ;;  %v18579_v18 = vpop.f32.mrf.mxu1  ;;  %v9322_v27 = vrot.slane %v19934_v45, 7  ;;  %v18600_v45 = vadd.f32 %v18409_v14, %v18312_v35  ;;  %13088 = vmatprep.subr.bf16.mxu1 %v13362_v23 }
 0x39b   : > { %20640 = vst [vmem:[#allocation32_spill] sm:$0xff] %v18563_v3  ;;  %v9303_v5 = vor.u32 %v20641_v31, %v9300_v11  ;;  %v18577_v3 = vld [vmem:[#allocation3 + $0xd4] sm:$0xf]  ;;  %v11630_v50 = vrot.slane %v9315_v19, 11  ;;  %v20643_v11 = vshrl.u32 %v18537_v54, 16  ;;  %v18592_v30 = vpop.f32.mrf.mxu0  ;;  %13010 = vmatprep.mubr.bf16.mxu1 %v11660_v36 }
 0x39c   : > { %v9312_v43 = vor.u32 %v20642_v59, %v9309_v40  ;;  %v18590_v59 = vadd.f32 %v18374_v20, %v18281_v26  ;;  %v9074_v40 = vld [vmem:[#allocation3 + $0xd0] sm:$0xf]  ;;  %20645 = vst [vmem:[#allocation45_spill] sm:$0xff] %v18600_v45  ;;  %v18606_v26 = vld [vmem:[#allocation3 + $0xd8] sm:$0xf]  ;;  %v18608_v20 = vpop.f32.mrf.mxu1 }
 0x39d   : > { %v9331_v31 = vrot.slane %v20643_v11, 7  ;;  %v9304_v39 = vsel %vm13652_vm2, %v11629_v12, %v9303_v5  ;;  %v18604_v11 = vadd.f32 %v18449_v8, %v18349_v46  ;;  %20647 = vst [vmem:[#allocation21_spill] sm:$0xff] %v18606_v26  ;;  %v9327_v12 = vrot.slane %v9322_v27, 4  ;;  %v18616_v35 = vpop.f32.mrf.mxu0  ;;  %v9078_v36 = vld [vmem:[#allocation3 + $0xe0] sm:$0xf]  ;;  %13089 = vmatpush3.bf16.msra.mxu1 %v13362_v23 }
 0x39e   : > { %20644 = vst [vmem:[#allocation13_spill] sm:$0xff] %v18590_v59  ;;  %v9313_v19 = vsel %vm13652_vm2, %v9305_v4, %v9312_v43  ;;  %v20648_v59 = vshll.u32 %v18530_v49, 16  ;;  %v20649_v4 = vshll.u32 %v18537_v54, 16  ;;  %v11701_v46 = vcombine.low %v18510_v37, %v18512_v24  ;;  %v9082_v23 = vld [vmem:[#allocation3 + $0xf0] sm:$0xf] }
 0x39f   : > { %20646 = vst [vmem:[#allocation20_spill] sm:$0xff] %v18604_v11  ;;  %v11661_v25 = vcombine.low %v9304_v39, %v9313_v19  ;;  %v9337_v14 = vshrl.u32 %v9074_v40, 16  ;;  %v18622_v19 = vpop.f32.mrf.mxu1  ;;  %v18635_v39 = vpop.f32.mrf.mxu0  ;;  %v20653_v37 = vshrl.u32 %v18577_v3, 16  ;;  %v9359_v40 = vshrl.u32 %v9078_v36, 16 }
 0x3a0   : > { %v9325_v5 = vor.u32 %v20648_v59, %v9322_v27  ;;  %v9334_v43 = vor.u32 %v20649_v4, %v9331_v31  ;;  %v20651_v27 = vcombine.low %v18407_v61, %v18437_v17  ;;  %v19945_v59 = vshrl.u32 %v18606_v26, 16  ;;  %v18633_v4 = vld [vmem:[#allocation3 + $0xe8] sm:$0xf] }
 0x3a1   : > { %20652 = vst [vmem:[#allocation19_spill] sm:$0xff] %v18633_v4  ;;  %v11631_v24 = vrot.slane %v9337_v14, 11  ;;  %13011 = vmatmul.mubr.bf16.gmra.mxu1 %v11661_v25  ;;  %v20660_v25 = vshll.u32 %v18614_v38, 16 }
 0x3a2   : > { %13055 = vmatmul.mubr.bf16.gmra.mxu0 %v20651_v27  ;;  %v9326_v28 = vsel %vm13652_vm2, %v11630_v50, %v9325_v5  ;;  %v9335_v31 = vsel %vm13652_vm2, %v9327_v12, %v9334_v43  ;;  %v9344_v27 = vrot.slane %v20653_v37, 7  ;;  %v11702_v50 = vcombine.low %v18530_v49, %v18537_v54  ;;  %v18641_v5 = vpop.f32.mrf.mxu1 }
 0x3a3   : > { %13058 = vmatprep.mubr.bf16.mxu0 %v11700_v22  ;;  %v11662_v8 = vcombine.low %v9326_v28, %v9335_v31  ;;  %v9353_v12 = vrot.slane %v19945_v59, 7  ;;  %v18647_v43 = vadd.f32 %v18475_v57, %v18364_v58  ;;  %v19946_v22 = vshrl.u32 %v18614_v38, 16  ;;  %v18650_v28 = vpop.f32.mrf.mxu0 }
 0x3a4   : > { %v20655_v37 = vshll.u32 %v18577_v3, 16  ;;  %v9349_v31 = vrot.slane %v9344_v27, 4  ;;  %v19947_v49 = vshrl.u32 %v18633_v4, 16  ;;  %v18656_v11 = vpop.f32.mrf.mxu1  ;;  %v20656_v59 = vshll.u32 %v18606_v26, 16 }
 0x3a5   : > { %20654 = vst [vmem:[#allocation42_spill] sm:$0xff] %v18647_v43  ;;  %v11632_v57 = vrot.slane %v9359_v40, 11  ;;  %v9366_v36 = vrot.slane %v19946_v22, 7  ;;  %v19948_v43 = vshll.u32 %v18633_v4, 16  ;;  %v18663_v45 = vpop.f32.mrf.mxu0  ;;  %v18671_v54 = vadd.f32 %v18486_v9, %v18387_v44  ;;  %v18677_v40 = vld [vmem:[#allocation3 + $0xf4] sm:$0xf]  ;;  %13014 = vmatprep.mubr.bf16.mxu1 %v11662_v8 }
 0x3a6   : > { %v9347_v14 = vor.u32 %v20655_v37, %v9344_v27  ;;  %v9356_v58 = vor.u32 %v20656_v59, %v9353_v12  ;;  %v9375_v37 = vrot.slane %v19947_v49, 7  ;;  %v18675_v59 = vadd.f32 %v18514_v56, %v18423_v10  ;;  %v18679_v12 = vld [vmem:[#allocation3 + $0xf8] sm:$0xf]  ;;  %v18681_v22 = vpop.f32.mrf.mxu1 }
 0x3a7   : > { %20657 = vst [vmem:[#allocation14_spill] sm:$0xff] %v18671_v54  ;;  %20659 = vst [vmem:[#allocation47_spill] sm:$0xff] %v18679_v12  ;;  %v9371_v49 = vrot.slane %v9366_v36, 4  ;;  %v18689_v44 = vadd.f32 %v18552_v13, %v18462_v2  ;;  %v18691_v10 = vpop.f32.mrf.mxu0  ;;  %v11703_v8 = vcombine.low %v18577_v3, %v18606_v26  ;;  %v9086_v54 = vld [vmem:[#allocation3 + $0x100] sm:$0xf]  ;;  %v19951_v2 = vshrl.u32 %v18677_v40, 16 }
 0x3a8   : > { %v9348_v27 = vsel %vm13652_vm2, %v11631_v24, %v9347_v14  ;;  %20658 = vst [vmem:[#allocation44_spill] sm:$0xff] %v18675_v59  ;;  %v9357_v24 = vsel %vm13652_vm2, %v9349_v31, %v9356_v58  ;;  %v9369_v14 = vor.u32 %v20660_v25, %v9366_v36  ;;  %v9378_v9 = vor.u32 %v19948_v43, %v9375_v37  ;;  %v18697_v31 = vld [vmem:[#allocation3 + $0x104] sm:$0xf]  ;;  %v18713_v25 = vpop.f32.mrf.mxu1 }
 0x3a9   : > { %20661 = vst [vmem:[#allocation51_spill] sm:$0xff] %v18689_v44  ;;  %v11663_v56 = vcombine.low %v9348_v27, %v9357_v24  ;;  %v9381_v59 = vshrl.u32 %v9082_v23, 16  ;;  %20662 = vst [vmem:[#allocation54_spill] sm:$0xff] %v18697_v31  ;;  %v19952_v36 = vshrl.u32 %v18679_v12, 16  ;;  %v18704_v27 = vld [vmem:[#allocation3 + $0x108] sm:$0xf]  ;;  %v18706_v37 = vpop.f32.mrf.mxu0 }
 0x3aa   : > { %13059 = vmatmul.mubr.bf16.gmra.mxu0 %v11701_v46  ;;  %v9370_v58 = vsel %vm13652_vm2, %v11632_v57, %v9369_v14  ;;  %20663 = vst [vmem:[#allocation28_spill] sm:$0xff] %v18704_v27  ;;  %v9379_v23 = vsel %vm13652_vm2, %v9371_v49, %v9378_v9  ;;  %v11704_v57 = vcombine.low %v18614_v38, %v18633_v4  ;;  %v9388_v43 = vrot.slane %v19951_v2, 7 }
 0x3ab   : > { %13062 = vmatprep.mubr.bf16.mxu0 %v11702_v50  ;;  %v11633_v24 = vrot.slane %v9381_v59, 11  ;;  %v11664_v14 = vcombine.low %v9370_v58, %v9379_v23  ;;  %v9397_v13 = vrot.slane %v19952_v36, 7  ;;  %v18721_v50 = vadd.f32 %v18570_v51, %v18480_v52  ;;  %v18723_v49 = vpop.f32.mrf.mxu0  ;;  %v18728_v58 = vpop.f32.mrf.mxu1  ;;  %v9090_v51 = vld [vmem:[#allocation3 + $0x110] sm:$0xf]  ;;  %13015 = vmatmul.mubr.bf16.gmra.mxu1 %v11663_v56 }
 0x3ac   : > { %v9403_v59 = vshrl.u32 %v9086_v54, 16  ;;  %v19958_v9 = vshrl.u32 %v18697_v31, 16  ;;  %v19957_v4 = vshrl.u32 %v18704_v27, 16  ;;  %v20665_v23 = vshll.u32 %v18677_v40, 16 }
 0x3ad   : > { %20664 = vst [vmem:[#allocation22_spill] sm:$0xff] %v18721_v50  ;;  %v9393_v44 = vrot.slane %v9388_v43, 4  ;;  %v20666_v36 = vshll.u32 %v18679_v12, 16  ;;  %v18735_v50 = vpop.f32.mrf.mxu0  ;;  %13018 = vmatprep.mubr.bf16.mxu1 %v11664_v14  ;;  %v20669_v14 = vshll.u32 %v18697_v31, 16 }
 0x3ae   : > { %v9391_v2 = vor.u32 %v20665_v23, %v9388_v43  ;;  %v11634_v54 = vrot.slane %v9403_v59, 11  ;;  %v9410_v46 = vrot.slane %v19958_v9, 7  ;;  %v9419_v26 = vrot.slane %v19957_v4, 7  ;;  %v18745_v43 = vld [vmem:[#allocation3 + $0x114] sm:$0xf] }
 0x3af   : > { %v9400_v38 = vor.u32 %v20666_v36, %v9397_v13  ;;  %v18743_v23 = vadd.f32 %v18592_v30, %v18496_v55  ;;  %v18747_v13 = vpop.f32.mrf.mxu1  ;;  %v18755_v59 = vadd.f32 %v18616_v35, %v18524_v6  ;;  %v18759_v4 = vadd.f32 %v18635_v39, %v18539_v48  ;;  %v18761_v55 = vld [vmem:[#allocation3 + $0x118] sm:$0xf]  ;;  %v18763_v30 = vpop.f32.mrf.mxu0  ;;  %v9033_v39 = vld [vmem:[#allocation3 + $0x2c] sm:$0x1] }
 0x3b0   : > { %v9392_v36 = vsel %vm13652_vm2, %v11633_v24, %v9391_v2  ;;  %v9413_v52 = vor.u32 %v20669_v14, %v9410_v46  ;;  %v9415_v2 = vrot.slane %v9410_v46, 4  ;;  %v20670_v24 = vshll.u32 %v18704_v27, 16 }
 0x3b1   : > { %v9401_v56 = vsel %vm13652_vm2, %v9393_v44, %v9400_v38  ;;  %20667 = vst [vmem:[#allocation37_spill] sm:$0xff] %v18755_v59  ;;  %20668 = vst [vmem:[#allocation53_spill] sm:$0xff] %v18759_v4  ;;  %v18769_v44 = vpop.f32.mrf.mxu1  ;;  %v11705_v6 = vcombine.low %v18677_v40, %v18679_v12  ;;  %v9425_v48 = vshrl.u32 %v9090_v51, 16  ;;  %v19959_v35 = vshrl.u32 %v18745_v43, 16 }
 0x3b2   : > { %v11665_v9 = vcombine.low %v9392_v36, %v9401_v56  ;;  %v9422_v38 = vor.u32 %v20670_v24, %v9419_v26  ;;  %13063 = vmatmul.mubr.bf16.gmra.mxu0 %v11703_v8  ;;  %v9414_v36 = vsel %vm13652_vm2, %v11634_v54, %v9413_v52  ;;  %v19962_v26 = vshrl.u32 %v18761_v55, 16  ;;  %v18781_v8 = vpop.f32.mrf.mxu0 }
 0x3b3   : > { %13066 = vmatprep.mubr.bf16.mxu0 %v11704_v57  ;;  %v11635_v24 = vrot.slane %v9425_v48, 11  ;;  %v9432_v51 = vrot.slane %v19959_v35, 7  ;;  %v11706_v57 = vcombine.low %v18697_v31, %v18704_v27  ;;  %v18791_v54 = vadd.f32 %v18650_v28, %v18565_v32 }
 0x3b4   : > { %v9423_v46 = vsel %vm13652_vm2, %v9415_v2, %v9422_v38  ;;  %v9441_v52 = vrot.slane %v19962_v26, 7  ;;  %v20672_v2 = vshrl.u32 %v18155_v21, 16  ;;  %v18799_v35 = vpop.f32.mrf.mxu0  ;;  %v20674_v56 = vshll.u32 %v18745_v43, 16  ;;  %13019 = vmatmul.mubr.bf16.gmra.mxu1 %v11665_v9 }
 0x3b5   : > { %v11666_v14 = vcombine.low %v9414_v36, %v9423_v46  ;;  %20671 = vst [vmem:[#allocation12_spill] sm:$0xff] %v18791_v54  ;;  %v20673_v36 = vshll.u32 %v18155_v21, 16  ;;  %v18797_v46 = vpop.f32.mrf.mxu1  ;;  %v9437_v27 = vrot.slane %v9432_v51, 4  ;;  %v20675_v26 = vshll.u32 %v18163_v15, 16 }
 0x3b6   : > { %v10122_v38 = vrot.slane %v20672_v2, 4  ;;  %v9435_v4 = vor.u32 %v20674_v56, %v9432_v51  ;;  %v20676_v32 = vshrl.u32 %v18163_v15, 16  ;;  %v20677_v2 = vshll.u32 %v18761_v55, 16  ;;  %v18815_v56 = vpop.f32.mrf.mxu0 }
 0x3b7   : > { %v10123_v48 = vrot.slane %v20673_v36, 5  ;;  %v10126_v31 = vrot.slane %v20675_v26, 5  ;;  %v10132_v36 = vshll.u32 %v9033_v39, 16  ;;  %v18811_v12 = vadd.f32 %v18663_v45, %v18579_v18  ;;  %v18813_v59 = vpop.f32.mrf.mxu1  ;;  %13022 = vmatprep.mubr.bf16.mxu1 %v11666_v14 }
 0x3b8   : > { %v10128_v28 = vrot.slane %v20676_v32, 4  ;;  %v9444_v54 = vor.u32 %v20677_v2, %v9441_v52  ;;  %v9436_v26 = vsel %vm13652_vm2, %v11635_v24, %v9435_v4  ;;  %v18821_v9 = vadd.f32 %v18691_v10, %v18608_v20  ;;  %v9037_v52 = vld [vmem:[#allocation3 + $0x3c] sm:$0x1]  ;;  %v9041_v2 = vld [vmem:[#allocation3 + $0x4c] sm:$0x1] }
 0x3b9   : > { %v10124_v21 = vor.u32 %v10123_v48, %v10122_v38  ;;  %v18825_v39 = vadd.f32 %v18706_v37, %v18622_v19  ;;  %v10134_v51 = vrot.slane %v10132_v36, 5  ;;  %v11707_v14 = vcombine.low %v18745_v43, %v18761_v55  ;;  %v18831_v38 = vpop.f32.mrf.mxu1  ;;  %v18837_v37 = vpop.f32.mrf.mxu0 }
 0x3ba   : > { %v10129_v15 = vor.u32 %v10128_v28, %v10126_v31  ;;  %v9445_v45 = vsel %vm13652_vm2, %v9437_v27, %v9444_v54  ;;  %13067 = vmatmul.mubr.bf16.gmra.mxu0 %v11705_v6  ;;  %v7361_v20 = vadd.f32 %v18713_v25, %v18271_v7  ;;  %v20678_v19 = vshrl.u32 %v18186_v16, 16 }
 0x3bb   : > { %v10125_v18 = vrot.slane %v10124_v21, 4  ;;  %v11667_v4 = vcombine.low %v9436_v26, %v9445_v45  ;;  %13070 = vmatprep.mubr.bf16.mxu0 %v11706_v57  ;;  %v20679_v27 = vshll.u32 %v18186_v16, 16  ;;  %v20680_v48 = vshll.u32 %v18201_v42, 16  ;;  %v18847_v7 = vpop.f32.mrf.mxu1 }
 0x3bc   : > { %v10130_v24 = vrot.slane %v10129_v15, 4  ;;  %v10136_v10 = vrot.slane %v20678_v19, 4  ;;  %v20681_v32 = vshrl.u32 %v18201_v42, 16  ;;  %v10146_v21 = vshll.u32 %v9037_v52, 16 }
 0x3bd   : > { %v10127_v34 = vsel %vm14099_vm7, %v10125_v18, %v10126_v31  ;;  %v10137_v54 = vrot.slane %v20679_v27, 5  ;;  %v10140_v6 = vrot.slane %v20680_v48, 5  ;;  %v18853_v57 = vadd.f32 %v18723_v49, %v18641_v5  ;;  %v18863_v48 = vpop.f32.mrf.mxu0  ;;  %v18865_v5 = vpop.f32.mrf.mxu1  ;;  %13023 = vmatmul.mubr.bf16.gmra.mxu1 %v11667_v4 }
 0x3be   : > { %v10142_v28 = vrot.slane %v20681_v32, 4  ;;  %v10135_v25 = vsel %vm14099_vm7, %v10130_v24, %v10134_v51  ;;  %v20682_v16 = vshrl.u32 %v18230_v29, 16  ;;  %v20683_v42 = vshll.u32 %v18230_v29, 16 }
 0x3bf   : > { %v11732_v36 = vcombine.low %v10127_v34, %v10135_v25  ;;  %v10138_v26 = vor.u32 %v10137_v54, %v10136_v10  ;;  %v10148_v18 = vrot.slane %v10146_v21, 5  ;;  %v20684_v19 = vshll.u32 %v18242_v41, 16  ;;  %v18877_v25 = vpop.f32.mrf.mxu1 }
 0x3c0   : > { %v10150_v31 = vrot.slane %v20682_v16, 4  ;;  %v10143_v15 = vor.u32 %v10142_v28, %v10140_v6  ;;  %v10151_v45 = vrot.slane %v20683_v42, 5  ;;  %v20685_v51 = vshrl.u32 %v18242_v41, 16 }
 0x3c1   : > { %v10154_v27 = vrot.slane %v20684_v19, 5  ;;  %v10160_v24 = vshll.u32 %v9041_v2, 16  ;;  %v10139_v49 = vrot.slane %v10138_v26, 4  ;;  %v7359_v29 = vadd.f32 %v18728_v58, %v18318_v1  ;;  %13090 = vmatprep.mubr.bf16.mxu1 %v11732_v36  ;;  %v18875_v2 = vpop.f32.mrf.mxu0 }
 0x3c2   : > { %v10156_v52 = vrot.slane %v20685_v51, 4  ;;  %v10144_v34 = vrot.slane %v10143_v15, 4  ;;  %v10152_v10 = vor.u32 %v10151_v45, %v10150_v31  ;;  %v18871_v28 = vadd.f32 %v18735_v50, %v18656_v11  ;;  %v9045_v11 = vld [vmem:[#allocation3 + $0x5c] sm:$0x1]  ;;  %13071 = vmatmul.mubr.bf16.gmra.mxu0 %v11707_v14  ;;  %v20687_v15 = vld [vmem:[#allocation52_spill] sm:$0xff] }
 0x3c3   : > { %v10162_v32 = vrot.slane %v10160_v24, 5  ;;  %v7362_v41 = vadd.f32 %v18747_v13, %v18330_v60  ;;  %v10141_v4 = vsel %vm14099_vm7, %v10139_v49, %v10140_v6  ;;  %v18885_v21 = vadd.f32 %v18763_v30, %v18681_v22  ;;  %v20686_v60 = vld [vmem:[#allocation48_spill] sm:$0xff]  ;;  %v18892_v36 = vpop.f32.mrf.mxu0  ;;  %v18894_v6 = vpop.f32.mrf.mxu1 }
 0x3c4   : > { %v10157_v54 = vor.u32 %v10156_v52, %v10154_v27  ;;  %v10149_v1 = vsel %vm14099_vm7, %v10144_v34, %v10148_v18  ;;  %v10153_v58 = vrot.slane %v10152_v10, 4  ;;  %v7360_v13 = vadd.f32 %v18769_v44, %v20686_v60 }
 0x3c5   : > { %v11733_v50 = vcombine.low %v10141_v4, %v10149_v1  ;;  %v18890_v31 = vadd.f32 %v18781_v8, %v7361_v20  ;;  %v7365_v22 = vadd.f32 %v18797_v46, %v20687_v15  ;;  %v20688_v30 = vshrl.u32 %v18257_v0, 16  ;;  %v18910_v52 = vpop.f32.mrf.mxu0 }
 0x3c6   : > { %v10158_v16 = vrot.slane %v10157_v54, 4  ;;  %v10155_v26 = vsel %vm14099_vm7, %v10153_v58, %v10154_v27  ;;  %v20689_v42 = vshll.u32 %v18257_v0, 16  ;;  %v20690_v8 = vshll.u32 %v18273_v63, 16  ;;  %v9049_v27 = vld [vmem:[#allocation3 + $0x6c] sm:$0x1]  ;;  %v20692_v0 = vld [vmem:[#allocation46_spill] sm:$0xff] }
 0x3c7   : > { %v10164_v14 = vrot.slane %v20688_v30, 4  ;;  %v20691_v18 = vshrl.u32 %v18273_v63, 16  ;;  %v10174_v51 = vshll.u32 %v9045_v11, 16  ;;  %v18913_v49 = vadd.f32 %v18799_v35, %v7359_v29  ;;  %v20695_v58 = vld [vmem:[#allocation30_spill] sm:$0xff]  ;;  %v18921_v11 = vpop.f32.mrf.mxu1  ;;  %13091 = vmatmul.mubr.bf16.vlgmr.msra.gmra.mxu1 %v11733_v50  ;;  %v12860_v30 = vpop.f32.mrf.mxu0 }
 0x3c8   : > { %v10165_v45 = vrot.slane %v20689_v42, 5  ;;  %v10163_v44 = vsel %vm14099_vm7, %v10158_v16, %v10162_v32  ;;  %v10168_v20 = vrot.slane %v20690_v8, 5  ;;  %v20693_v34 = vshrl.u32 %v20692_v0, 16 }
 0x3c9   : > { %v10170_v19 = vrot.slane %v20691_v18, 4  ;;  %v11734_v46 = vcombine.low %v10155_v26, %v10163_v44  ;;  %v10176_v32 = vrot.slane %v10174_v51, 5  ;;  %v20694_v4 = vshll.u32 %v20692_v0, 16  ;;  %v20698_v44 = vld [vmem:[#allocation50_spill] sm:$0xff] }
 0x3ca   : > { %v10166_v24 = vor.u32 %v10165_v45, %v10164_v14  ;;  %v10178_v10 = vrot.slane %v20693_v34, 4  ;;  %v20696_v63 = vshll.u32 %v20695_v58, 16  ;;  %v20697_v26 = vshrl.u32 %v20695_v58, 16  ;;  %v20700_v34 = vld [vmem:[#allocation17_spill] sm:$0xff] }
 0x3cb   : > { %v10171_v54 = vor.u32 %v10170_v19, %v10168_v20  ;;  %v10179_v1 = vrot.slane %v20694_v4, 5  ;;  %v10188_v35 = vshll.u32 %v9049_v27, 16  ;;  %v7363_v29 = vadd.f32 %v18813_v59, %v18398_v47  ;;  %13094 = vmatprep.mubr.bf16.mxu1 %v11734_v46  ;;  %v18937_v27 = vpop.f32.mrf.mxu0  ;;  %v20699_v46 = vld [vmem:[#allocation40_spill] sm:$0xff] }
 0x3cc   : > { %v10182_v16 = vrot.slane %v20696_v63, 5  ;;  %v10167_v60 = vrot.slane %v10166_v24, 4  ;;  %v10184_v15 = vrot.slane %v20697_v26, 4  ;;  %v18928_v45 = vadd.f32 %v18815_v56, %v7362_v41  ;;  %v12816_v24 = vpop.f32.mrf.mxu1  ;;  %v9057_v63 = vld [vmem:[#allocation3 + $0x8c] sm:$0x1] }
 0x3cd   : > { %v10172_v14 = vrot.slane %v10171_v54, 4  ;;  %v10180_v42 = vor.u32 %v10179_v1, %v10178_v10  ;;  %v7366_v8 = vadd.f32 %v18831_v38, %v20698_v44  ;;  %v10190_v19 = vrot.slane %v10188_v35, 5  ;;  %v9053_v38 = vld [vmem:[#allocation3 + $0x7c] sm:$0x1]  ;;  %v18950_v54 = vpop.f32.mrf.mxu0 }
 0x3ce   : > { %v10169_v50 = vsel %vm14099_vm7, %v10167_v60, %v10168_v20  ;;  %v10185_v18 = vor.u32 %v10184_v15, %v10182_v16  ;;  %v18935_v51 = vadd.f32 %v18837_v37, %v7360_v13  ;;  %v7364_v56 = vadd.f32 %v18847_v7, %v20699_v46  ;;  %v20705_v15 = vld [vmem:[#allocation38_spill] sm:$0xff] }
 0x3cf   : > { %v10177_v47 = vsel %vm14099_vm7, %v10172_v14, %v10176_v32  ;;  %v10181_v59 = vrot.slane %v10180_v42, 4  ;;  %v18944_v41 = vadd.f32 %v18863_v48, %v7365_v22  ;;  %v7369_v37 = vadd.f32 %v18865_v5, %v20700_v34 }
 0x3d0   : > { %v11735_v20 = vcombine.low %v10169_v50, %v10177_v47  ;;  %v10186_v0 = vrot.slane %v10185_v18, 4  ;;  %v20701_v13 = vshrl.u32 %v18332_v33, 16  ;;  %v20702_v7 = vshll.u32 %v18332_v33, 16  ;;  %v7280_v18 = vpop.f32.mrf.mxu1 }
 0x3d1   : > { %v10183_v32 = vsel %vm14099_vm7, %v10181_v59, %v10182_v16  ;;  %v20703_v48 = vshll.u32 %v18347_v62, 16  ;;  %v20704_v1 = vshrl.u32 %v18347_v62, 16  ;;  %v10202_v60 = vshll.u32 %v9053_v38, 16  ;;  %v8005_v62 = vpop.f32.mrf.mxu0  ;;  %v20708_v59 = vld [vmem:[#allocation34_spill] sm:$0xff] }
 0x3d2   : > { %v10192_v10 = vrot.slane %v20701_v13, 4  ;;  %v10193_v4 = vrot.slane %v20702_v7, 5  ;;  %v10191_v5 = vsel %vm14099_vm7, %v10186_v0, %v10190_v19  ;;  %v18963_v26 = vadd.f32 %v18875_v2, %v7363_v29  ;;  %13095 = vmatmul.mubr.bf16.gmra.mxu1 %v11735_v20  ;;  %v20712_v20 = vld [vmem:[#allocation11_spill] sm:$0xff] }
 0x3d3   : > { %v10196_v22 = vrot.slane %v20703_v48, 5  ;;  %v10198_v58 = vrot.slane %v20704_v1, 4  ;;  %v20706_v35 = vshrl.u32 %v20705_v15, 16  ;;  %v11736_v14 = vcombine.low %v10183_v32, %v10191_v5 }
 0x3d4   : > { %v10194_v33 = vor.u32 %v10193_v4, %v10192_v10  ;;  %v20707_v44 = vshll.u32 %v20705_v15, 16  ;;  %v10204_v47 = vrot.slane %v10202_v60, 5  ;;  %v20709_v46 = vshll.u32 %v20708_v59, 16  ;;  %v20711_v10 = vld [vmem:[#allocation15_spill] sm:$0xff] }
 0x3d5   : > { %v10206_v16 = vrot.slane %v20706_v35, 4  ;;  %v10199_v42 = vor.u32 %v10198_v58, %v10196_v22  ;;  %v20710_v38 = vshrl.u32 %v20708_v59, 16  ;;  %v10216_v29 = vshll.u32 %v9057_v63, 16  ;;  %13098 = vmatprep.mubr.bf16.mxu1 %v11736_v14  ;;  %v9061_v15 = vld [vmem:[#allocation3 + $0x9c] sm:$0x1]  ;;  %v12864_v35 = vpop.f32.mrf.mxu0 }
 0x3d6   : > { %v10207_v50 = vrot.slane %v20707_v44, 5  ;;  %v10210_v19 = vrot.slane %v20709_v46, 5  ;;  %v10195_v0 = vrot.slane %v10194_v33, 4  ;;  %v7367_v32 = vadd.f32 %v18877_v25, %v20711_v10  ;;  %v12817_v25 = vpop.f32.mrf.mxu1 }
 0x3d7   : > { %v10212_v2 = vrot.slane %v20710_v38, 4  ;;  %v10200_v34 = vrot.slane %v10199_v42, 4  ;;  %v10218_v4 = vrot.slane %v10216_v29, 5  ;;  %v18976_v48 = vadd.f32 %v18892_v36, %v7366_v8  ;;  %v20713_v36 = vld [vmem:[#allocation4_spill] sm:$0xff] }
 0x3d8   : > { %v10208_v13 = vor.u32 %v10207_v50, %v10206_v16  ;;  %v7370_v1 = vadd.f32 %v18894_v6, %v20712_v20  ;;  %v10197_v58 = vsel %vm14099_vm7, %v10195_v0, %v10196_v22  ;;  %v18985_v60 = vadd.f32 %v18910_v52, %v7364_v56  ;;  %v20714_v22 = vld [vmem:[#allocation27_spill] sm:$0xff]  ;;  %v20719_v0 = vld [vmem:[#allocation16_spill] sm:$0xff] }
 0x3d9   : > { %v10213_v7 = vor.u32 %v10212_v2, %v10210_v19  ;;  %v10205_v63 = vsel %vm14099_vm7, %v10200_v34, %v10204_v47  ;;  %v7368_v8 = vadd.f32 %v18921_v11, %v20713_v36  ;;  %v18989_v33 = vadd.f32 %v12860_v30, %v7369_v37  ;;  %v8018_v47 = vpop.f32.mrf.mxu0  ;;  %v20725_v36 = vld [vmem:[#allocation32_spill] sm:$0xff] }
 0x3da   : > { %v10209_v5 = vrot.slane %v10208_v13, 4  ;;  %v11737_v16 = vcombine.low %v10197_v58, %v10205_v63  ;;  %v7373_v42 = vadd.f32 %v12816_v24, %v20714_v22  ;;  %v20715_v44 = vshrl.u32 %v18407_v61, 16  ;;  %v7283_v13 = vpop.f32.mrf.mxu1 }
 0x3db   : > { %v10214_v14 = vrot.slane %v10213_v7, 4  ;;  %v20716_v52 = vshll.u32 %v18407_v61, 16  ;;  %v20717_v46 = vshll.u32 %v18437_v17, 16  ;;  %v20718_v30 = vshrl.u32 %v18437_v17, 16  ;;  %v12865_v10 = vpop.f32.mrf.mxu0  ;;  %v20722_v17 = vld [vmem:[#allocation26_spill] sm:$0xff] }
 0x3dc   : > { %v10211_v6 = vsel %vm14099_vm7, %v10209_v5, %v10210_v19  ;;  %v10220_v50 = vrot.slane %v20715_v44, 4  ;;  %v10230_v38 = vshll.u32 %v9061_v15, 16  ;;  %v9065_v19 = vld [vmem:[#allocation3 + $0xac] sm:$0x1]  ;;  %v19005_v29 = vadd.f32 %v18937_v27, %v7367_v32  ;;  %13099 = vmatmul.mubr.bf16.gmra.mxu1 %v11737_v16 }
 0x3dd   : > { %v10221_v56 = vrot.slane %v20716_v52, 5  ;;  %v10219_v59 = vsel %vm14099_vm7, %v10214_v14, %v10218_v4  ;;  %v10224_v11 = vrot.slane %v20717_v46, 5  ;;  %v10226_v37 = vrot.slane %v20718_v30, 4 }
 0x3de   : > { %v11738_v2 = vcombine.low %v10211_v6, %v10219_v59  ;;  %v20720_v61 = vshrl.u32 %v20719_v0, 16  ;;  %v10232_v4 = vrot.slane %v10230_v38, 5  ;;  %v20721_v20 = vshll.u32 %v20719_v0, 16  ;;  %v8021_v38 = vpop.f32.mrf.mxu0 }
 0x3df   : > { %v10222_v24 = vor.u32 %v10221_v56, %v10220_v50  ;;  %v10227_v7 = vor.u32 %v10226_v37, %v10224_v11  ;;  %v20723_v63 = vshll.u32 %v20722_v17, 16  ;;  %v20724_v14 = vshrl.u32 %v20722_v17, 16  ;;  %v20726_v50 = vld [vmem:[#allocation13_spill] sm:$0xff]  ;;  %v12820_v37 = vpop.f32.mrf.mxu1 }
 0x3e0   : > { %v10234_v34 = vrot.slane %v20720_v61, 4  ;;  %v10235_v58 = vrot.slane %v20721_v20, 5  ;;  %13102 = vmatprep.mubr.bf16.mxu1 %v11738_v2  ;;  %v10244_v32 = vshll.u32 %v9065_v19, 16  ;;  %v7371_v6 = vadd.f32 %v7280_v18, %v20725_v36  ;;  %v20727_v2 = vld [vmem:[#allocation45_spill] sm:$0xff]  ;;  %v20728_v61 = vld [vmem:[#allocation20_spill] sm:$0xff]  ;;  %v20735_v36 = vld [vmem:[#allocation18_spill] sm:$0xff] }
 0x3e1   : > { %v10238_v5 = vrot.slane %v20723_v63, 5  ;;  %v10223_v15 = vrot.slane %v10222_v24, 4  ;;  %v10240_v27 = vrot.slane %v20724_v14, 4  ;;  %v10228_v22 = vrot.slane %v10227_v7, 4  ;;  %v20732_v17 = vld [vmem:[#allocation9_spill] sm:$0xff] }
 0x3e2   : > { %v10236_v44 = vor.u32 %v10235_v58, %v10234_v34  ;;  %v19017_v16 = vadd.f32 %v18950_v54, %v7370_v1  ;;  %v7374_v52 = vadd.f32 %v12817_v25, %v20726_v50  ;;  %v10246_v46 = vrot.slane %v10244_v32, 5  ;;  %v9069_v54 = vld [vmem:[#allocation3 + $0xbc] sm:$0x1]  ;;  %v12868_v50 = vpop.f32.mrf.mxu0 }
 0x3e3   : > { %v10225_v56 = vsel %vm14099_vm7, %v10223_v15, %v10224_v11  ;;  %v10241_v59 = vor.u32 %v10240_v27, %v10238_v5  ;;  %v19022_v30 = vadd.f32 %v8005_v62, %v7368_v8  ;;  %v10233_v19 = vsel %vm14099_vm7, %v10228_v22, %v10232_v4  ;;  %v20729_v11 = vld [vmem:[#allocation49_spill] sm:$0xff]  ;;  %v7296_v62 = vpop.f32.mrf.mxu1 }
 0x3e4   : > { %v10237_v18 = vrot.slane %v10236_v44, 4  ;;  %v7372_v24 = vadd.f32 %v7283_v13, %v20727_v2  ;;  %v19027_v0 = vadd.f32 %v12864_v35, %v7373_v42  ;;  %v11739_v1 = vcombine.low %v10225_v56, %v10233_v19  ;;  %v9073_v15 = vld [vmem:[#allocation3 + $0xcc] sm:$0x1] }
 0x3e5   : > { %v10242_v25 = vrot.slane %v10241_v59, 4  ;;  %v7377_v34 = vadd.f32 %v12820_v37, %v20728_v61  ;;  %v20730_v7 = vshrl.u32 %v20729_v11, 16  ;;  %v20731_v58 = vshll.u32 %v20729_v11, 16  ;;  %v20738_v61 = vld [vmem:[#allocation29_spill] sm:$0xff] }
 0x3e6   : > { %v10239_v8 = vsel %vm14099_vm7, %v10237_v18, %v10238_v5  ;;  %v20733_v63 = vshll.u32 %v20732_v17, 16  ;;  %v20734_v35 = vshrl.u32 %v20732_v17, 16  ;;  %v10258_v27 = vshll.u32 %v9069_v54, 16  ;;  %v12821_v5 = vpop.f32.mrf.mxu1  ;;  %13103 = vmatmul.mubr.bf16.gmra.mxu1 %v11739_v1  ;;  %v8034_v54 = vpop.f32.mrf.mxu0  ;;  %v20741_v1 = vld [vmem:[#allocation42_spill] sm:$0xff] }
 0x3e7   : > { %v10248_v20 = vrot.slane %v20730_v7, 4  ;;  %v10249_v4 = vrot.slane %v20731_v58, 5  ;;  %v10247_v14 = vsel %vm14099_vm7, %v10242_v25, %v10246_v46  ;;  %v19042_v32 = vadd.f32 %v8018_v47, %v7371_v6 }
 0x3e8   : > { %v10252_v13 = vrot.slane %v20733_v63, 5  ;;  %v10254_v42 = vrot.slane %v20734_v35, 4  ;;  %v20736_v22 = vshrl.u32 %v20735_v36, 16  ;;  %v11740_v56 = vcombine.low %v10239_v8, %v10247_v14 }
 0x3e9   : > { %v10250_v59 = vor.u32 %v10249_v4, %v10248_v20  ;;  %v20737_v19 = vshll.u32 %v20735_v36, 16  ;;  %v10260_v2 = vrot.slane %v10258_v27, 5  ;;  %v20739_v11 = vshll.u32 %v20738_v61, 16  ;;  %v7299_v20 = vpop.f32.mrf.mxu1 }
 0x3ea   : > { %v10262_v44 = vrot.slane %v20736_v22, 4  ;;  %v10255_v37 = vor.u32 %v10254_v42, %v10252_v13  ;;  %v20740_v46 = vshrl.u32 %v20738_v61, 16  ;;  %v10272_v6 = vshll.u32 %v9073_v15, 16  ;;  %13106 = vmatprep.mubr.bf16.mxu1 %v11740_v56  ;;  %v20742_v42 = vld [vmem:[#allocation14_spill] sm:$0xff]  ;;  %v9077_v56 = vld [vmem:[#allocation3 + $0xdc] sm:$0x1] }
 0x3eb   : > { %v10263_v18 = vrot.slane %v20737_v19, 5  ;;  %v10266_v7 = vrot.slane %v20739_v11, 5  ;;  %v10251_v25 = vrot.slane %v10250_v59, 4  ;;  %v7375_v8 = vadd.f32 %v7296_v62, %v20741_v1  ;;  %v20746_v61 = vld [vmem:[#allocation21_spill] sm:$0xff] }
 0x3ec   : > { %v10268_v47 = vrot.slane %v20740_v46, 4  ;;  %v10256_v58 = vrot.slane %v10255_v37, 4  ;;  %v10274_v63 = vrot.slane %v10272_v6, 5  ;;  %v19053_v35 = vadd.f32 %v12865_v10, %v7374_v52  ;;  %v20743_v37 = vld [vmem:[#allocation44_spill] sm:$0xff]  ;;  %v9081_v6 = vld [vmem:[#allocation3 + $0xec] sm:$0x1] }
 0x3ed   : > { %v10264_v17 = vor.u32 %v10263_v18, %v10262_v44  ;;  %v7378_v14 = vadd.f32 %v12821_v5, %v20742_v42  ;;  %v10253_v27 = vsel %vm14099_vm7, %v10251_v25, %v10252_v13  ;;  %v19060_v22 = vadd.f32 %v8021_v38, %v7372_v24  ;;  %v12869_v44 = vpop.f32.mrf.mxu0  ;;  %v12824_v25 = vpop.f32.mrf.mxu1 }
 0x3ee   : > { %v10269_v4 = vor.u32 %v10268_v47, %v10266_v7  ;;  %v10261_v15 = vsel %vm14099_vm7, %v10256_v58, %v10260_v2  ;;  %v7376_v19 = vadd.f32 %v7299_v20, %v20743_v37  ;;  %v19063_v18 = vadd.f32 %v12868_v50, %v7377_v34 }
 0x3ef   : > { %v10265_v36 = vrot.slane %v10264_v17, 4  ;;  %v11741_v59 = vcombine.low %v10253_v27, %v10261_v15  ;;  %v20744_v52 = vshrl.u32 %v18577_v3, 16  ;;  %v20745_v5 = vshll.u32 %v18577_v3, 16  ;;  %v20749_v17 = vld [vmem:[#allocation25_spill] sm:$0xff]  ;;  %v8037_v42 = vpop.f32.mrf.mxu0  ;;  %v20752_v27 = vld [vmem:[#allocation51_spill] sm:$0xff] }
 0x3f0   : > { %v10270_v62 = vrot.slane %v10269_v4, 4  ;;  %v20747_v38 = vshll.u32 %v20746_v61, 16  ;;  %v20748_v46 = vshrl.u32 %v20746_v61, 16  ;;  %v10286_v34 = vshll.u32 %v9077_v56, 16 }
 0x3f1   : > { %v10267_v10 = vsel %vm14099_vm7, %v10265_v36, %v10266_v7  ;;  %v10276_v13 = vrot.slane %v20744_v52, 4  ;;  %v10277_v2 = vrot.slane %v20745_v5, 5  ;;  %v19077_v50 = vadd.f32 %v8034_v54, %v7375_v8  ;;  %13107 = vmatmul.mubr.bf16.gmra.mxu1 %v11741_v59 }
 0x3f2   : > { %v10280_v24 = vrot.slane %v20747_v38, 5  ;;  %v10275_v11 = vsel %vm14099_vm7, %v10270_v62, %v10274_v63  ;;  %v10282_v47 = vrot.slane %v20748_v46, 4  ;;  %v20750_v3 = vshrl.u32 %v20749_v17, 16  ;;  %v20753_v62 = vld [vmem:[#allocation19_spill] sm:$0xff] }
 0x3f3   : > { %v11742_v7 = vcombine.low %v10267_v10, %v10275_v11  ;;  %v10278_v58 = vor.u32 %v10277_v2, %v10276_v13  ;;  %v20751_v20 = vshll.u32 %v20749_v17, 16  ;;  %v7381_v63 = vadd.f32 %v12824_v25, %v20752_v27  ;;  %v7312_v13 = vpop.f32.mrf.mxu1  ;;  %v20756_v2 = vld [vmem:[#allocation22_spill] sm:$0xff]  ;;  %v9085_v17 = vld [vmem:[#allocation3 + $0xfc] sm:$0x1] }
 0x3f4   : > { %v10290_v1 = vrot.slane %v20750_v3, 4  ;;  %v10283_v15 = vor.u32 %v10282_v47, %v10280_v24  ;;  %v10288_v36 = vrot.slane %v10286_v34, 5  ;;  %v20754_v56 = vshll.u32 %v20753_v62, 16 }
 0x3f5   : > { %v10291_v4 = vrot.slane %v20751_v20, 5  ;;  %13110 = vmatprep.mubr.bf16.mxu1 %v11742_v7  ;;  %v10279_v8 = vrot.slane %v10278_v58, 4  ;;  %v20755_v37 = vshrl.u32 %v20753_v62, 16  ;;  %v10300_v52 = vshll.u32 %v9081_v6, 16  ;;  %v12825_v25 = vpop.f32.mrf.mxu1  ;;  %v12872_v58 = vpop.f32.mrf.mxu0  ;;  %v20759_v62 = vld [vmem:[#allocation37_spill] sm:$0xff] }
 0x3f6   : > { %v10294_v54 = vrot.slane %v20754_v56, 5  ;;  %v10284_v5 = vrot.slane %v10283_v15, 4  ;;  %v7379_v61 = vadd.f32 %v7312_v13, %v20756_v2  ;;  %v19089_v38 = vadd.f32 %v12869_v44, %v7378_v14 }
 0x3f7   : > { %v10292_v59 = vor.u32 %v10291_v4, %v10290_v1  ;;  %v10296_v10 = vrot.slane %v20755_v37, 4  ;;  %v19091_v11 = vadd.f32 %v8037_v42, %v7376_v19  ;;  %v10281_v46 = vsel %vm14099_vm7, %v10279_v8, %v10280_v24  ;;  %v7315_v4 = vpop.f32.mrf.mxu1  ;;  %v8050_v15 = vpop.f32.mrf.mxu0 }
 0x3f8   : > { %v10302_v7 = vrot.slane %v10300_v52, 5  ;;  %v10289_v6 = vsel %vm14099_vm7, %v10284_v5, %v10288_v36  ;;  %v7382_v3 = vadd.f32 %v12825_v25, %v18743_v23  ;;  %v19098_v1 = vadd.f32 %v12872_v58, %v7381_v63  ;;  %v20760_v36 = vld [vmem:[#allocation47_spill] sm:$0xff] }
 0x3f9   : > { %v10293_v47 = vrot.slane %v10292_v59, 4  ;;  %v10297_v34 = vor.u32 %v10296_v10, %v10294_v54  ;;  %v20757_v14 = vshrl.u32 %v18677_v40, 16  ;;  %v11743_v19 = vcombine.low %v10281_v46, %v10289_v6  ;;  %v9089_v10 = vld [vmem:[#allocation3 + $0x10c] sm:$0x1]  ;;  %v12873_v46 = vpop.f32.mrf.mxu0 }
 0x3fa   : > { %v20758_v42 = vshll.u32 %v18677_v40, 16  ;;  %v7380_v56 = vadd.f32 %v7315_v4, %v20759_v62  ;;  %v20761_v8 = vshll.u32 %v20760_v36, 16  ;;  %v20762_v63 = vshrl.u32 %v20760_v36, 16  ;;  %v20763_v40 = vld [vmem:[#allocation54_spill] sm:$0xff]  ;;  %v20766_v4 = vld [vmem:[#allocation28_spill] sm:$0xff]  ;;  %v12828_v36 = vpop.f32.mrf.mxu1 }
 0x3fb   : > { %v10304_v44 = vrot.slane %v20757_v14, 4  ;;  %v10295_v24 = vsel %vm14099_vm7, %v10293_v47, %v10294_v54  ;;  %v10298_v20 = vrot.slane %v10297_v34, 4  ;;  %v10314_v37 = vshll.u32 %v9085_v17, 16  ;;  %13111 = vmatmul.mubr.bf16.gmra.mxu1 %v11743_v19  ;;  %v5670_v14 = vld [vmem:[#allocation3 + $0x11c] sm:$0x1] }
 0x3fc   : > { %v10305_v27 = vrot.slane %v20758_v42, 5  ;;  %v10308_v23 = vrot.slane %v20761_v8, 5  ;;  %v10310_v59 = vrot.slane %v20762_v63, 4  ;;  %v19113_v13 = vadd.f32 %v8050_v15, %v7379_v61 }
 0x3fd   : > { %v10303_v54 = vsel %vm14099_vm7, %v10298_v20, %v10302_v7  ;;  %v20764_v5 = vshrl.u32 %v20763_v40, 16  ;;  %v10316_v25 = vrot.slane %v10314_v37, 5  ;;  %v20765_v58 = vshll.u32 %v20763_v40, 16  ;;  %v8053_v20 = vpop.f32.mrf.mxu0 }
 0x3fe   : > { %v10306_v52 = vor.u32 %v10305_v27, %v10304_v44  ;;  %v11744_v47 = vcombine.low %v10295_v24, %v10303_v54  ;;  %v10311_v34 = vor.u32 %v10310_v59, %v10308_v23  ;;  %v20767_v19 = vshll.u32 %v20766_v4, 16 }
 0x3ff   : > { %v10318_v2 = vrot.slane %v20764_v5, 4  ;;  %v10319_v6 = vrot.slane %v20765_v58, 5  ;;  %v20768_v7 = vshrl.u32 %v20766_v4, 16  ;;  %v10328_v61 = vshll.u32 %v9089_v10, 16  ;;  %v12876_v4 = vpop.f32.mrf.mxu0 }
 0x400   : > { %v10307_v17 = vrot.slane %v10306_v52, 4  ;;  %v10322_v42 = vrot.slane %v20767_v19, 5  ;;  %13114 = vmatprep.mubr.bf16.mxu1 %v11744_v47  ;;  %v10312_v27 = vrot.slane %v10311_v34, 4  ;;  %v19123_v62 = vadd.f32 %v12873_v46, %v7382_v3  ;;  %v20770_v52 = vld [vmem:[#allocation53_spill] sm:$0xff]  ;;  %v7328_v47 = vpop.f32.mrf.mxu1 }
 0x401   : > { %v10324_v44 = vrot.slane %v20768_v7, 4  ;;  %v10320_v15 = vor.u32 %v10319_v6, %v10318_v2  ;;  %v19125_v24 = vadd.f32 %v8053_v20, %v7380_v56  ;;  %v10330_v59 = vrot.slane %v10328_v61, 5 }
 0x402   : > { %v10309_v8 = vsel %vm14099_vm7, %v10307_v17, %v10308_v23  ;;  %v5671_v54 = vsel %vm13913_vm4, 0, %v5670_v14  ;;  %v7385_v40 = vadd.f32 %v12828_v36, %v20770_v52  ;;  %v10317_v10 = vsel %vm14099_vm7, %v10312_v27, %v10316_v25  ;;  %v20774_v14 = vld [vmem:[#allocation12_spill] sm:$0xff]  ;;  %v12829_v61 = vpop.f32.mrf.mxu1 }
 0x403   : > { %v10325_v63 = vor.u32 %v10324_v44, %v10322_v42  ;;  %v10321_v5 = vrot.slane %v10320_v15, 4  ;;  %5672 = vst [vmem:[#allocation3 + $0x11c] sm:$0x1] %v5671_v54  ;;  %v20771_v3 = vshrl.u32 %v18745_v43, 16  ;;  %v11745_v2 = vcombine.low %v10309_v8, %v10317_v10  ;;  %v8066_v8 = vpop.f32.mrf.mxu0 }
 0x404   : > { %v20772_v23 = vshll.u32 %v18745_v43, 16  ;;  %v20773_v58 = vshll.u32 %v18761_v55, 16  ;;  %v7383_v17 = vadd.f32 %v7328_v47, %v20774_v14  ;;  %v20775_v19 = vshrl.u32 %v18761_v55, 16 }
 0x405   : > { %v10332_v56 = vrot.slane %v20771_v3, 4  ;;  %v10326_v46 = vrot.slane %v10325_v63, 4  ;;  %13115 = vmatmul.mubr.bf16.gmra.mxu1 %v11745_v2  ;;  %v10323_v7 = vsel %vm14099_vm7, %v10321_v5, %v10322_v42  ;;  %v19147_v20 = vadd.f32 %v12876_v4, %v7385_v40  ;;  %v7331_v63 = vpop.f32.mrf.mxu1  ;;  %v12877_v42 = vpop.f32.mrf.mxu0 }
 0x406   : > { %v10333_v34 = vrot.slane %v20772_v23, 5  ;;  %v10336_v6 = vrot.slane %v20773_v58, 5  ;;  %v10338_v25 = vrot.slane %v20775_v19, 4  ;;  %v7386_v15 = vadd.f32 %v12829_v61, %v18811_v12 }
 0x407   : > { %v10331_v44 = vsel %vm14099_vm7, %v10326_v46, %v10330_v59  ;;  %v19150_v55 = vadd.f32 %v8066_v8, %v7383_v17  ;;  %v7384_v54 = vadd.f32 %v7331_v63, %v18821_v9  ;;  %v8069_v3 = vpop.f32.mrf.mxu0  ;;  %v12832_v2 = vpop.f32.mrf.mxu1 }
 0x408   : > { %v10334_v43 = vor.u32 %v10333_v34, %v10332_v56  ;;  %v11746_v27 = vcombine.low %v10323_v7, %v10331_v44  ;;  %v10339_v36 = vor.u32 %v10338_v25, %v10336_v6  ;;  %v19155_v40 = vadd.f32 %v12877_v42, %v7386_v15 }
 0x409   : > { %v19157_v12 = vadd.f32 %v8069_v3, %v7384_v54  ;;  %v7389_v46 = vadd.f32 %v12832_v2, %v18825_v39  ;;  %v12880_v9 = vpop.f32.mrf.mxu0  ;;  %v7344_v34 = vpop.f32.mrf.mxu1 }
 0x40a   : > { %v10335_v37 = vrot.slane %v10334_v43, 4  ;;  %13118 = vmatprep.mubr.bf16.mxu1 %v11746_v27  ;;  %v9093_v52 = vld [vmem:[#allocation3 + $0x11c] sm:$0x1]  ;;  %v10340_v10 = vrot.slane %v10339_v36, 4  ;;  %v7387_v58 = vadd.f32 %v7344_v34, %v18853_v57 }
 0x40b   : > { %v10342_v5 = vshll.u32 %v9093_v52, 16  ;;  %v8082_v14 = vpop.f32.mrf.mxu0  ;;  %v12833_v17 = vpop.f32.mrf.mxu1 }
 0x40c   : > { %v10337_v59 = vsel %vm14099_vm7, %v10335_v37, %v10336_v6  ;;  %v19163_v6 = vadd.f32 %v12880_v9, %v7389_v46  ;;  %v7390_v4 = vadd.f32 %v12833_v17, %v18871_v28  ;;  %v19166_v19 = vadd.f32 %v8082_v14, %v7387_v58 }
 0x40d   : > { %v10344_v56 = vrot.slane %v10342_v5, 5  ;;  %v12881_v25 = vpop.f32.mrf.mxu0  ;;  %v7347_v7 = vpop.f32.mrf.mxu1 }
 0x40e   : > { %v7388_v39 = vadd.f32 %v7347_v7, %v18885_v21  ;;  %v19169_v53 = vadd.f32 %v12881_v25, %v7390_v4 }
 0x40f   : > { %v10345_v47 = vsel %vm14099_vm7, %v10340_v10, %v10344_v56  ;;  %v8085_v44 = vpop.f32.mrf.mxu0  ;;  %v12900_v61 = vpop.f32.mrf.mxu1 }
 0x410   : > { %v11747_v23 = vcombine.low %v10337_v59, %v10345_v47  ;;  %v19172_v43 = vadd.f32 %v12900_v61, %v18890_v31  ;;  %v19174_v57 = vadd.f32 %v8085_v44, %v7388_v39 }
 0x411   : > { %v8324_v27 = vpop.f32.mrf.mxu1  ;;  %v19176_v15 = vpop.f32.mrf.mxu0 }
 0x412   : > { %13119 = vmatmul.mubr.bf16.gmra.mxu1 %v11747_v23  ;;  %v19179_v28 = vadd.f32 %v8324_v27, %v18913_v49 }
 0x413   : > { %v12901_v36 = vpop.f32.mrf.mxu1  ;;  %v19181_v8 = vpop.f32.mrf.mxu0 }
 0x414   : > { %v19184_v21 = vadd.f32 %v12901_v36, %v18928_v45 }
 0x415   : > { %v8327_v63 = vpop.f32.mrf.mxu1  ;;  %v19186_v37 = vpop.f32.mrf.mxu0 }
 0x416   : > { %v19189_v31 = vadd.f32 %v8327_v63, %v18935_v51 }
 0x417   : > { %v12904_v54 = vpop.f32.mrf.mxu1  ;;  %v19191_v42 = vpop.f32.mrf.mxu0 }
 0x418   : > { %v19194_v52 = vadd.f32 %v12904_v54, %v18944_v41 }
 0x419   : > { %v8340_v49 = vpop.f32.mrf.mxu1  ;;  %v19196_v59 = vpop.f32.mrf.mxu0 }
 0x41a   : > { %v19199_v10 = vadd.f32 %v8340_v49, %v18963_v26 }
 0x41b   : > { %v12905_v45 = vpop.f32.mrf.mxu1  ;;  %v19201_v5 = vpop.f32.mrf.mxu0 }
 0x41c   : > { %v19204_v3 = vadd.f32 %v12905_v45, %v18976_v48 }
 0x41d   : > { %v8343_v51 = vpop.f32.mrf.mxu1  ;;  %v19206_v56 = vpop.f32.mrf.mxu0 }
 0x41e   : > { %v19209_v2 = vadd.f32 %v8343_v51, %v18985_v60 }
 0x41f   : > { %v12908_v41 = vpop.f32.mrf.mxu1  ;;  %v19211_v46 = vpop.f32.mrf.mxu0 }
 0x420   : > { %v19214_v47 = vadd.f32 %v12908_v41, %v18989_v33 }
 0x421   : > { %v8356_v26 = vpop.f32.mrf.mxu1  ;;  %v19216_v9 = vpop.f32.mrf.mxu0 }
 0x422   : > { %v19219_v23 = vadd.f32 %v8356_v26, %v19005_v29 }
 0x423   : > { %v12909_v48 = vpop.f32.mrf.mxu1  ;;  %v19221_v34 = vpop.f32.mrf.mxu0 }
 0x424   : > { %v19224_v58 = vadd.f32 %v12909_v48, %v19017_v16 }
 0x425   : > { %v8359_v60 = vpop.f32.mrf.mxu1  ;;  %v19226_v14 = vpop.f32.mrf.mxu0 }
 0x426   : > { %v19229_v17 = vadd.f32 %v8359_v60, %v19022_v30 }
 0x427   : > { %v12912_v33 = vpop.f32.mrf.mxu1  ;;  %v19231_v4 = vpop.f32.mrf.mxu0 }
 0x428   : > { %v19234_v25 = vadd.f32 %v12912_v33, %v19027_v0 }
 0x429   : > { %v8372_v29 = vpop.f32.mrf.mxu1  ;;  %v19236_v7 = vpop.f32.mrf.mxu0 }
 0x42a   : > { %v19239_v39 = vadd.f32 %v8372_v29, %v19042_v32 }
 0x42b   : > { %v12913_v16 = vpop.f32.mrf.mxu1  ;;  %v19241_v44 = vpop.f32.mrf.mxu0 }
 0x42c   : > { %20776 = vst [vmem:[#allocation31_spill] sm:$0xff] %v19239_v39  ;;  %20777 = vst [vmem:[#allocation23_spill] sm:$0xff] %v19241_v44  ;;  %v19244_v61 = vadd.f32 %v12913_v16, %v19053_v35 }
 0x42d   : > { %v8375_v30 = vpop.f32.mrf.mxu1  ;;  %v19246_v27 = vpop.f32.mrf.mxu0 }
 0x42e   : > { %20778 = vst [vmem:[#allocation43_spill] sm:$0xff] %v19244_v61  ;;  %20779 = vst [vmem:[#allocation55_spill] sm:$0xff] %v19246_v27  ;;  %v19249_v36 = vadd.f32 %v8375_v30, %v19060_v22 }
 0x42f   : > { %v12916_v0 = vpop.f32.mrf.mxu1  ;;  %v19251_v63 = vpop.f32.mrf.mxu0 }
 0x430   : > { %20780 = vst [vmem:[#allocation56_spill] sm:$0xff] %v19249_v36  ;;  %20781 = vst [vmem:[#allocation58_spill] sm:$0xff] %v19251_v63  ;;  %v19254_v54 = vadd.f32 %v12916_v0, %v19063_v18 }
 0x431   : > { %v8388_v32 = vpop.f32.mrf.mxu1  ;;  %v19256_v49 = vpop.f32.mrf.mxu0 }
 0x432   : > { %20782 = vst [vmem:[#allocation35_spill] sm:$0xff] %v19254_v54  ;;  %20783 = vst [vmem:[#allocation33_spill] sm:$0xff] %v19256_v49  ;;  %v19259_v45 = vadd.f32 %v8388_v32, %v19077_v50 }
 0x433   : > { %v12917_v35 = vpop.f32.mrf.mxu1  ;;  %v19261_v51 = vpop.f32.mrf.mxu0 }
 0x434   : > { %20784 = vst [vmem:[#allocation24_spill] sm:$0xff] %v19259_v45  ;;  %20785 = vst [vmem:[#allocation60_spill] sm:$0xff] %v19261_v51  ;;  %v19264_v41 = vadd.f32 %v12917_v35, %v19089_v38 }
 0x435   : > { %v8391_v22 = vpop.f32.mrf.mxu1  ;;  %v19266_v26 = vpop.f32.mrf.mxu0 }
 0x436   : > { %20786 = vst [vmem:[#allocation57_spill] sm:$0xff] %v19264_v41  ;;  %20787 = vst [vmem:[#allocation59_spill] sm:$0xff] %v19266_v26  ;;  %v19269_v48 = vadd.f32 %v8391_v22, %v19091_v11 }
 0x437   : > { %v12920_v18 = vpop.f32.mrf.mxu1  ;;  %v19271_v60 = vpop.f32.mrf.mxu0 }
 0x438   : > { %20788 = vst [vmem:[#allocation61_spill] sm:$0xff] %v19269_v48  ;;  %20789 = vst [vmem:[#allocation63_spill] sm:$0xff] %v19271_v60  ;;  %v19274_v33 = vadd.f32 %v12920_v18, %v19098_v1 }
 0x439   : > { %v8404_v50 = vpop.f32.mrf.mxu1  ;;  %v19276_v29 = vpop.f32.mrf.mxu0 }
 0x43a   : > { %20790 = vst [vmem:[#allocation62_spill] sm:$0xff] %v19274_v33  ;;  %20791 = vst [vmem:[#allocation39_spill] sm:$0xff] %v19276_v29  ;;  %v19279_v16 = vadd.f32 %v8404_v50, %v19113_v13 }
 0x43b   : > { %v12921_v38 = vpop.f32.mrf.mxu1  ;;  %v19281_v30 = vpop.f32.mrf.mxu0 }
 0x43c   : > { %20792 = vst [vmem:[#allocation65_spill] sm:$0xff] %v19279_v16  ;;  %20793 = vst [vmem:[#allocation6_spill] sm:$0xff] %v19281_v30  ;;  %v19284_v0 = vadd.f32 %v12921_v38, %v19123_v62 }
 0x43d   : > { %v8407_v11 = vpop.f32.mrf.mxu1  ;;  %v19286_v32 = vpop.f32.mrf.mxu0 }
 0x43e   : > { %20794 = vst [vmem:[#allocation64_spill] sm:$0xff] %v19284_v0  ;;  %20795 = vst [vmem:[#allocation66_spill] sm:$0xff] %v19286_v32  ;;  %v19289_v35 = vadd.f32 %v8407_v11, %v19125_v24 }
 0x43f   : > { %v12924_v1 = vpop.f32.mrf.mxu1  ;;  %v19291_v22 = vpop.f32.mrf.mxu0 }
 0x440   : > { %20796 = vst [vmem:[#allocation7_spill] sm:$0xff] %v19289_v35  ;;  %20797 = vst [vmem:[#allocation5_spill] sm:$0xff] %v19291_v22  ;;  %v19294_v18 = vadd.f32 %v12924_v1, %v19147_v20 }
 0x441   : > { %v8420_v13 = vpop.f32.mrf.mxu1  ;;  %v19296_v50 = vpop.f32.mrf.mxu0 }
 0x442   : > { %20798 = vst [vmem:[#allocation36_spill] sm:$0xff] %v19294_v18  ;;  %20799 = vst [vmem:[#allocation10_spill] sm:$0xff] %v19296_v50  ;;  %v19299_v30 = vadd.f32 %v8420_v13, %v19150_v55 }
 0x443   : > { %v12925_v62 = vpop.f32.mrf.mxu1  ;;  %v19301_v38 = vpop.f32.mrf.mxu0 }
 0x444   : > { %20800 = vst [vmem:[#allocation41_spill] sm:$0xff] %v19299_v30  ;;  %20801 = vst [vmem:[#allocation48_spill] sm:$0xff] %v19301_v38  ;;  %v19304_v32 = vadd.f32 %v12925_v62, %v19155_v40 }
 0x445   : > { %v8423_v24 = vpop.f32.mrf.mxu1  ;;  %v19306_v11 = vpop.f32.mrf.mxu0 }
 0x446   : > { %20802 = vst [vmem:[#allocation52_spill] sm:$0xff] %v19304_v32  ;;  %20803 = vst [vmem:[#allocation46_spill] sm:$0xff] %v19306_v11  ;;  %v19309_v22 = vadd.f32 %v8423_v24, %v19157_v12 }
 0x447   : > { %v12928_v20 = vpop.f32.mrf.mxu1  ;;  %v19311_v1 = vpop.f32.mrf.mxu0 }
 0x448   : > { %20804 = vst [vmem:[#allocation30_spill] sm:$0xff] %v19309_v22  ;;  %20805 = vst [vmem:[#allocation50_spill] sm:$0xff] %v19311_v1  ;;  %v8481_v50 = vadd.f32 %v12928_v20, %v19163_v6 }
 0x449   : > { %v8436_v18 = vpop.f32.mrf.mxu1  ;;  %v12976_v13 = vpop.f32.mrf.mxu0 }
 0x44a   : > { %v8479_v55 = vadd.f32 %v8436_v18, %v19166_v19  ;;  %v9027_v38 = vadd.f32 %v12976_v13, %v8481_v50 }
 0x44b   : > { %v12929_v30 = vpop.f32.mrf.mxu1  ;;  %v8982_v62 = vpop.f32.mrf.mxu0 }
 0x44c   : > { %v8482_v40 = vadd.f32 %v12929_v30, %v19169_v53  ;;  %v9025_v35 = vadd.f32 %v8982_v62, %v8479_v55 }
 0x44d   : > { %v8439_v32 = vpop.f32.mrf.mxu1  ;;  %v12977_v12 = vpop.f32.mrf.mxu0 }
 0x44e   : > { %v8480_v11 = vadd.f32 %v8439_v32, %v19174_v57  ;;  %v9028_v22 = vadd.f32 %v12977_v12, %v8482_v40 }
 0x44f   : > { %v12996_v24 = vpop.f32.mrf.mxu1  ;;  %v8985_v0 = vpop.f32.mrf.mxu0 }
 0x450   : > { %v9026_v16 = vadd.f32 %v8985_v0, %v8480_v11 }
 0x451   : > { %v9609_v1 = vpop.f32.mrf.mxu1  ;;  %v13044_v6 = vpop.f32.mrf.mxu0 }
 0x453   : > { %v12997_v20 = vpop.f32.mrf.mxu1  ;;  %v9963_v19 = vpop.f32.mrf.mxu0 }
 0x455   : > { %v19317_v29 = vpop.f32.mrf.mxu1  ;;  %v13045_v53 = vpop.f32.mrf.mxu0 }
 0x457   : > { %v19319_v18 = vpop.f32.mrf.mxu1  ;;  %v19325_v55 = vpop.f32.mrf.mxu0 }
 0x459   : > { %v19321_v50 = vpop.f32.mrf.mxu1  ;;  %v19331_v13 = vpop.f32.mrf.mxu0 }
 0x45b   : > { %v19323_v30 = vpop.f32.mrf.mxu1  ;;  %v19337_v40 = vpop.f32.mrf.mxu0 }
 0x45d   : > { %v19327_v57 = vpop.f32.mrf.mxu1  ;;  %v19343_v33 = vpop.f32.mrf.mxu0 }
 0x45f   : > { %v19329_v32 = vpop.f32.mrf.mxu1  ;;  %v19349_v26 = vpop.f32.mrf.mxu0 }
 0x461   : > { %v19333_v0 = vpop.f32.mrf.mxu1  ;;  %v19355_v45 = vpop.f32.mrf.mxu0 }
 0x463   : > { %v19335_v11 = vpop.f32.mrf.mxu1  ;;  %v19361_v63 = vpop.f32.mrf.mxu0 }
 0x465   : > { %v19339_v62 = vpop.f32.mrf.mxu1 }
 0x467   : > { %v19341_v12 = vpop.f32.mrf.mxu1 }
 0x468   : > { %20806 = vst [vmem:[#allocation40_spill] sm:$0xff] %v19341_v12 }
 0x469   : > { %v19345_v60 = vpop.f32.mrf.mxu1 }
 0x46a   : > { %20807 = vst [vmem:[#allocation17_spill] sm:$0xff] %v19345_v60  ;;  %v19367_v60 = vpop.f32.mrf.mxu0 }
 0x46b   : > { %v19347_v48 = vpop.f32.mrf.mxu1  ;;  %20815 = vst [vmem:[#allocation26_spill] sm:$0xff] %v19367_v60 }
 0x46c   : > { %20808 = vst [vmem:[#allocation38_spill] sm:$0xff] %v19347_v48 }
 0x46d   : > { %v19351_v41 = vpop.f32.mrf.mxu1 }
 0x46e   : > { %20809 = vst [vmem:[#allocation34_spill] sm:$0xff] %v19351_v41  ;;  %v19373_v41 = vpop.f32.mrf.mxu0 }
 0x46f   : > { %v19353_v51 = vpop.f32.mrf.mxu1  ;;  %20818 = vst [vmem:[#allocation45_spill] sm:$0xff] %v19373_v41 }
 0x470   : > { %20810 = vst [vmem:[#allocation15_spill] sm:$0xff] %v19353_v51 }
 0x471   : > { %v19357_v49 = vpop.f32.mrf.mxu1 }
 0x472   : > { %20811 = vst [vmem:[#allocation11_spill] sm:$0xff] %v19357_v49  ;;  %v19379_v49 = vpop.f32.mrf.mxu0 }
 0x473   : > { %v19359_v54 = vpop.f32.mrf.mxu1  ;;  %20821 = vst [vmem:[#allocation9_spill] sm:$0xff] %v19379_v49 }
 0x474   : > { %20812 = vst [vmem:[#allocation4_spill] sm:$0xff] %v19359_v54 }
 0x475   : > { %v19363_v36 = vpop.f32.mrf.mxu1 }
 0x476   : > { %20813 = vst [vmem:[#allocation27_spill] sm:$0xff] %v19363_v36  ;;  %v19385_v36 = vpop.f32.mrf.mxu0 }
 0x477   : > { %v19365_v27 = vpop.f32.mrf.mxu1  ;;  %20824 = vst [vmem:[#allocation42_spill] sm:$0xff] %v19385_v36 }
 0x478   : > { %20814 = vst [vmem:[#allocation16_spill] sm:$0xff] %v19365_v27 }
 0x479   : > { %v19369_v48 = vpop.f32.mrf.mxu1 }
 0x47a   : > { %20816 = vst [vmem:[#allocation32_spill] sm:$0xff] %v19369_v48 }
 0x47b   : > { %v19371_v61 = vpop.f32.mrf.mxu1 }
 0x47c   : > { %20817 = vst [vmem:[#allocation13_spill] sm:$0xff] %v19371_v61  ;;  %v19391_v61 = vpop.f32.mrf.mxu0 }
 0x47d   : > { %v19375_v51 = vpop.f32.mrf.mxu1  ;;  %20827 = vst [vmem:[#allocation21_spill] sm:$0xff] %v19391_v61 }
 0x47e   : > { %20819 = vst [vmem:[#allocation20_spill] sm:$0xff] %v19375_v51  ;;  %v8999_v51 = vadd.f32 %v19176_v15, %v19172_v43  ;;  %v19401_v36 = vpop.f32.mrf.mxu0  ;;  %v19410_v15 = vld [vmem:[%s19679_s5] ss:$0 sm:$0xff] }
 0x47f   : > { %v19377_v12 = vpop.f32.mrf.mxu1 }
 0x480   : > { %20820 = vst [vmem:[#allocation49_spill] sm:$0xff] %v19377_v12 }
 0x481   : > { %v19381_v54 = vpop.f32.mrf.mxu1 }
 0x482   : > { %20822 = vst [vmem:[#allocation18_spill] sm:$0xff] %v19381_v54  ;;  %v8997_v54 = vadd.f32 %v19181_v8, %v19179_v28  ;;  %v8998_v28 = vadd.f32 %v19191_v42, %v19189_v31  ;;  %v9003_v31 = vadd.f32 %v19196_v59, %v19194_v52  ;;  %v9001_v42 = vadd.f32 %v19201_v5, %v19199_v10  ;;  %v13379_v5 = vld [vmem:[%s13632_s9 + $0x10] sm:$0xff] }
 0x483   : > { %v19383_v44 = vpop.f32.mrf.mxu1 }
 0x484   : > { %20823 = vst [vmem:[#allocation29_spill] sm:$0xff] %v19383_v44  ;;  %v9738_v44 = vadd.f32 %v12996_v24, %v8999_v51  ;;  %v9004_v24 = vadd.f32 %v19206_v56, %v19204_v3  ;;  %v9740_v52 = vadd.f32 %v19321_v50, %v9001_v42 }
 0x485   : > { %v19387_v27 = vpop.f32.mrf.mxu1 }
 0x486   : > { %20825 = vst [vmem:[#allocation14_spill] sm:$0xff] %v19387_v27  ;;  %v9743_v3 = vadd.f32 %v19323_v30, %v9004_v24  ;;  %v9007_v30 = vadd.f32 %v19216_v9, %v19214_v47  ;;  %v9005_v47 = vadd.f32 %v19221_v34, %v19219_v23  ;;  %v9006_v23 = vadd.f32 %v19231_v4, %v19229_v17  ;;  %v13383_v4 = vld [vmem:[%s13632_s9 + $0x30] sm:$0xff] }
 0x487   : > { %v13024_v39 = vpop.f32.mrf.mxu1 }
 0x488   : > { %v19389_v48 = vadd.f32 %v13024_v39, %v9027_v38  ;;  %v9000_v39 = vadd.f32 %v19186_v37, %v19184_v21  ;;  %v9736_v38 = vadd.f32 %v9609_v1, %v8997_v54  ;;  %v19419_v21 = vld [vmem:[%s19680_s6] ss:$0 sm:$0xff]  ;;  %v9746_v9 = vadd.f32 %v19329_v32, %v9007_v30  ;;  %v20829_v30 = vld [vmem:[#allocation31_spill] sm:$0xff] }
 0x489   : > { %v9721_v41 = vpop.f32.mrf.mxu1 }
 0x48a   : > { %20826 = vst [vmem:[#allocation44_spill] sm:$0xff] %v19389_v48  ;;  %v19395_v12 = vadd.f32 %v9721_v41, %v9025_v35  ;;  %v10092_v48 = vadd.f32 %v13044_v6, %v9738_v44  ;;  %v9739_v8 = vadd.f32 %v12997_v20, %v9000_v39  ;;  %v19414_v41 = vpop.f32.mrf.mxu0  ;;  %v9737_v44 = vadd.f32 %v19317_v29, %v8998_v28 }
 0x48b   : > { %v13025_v49 = vpop.f32.mrf.mxu1  ;;  %v9742_v6 = vadd.f32 %v19319_v18, %v9003_v31  ;;  %v9002_v39 = vadd.f32 %v19211_v46, %v19209_v2  ;;  %v10094_v18 = vadd.f32 %v19337_v40, %v9740_v52  ;;  %v10097_v40 = vadd.f32 %v19343_v33, %v9743_v3 }
 0x48c   : > { %v19399_v60 = vadd.f32 %v13025_v49, %v9028_v22  ;;  %v10090_v49 = vadd.f32 %v9963_v19, %v9736_v38  ;;  %v10091_v35 = vadd.f32 %v19325_v55, %v9737_v44  ;;  %v19434_v59 = vpop.f32.mrf.mxu0  ;;  %v13381_v44 = vld [vmem:[%s13632_s9 + $0x18] sm:$0xff]  ;;  %v10100_v34 = vadd.f32 %v19355_v45, %v9746_v9 }
 0x48d   : > { %v9724_v27 = vpop.f32.mrf.mxu1  ;;  %v10096_v56 = vadd.f32 %v19331_v13, %v9742_v6  ;;  %v9741_v13 = vadd.f32 %v19327_v57, %v9002_v39 }
 0x48e   : > { %v19405_v61 = vadd.f32 %v9724_v27, %v9026_v16  ;;  %v10093_v27 = vadd.f32 %v13045_v53, %v9739_v8  ;;  %v19458_v8 = vpop.f32.mrf.mxu0 }
 0x48f   : > { %v13092_v43 = vpop.f32.mrf.mxu1  ;;  %v10095_v33 = vadd.f32 %v19349_v26, %v9741_v13  ;;  %v20830_v13 = vld [vmem:[#allocation23_spill] sm:$0xff] }
 0x490   : > { %v10638_v51 = vadd.f32 %v13092_v43, %v10092_v48  ;;  %v13380_v43 = vld [vmem:[%s13632_s9] sm:$0xff]  ;;  %v19476_v26 = vpop.f32.mrf.mxu0 }
 0x491   : > { %v10509_v37 = vpop.f32.mrf.mxu1 }
 0x492   : > { %v10677_v54 = vmul.f32 %v19410_v15, %v10638_v51  ;;  %v10636_v16 = vadd.f32 %v10509_v37, %v10090_v49 }
 0x493   : > { %v13093_v48 = vpop.f32.mrf.mxu1 }
 0x494   : > { %v10716_v22 = vadd.f32 %v19419_v21, %v10677_v54  ;;  %v10675_v1 = vmul.f32 %v19410_v15, %v10636_v16  ;;  %v10639_v29 = vadd.f32 %v13093_v48, %v10093_v27  ;;  %v13382_v48 = vld [vmem:[%s13632_s9 + $0x8] sm:$0xff] }
 0x495   : > { %v10512_v10 = vpop.f32.mrf.mxu1 }
 0x496   : > { %v10748_v20 = vadd.f32 %v13379_v5, %v10716_v22  ;;  %v10714_v19 = vadd.f32 %v19419_v21, %v10675_v1  ;;  %v10678_v53 = vmul.f32 %v19410_v15, %v10639_v29  ;;  %v10637_v55 = vadd.f32 %v10512_v10, %v10091_v35 }
 0x497   : > { %v13096_v50 = vpop.f32.mrf.mxu1  ;;  %v9008_v29 = vadd.f32 %v19226_v14, %v19224_v58  ;;  %v9011_v58 = vadd.f32 %v19236_v7, %v19234_v25  ;;  %v9744_v14 = vadd.f32 %v19333_v0, %v9005_v47  ;;  %v20828_v7 = vld [vmem:[#allocation26_spill] sm:$0xff] }
 0x498   : > { %v10780_v38 = vmax.f32 %v10748_v20, 0.0  ;;  %v10746_v28 = vadd.f32 %v13380_v43, %v10714_v19  ;;  %v10717_v2 = vadd.f32 %v19419_v21, %v10678_v53  ;;  %v10676_v46 = vmul.f32 %v19410_v15, %v10637_v55  ;;  %v13384_v19 = vld [vmem:[%s13632_s9 + $0x20] sm:$0xff]  ;;  %v13385_v43 = vld [vmem:[%s13632_s9 + $0x38] sm:$0xff] }
 0x499   : > { %v10642_v49 = vadd.f32 %v13096_v50, %v10096_v56  ;;  %v10525_v51 = vpop.f32.mrf.mxu1  ;;  %v9747_v17 = vadd.f32 %v19335_v11, %v9008_v29  ;;  %v9745_v56 = vadd.f32 %v19339_v62, %v9006_v23  ;;  %v10098_v25 = vadd.f32 %v19361_v63, %v9744_v14  ;;  %v19494_v11 = vpop.f32.mrf.mxu0  ;;  %v20839_v14 = vld [vmem:[#allocation35_spill] sm:$0xff] }
 0x49a   : > { %10812 = vst [vmem:[%s19449_s23 + $0x10] sm:$0xff] %v10780_v38  ;;  %v10778_v37 = vmax.f32 %v10746_v28, 0.0  ;;  %v10749_v27 = vadd.f32 %v13381_v44, %v10717_v2  ;;  %v10715_v54 = vadd.f32 %v19419_v21, %v10676_v46  ;;  %v10640_v16 = vadd.f32 %v10525_v51, %v10094_v18 }
 0x49b   : > { %v10681_v57 = vmul.f32 %v19410_v15, %v10642_v49  ;;  %v13097_v31 = vpop.f32.mrf.mxu1  ;;  %v10101_v0 = vadd.f32 %v20828_v7, %v9747_v17  ;;  %v9009_v62 = vadd.f32 %v20830_v13, %v20829_v30  ;;  %v20832_v49 = vld [vmem:[#allocation45_spill] sm:$0xff]  ;;  %v20843_v7 = vld [vmem:[#allocation60_spill] sm:$0xff]  ;;  %v13389_v13 = vld [vmem:[%s13632_s9 + $0x58] sm:$0xff] }
 0x49c   : > { %10810 = vst [vmem:[%s19449_s23] sm:$0xff] %v10778_v37  ;;  %v10781_v42 = vmax.f32 %v10749_v27, 0.0  ;;  %v10747_v35 = vadd.f32 %v13382_v48, %v10715_v54  ;;  %v10679_v22 = vmul.f32 %v19410_v15, %v10640_v16  ;;  %v10643_v1 = vadd.f32 %v13097_v31, %v10097_v40  ;;  %v20831_v40 = vld [vmem:[#allocation40_spill] sm:$0xff]  ;;  %v13386_v54 = vld [vmem:[%s13632_s9 + $0x28] sm:$0xff] }
 0x49d   : > { %v10720_v32 = vadd.f32 %v19419_v21, %v10681_v57  ;;  %v10528_v24 = vpop.f32.mrf.mxu1  ;;  %v9750_v63 = vadd.f32 %v20831_v40, %v9011_v58  ;;  %v10099_v51 = vadd.f32 %v20832_v49, %v9745_v56  ;;  %v20834_v57 = vld [vmem:[#allocation55_spill] sm:$0xff]  ;;  %v20840_v17 = vld [vmem:[#allocation33_spill] sm:$0xff] }
 0x49e   : > { %10813 = vst [vmem:[%s19449_s23 + $0x18] sm:$0xff] %v10781_v42  ;;  %v10779_v6 = vmax.f32 %v10747_v35, 0.0  ;;  %v10718_v52 = vadd.f32 %v19419_v21, %v10679_v22  ;;  %v10682_v10 = vmul.f32 %v19410_v15, %v10643_v1  ;;  %v10641_v5 = vadd.f32 %v10528_v24, %v10095_v33  ;;  %v20833_v33 = vld [vmem:[#allocation43_spill] sm:$0xff]  ;;  %v20835_v42 = vld [vmem:[#allocation17_spill] sm:$0xff]  ;;  %v19511_v1 = vpop.f32.mrf.mxu0 }
 0x49f   : > { %v10752_v45 = vadd.f32 %v13383_v4, %v10720_v32  ;;  %v13100_v20 = vpop.f32.mrf.mxu1  ;;  %v9012_v31 = vadd.f32 %v20834_v57, %v20833_v33  ;;  %v9748_v48 = vadd.f32 %v20835_v42, %v9009_v62  ;;  %v20836_v35 = vld [vmem:[#allocation9_spill] sm:$0xff]  ;;  %v13387_v32 = vld [vmem:[%s13632_s9 + $0x50] sm:$0xff]  ;;  %v9015_v4 = vadd.f32 %v20840_v17, %v20839_v14  ;;  %v20852_v17 = vld [vmem:[#allocation63_spill] sm:$0xff] }
 0x4a0   : > { %10811 = vst [vmem:[%s19449_s23 + $0x8] sm:$0xff] %v10779_v6  ;;  %v10750_v53 = vadd.f32 %v13384_v19, %v10718_v52  ;;  %v10721_v55 = vadd.f32 %v19419_v21, %v10682_v10  ;;  %v10680_v39 = vmul.f32 %v19410_v15, %v10641_v5  ;;  %v10646_v3 = vadd.f32 %v13100_v20, %v10100_v34  ;;  %v20837_v10 = vld [vmem:[#allocation56_spill] sm:$0xff]  ;;  %v20838_v5 = vld [vmem:[#allocation58_spill] sm:$0xff]  ;;  %v13390_v33 = vld [vmem:[%s13632_s9 + $0x48] sm:$0xff] }
 0x4a1   : > { %v10784_v18 = vmax.f32 %v10752_v45, 0.0  ;;  %v10541_v50 = vpop.f32.mrf.mxu1  ;;  %v10104_v22 = vadd.f32 %v20836_v35, %v9750_v63  ;;  %v9010_v58 = vadd.f32 %v20838_v5, %v20837_v10  ;;  %v20841_v45 = vld [vmem:[#allocation42_spill] sm:$0xff]  ;;  %v20849_v35 = vld [vmem:[#allocation59_spill] sm:$0xff]  ;;  %v20851_v14 = vld [vmem:[#allocation61_spill] sm:$0xff] }
 0x4a2   : > { %v10782_v38 = vmax.f32 %v10750_v53, 0.0  ;;  %v10753_v28 = vadd.f32 %v13385_v43, %v10721_v55  ;;  %v10719_v2 = vadd.f32 %v19419_v21, %v10680_v39  ;;  %v10685_v46 = vmul.f32 %v19410_v15, %v10646_v3 }
 0x4a3   : > { %10816 = vst [vmem:[%s19449_s23 + $0x30] sm:$0xff] %v10784_v18  ;;  %v10644_v37 = vadd.f32 %v10541_v50, %v10098_v25  ;;  %v13101_v44 = vpop.f32.mrf.mxu1  ;;  %v10102_v20 = vadd.f32 %v20841_v45, %v9748_v48  ;;  %v20842_v25 = vld [vmem:[#allocation24_spill] sm:$0xff]  ;;  %v20844_v18 = vld [vmem:[#allocation38_spill] sm:$0xff]  ;;  %v20848_v48 = vld [vmem:[#allocation57_spill] sm:$0xff] }
 0x4a4   : > { %10814 = vst [vmem:[%s19449_s23 + $0x20] sm:$0xff] %v10782_v38  ;;  %v10785_v27 = vmax.f32 %v10753_v28, 0.0  ;;  %v10751_v16 = vadd.f32 %v13386_v54, %v10719_v2  ;;  %v10724_v47 = vadd.f32 %v19419_v21, %v10685_v46  ;;  %v10647_v9 = vadd.f32 %v13101_v44, %v10101_v0  ;;  %v20845_v38 = vld [vmem:[#allocation34_spill] sm:$0xff]  ;;  %v19530_v28 = vpop.f32.mrf.mxu0  ;;  %v13388_v2 = vld [vmem:[%s13632_s9 + $0x40] sm:$0xff]  ;;  %v20847_v44 = vld [vmem:[#allocation21_spill] sm:$0xff] }
 0x4a5   : > { %v10683_v29 = vmul.f32 %v19410_v15, %v10644_v37  ;;  %v10544_v23 = vpop.f32.mrf.mxu1  ;;  %v9013_v0 = vadd.f32 %v20843_v7, %v20842_v25  ;;  %v9751_v50 = vadd.f32 %v20844_v18, %v9012_v31  ;;  %v9749_v43 = vadd.f32 %v20845_v38, %v9010_v58  ;;  %v20853_v45 = vld [vmem:[#allocation4_spill] sm:$0xff]  ;;  %v20854_v7 = vld [vmem:[#allocation62_spill] sm:$0xff] }
 0x4a6   : > { %10817 = vst [vmem:[%s19449_s23 + $0x38] sm:$0xff] %v10785_v27  ;;  %v10783_v34 = vmax.f32 %v10751_v16, 0.0  ;;  %v10756_v24 = vadd.f32 %v13387_v32, %v10724_v47  ;;  %v10686_v6 = vmul.f32 %v19410_v15, %v10647_v9  ;;  %v10645_v52 = vadd.f32 %v10544_v23, %v10099_v51  ;;  %v20846_v51 = vld [vmem:[#allocation15_spill] sm:$0xff]  ;;  %v19547_v32 = vpop.f32.mrf.mxu0  ;;  %v20857_v38 = vld [vmem:[#allocation6_spill] sm:$0xff] }
 0x4a7   : > { %v10722_v19 = vadd.f32 %v19419_v21, %v10683_v29  ;;  %v13104_v53 = vpop.f32.mrf.mxu1  ;;  %v9754_v37 = vadd.f32 %v20846_v51, %v9015_v4  ;;  %v10105_v27 = vadd.f32 %v20847_v44, %v9751_v50  ;;  %v10103_v54 = vadd.f32 %v19401_v36, %v9749_v43  ;;  %v20850_v29 = vld [vmem:[#allocation11_spill] sm:$0xff]  ;;  %v20856_v50 = vld [vmem:[#allocation65_spill] sm:$0xff]  ;;  %v20859_v51 = vld [vmem:[#allocation66_spill] sm:$0xff] }
 0x4a8   : > { %10815 = vst [vmem:[%s19449_s23 + $0x28] sm:$0xff] %v10783_v34  ;;  %v10788_v55 = vmax.f32 %v10756_v24, 0.0  ;;  %v10725_v39 = vadd.f32 %v19419_v21, %v10686_v6  ;;  %v10684_v3 = vmul.f32 %v19410_v15, %v10645_v52  ;;  %v10650_v56 = vadd.f32 %v13104_v53, %v10104_v22  ;;  %v13391_v52 = vld [vmem:[%s13632_s9 + $0x70] sm:$0xff]  ;;  %v20860_v44 = vld [vmem:[#allocation27_spill] sm:$0xff] }
 0x4a9   : > { %v10754_v46 = vadd.f32 %v13388_v2, %v10722_v19  ;;  %v10557_v30 = vpop.f32.mrf.mxu1  ;;  %v9016_v22 = vadd.f32 %v20849_v35, %v20848_v48  ;;  %v9752_v23 = vadd.f32 %v20850_v29, %v9013_v0  ;;  %v10108_v34 = vadd.f32 %v19414_v41, %v9754_v37  ;;  %v20855_v0 = vld [vmem:[#allocation39_spill] sm:$0xff]  ;;  %v19566_v2 = vpop.f32.mrf.mxu0  ;;  %v20862_v35 = vld [vmem:[#allocation32_spill] sm:$0xff] }
 0x4aa   : > { %10820 = vst [vmem:[%s19449_s23 + $0x50] sm:$0xff] %v10788_v55  ;;  %v10757_v62 = vadd.f32 %v13389_v13, %v10725_v39  ;;  %v10723_v40 = vadd.f32 %v19419_v21, %v10684_v3  ;;  %v10689_v63 = vmul.f32 %v19410_v15, %v10650_v56  ;;  %v10648_v49 = vadd.f32 %v10557_v30, %v10102_v20  ;;  %v13392_v39 = vld [vmem:[%s13632_s9 + $0x60] sm:$0xff] }
 0x4ab   : > { %v10786_v16 = vmax.f32 %v10754_v46, 0.0  ;;  %v13105_v47 = vpop.f32.mrf.mxu1  ;;  %v9014_v4 = vadd.f32 %v20852_v17, %v20851_v14  ;;  %v9755_v20 = vadd.f32 %v20853_v45, %v9016_v22  ;;  %v10106_v41 = vadd.f32 %v19434_v59, %v9752_v23  ;;  %v20863_v14 = vld [vmem:[#allocation7_spill] sm:$0xff]  ;;  %v20864_v17 = vld [vmem:[#allocation5_spill] sm:$0xff] }
 0x4ac   : > { %v10789_v9 = vmax.f32 %v10757_v62, 0.0  ;;  %v10755_v57 = vadd.f32 %v13390_v33, %v10723_v40  ;;  %v10728_v31 = vadd.f32 %v19419_v21, %v10689_v63  ;;  %v10687_v42 = vmul.f32 %v19410_v15, %v10648_v49  ;;  %v20858_v49 = vld [vmem:[#allocation64_spill] sm:$0xff]  ;;  %v13394_v33 = vld [vmem:[%s13632_s9 + $0x68] sm:$0xff] }
 0x4ad   : > { %10818 = vst [vmem:[%s19449_s23 + $0x40] sm:$0xff] %v10786_v16  ;;  %v10651_v36 = vadd.f32 %v13105_v47, %v10105_v27  ;;  %v10560_v24 = vpop.f32.mrf.mxu1  ;;  %v9019_v18 = vadd.f32 %v20855_v0, %v20854_v7  ;;  %v9017_v43 = vadd.f32 %v20857_v38, %v20856_v50  ;;  %v10109_v59 = vadd.f32 %v19458_v8, %v9755_v20  ;;  %v13393_v16 = vld [vmem:[%s13632_s9 + $0x78] sm:$0xff]  ;;  %v20865_v45 = vld [vmem:[#allocation13_spill] sm:$0xff]  ;;  %v20868_v0 = vld [vmem:[#allocation20_spill] sm:$0xff] }
 0x4ae   : > { %10821 = vst [vmem:[%s19449_s23 + $0x58] sm:$0xff] %v10789_v9  ;;  %v10787_v6 = vmax.f32 %v10755_v57, 0.0  ;;  %v10760_v10 = vadd.f32 %v13391_v52, %v10728_v31  ;;  %v10726_v5 = vadd.f32 %v19419_v21, %v10687_v42  ;;  %v10649_v58 = vadd.f32 %v10560_v24, %v10103_v54  ;;  %v20861_v54 = vld [vmem:[#allocation16_spill] sm:$0xff]  ;;  %v13395_v52 = vld [vmem:[%s13632_s9 + $0x90] sm:$0xff] }
 0x4af   : > { %v10690_v19 = vmul.f32 %v19410_v15, %v10651_v36  ;;  %v9020_v37 = vadd.f32 %v20859_v51, %v20858_v49  ;;  %v9753_v27 = vadd.f32 %v20860_v44, %v9014_v4  ;;  %v9758_v8 = vadd.f32 %v20861_v54, %v9019_v18  ;;  %v20871_v51 = vld [vmem:[#allocation52_spill] sm:$0xff] }
 0x4b0   : > { %10819 = vst [vmem:[%s19449_s23 + $0x48] sm:$0xff] %v10787_v6  ;;  %v10792_v55 = vmax.f32 %v10760_v10, 0.0  ;;  %v10758_v3 = vadd.f32 %v13392_v39, %v10726_v5  ;;  %v10688_v56 = vmul.f32 %v19410_v15, %v10649_v58  ;;  %v9756_v22 = vadd.f32 %v20862_v35, %v9017_v43  ;;  %v20876_v35 = vld [vmem:[#allocation18_spill] sm:$0xff] }
 0x4b1   : > { %v13108_v53 = vpop.f32.mrf.mxu1  ;;  %v10729_v46 = vadd.f32 %v19419_v21, %v10690_v19  ;;  %v10107_v29 = vadd.f32 %v19476_v26, %v9753_v27  ;;  %v10112_v23 = vadd.f32 %v19494_v11, %v9758_v8  ;;  %v9018_v4 = vadd.f32 %v20864_v17, %v20863_v14 }
 0x4b2   : > { %v10654_v25 = vadd.f32 %v13108_v53, %v10108_v34  ;;  %10824 = vst [vmem:[%s19449_s23 + $0x70] sm:$0xff] %v10792_v55  ;;  %v10790_v13 = vmax.f32 %v10758_v3, 0.0  ;;  %v10727_v62 = vadd.f32 %v19419_v21, %v10688_v56  ;;  %v10059_v34 = vpop.f32.mrf.mxu0  ;;  %v9759_v20 = vadd.f32 %v20865_v45, %v9020_v37  ;;  %v13396_v53 = vld [vmem:[%s13632_s9 + $0x80] sm:$0xff]  ;;  %v20872_v37 = vld [vmem:[#allocation46_spill] sm:$0xff] }
 0x4b3   : > { %v10573_v30 = vpop.f32.mrf.mxu1  ;;  %v10761_v47 = vadd.f32 %v13393_v16, %v10729_v46  ;;  %v10110_v26 = vadd.f32 %v19511_v1, %v9756_v22  ;;  %v20866_v56 = vld [vmem:[#allocation36_spill] sm:$0xff]  ;;  %v9757_v18 = vadd.f32 %v20868_v0, %v9018_v4  ;;  %v13397_v46 = vld [vmem:[%s13632_s9 + $0x98] sm:$0xff]  ;;  %v9024_v44 = vadd.f32 %v20872_v37, %v20871_v51 }
 0x4b4   : > { %v10693_v40 = vmul.f32 %v19410_v15, %v10654_v25  ;;  %v10652_v63 = vadd.f32 %v10573_v30, %v10106_v41  ;;  %10822 = vst [vmem:[%s19449_s23 + $0x60] sm:$0xff] %v10790_v13  ;;  %v10759_v57 = vadd.f32 %v13394_v33, %v10727_v62  ;;  %v20867_v25 = vld [vmem:[#allocation10_spill] sm:$0xff]  ;;  %v10113_v1 = vadd.f32 %v19530_v28, %v9759_v20  ;;  %v13069_v50 = vpop.f32.mrf.mxu0 }
 0x4b5   : > { %v13109_v9 = vpop.f32.mrf.mxu1  ;;  %v10793_v36 = vmax.f32 %v10761_v47, 0.0  ;;  %v9023_v7 = vadd.f32 %v20867_v25, %v20866_v56  ;;  %v10111_v28 = vadd.f32 %v19547_v32, %v9757_v18  ;;  %v20873_v33 = vld [vmem:[#allocation30_spill] sm:$0xff]  ;;  %v13398_v32 = vld [vmem:[%s13632_s9 + $0x88] sm:$0xff] }
 0x4b6   : > { %v10732_v31 = vadd.f32 %v19419_v21, %v10693_v40  ;;  %v10691_v42 = vmul.f32 %v19410_v15, %v10652_v63  ;;  %v10655_v48 = vadd.f32 %v13109_v9, %v10109_v59  ;;  %v10791_v6 = vmax.f32 %v10759_v57, 0.0  ;;  %v20869_v40 = vld [vmem:[#allocation41_spill] sm:$0xff]  ;;  %v20870_v63 = vld [vmem:[#allocation48_spill] sm:$0xff]  ;;  %v20874_v57 = vld [vmem:[#allocation50_spill] sm:$0xff] }
 0x4b7   : > { %v10576_v24 = vpop.f32.mrf.mxu1  ;;  %10825 = vst [vmem:[%s19449_s23 + $0x78] sm:$0xff] %v10793_v36  ;;  %v9021_v49 = vadd.f32 %v20870_v63, %v20869_v40 }
 0x4b8   : > { %v10764_v10 = vadd.f32 %v13395_v52, %v10732_v31  ;;  %v10730_v5 = vadd.f32 %v19419_v21, %v10691_v42  ;;  %v10694_v58 = vmul.f32 %v19410_v15, %v10655_v48  ;;  %v10653_v11 = vadd.f32 %v10576_v24, %v10107_v29  ;;  %10823 = vst [vmem:[%s19449_s23 + $0x68] sm:$0xff] %v10791_v6  ;;  %v20875_v42 = vld [vmem:[#allocation49_spill] sm:$0xff]  ;;  %v10062_v29 = vpop.f32.mrf.mxu0  ;;  %v13399_v24 = vld [vmem:[%s13632_s9 + $0xb0] sm:$0xff] }
 0x4b9   : > { %v9022_v31 = vadd.f32 %v20874_v57, %v20873_v33  ;;  %v9762_v48 = vadd.f32 %v20875_v42, %v9023_v7  ;;  %v9760_v22 = vadd.f32 %v20876_v35, %v9021_v49  ;;  %v13401_v7 = vld [vmem:[%s13632_s9 + $0xb8] sm:$0xff] }
 0x4ba   : > { %v10796_v19 = vmax.f32 %v10764_v10, 0.0  ;;  %v10762_v55 = vadd.f32 %v13396_v53, %v10730_v5  ;;  %v10733_v39 = vadd.f32 %v19419_v21, %v10694_v58  ;;  %v10692_v38 = vmul.f32 %v19410_v15, %v10653_v11  ;;  %v20877_v58 = vld [vmem:[#allocation29_spill] sm:$0xff]  ;;  %v13400_v11 = vld [vmem:[%s13632_s9 + $0xa0] sm:$0xff]  ;;  %v13072_v56 = vpop.f32.mrf.mxu0  ;;  %v13405_v35 = vld [vmem:[%s13632_s9 + $0xd8] sm:$0xff] }
 0x4bb   : > { %v13112_v41 = vpop.f32.mrf.mxu1  ;;  %v9763_v14 = vadd.f32 %v20877_v58, %v9024_v44  ;;  %v10116_v17 = vadd.f32 %v19566_v2, %v9762_v48  ;;  %v10114_v4 = vadd.f32 %v10059_v34, %v9760_v22 }
 0x4bc   : > { %v10658_v3 = vadd.f32 %v13112_v41, %v10112_v23  ;;  %10828 = vst [vmem:[%s19449_s23 + $0x90] sm:$0xff] %v10796_v19  ;;  %v10794_v59 = vmax.f32 %v10762_v55, 0.0  ;;  %v10765_v30 = vadd.f32 %v13397_v46, %v10733_v39  ;;  %v10731_v27 = vadd.f32 %v19419_v21, %v10692_v38  ;;  %v20878_v55 = vld [vmem:[#allocation14_spill] sm:$0xff]  ;;  %v13402_v46 = vld [vmem:[%s13632_s9 + $0xa8] sm:$0xff]  ;;  %v10075_v40 = vpop.f32.mrf.mxu0 }
 0x4bd   : > { %v10589_v43 = vpop.f32.mrf.mxu1  ;;  %v9761_v39 = vadd.f32 %v20878_v55, %v9022_v31  ;;  %v20879_v31 = vld [vmem:[#allocation44_spill] sm:$0xff] }
 0x4be   : > { %v10697_v13 = vmul.f32 %v19410_v15, %v10658_v3  ;;  %v10656_v62 = vadd.f32 %v10589_v43, %v10110_v26  ;;  %10826 = vst [vmem:[%s19449_s23 + $0x80] sm:$0xff] %v10794_v59  ;;  %v10797_v8 = vmax.f32 %v10765_v30, 0.0  ;;  %v10763_v23 = vadd.f32 %v13398_v32, %v10731_v27  ;;  %v13403_v27 = vld [vmem:[%s13632_s9 + $0xd0] sm:$0xff]  ;;  %v13073_v33 = vpop.f32.mrf.mxu0 }
 0x4bf   : > { %v13113_v54 = vpop.f32.mrf.mxu1  ;;  %v10117_v3 = vadd.f32 %v13069_v50, %v9763_v14  ;;  %v10115_v38 = vadd.f32 %v10062_v29, %v9761_v39  ;;  %v10120_v42 = vadd.f32 %v13072_v56, %v20879_v31  ;;  %v10121_v58 = vadd.f32 %v13073_v33, %v19399_v60  ;;  %v13407_v60 = vld [vmem:[%s13632_s9 + $0xf0] sm:$0xff] }
 0x4c0   : > { %v10736_v16 = vadd.f32 %v19419_v21, %v10697_v13  ;;  %v10695_v47 = vmul.f32 %v19410_v15, %v10656_v62  ;;  %v10659_v9 = vadd.f32 %v13113_v54, %v10113_v1  ;;  %10829 = vst [vmem:[%s19449_s23 + $0x98] sm:$0xff] %v10797_v8  ;;  %v10795_v45 = vmax.f32 %v10763_v23, 0.0  ;;  %v13404_v8 = vld [vmem:[%s13632_s9 + $0xc0] sm:$0xff] }
 0x4c1   : > { %v10592_v36 = vpop.f32.mrf.mxu1  ;;  %v10118_v23 = vadd.f32 %v10075_v40, %v19395_v12 }
 0x4c2   : > { %v10768_v6 = vadd.f32 %v13399_v24, %v10736_v16  ;;  %v10734_v52 = vadd.f32 %v19419_v21, %v10695_v47  ;;  %v10698_v10 = vmul.f32 %v19410_v15, %v10659_v9  ;;  %v10657_v5 = vadd.f32 %v10592_v36, %v10111_v28  ;;  %10827 = vst [vmem:[%s19449_s23 + $0x88] sm:$0xff] %v10795_v45  ;;  %v13406_v24 = vld [vmem:[%s13632_s9 + $0xc8] sm:$0xff] }
 0x4c4   : > { %v10800_v26 = vmax.f32 %v10768_v6, 0.0  ;;  %v10766_v41 = vadd.f32 %v13400_v11, %v10734_v52  ;;  %v10737_v19 = vadd.f32 %v19419_v21, %v10698_v10  ;;  %v10696_v53 = vmul.f32 %v19410_v15, %v10657_v5  ;;  %v10078_v10 = vpop.f32.mrf.mxu0 }
 0x4c5   : > { %v13116_v20 = vpop.f32.mrf.mxu1 }
 0x4c6   : > { %v10662_v25 = vadd.f32 %v13116_v20, %v10116_v17  ;;  %10832 = vst [vmem:[%s19449_s23 + $0xb0] sm:$0xff] %v10800_v26  ;;  %v10798_v34 = vmax.f32 %v10766_v41, 0.0  ;;  %v10769_v0 = vadd.f32 %v13401_v7, %v10737_v19  ;;  %v10735_v18 = vadd.f32 %v19419_v21, %v10696_v53  ;;  %v13409_v7 = vld [vmem:[%s13632_s9 + $0xf8] sm:$0xff] }
 0x4c7   : > { %v10605_v2 = vpop.f32.mrf.mxu1  ;;  %v10119_v20 = vadd.f32 %v10078_v10, %v19405_v61 }
 0x4c8   : > { %v10660_v1 = vadd.f32 %v10605_v2, %v10114_v4  ;;  %v10701_v43 = vmul.f32 %v19410_v15, %v10662_v25  ;;  %10830 = vst [vmem:[%s19449_s23 + $0xa0] sm:$0xff] %v10798_v34  ;;  %v10801_v50 = vmax.f32 %v10769_v0, 0.0  ;;  %v10767_v30 = vadd.f32 %v13402_v46, %v10735_v18 }
 0x4c9   : > { %v13117_v59 = vpop.f32.mrf.mxu1 }
 0x4ca   : > { %v10699_v13 = vmul.f32 %v19410_v15, %v10660_v1  ;;  %v10663_v62 = vadd.f32 %v13117_v59, %v10117_v3  ;;  %v10740_v63 = vadd.f32 %v19419_v21, %v10701_v43  ;;  %10833 = vst [vmem:[%s19449_s23 + $0xb8] sm:$0xff] %v10801_v50  ;;  %v10799_v51 = vmax.f32 %v10767_v30, 0.0  ;;  %v13408_v3 = vld [vmem:[%s13632_s9 + $0xe0] sm:$0xff] }
 0x4cb   : > { %v10608_v49 = vpop.f32.mrf.mxu1 }
 0x4cc   : > { %v10738_v37 = vadd.f32 %v19419_v21, %v10699_v13  ;;  %v10702_v44 = vmul.f32 %v19410_v15, %v10663_v62  ;;  %v10661_v28 = vadd.f32 %v10608_v49, %v10115_v38  ;;  %v10772_v54 = vadd.f32 %v13403_v27, %v10740_v63  ;;  %10831 = vst [vmem:[%s19449_s23 + $0xa8] sm:$0xff] %v10799_v51  ;;  %v13410_v38 = vld [vmem:[%s13632_s9 + $0xe8] sm:$0xff] }
 0x4ce   : > { %v10770_v16 = vadd.f32 %v13404_v8, %v10738_v37  ;;  %v10741_v47 = vadd.f32 %v19419_v21, %v10702_v44  ;;  %v10700_v9 = vmul.f32 %v19410_v15, %v10661_v28  ;;  %v10804_v57 = vmax.f32 %v10772_v54, 0.0 }
 0x4d0   : > { %v10802_v48 = vmax.f32 %v10770_v16, 0.0  ;;  %v10773_v22 = vadd.f32 %v13405_v35, %v10741_v47  ;;  %v10739_v29 = vadd.f32 %v19419_v21, %v10700_v9  ;;  %10836 = vst [vmem:[%s19449_s23 + $0xd0] sm:$0xff] %v10804_v57 }
 0x4d2   : > { %v13120_v32 = vpop.f32.mrf.mxu1  ;;  %10834 = vst [vmem:[%s19449_s23 + $0xc0] sm:$0xff] %v10802_v48  ;;  %v10805_v36 = vmax.f32 %v10773_v22, 0.0  ;;  %v10771_v6 = vadd.f32 %v13406_v24, %v10739_v29 }
 0x4d3   : > { %v10666_v52 = vadd.f32 %v13120_v32, %v10120_v42 }
 0x4d4   : > { %v10621_v5 = vpop.f32.mrf.mxu1  ;;  %10837 = vst [vmem:[%s19449_s23 + $0xd8] sm:$0xff] %v10805_v36  ;;  %v10803_v14 = vmax.f32 %v10771_v6, 0.0 }
 0x4d5   : > { %v10705_v17 = vmul.f32 %v19410_v15, %v10666_v52  ;;  %v10664_v4 = vadd.f32 %v10621_v5, %v10118_v23 }
 0x4d6   : > { %v13121_v45 = vpop.f32.mrf.mxu1  ;;  %10835 = vst [vmem:[%s19449_s23 + $0xc8] sm:$0xff] %v10803_v14 }
 0x4d7   : > { %v10744_v12 = vadd.f32 %v19419_v21, %v10705_v17  ;;  %v10703_v26 = vmul.f32 %v19410_v15, %v10664_v4  ;;  %v10667_v11 = vadd.f32 %v13121_v45, %v10121_v58 }
 0x4d8   : > { %v10624_v41 = vpop.f32.mrf.mxu1 }
 0x4d9   : > { %v10776_v19 = vadd.f32 %v13407_v60, %v10744_v12  ;;  %v10742_v53 = vadd.f32 %v19419_v21, %v10703_v26  ;;  %v10706_v55 = vmul.f32 %v19410_v15, %v10667_v11  ;;  %v10665_v39 = vadd.f32 %v10624_v41, %v10119_v20 }
 0x4db   : > { %v10808_v61 = vmax.f32 %v10776_v19, 0.0  ;;  %v10774_v56 = vadd.f32 %v13408_v3, %v10742_v53  ;;  %v10745_v25 = vadd.f32 %v19419_v21, %v10706_v55  ;;  %v10704_v2 = vmul.f32 %v19410_v15, %v10665_v39 }
 0x4dd   : > { %10840 = vst [vmem:[%s19449_s23 + $0xf0] sm:$0xff] %v10808_v61  ;;  %v10806_v34 = vmax.f32 %v10774_v56, 0.0  ;;  %v10777_v0 = vadd.f32 %v13409_v7, %v10745_v25  ;;  %v10743_v18 = vadd.f32 %v19419_v21, %v10704_v2 }
 0x4df   : > { %10838 = vst [vmem:[%s19449_s23 + $0xe0] sm:$0xff] %v10806_v34  ;;  %v10809_v1 = vmax.f32 %v10777_v0, 0.0  ;;  %v10775_v43 = vadd.f32 %v13410_v38, %v10743_v18 }
 0x4e1   : > { %10841 = vst [vmem:[%s19449_s23 + $0xf8] sm:$0xff] %v10809_v1  ;;  %v10807_v59 = vmax.f32 %v10775_v43, 0.0 }
 0x4e3   : > { %10839 = vst [vmem:[%s19449_s23 + $0xe8] sm:$0xff] %v10807_v59 }
 0x4e4 PF: > { %s17_s24 = sadd.s32 1, %s13417_s24  }
 0x4e5   : > { %p14_p4 = scmp.ge.s32.totalorder %s17_s24, 4  }
 0x4e7   :  { %16 = sbr.rel (!%p14_p4) target bundleno = 1 (0x1), region = 98 }

</bundles_post_ra>
